<compile_context>
chip_gen: v7x
topology: tpu7x:2x2x1
jax: 0.10.0
libtpu: 0.0.40
codegen_flags: <defaults>
</compile_context>

<pallas_src>
import math

import jax
import jax.numpy as jnp
from jax import lax
from jax.experimental import pallas as pl
from jax.experimental.pallas import tpu as pltpu

LANE = 128
NEG_BIG = 1e30


def _round_up(n, m):
    return ((n + m - 1) // m) * m


def _elu(x):
    # F.elu, alpha=1.0
    return jnp.where(x > 0, x, jnp.exp(jnp.minimum(x, 0.0)) - 1.0)


# ----------------------------------------------------------------------------
# Fused kernel: 4 x (TransformerConv + ELU) -> GlobalAttention pool -> Linear
# ----------------------------------------------------------------------------
def _fused_kernel(x_ref, adj_ref, gmask_ref,
                  w1, b1, s1, c1, w2, b2, s2, c2,
                  w3, b3, s3, c3, w4, b4, s4, c4,
                  wg_ref, bg_ref, wfc_ref, bfc_ref,
                  o_ref):
    h = x_ref[...]                                         # (N, 128) bf16
    adj = adj_ref[...].astype(jnp.float32)                 # (N, N) 0/1, target x source
    bias = (adj - 1.0) * NEG_BIG                           # additive edge mask, f32
    # Nodes with no incoming edge receive no aggregated message (PyG semantics).
    hasin = (jnp.sum(adj, axis=-1, keepdims=True) > 0.0).astype(jnp.float32)  # (N, 1)

    for wqkv_ref, bqkv_ref, ws_ref, bs_ref in (
            (w1, b1, s1, c1), (w2, b2, s2, c2), (w3, b3, s3, c3), (w4, b4, s4, c4)):
        wqkv = wqkv_ref[...]                               # (Din_p, 3*Dout_p) bf16
        dout = wqkv.shape[1] // 3

        # One fused lane-dense projection matmul; cast to bf16 immediately to keep the
        # live f32 width small (only the MXU accumulator is f32).
        qkv = (jnp.dot(h, wqkv, preferred_element_type=jnp.float32)
               + bqkv_ref[...]).astype(jnp.bfloat16)
        q = qkv[:, 0 * dout:1 * dout]                      # 1/sqrt(d) folded into wq
        k = qkv[:, 1 * dout:2 * dout]
        v = qkv[:, 2 * dout:3 * dout]
        skip = jnp.dot(h, ws_ref[...], preferred_element_type=jnp.float32) + bs_ref[...]

        # scores[i, j] = <q_i, k_j>: contract the last dim of both operands -> MXU-native
        # "trans_b" form (no XLU transpose of k), f32 accumulation.
        scores = lax.dot_general(q, k, (((1,), (1,)), ((), ())),
                                 preferred_element_type=jnp.float32)        # (N, N) f32
        masked = scores + bias
        m = jnp.max(masked, axis=-1, keepdims=True)
        e = jnp.exp(masked - m)                            # non-edges underflow to 0
        denom = jnp.sum(e, axis=-1, keepdims=True)
        # Fold the zero-in-degree mask into the per-row normalization scale (N x 1 work),
        # NOT into `e` (denom would become 0 -> inf with the approx reciprocal).
        row_scale = hasin * pl.reciprocal(denom, approx=True)               # (N, 1)
        alpha = (e * row_scale).astype(jnp.bfloat16)

        agg = jnp.dot(alpha, v, preferred_element_type=jnp.float32)         # (N, Dout_p)
        h = _elu(agg + skip).astype(jnp.bfloat16)

    # ---------------- GlobalAttention pooling + final Linear ----------------
    gmask = gmask_ref[...]                                 # (G, N) f32 one-hot membership
    # gate_j = <h_j, wg> + bg, produced directly lane-dense as (1, N).
    gate = lax.dot_general(wg_ref[...], h, (((1,), (1,)), ((), ())),
                           preferred_element_type=jnp.float32) + bg_ref[...]   # (1, N)
    # Per-graph max for a numerically stable softmax (padded columns are masked out).
    m_g = jnp.max(gate + (gmask - 1.0) * NEG_BIG, axis=-1, keepdims=True)       # (G, 1)
    node_max = jnp.sum(gmask * m_g, axis=0, keepdims=True)                      # (1, N)
    weights = gmask * jnp.exp(gate - node_max)                                  # (G, N)

    num = jnp.dot(weights.astype(jnp.bfloat16), h,
                  preferred_element_type=jnp.float32)                           # (G, Dp)
    den = jnp.sum(weights, axis=-1, keepdims=True)                              # (G, 1)
    pooled = (num * pl.reciprocal(den, approx=True)).astype(jnp.bfloat16)

    o_ref[...] = jnp.dot(pooled, wfc_ref[...],
                         preferred_element_type=jnp.float32) + bfc_ref[...]     # (G, 128)


# ----------------------------------------------------------------------------
# Parameter construction (deterministic, synthetic) with padding / folding
# ----------------------------------------------------------------------------
def _init_linear(key, d_in, d_out, scale=0.05):
    kw, kb = jax.random.split(key)
    w = scale * jax.random.normal(kw, (d_in, d_out), jnp.float32)
    b = scale * jax.random.normal(kb, (1, d_out), jnp.float32)
    return w, b


def _pad2(a, rows, cols):
    return jnp.zeros((rows, cols), a.dtype).at[:a.shape[0], :a.shape[1]].set(a)


def init_transformer_net_params(key, num_node_features):
    head_dim1, head_dim2, head_dim3, head_dim4 = 64, 32, 16, 8
    dims = [num_node_features, head_dim1 * 8, head_dim2 * 8, head_dim3 * 4, head_dim4 * 4]
    dims_p = [_round_up(d, LANE) for d in dims]

    convs = []
    for li in range(4):
        key, kq, kk, kv, ks = jax.random.split(key, 5)
        d_in, d_out = dims[li], dims[li + 1]
        d_in_p, d_out_p = dims_p[li], dims_p[li + 1]
        wq, bq = _init_linear(kq, d_in, d_out)
        wk, bk = _init_linear(kk, d_in, d_out)
        wv, bv = _init_linear(kv, d_in, d_out)
        ws, bs = _init_linear(ks, d_in, d_out)
        # Fold the 1/sqrt(d_out) attention scale into the query projection.
        sc = 1.0 / math.sqrt(d_out)
        wq, bq = wq * sc, bq * sc
        # q|k|v concatenated (skip is a separate small matmul to limit live f32 width).
        w_qkv = jnp.concatenate(
            [_pad2(w, d_in_p, d_out_p) for w in (wq, wk, wv)],
            axis=1).astype(jnp.bfloat16)                                # (Din_p, 3*Dout_p)
        b_qkv = jnp.concatenate(
            [_pad2(b, 1, d_out_p) for b in (bq, bk, bv)],
            axis=1).astype(jnp.bfloat16)                                # (1, 3*Dout_p)
        convs.append(dict(
            w_qkv=w_qkv, b_qkv=b_qkv,
            w_s=_pad2(ws, d_in_p, d_out_p).astype(jnp.bfloat16),        # (Din_p, Dout_p)
            b_s=_pad2(bs, 1, d_out_p).astype(jnp.bfloat16),             # (1, Dout_p)
        ))

    key, kg, kf = jax.random.split(key, 3)
    gate_w, gate_b = _init_linear(kg, dims[-1], 1)   # Linear(D, 1)
    fc_w, fc_b = _init_linear(kf, dims[-1], 2)       # Linear(D, 2)
    d_last_p = dims_p[-1]
    return dict(
        convs=convs,
        gate_w=_pad2(gate_w.T, 1, d_last_p).astype(jnp.bfloat16),  # (1, Dp)
        gate_b=gate_b.reshape(1, 1),                               # (1, 1) f32
        fc_w=_pad2(fc_w, d_last_p, LANE).astype(jnp.bfloat16),     # (Dp, 128) padded out
        fc_b=_pad2(fc_b, 1, LANE),                                 # (1, 128) f32
    )


# ----------------------------------------------------------------------------
# Forward pass: thin JAX glue around one fused pallas_call
# ----------------------------------------------------------------------------
@jax.jit
def transformer_net_forward(x, adj, gmask, params):
    n, f_in = x.shape
    g = gmask.shape[0]
    c = params["convs"]
    f_in_p = c[0]["w_qkv"].shape[0]

    # Pad the node axis to an MXU/lane-native multiple of 128 (block-diagonal adjacency:
    # padded nodes have no edges and zero gmask, so they never contribute).
    n_p = max(LANE, _round_up(n, LANE))
    x_p = jnp.zeros((n_p, f_in_p), jnp.bfloat16).at[:n, :f_in].set(x.astype(jnp.bfloat16))
    adj_p = jnp.zeros((n_p, n_p), jnp.bfloat16).at[:n, :n].set(adj.astype(jnp.bfloat16))
    gmask_p = jnp.zeros((g, n_p), jnp.float32).at[:, :n].set(gmask.astype(jnp.float32))

    args = (x_p, adj_p, gmask_p,
            c[0]["w_qkv"], c[0]["b_qkv"], c[0]["w_s"], c[0]["b_s"],
            c[1]["w_qkv"], c[1]["b_qkv"], c[1]["w_s"], c[1]["b_s"],
            c[2]["w_qkv"], c[2]["b_qkv"], c[2]["w_s"], c[2]["b_s"],
            c[3]["w_qkv"], c[3]["b_qkv"], c[3]["w_s"], c[3]["b_s"],
            params["gate_w"], params["gate_b"], params["fc_w"], params["fc_b"])

    # VMEM budget: actual argument footprint with 4x headroom for intermediates, at least
    # 16 MiB, capped at 48 MiB so it stays below v7x's 64 MiB physical VMEM.
    arg_bytes = sum(int(a.size) * a.dtype.itemsize for a in args)
    vmem_limit = int(min(48 * 1024 * 1024, max(16 * 1024 * 1024, 4 * arg_bytes)))

    out_p = pl.pallas_call(
        _fused_kernel,
        out_shape=jax.ShapeDtypeStruct((g, LANE), jnp.float32),
        in_specs=[pl.BlockSpec(memory_space=pltpu.MemorySpace.VMEM)] * len(args),
        out_specs=pl.BlockSpec(memory_space=pltpu.MemorySpace.VMEM),
        compiler_params=pltpu.CompilerParams(vmem_limit_bytes=vmem_limit),
    )(*args)

    return out_p[:, :2]   # drop lane padding of the 2-class head


if __name__ == "__main__":
    key = jax.random.PRNGKey(0)

    N = 16                 # total nodes (2 graphs of 8 nodes each)
    G = 2                  # graphs in the batch
    F_IN = 16              # num_node_features

    key, kx, kp = jax.random.split(key, 3)
    x = jax.random.normal(kx, (N, F_IN), jnp.float32)

    # edge_index: bidirectional ring inside each graph (PyG: row 0 = source, row 1 = target)
    src, dst = [], []
    nodes_per_graph = N // G
    for g in range(G):
        base = g * nodes_per_graph
        for i in range(nodes_per_graph):
            a = base + i
            b = base + (i + 1) % nodes_per_graph
            src += [a, b]
            dst += [b, a]
    edge_index = jnp.array([src, dst], dtype=jnp.int32)

    # dense adjacency mask: adj[target, source] = 1
    adj = jnp.zeros((N, N), jnp.float32).at[edge_index[1], edge_index[0]].set(1.0)

    # graph membership one-hot mask (G, N)
    batch = jnp.repeat(jnp.arange(G, dtype=jnp.int32), nodes_per_graph)
    gmask = (batch[None, :] == jnp.arange(G, dtype=jnp.int32)[:, None]).astype(jnp.float32)

    params = init_transformer_net_params(kp, F_IN)

    out = transformer_net_forward(x, adj, gmask, params)
    out = jax.block_until_ready(out)
    assert out.shape == (G, 2) and out.dtype == jnp.float32
    print("KERNEL_OK")
</pallas_src>

<mosaic_0001>
module attributes {stable_mosaic.version = 11 : i64} {
  func.func @_fused_kernel(%arg0: memref<128x128xbf16, #tpu.memory_space<vmem>>, %arg1: memref<128x128xbf16, #tpu.memory_space<vmem>>, %arg2: memref<2x128xf32, #tpu.memory_space<vmem>>, %arg3: memref<128x1536xbf16, #tpu.memory_space<vmem>>, %arg4: memref<1x1536xbf16, #tpu.memory_space<vmem>>, %arg5: memref<128x512xbf16, #tpu.memory_space<vmem>>, %arg6: memref<1x512xbf16, #tpu.memory_space<vmem>>, %arg7: memref<512x768xbf16, #tpu.memory_space<vmem>>, %arg8: memref<1x768xbf16, #tpu.memory_space<vmem>>, %arg9: memref<512x256xbf16, #tpu.memory_space<vmem>>, %arg10: memref<1x256xbf16, #tpu.memory_space<vmem>>, %arg11: memref<256x384xbf16, #tpu.memory_space<vmem>>, %arg12: memref<1x384xbf16, #tpu.memory_space<vmem>>, %arg13: memref<256x128xbf16, #tpu.memory_space<vmem>>, %arg14: memref<1x128xbf16, #tpu.memory_space<vmem>>, %arg15: memref<128x384xbf16, #tpu.memory_space<vmem>>, %arg16: memref<1x384xbf16, #tpu.memory_space<vmem>>, %arg17: memref<128x128xbf16, #tpu.memory_space<vmem>>, %arg18: memref<1x128xbf16, #tpu.memory_space<vmem>>, %arg19: memref<1x128xbf16, #tpu.memory_space<vmem>>, %arg20: memref<1x1xf32, #tpu.memory_space<vmem>>, %arg21: memref<128x128xbf16, #tpu.memory_space<vmem>>, %arg22: memref<1x128xf32, #tpu.memory_space<vmem>>, %arg23: memref<2x128xf32, #tpu.memory_space<vmem>>) attributes {dimension_semantics = [], scalar_prefetch = 0 : i64, scratch_operands = 0 : i64, tpu.core_type = #tpu.core_type<tc>} {
    %c0 = arith.constant 0 : index
    %c0_0 = arith.constant 0 : index
    %0 = vector.load %arg0[%c0, %c0_0] : memref<128x128xbf16, #tpu.memory_space<vmem>>, vector<128x128xbf16>
    %c0_1 = arith.constant 0 : index
    %c0_2 = arith.constant 0 : index
    %1 = vector.load %arg1[%c0_1, %c0_2] : memref<128x128xbf16, #tpu.memory_space<vmem>>, vector<128x128xbf16>
    %2 = arith.extf %1 : vector<128x128xbf16> to vector<128x128xf32>
    %cst = arith.constant 1.000000e+00 : f32
    %3 = vector.broadcast %cst : f32 to vector<128x128xf32>
    %4 = arith.subf %2, %3 : vector<128x128xf32>
    %cst_3 = arith.constant 1.000000e+30 : f32
    %5 = vector.broadcast %cst_3 : f32 to vector<128x128xf32>
    %6 = arith.mulf %4, %5 : vector<128x128xf32>
    %cst_4 = arith.constant dense<0.000000e+00> : vector<128xf32>
    %7 = vector.multi_reduction <add>, %2, %cst_4 [1] : vector<128x128xf32> to vector<128xf32>
    %8 = vector.shape_cast %7 : vector<128xf32> to vector<128x1xf32>
    %cst_5 = arith.constant 0.000000e+00 : f32
    %9 = vector.broadcast %cst_5 : f32 to vector<128x1xf32>
    %10 = arith.cmpf ogt, %8, %9 : vector<128x1xf32>
    %11 = arith.extui %10 : vector<128x1xi1> to vector<128x1xi32>
    %12 = arith.sitofp %11 : vector<128x1xi32> to vector<128x1xf32>
    %c0_6 = arith.constant 0 : index
    %c0_7 = arith.constant 0 : index
    %13 = vector.load %arg3[%c0_6, %c0_7] : memref<128x1536xbf16, #tpu.memory_space<vmem>>, vector<128x1536xbf16>
    %cst_8 = arith.constant dense<0.000000e+00> : vector<128x1536xf32>
    %14 = tpu.matmul %0, %13, %cst_8 {dimension_numbers = #tpu.dot_dimension_numbers<[1], [0], [0], [1], [0, 0, 1, 1], [], []>} : vector<128x128xbf16>, vector<128x1536xbf16>, vector<128x1536xf32> -> vector<128x1536xf32>
    %c0_9 = arith.constant 0 : index
    %c0_10 = arith.constant 0 : index
    %15 = vector.load %arg4[%c0_9, %c0_10] : memref<1x1536xbf16, #tpu.memory_space<vmem>>, vector<1x1536xbf16>
    %16 = arith.extf %15 : vector<1x1536xbf16> to vector<1x1536xf32>
    %17 = vector.broadcast %16 : vector<1x1536xf32> to vector<128x1536xf32>
    %18 = arith.addf %14, %17 : vector<128x1536xf32>
    %19 = arith.truncf %18 : vector<128x1536xf32> to vector<128x1536xbf16>
    %20 = vector.extract_strided_slice %19 {offsets = [0, 0], sizes = [128, 512], strides = [1, 1]} : vector<128x1536xbf16> to vector<128x512xbf16>
    %21 = vector.extract_strided_slice %19 {offsets = [0, 512], sizes = [128, 512], strides = [1, 1]} : vector<128x1536xbf16> to vector<128x512xbf16>
    %22 = vector.extract_strided_slice %19 {offsets = [0, 1024], sizes = [128, 512], strides = [1, 1]} : vector<128x1536xbf16> to vector<128x512xbf16>
    %c0_11 = arith.constant 0 : index
    %c0_12 = arith.constant 0 : index
    %23 = vector.load %arg5[%c0_11, %c0_12] : memref<128x512xbf16, #tpu.memory_space<vmem>>, vector<128x512xbf16>
    %cst_13 = arith.constant dense<0.000000e+00> : vector<128x512xf32>
    %24 = tpu.matmul %0, %23, %cst_13 {dimension_numbers = #tpu.dot_dimension_numbers<[1], [0], [0], [1], [0, 0, 1, 1], [], []>} : vector<128x128xbf16>, vector<128x512xbf16>, vector<128x512xf32> -> vector<128x512xf32>
    %c0_14 = arith.constant 0 : index
    %c0_15 = arith.constant 0 : index
    %25 = vector.load %arg6[%c0_14, %c0_15] : memref<1x512xbf16, #tpu.memory_space<vmem>>, vector<1x512xbf16>
    %26 = arith.extf %25 : vector<1x512xbf16> to vector<1x512xf32>
    %27 = vector.broadcast %26 : vector<1x512xf32> to vector<128x512xf32>
    %28 = arith.addf %24, %27 : vector<128x512xf32>
    %cst_16 = arith.constant dense<0.000000e+00> : vector<128x128xf32>
    %29 = tpu.matmul %20, %21, %cst_16 {dimension_numbers = #tpu.dot_dimension_numbers<[1], [1], [0], [0], [0, 0, 1, 0], [], []>} : vector<128x512xbf16>, vector<128x512xbf16>, vector<128x128xf32> -> vector<128x128xf32>
    %30 = arith.addf %29, %6 : vector<128x128xf32>
    %cst_17 = arith.constant dense<0xFF800000> : vector<128xf32>
    %31 = vector.multi_reduction <maximumf>, %30, %cst_17 [1] : vector<128x128xf32> to vector<128xf32>
    %32 = vector.shape_cast %31 : vector<128xf32> to vector<128x1xf32>
    %33 = vector.broadcast %32 : vector<128x1xf32> to vector<128x128xf32>
    %34 = arith.subf %30, %33 : vector<128x128xf32>
    %35 = math.exp %34 : vector<128x128xf32>
    %cst_18 = arith.constant dense<0.000000e+00> : vector<128xf32>
    %36 = vector.multi_reduction <add>, %35, %cst_18 [1] : vector<128x128xf32> to vector<128xf32>
    %37 = vector.shape_cast %36 : vector<128xf32> to vector<128x1xf32>
    %38 = tpu.reciprocal %37 {approx = true} : vector<128x1xf32> -> vector<128x1xf32>
    %39 = arith.mulf %12, %38 : vector<128x1xf32>
    %40 = vector.broadcast %39 : vector<128x1xf32> to vector<128x128xf32>
    %41 = arith.mulf %35, %40 : vector<128x128xf32>
    %42 = arith.truncf %41 : vector<128x128xf32> to vector<128x128xbf16>
    %cst_19 = arith.constant dense<0.000000e+00> : vector<128x512xf32>
    %43 = tpu.matmul %42, %22, %cst_19 {dimension_numbers = #tpu.dot_dimension_numbers<[1], [0], [0], [1], [0, 0, 1, 1], [], []>} : vector<128x128xbf16>, vector<128x512xbf16>, vector<128x512xf32> -> vector<128x512xf32>
    %44 = arith.addf %43, %28 : vector<128x512xf32>
    %cst_20 = arith.constant 0.000000e+00 : f32
    %45 = vector.broadcast %cst_20 : f32 to vector<128x512xf32>
    %46 = arith.cmpf ogt, %44, %45 : vector<128x512xf32>
    %cst_21 = arith.constant 0.000000e+00 : f32
    %47 = vector.broadcast %cst_21 : f32 to vector<128x512xf32>
    %48 = arith.minimumf %44, %47 : vector<128x512xf32>
    %49 = math.exp %48 : vector<128x512xf32>
    %cst_22 = arith.constant 1.000000e+00 : f32
    %50 = vector.broadcast %cst_22 : f32 to vector<128x512xf32>
    %51 = arith.subf %49, %50 : vector<128x512xf32>
    %52 = arith.select %46, %44, %51 : vector<128x512xi1>, vector<128x512xf32>
    %53 = arith.truncf %52 : vector<128x512xf32> to vector<128x512xbf16>
    %c0_23 = arith.constant 0 : index
    %c0_24 = arith.constant 0 : index
    %54 = vector.load %arg7[%c0_23, %c0_24] : memref<512x768xbf16, #tpu.memory_space<vmem>>, vector<512x768xbf16>
    %cst_25 = arith.constant dense<0.000000e+00> : vector<128x768xf32>
    %55 = tpu.matmul %53, %54, %cst_25 {dimension_numbers = #tpu.dot_dimension_numbers<[1], [0], [0], [1], [0, 0, 1, 1], [], []>} : vector<128x512xbf16>, vector<512x768xbf16>, vector<128x768xf32> -> vector<128x768xf32>
    %c0_26 = arith.constant 0 : index
    %c0_27 = arith.constant 0 : index
    %56 = vector.load %arg8[%c0_26, %c0_27] : memref<1x768xbf16, #tpu.memory_space<vmem>>, vector<1x768xbf16>
    %57 = arith.extf %56 : vector<1x768xbf16> to vector<1x768xf32>
    %58 = vector.broadcast %57 : vector<1x768xf32> to vector<128x768xf32>
    %59 = arith.addf %55, %58 : vector<128x768xf32>
    %60 = arith.truncf %59 : vector<128x768xf32> to vector<128x768xbf16>
    %61 = vector.extract_strided_slice %60 {offsets = [0, 0], sizes = [128, 256], strides = [1, 1]} : vector<128x768xbf16> to vector<128x256xbf16>
    %62 = vector.extract_strided_slice %60 {offsets = [0, 256], sizes = [128, 256], strides = [1, 1]} : vector<128x768xbf16> to vector<128x256xbf16>
    %63 = vector.extract_strided_slice %60 {offsets = [0, 512], sizes = [128, 256], strides = [1, 1]} : vector<128x768xbf16> to vector<128x256xbf16>
    %c0_28 = arith.constant 0 : index
    %c0_29 = arith.constant 0 : index
    %64 = vector.load %arg9[%c0_28, %c0_29] : memref<512x256xbf16, #tpu.memory_space<vmem>>, vector<512x256xbf16>
    %cst_30 = arith.constant dense<0.000000e+00> : vector<128x256xf32>
    %65 = tpu.matmul %53, %64, %cst_30 {dimension_numbers = #tpu.dot_dimension_numbers<[1], [0], [0], [1], [0, 0, 1, 1], [], []>} : vector<128x512xbf16>, vector<512x256xbf16>, vector<128x256xf32> -> vector<128x256xf32>
    %c0_31 = arith.constant 0 : index
    %c0_32 = arith.constant 0 : index
    %66 = vector.load %arg10[%c0_31, %c0_32] : memref<1x256xbf16, #tpu.memory_space<vmem>>, vector<1x256xbf16>
    %67 = arith.extf %66 : vector<1x256xbf16> to vector<1x256xf32>
    %68 = vector.broadcast %67 : vector<1x256xf32> to vector<128x256xf32>
    %69 = arith.addf %65, %68 : vector<128x256xf32>
    %cst_33 = arith.constant dense<0.000000e+00> : vector<128x128xf32>
    %70 = tpu.matmul %61, %62, %cst_33 {dimension_numbers = #tpu.dot_dimension_numbers<[1], [1], [0], [0], [0, 0, 1, 0], [], []>} : vector<128x256xbf16>, vector<128x256xbf16>, vector<128x128xf32> -> vector<128x128xf32>
    %71 = arith.addf %70, %6 : vector<128x128xf32>
    %cst_34 = arith.constant dense<0xFF800000> : vector<128xf32>
    %72 = vector.multi_reduction <maximumf>, %71, %cst_34 [1] : vector<128x128xf32> to vector<128xf32>
    %73 = vector.shape_cast %72 : vector<128xf32> to vector<128x1xf32>
    %74 = vector.broadcast %73 : vector<128x1xf32> to vector<128x128xf32>
    %75 = arith.subf %71, %74 : vector<128x128xf32>
    %76 = math.exp %75 : vector<128x128xf32>
    %cst_35 = arith.constant dense<0.000000e+00> : vector<128xf32>
    %77 = vector.multi_reduction <add>, %76, %cst_35 [1] : vector<128x128xf32> to vector<128xf32>
    %78 = vector.shape_cast %77 : vector<128xf32> to vector<128x1xf32>
    %79 = tpu.reciprocal %78 {approx = true} : vector<128x1xf32> -> vector<128x1xf32>
    %80 = arith.mulf %12, %79 : vector<128x1xf32>
    %81 = vector.broadcast %80 : vector<128x1xf32> to vector<128x128xf32>
    %82 = arith.mulf %76, %81 : vector<128x128xf32>
    %83 = arith.truncf %82 : vector<128x128xf32> to vector<128x128xbf16>
    %cst_36 = arith.constant dense<0.000000e+00> : vector<128x256xf32>
    %84 = tpu.matmul %83, %63, %cst_36 {dimension_numbers = #tpu.dot_dimension_numbers<[1], [0], [0], [1], [0, 0, 1, 1], [], []>} : vector<128x128xbf16>, vector<128x256xbf16>, vector<128x256xf32> -> vector<128x256xf32>
    %85 = arith.addf %84, %69 : vector<128x256xf32>
    %cst_37 = arith.constant 0.000000e+00 : f32
    %86 = vector.broadcast %cst_37 : f32 to vector<128x256xf32>
    %87 = arith.cmpf ogt, %85, %86 : vector<128x256xf32>
    %cst_38 = arith.constant 0.000000e+00 : f32
    %88 = vector.broadcast %cst_38 : f32 to vector<128x256xf32>
    %89 = arith.minimumf %85, %88 : vector<128x256xf32>
    %90 = math.exp %89 : vector<128x256xf32>
    %cst_39 = arith.constant 1.000000e+00 : f32
    %91 = vector.broadcast %cst_39 : f32 to vector<128x256xf32>
    %92 = arith.subf %90, %91 : vector<128x256xf32>
    %93 = arith.select %87, %85, %92 : vector<128x256xi1>, vector<128x256xf32>
    %94 = arith.truncf %93 : vector<128x256xf32> to vector<128x256xbf16>
    %c0_40 = arith.constant 0 : index
    %c0_41 = arith.constant 0 : index
    %95 = vector.load %arg11[%c0_40, %c0_41] : memref<256x384xbf16, #tpu.memory_space<vmem>>, vector<256x384xbf16>
    %cst_42 = arith.constant dense<0.000000e+00> : vector<128x384xf32>
    %96 = tpu.matmul %94, %95, %cst_42 {dimension_numbers = #tpu.dot_dimension_numbers<[1], [0], [0], [1], [0, 0, 1, 1], [], []>} : vector<128x256xbf16>, vector<256x384xbf16>, vector<128x384xf32> -> vector<128x384xf32>
    %c0_43 = arith.constant 0 : index
    %c0_44 = arith.constant 0 : index
    %97 = vector.load %arg12[%c0_43, %c0_44] : memref<1x384xbf16, #tpu.memory_space<vmem>>, vector<1x384xbf16>
    %98 = arith.extf %97 : vector<1x384xbf16> to vector<1x384xf32>
    %99 = vector.broadcast %98 : vector<1x384xf32> to vector<128x384xf32>
    %100 = arith.addf %96, %99 : vector<128x384xf32>
    %101 = arith.truncf %100 : vector<128x384xf32> to vector<128x384xbf16>
    %102 = vector.extract_strided_slice %101 {offsets = [0, 0], sizes = [128, 128], strides = [1, 1]} : vector<128x384xbf16> to vector<128x128xbf16>
    %103 = vector.extract_strided_slice %101 {offsets = [0, 128], sizes = [128, 128], strides = [1, 1]} : vector<128x384xbf16> to vector<128x128xbf16>
    %104 = vector.extract_strided_slice %101 {offsets = [0, 256], sizes = [128, 128], strides = [1, 1]} : vector<128x384xbf16> to vector<128x128xbf16>
    %c0_45 = arith.constant 0 : index
    %c0_46 = arith.constant 0 : index
    %105 = vector.load %arg13[%c0_45, %c0_46] : memref<256x128xbf16, #tpu.memory_space<vmem>>, vector<256x128xbf16>
    %cst_47 = arith.constant dense<0.000000e+00> : vector<128x128xf32>
    %106 = tpu.matmul %94, %105, %cst_47 {dimension_numbers = #tpu.dot_dimension_numbers<[1], [0], [0], [1], [0, 0, 1, 1], [], []>} : vector<128x256xbf16>, vector<256x128xbf16>, vector<128x128xf32> -> vector<128x128xf32>
    %c0_48 = arith.constant 0 : index
    %c0_49 = arith.constant 0 : index
    %107 = vector.load %arg14[%c0_48, %c0_49] : memref<1x128xbf16, #tpu.memory_space<vmem>>, vector<1x128xbf16>
    %108 = arith.extf %107 : vector<1x128xbf16> to vector<1x128xf32>
    %109 = vector.broadcast %108 : vector<1x128xf32> to vector<128x128xf32>
    %110 = arith.addf %106, %109 : vector<128x128xf32>
    %cst_50 = arith.constant dense<0.000000e+00> : vector<128x128xf32>
    %111 = tpu.matmul %102, %103, %cst_50 {dimension_numbers = #tpu.dot_dimension_numbers<[1], [1], [0], [0], [0, 0, 1, 0], [], []>} : vector<128x128xbf16>, vector<128x128xbf16>, vector<128x128xf32> -> vector<128x128xf32>
    %112 = arith.addf %111, %6 : vector<128x128xf32>
    %cst_51 = arith.constant dense<0xFF800000> : vector<128xf32>
    %113 = vector.multi_reduction <maximumf>, %112, %cst_51 [1] : vector<128x128xf32> to vector<128xf32>
    %114 = vector.shape_cast %113 : vector<128xf32> to vector<128x1xf32>
    %115 = vector.broadcast %114 : vector<128x1xf32> to vector<128x128xf32>
    %116 = arith.subf %112, %115 : vector<128x128xf32>
    %117 = math.exp %116 : vector<128x128xf32>
    %cst_52 = arith.constant dense<0.000000e+00> : vector<128xf32>
    %118 = vector.multi_reduction <add>, %117, %cst_52 [1] : vector<128x128xf32> to vector<128xf32>
    %119 = vector.shape_cast %118 : vector<128xf32> to vector<128x1xf32>
    %120 = tpu.reciprocal %119 {approx = true} : vector<128x1xf32> -> vector<128x1xf32>
    %121 = arith.mulf %12, %120 : vector<128x1xf32>
    %122 = vector.broadcast %121 : vector<128x1xf32> to vector<128x128xf32>
    %123 = arith.mulf %117, %122 : vector<128x128xf32>
    %124 = arith.truncf %123 : vector<128x128xf32> to vector<128x128xbf16>
    %cst_53 = arith.constant dense<0.000000e+00> : vector<128x128xf32>
    %125 = tpu.matmul %124, %104, %cst_53 {dimension_numbers = #tpu.dot_dimension_numbers<[1], [0], [0], [1], [0, 0, 1, 1], [], []>} : vector<128x128xbf16>, vector<128x128xbf16>, vector<128x128xf32> -> vector<128x128xf32>
    %126 = arith.addf %125, %110 : vector<128x128xf32>
    %cst_54 = arith.constant 0.000000e+00 : f32
    %127 = vector.broadcast %cst_54 : f32 to vector<128x128xf32>
    %128 = arith.cmpf ogt, %126, %127 : vector<128x128xf32>
    %cst_55 = arith.constant 0.000000e+00 : f32
    %129 = vector.broadcast %cst_55 : f32 to vector<128x128xf32>
    %130 = arith.minimumf %126, %129 : vector<128x128xf32>
    %131 = math.exp %130 : vector<128x128xf32>
    %cst_56 = arith.constant 1.000000e+00 : f32
    %132 = vector.broadcast %cst_56 : f32 to vector<128x128xf32>
    %133 = arith.subf %131, %132 : vector<128x128xf32>
    %134 = arith.select %128, %126, %133 : vector<128x128xi1>, vector<128x128xf32>
    %135 = arith.truncf %134 : vector<128x128xf32> to vector<128x128xbf16>
    %c0_57 = arith.constant 0 : index
    %c0_58 = arith.constant 0 : index
    %136 = vector.load %arg15[%c0_57, %c0_58] : memref<128x384xbf16, #tpu.memory_space<vmem>>, vector<128x384xbf16>
    %cst_59 = arith.constant dense<0.000000e+00> : vector<128x384xf32>
    %137 = tpu.matmul %135, %136, %cst_59 {dimension_numbers = #tpu.dot_dimension_numbers<[1], [0], [0], [1], [0, 0, 1, 1], [], []>} : vector<128x128xbf16>, vector<128x384xbf16>, vector<128x384xf32> -> vector<128x384xf32>
    %c0_60 = arith.constant 0 : index
    %c0_61 = arith.constant 0 : index
    %138 = vector.load %arg16[%c0_60, %c0_61] : memref<1x384xbf16, #tpu.memory_space<vmem>>, vector<1x384xbf16>
    %139 = arith.extf %138 : vector<1x384xbf16> to vector<1x384xf32>
    %140 = vector.broadcast %139 : vector<1x384xf32> to vector<128x384xf32>
    %141 = arith.addf %137, %140 : vector<128x384xf32>
    %142 = arith.truncf %141 : vector<128x384xf32> to vector<128x384xbf16>
    %143 = vector.extract_strided_slice %142 {offsets = [0, 0], sizes = [128, 128], strides = [1, 1]} : vector<128x384xbf16> to vector<128x128xbf16>
    %144 = vector.extract_strided_slice %142 {offsets = [0, 128], sizes = [128, 128], strides = [1, 1]} : vector<128x384xbf16> to vector<128x128xbf16>
    %145 = vector.extract_strided_slice %142 {offsets = [0, 256], sizes = [128, 128], strides = [1, 1]} : vector<128x384xbf16> to vector<128x128xbf16>
    %c0_62 = arith.constant 0 : index
    %c0_63 = arith.constant 0 : index
    %146 = vector.load %arg17[%c0_62, %c0_63] : memref<128x128xbf16, #tpu.memory_space<vmem>>, vector<128x128xbf16>
    %cst_64 = arith.constant dense<0.000000e+00> : vector<128x128xf32>
    %147 = tpu.matmul %135, %146, %cst_64 {dimension_numbers = #tpu.dot_dimension_numbers<[1], [0], [0], [1], [0, 0, 1, 1], [], []>} : vector<128x128xbf16>, vector<128x128xbf16>, vector<128x128xf32> -> vector<128x128xf32>
    %c0_65 = arith.constant 0 : index
    %c0_66 = arith.constant 0 : index
    %148 = vector.load %arg18[%c0_65, %c0_66] : memref<1x128xbf16, #tpu.memory_space<vmem>>, vector<1x128xbf16>
    %149 = arith.extf %148 : vector<1x128xbf16> to vector<1x128xf32>
    %150 = vector.broadcast %149 : vector<1x128xf32> to vector<128x128xf32>
    %151 = arith.addf %147, %150 : vector<128x128xf32>
    %cst_67 = arith.constant dense<0.000000e+00> : vector<128x128xf32>
    %152 = tpu.matmul %143, %144, %cst_67 {dimension_numbers = #tpu.dot_dimension_numbers<[1], [1], [0], [0], [0, 0, 1, 0], [], []>} : vector<128x128xbf16>, vector<128x128xbf16>, vector<128x128xf32> -> vector<128x128xf32>
    %153 = arith.addf %152, %6 : vector<128x128xf32>
    %cst_68 = arith.constant dense<0xFF800000> : vector<128xf32>
    %154 = vector.multi_reduction <maximumf>, %153, %cst_68 [1] : vector<128x128xf32> to vector<128xf32>
    %155 = vector.shape_cast %154 : vector<128xf32> to vector<128x1xf32>
    %156 = vector.broadcast %155 : vector<128x1xf32> to vector<128x128xf32>
    %157 = arith.subf %153, %156 : vector<128x128xf32>
    %158 = math.exp %157 : vector<128x128xf32>
    %cst_69 = arith.constant dense<0.000000e+00> : vector<128xf32>
    %159 = vector.multi_reduction <add>, %158, %cst_69 [1] : vector<128x128xf32> to vector<128xf32>
    %160 = vector.shape_cast %159 : vector<128xf32> to vector<128x1xf32>
    %161 = tpu.reciprocal %160 {approx = true} : vector<128x1xf32> -> vector<128x1xf32>
    %162 = arith.mulf %12, %161 : vector<128x1xf32>
    %163 = vector.broadcast %162 : vector<128x1xf32> to vector<128x128xf32>
    %164 = arith.mulf %158, %163 : vector<128x128xf32>
    %165 = arith.truncf %164 : vector<128x128xf32> to vector<128x128xbf16>
    %cst_70 = arith.constant dense<0.000000e+00> : vector<128x128xf32>
    %166 = tpu.matmul %165, %145, %cst_70 {dimension_numbers = #tpu.dot_dimension_numbers<[1], [0], [0], [1], [0, 0, 1, 1], [], []>} : vector<128x128xbf16>, vector<128x128xbf16>, vector<128x128xf32> -> vector<128x128xf32>
    %167 = arith.addf %166, %151 : vector<128x128xf32>
    %cst_71 = arith.constant 0.000000e+00 : f32
    %168 = vector.broadcast %cst_71 : f32 to vector<128x128xf32>
    %169 = arith.cmpf ogt, %167, %168 : vector<128x128xf32>
    %cst_72 = arith.constant 0.000000e+00 : f32
    %170 = vector.broadcast %cst_72 : f32 to vector<128x128xf32>
    %171 = arith.minimumf %167, %170 : vector<128x128xf32>
    %172 = math.exp %171 : vector<128x128xf32>
    %cst_73 = arith.constant 1.000000e+00 : f32
    %173 = vector.broadcast %cst_73 : f32 to vector<128x128xf32>
    %174 = arith.subf %172, %173 : vector<128x128xf32>
    %175 = arith.select %169, %167, %174 : vector<128x128xi1>, vector<128x128xf32>
    %176 = arith.truncf %175 : vector<128x128xf32> to vector<128x128xbf16>
    %c0_74 = arith.constant 0 : index
    %c0_75 = arith.constant 0 : index
    %177 = vector.load %arg2[%c0_74, %c0_75] : memref<2x128xf32, #tpu.memory_space<vmem>>, vector<2x128xf32>
    %c0_76 = arith.constant 0 : index
    %c0_77 = arith.constant 0 : index
    %178 = vector.load %arg19[%c0_76, %c0_77] : memref<1x128xbf16, #tpu.memory_space<vmem>>, vector<1x128xbf16>
    %cst_78 = arith.constant dense<0.000000e+00> : vector<1x128xf32>
    %179 = tpu.matmul %178, %176, %cst_78 {dimension_numbers = #tpu.dot_dimension_numbers<[1], [1], [0], [0], [0, 0, 1, 0], [], []>} : vector<1x128xbf16>, vector<128x128xbf16>, vector<1x128xf32> -> vector<1x128xf32>
    %c0_79 = arith.constant 0 : index
    %c0_80 = arith.constant 0 : index
    %180 = vector.load %arg20[%c0_79, %c0_80] : memref<1x1xf32, #tpu.memory_space<vmem>>, vector<1x1xf32>
    %181 = vector.broadcast %180 : vector<1x1xf32> to vector<1x128xf32>
    %182 = arith.addf %179, %181 : vector<1x128xf32>
    %cst_81 = arith.constant 1.000000e+00 : f32
    %183 = vector.broadcast %cst_81 : f32 to vector<2x128xf32>
    %184 = arith.subf %177, %183 : vector<2x128xf32>
    %cst_82 = arith.constant 1.000000e+30 : f32
    %185 = vector.broadcast %cst_82 : f32 to vector<2x128xf32>
    %186 = arith.mulf %184, %185 : vector<2x128xf32>
    %187 = vector.broadcast %182 : vector<1x128xf32> to vector<2x128xf32>
    %188 = arith.addf %187, %186 : vector<2x128xf32>
    %cst_83 = arith.constant dense<0xFF800000> : vector<2xf32>
    %189 = vector.multi_reduction <maximumf>, %188, %cst_83 [1] : vector<2x128xf32> to vector<2xf32>
    %190 = vector.shape_cast %189 : vector<2xf32> to vector<2x1xf32>
    %191 = vector.broadcast %190 : vector<2x1xf32> to vector<2x128xf32>
    %192 = arith.mulf %177, %191 : vector<2x128xf32>
    %cst_84 = arith.constant dense<0.000000e+00> : vector<128xf32>
    %193 = vector.multi_reduction <add>, %192, %cst_84 [0] : vector<2x128xf32> to vector<128xf32>
    %194 = vector.shape_cast %193 : vector<128xf32> to vector<1x128xf32>
    %195 = arith.subf %182, %194 : vector<1x128xf32>
    %196 = math.exp %195 : vector<1x128xf32>
    %197 = vector.broadcast %196 : vector<1x128xf32> to vector<2x128xf32>
    %198 = arith.mulf %177, %197 : vector<2x128xf32>
    %199 = arith.truncf %198 : vector<2x128xf32> to vector<2x128xbf16>
    %cst_85 = arith.constant dense<0.000000e+00> : vector<2x128xf32>
    %200 = tpu.matmul %199, %176, %cst_85 {dimension_numbers = #tpu.dot_dimension_numbers<[1], [0], [0], [1], [0, 0, 1, 1], [], []>} : vector<2x128xbf16>, vector<128x128xbf16>, vector<2x128xf32> -> vector<2x128xf32>
    %cst_86 = arith.constant dense<0.000000e+00> : vector<2xf32>
    %201 = vector.multi_reduction <add>, %198, %cst_86 [1] : vector<2x128xf32> to vector<2xf32>
    %202 = vector.shape_cast %201 : vector<2xf32> to vector<2x1xf32>
    %203 = tpu.reciprocal %202 {approx = true} : vector<2x1xf32> -> vector<2x1xf32>
    %204 = vector.broadcast %203 : vector<2x1xf32> to vector<2x128xf32>
    %205 = arith.mulf %200, %204 : vector<2x128xf32>
    %206 = arith.truncf %205 : vector<2x128xf32> to vector<2x128xbf16>
    %c0_87 = arith.constant 0 : index
    %c0_88 = arith.constant 0 : index
    %207 = vector.load %arg21[%c0_87, %c0_88] : memref<128x128xbf16, #tpu.memory_space<vmem>>, vector<128x128xbf16>
    %cst_89 = arith.constant dense<0.000000e+00> : vector<2x128xf32>
    %208 = tpu.matmul %206, %207, %cst_89 {dimension_numbers = #tpu.dot_dimension_numbers<[1], [0], [0], [1], [0, 0, 1, 1], [], []>} : vector<2x128xbf16>, vector<128x128xbf16>, vector<2x128xf32> -> vector<2x128xf32>
    %c0_90 = arith.constant 0 : index
    %c0_91 = arith.constant 0 : index
    %209 = vector.load %arg22[%c0_90, %c0_91] : memref<1x128xf32, #tpu.memory_space<vmem>>, vector<1x128xf32>
    %210 = vector.broadcast %209 : vector<1x128xf32> to vector<2x128xf32>
    %211 = arith.addf %208, %210 : vector<2x128xf32>
    %c0_92 = arith.constant 0 : index
    %c0_93 = arith.constant 0 : index
    %212 = vector.load %arg23[%c0_92, %c0_93] : memref<2x128xf32, #tpu.memory_space<vmem>>, vector<2x128xf32>
    tpu.vector_store %arg23[%c0_92, %c0_93], %211 {strides = array<i32>} : memref<2x128xf32, #tpu.memory_space<vmem>>, vector<2x128xf32>,
    return
  }
}

</mosaic_0001>

<bundles_post_ra>
// kernel: transformer_net_forward.1
= control target key start
LH: loop header
LB: loop body
LE: loop exit
PB: predicated region body
PF: predicated region fallthrough
CT: control target
= control target key end

     0   :  { %s16788_s0 = inlined_call_operand.vmem [shape: bf16[128,128], index: 0, kind: input, shape index: {}]   ;;  %s16789_s1 = inlined_call_operand.vmem [shape: bf16[128,128], index: 1, kind: input, shape index: {}]   ;;  %s16790_s2 = inlined_call_operand.vmem [shape: f32[2,128], index: 2, kind: input, shape index: {}]   ;;  %s16791_s3 = inlined_call_operand.hbm [shape: bf16[128,1536], index: 3, kind: input, shape index: {}]   ;;  %s16792_s4 = inlined_call_operand.hbm [shape: bf16[1,1536], index: 4, kind: input, shape index: {}]   ;;  %s16793_s5 = inlined_call_operand.vmem [shape: bf16[128,512], index: 5, kind: input, shape index: {}]   ;;  %s16794_s6 = inlined_call_operand.hbm [shape: bf16[1,512], index: 6, kind: input, shape index: {}]   ;;  %s16795_s7 = inlined_call_operand.hbm [shape: bf16[512,768], index: 7, kind: input, shape index: {}]   ;;  %s16796_s8 = inlined_call_operand.hbm [shape: bf16[1,768], index: 8, kind: input, shape index: {}]   ;;  %s16797_s9 = inlined_call_operand.hbm [shape: bf16[512,256], index: 9, kind: input, shape index: {}]   ;;  %s16798_s10 = inlined_call_operand.hbm [shape: bf16[1,256], index: 10, kind: input, shape index: {}]   ;;  %s16799_s11 = inlined_call_operand.hbm [shape: bf16[256,384], index: 11, kind: input, shape index: {}]   ;;  %s16800_s12 = inlined_call_operand.hbm [shape: bf16[1,384], index: 12, kind: input, shape index: {}]   ;;  %s16801_s13 = inlined_call_operand.hbm [shape: bf16[256,128], index: 13, kind: input, shape index: {}]   ;;  %s16802_s14 = inlined_call_operand.hbm [shape: bf16[1,128], index: 14, kind: input, shape index: {}]   ;;  %s16803_s15 = inlined_call_operand.hbm [shape: bf16[128,384], index: 15, kind: input, shape index: {}]   ;;  %s16804_s16 = inlined_call_operand.hbm [shape: bf16[1,384], index: 16, kind: input, shape index: {}]   ;;  %s16805_s17 = inlined_call_operand.hbm [shape: bf16[128,128], index: 17, kind: input, shape index: {}]   ;;  %s16806_s18 = inlined_call_operand.hbm [shape: bf16[1,128], index: 18, kind: input, shape index: {}]   ;;  %s16807_s19 = inlined_call_operand.hbm [shape: bf16[1,128], index: 19, kind: input, shape index: {}]   ;;  %s16808_s20 = inlined_call_operand.<no memory space> [shape: f32[1,1], index: 20, kind: input, shape index: {}]   ;;  %s16809_s21 = inlined_call_operand.hbm [shape: bf16[128,128], index: 21, kind: input, shape index: {}]   ;;  %s16810_s22 = inlined_call_operand.hbm [shape: f32[1,128], index: 22, kind: input, shape index: {}]   ;;  %s16811_s23 = inlined_call_operand.hbm [shape: f32[2,128], index: 23, kind: output, shape index: {}]  }
   0x1   :  { %16980 = sst [smem:[#allocation104_spill]] %s16788_s0  ;;  %v28_v0 = vstv %s16808_s20 }
   0x2   :  { %16981 = sst [smem:[#allocation105_spill]] %s16789_s1  ;;  %29 = vst [vmem:[#allocation2] sm:$0x1] %v28_v0 }
   0x3   :  { %16982 = sst [smem:[#allocation106_spill]] %s16790_s2 }
   0x4   :  { %16983 = sst [smem:[#allocation107_spill]] %s16791_s3 }
   0x5   :  { %16984 = sst [smem:[#allocation108_spill]] %s16792_s4 }
   0x6   :  { %16985 = sst [smem:[#allocation109_spill]] %s16793_s5 }
   0x7   :  { %16986 = sst [smem:[#allocation110_spill]] %s16794_s6 }
   0x8   :  { %16987 = sst [smem:[#allocation111_spill]] %s16795_s7 }
   0x9   :  { %30 = vsyncpa [#allocation4], 0 }
   0xa   :  { %31 = vsyncpa [#allocation7], 0 }
   0xb   :  { %32 = vsyncpa [#allocation10], 0 }
   0xc   :  { %33 = vsyncpa [#allocation13], 0 }
   0xd   :  { %34 = vsyncpa [#allocation16], 0 }
   0xe   :  { %35 = vsyncpa [#allocation19], 0 }
   0xf   :  { %36 = vsyncpa [#allocation22], 0 }
  0x10   :  { %37 = vsyncpa [#allocation25], 0 }
  0x11   :  { %38 = vsyncpa [#allocation28], 0 }
  0x12   :  { %39 = vsyncpa [#allocation31], 0 }
  0x13   :  { %40 = vsyncpa [#allocation5], 0  ;;  %s12604_s24 = smov [#allocation6]   ;;  %s12605_s5 = smov [#allocation9]  }
  0x14   :  { %s65_s25 = sshll.u32 %s12604_s24, 4  ;;  %s86_s1 = sshll.u32 %s12605_s5, 4  ;;  %s66_s25 = int_to_ptr.vmem [resolvable:$true] %s65_s25  ;;  %s12759_s1 = int_to_ptr.vmem [resolvable:$true] %s86_s1 }
  0x15   :  { %s16988_s2 = sld [smem:[#allocation108_spill]] }
  0x1b   :  { %s12164_s6 = scalar_lea.hbm %s16988_s2, 192 }
  0x1c   :  { %p12165_p0 = scmp.ne.s32.totalorder %s16988_s2, %s12164_s6  ;;  %p12168_p1 = scmp.lt.u32.totalorder %s12164_s6, %s16988_s2 }
  0x1e   :  { %p12170_p2 = pnand %p12168_p1, %p12165_p0 }
  0x20   :  { %12173 = shalt.err (!%p12170_p2)
}
  0x21   :  { %s12174_s3 = scalar_lea.vmem %s66_s25, 192  ;;  %p12179_p4 = scmp.lt.s32.totalorder %s66_s25, %s66_s25 }
  0x22   :  { %p12175_p3 = scmp.ne.s32.totalorder %s66_s25, %s12174_s3  ;;  %p12180_p5 = scmp.lt.s32.totalorder %s12174_s3, %s12174_s3 }
  0x24   :  { %p12181_p6 = por %p12180_p5, %p12179_p4 }
  0x26   :  { %p12182_p7 = pnand %p12181_p6, %p12175_p3 }
  0x28   :  { %12185 = shalt.err (!%p12182_p7)
}
  0x29   :  { %68 = dma.hbm_to_vmem [thread:$0]  %s16988_s2, 192, %s66_s25, [#allocation7]  }
  0x2a   :  { %s16989_s5 = sld [smem:[#allocation111_spill]] }
  0x30   :  { %s12186_s20 = scalar_lea.hbm %s16989_s5, 24576 }
  0x31   :  { %p12187_p8 = scmp.ne.s32.totalorder %s16989_s5, %s12186_s20  ;;  %p12190_p9 = scmp.lt.u32.totalorder %s12186_s20, %s16989_s5 }
  0x33   :  { %p12192_p10 = pnand %p12190_p9, %p12187_p8 }
  0x35   :  { %12195 = shalt.err (!%p12192_p10)
}
  0x36   :  { %s12196_s28 = scalar_lea.vmem %s12759_s1, 24576  ;;  %p12201_p12 = scmp.lt.s32.totalorder %s12759_s1, %s12759_s1 }
  0x37   :  { %p12197_p11 = scmp.ne.s32.totalorder %s12759_s1, %s12196_s28  ;;  %p12202_p13 = scmp.lt.s32.totalorder %s12196_s28, %s12196_s28 }
  0x39   :  { %p12203_p0 = por %p12202_p13, %p12201_p12 }
  0x3b   :  { %p12204_p1 = pnand %p12203_p0, %p12197_p11 }
  0x3d   :  { %12207 = shalt.err (!%p12204_p1)
}
  0x3e   :  { %s12606_s25 = smov 384   ;;  %s12607_s2 = smov 24  }
  0x3f   :  { %92 = dma.hbm_to_vmem [thread:$0]  %s16989_s5, 24576, %s12759_s1, [#allocation10], %s12606_s25, %s12606_s25, %s12607_s2  }
  0x40   :  { %s12608_s0 = smov [#allocation12]   ;;  %s12208_s20 = scalar_lea.hbm %s16797_s9, 8192 }
  0x41   :  { %s108_s4 = sshll.u32 %s12608_s0, 4  ;;  %p12209_p2 = scmp.ne.s32.totalorder %s16797_s9, %s12208_s20  ;;  %s109_s4 = int_to_ptr.vmem [resolvable:$true] %s108_s4 }
  0x42   :  { %p12212_p3 = scmp.lt.u32.totalorder %s12208_s20, %s16797_s9 }
  0x44   :  { %p12214_p4 = pnand %p12212_p3, %p12209_p2 }
  0x46   :  { %12217 = shalt.err (!%p12214_p4)
}
  0x47   :  { %s12218_s28 = scalar_lea.vmem %s109_s4, 8192  ;;  %p12223_p6 = scmp.lt.s32.totalorder %s109_s4, %s109_s4 }
  0x48   :  { %p12219_p5 = scmp.ne.s32.totalorder %s109_s4, %s12218_s28  ;;  %p12224_p7 = scmp.lt.s32.totalorder %s12218_s28, %s12218_s28 }
  0x4a   :  { %p12225_p8 = por %p12224_p7, %p12223_p6 }
  0x4c   :  { %p12226_p9 = pnand %p12225_p8, %p12219_p5 }
  0x4e   :  { %12229 = shalt.err (!%p12226_p9)
}
  0x4f   :  { %s12609_s1 = smov 128   ;;  %s12610_s5 = smov 8  }
  0x50   :  { %114 = dma.hbm_to_vmem [thread:$0]  %s16797_s9, 8192, %s109_s4, [#allocation13], %s12609_s1, %s12609_s1, %s12610_s5  }
  0x51   :  { %s12611_s29 = smov [#allocation15]   ;;  %s12230_s24 = scalar_lea.hbm %s16799_s11, 6144 }
  0x52   :  { %s130_s3 = sshll.u32 %s12611_s29, 4  ;;  %p12231_p10 = scmp.ne.s32.totalorder %s16799_s11, %s12230_s24  ;;  %s131_s3 = int_to_ptr.vmem [resolvable:$true] %s130_s3 }
  0x53   :  { %p12234_p11 = scmp.lt.u32.totalorder %s12230_s24, %s16799_s11 }
  0x55   :  { %p12236_p12 = pnand %p12234_p11, %p12231_p10 }
  0x57   :  { %12239 = shalt.err (!%p12236_p12)
}
  0x58   :  { %s12240_s7 = scalar_lea.vmem %s131_s3, 6144  ;;  %p12245_p0 = scmp.lt.s32.totalorder %s131_s3, %s131_s3 }
  0x59   :  { %p12241_p13 = scmp.ne.s32.totalorder %s131_s3, %s12240_s7  ;;  %p12246_p1 = scmp.lt.s32.totalorder %s12240_s7, %s12240_s7 }
  0x5b   :  { %p12247_p2 = por %p12246_p1, %p12245_p0 }
  0x5d   :  { %p12248_p3 = pnand %p12247_p2, %p12241_p13 }
  0x5f   :  { %12251 = shalt.err (!%p12248_p3)
}
  0x60   :  { %s12612_s9 = smov 192   ;;  %s12613_s4 = smov 12  }
  0x61   :  { %136 = dma.hbm_to_vmem [thread:$0]  %s16799_s11, 6144, %s131_s3, [#allocation16], %s12612_s9, %s12612_s9, %s12613_s4  }
  0x62   :  { %s12614_s5 = smov [#allocation18]   ;;  %s12252_s0 = scalar_lea.hbm %s16801_s13, 2048 }
  0x63   :  { %s152_s25 = sshll.u32 %s12614_s5, 4  ;;  %p12253_p4 = scmp.ne.s32.totalorder %s16801_s13, %s12252_s0  ;;  %s153_s25 = int_to_ptr.vmem [resolvable:$true] %s152_s25 }
  0x64   :  { %p12256_p5 = scmp.lt.u32.totalorder %s12252_s0, %s16801_s13 }
  0x66   :  { %p12258_p6 = pnand %p12256_p5, %p12253_p4 }
  0x68   :  { %12261 = shalt.err (!%p12258_p6)
}
  0x69   :  { %s12262_s27 = scalar_lea.vmem %s153_s25, 2048  ;;  %p12267_p8 = scmp.lt.s32.totalorder %s153_s25, %s153_s25 }
  0x6a   :  { %p12263_p7 = scmp.ne.s32.totalorder %s153_s25, %s12262_s27  ;;  %p12268_p9 = scmp.lt.s32.totalorder %s12262_s27, %s12262_s27 }
  0x6c   :  { %p12269_p10 = por %p12268_p9, %p12267_p8 }
  0x6e   :  { %p12270_p11 = pnand %p12269_p10, %p12263_p7 }
  0x70   :  { %12273 = shalt.err (!%p12270_p11)
}
  0x71   :  { %s12615_s11 = smov 64   ;;  %s12616_s3 = smov 4  }
  0x72   :  { %158 = dma.hbm_to_vmem [thread:$0]  %s16801_s13, 2048, %s153_s25, [#allocation19], %s12615_s11, %s12615_s11, %s12616_s3  }
  0x73   :  { %s12617_s28 = smov [#allocation21]   ;;  %s12618_s5 = smov [#allocation24]  }
  0x74   :  { %s174_s1 = sshll.u32 %s12617_s28, 4  ;;  %s196_s2 = sshll.u32 %s12618_s5, 4  ;;  %s175_s1 = int_to_ptr.vmem [resolvable:$true] %s174_s1  ;;  %s197_s2 = int_to_ptr.vmem [resolvable:$true] %s196_s2 }
  0x75   :  { %s12274_s30 = scalar_lea.hbm %s16803_s15, 3072 }
  0x76   :  { %p12275_p12 = scmp.ne.s32.totalorder %s16803_s15, %s12274_s30  ;;  %p12278_p13 = scmp.lt.u32.totalorder %s12274_s30, %s16803_s15 }
  0x78   :  { %p12280_p0 = pnand %p12278_p13, %p12275_p12 }
  0x7a   :  { %12283 = shalt.err (!%p12280_p0)
}
  0x7b   :  { %s12284_s13 = scalar_lea.vmem %s175_s1, 3072  ;;  %p12289_p2 = scmp.lt.s32.totalorder %s175_s1, %s175_s1 }
  0x7c   :  { %p12285_p1 = scmp.ne.s32.totalorder %s175_s1, %s12284_s13  ;;  %p12290_p3 = scmp.lt.s32.totalorder %s12284_s13, %s12284_s13 }
  0x7e   :  { %p12291_p4 = por %p12290_p3, %p12289_p2 }
  0x80   :  { %p12292_p5 = pnand %p12291_p4, %p12285_p1 }
  0x82   :  { %12295 = shalt.err (!%p12292_p5)
}
  0x83   :  { %180 = dma.hbm_to_vmem [thread:$0]  %s16803_s15, 3072, %s175_s1, [#allocation22], %s12612_s9, %s12612_s9, %s12613_s4  }
  0x84   :  { %s12296_s5 = scalar_lea.hbm %s16805_s17, 1024 }
  0x85   :  { %p12297_p6 = scmp.ne.s32.totalorder %s16805_s17, %s12296_s5  ;;  %p12300_p7 = scmp.lt.u32.totalorder %s12296_s5, %s16805_s17 }
  0x87   :  { %p12302_p8 = pnand %p12300_p7, %p12297_p6 }
  0x89   :  { %12305 = shalt.err (!%p12302_p8)
}
  0x8a   :  { %s12306_s20 = scalar_lea.vmem %s197_s2, 1024  ;;  %p12311_p10 = scmp.lt.s32.totalorder %s197_s2, %s197_s2 }
  0x8b   :  { %p12307_p9 = scmp.ne.s32.totalorder %s197_s2, %s12306_s20  ;;  %p12312_p11 = scmp.lt.s32.totalorder %s12306_s20, %s12306_s20 }
  0x8d   :  { %p12313_p12 = por %p12312_p11, %p12311_p10 }
  0x8f   :  { %p12314_p13 = pnand %p12313_p12, %p12307_p9 }
  0x91   :  { %12317 = shalt.err (!%p12314_p13)
}
  0x92   :  { %202 = dma.hbm_to_vmem [thread:$0]  %s16805_s17, 1024, %s197_s2, [#allocation25], %s12615_s11, %s12615_s11, %s12616_s3  }
  0x93   :  { %s12619_s4 = smov [#allocation27]   ;;  %s12620_s26 = smov [#allocation3]  }
  0x94   :  { %s219_s1 = sshll.u32 %s12619_s4, 4  ;;  %s52_s27 = sshll.u32 %s12620_s26, 4  ;;  %s220_s1 = int_to_ptr.vmem [resolvable:$true] %s219_s1  ;;  %s53_s27 = int_to_ptr.vmem [resolvable:$true] %s52_s27 }
  0x95   :  { %s12318_s6 = scalar_lea.hbm %s16807_s19, 16 }
  0x96   :  { %p12319_p0 = scmp.ne.s32.totalorder %s16807_s19, %s12318_s6  ;;  %p12322_p1 = scmp.lt.u32.totalorder %s12318_s6, %s16807_s19 }
  0x98   :  { %p12324_p2 = pnand %p12322_p1, %p12319_p0 }
  0x9a   :  { %12327 = shalt.err (!%p12324_p2)
}
  0x9b   :  { %s12328_s17 = scalar_lea.vmem %s220_s1, 16  ;;  %s12332_s2 = scalar_lea.vmem %s220_s1, 32 }
  0x9c   :  { %p12329_p3 = scmp.ne.s32.totalorder %s220_s1, %s12328_s17  ;;  %p12333_p4 = scmp.lt.s32.totalorder %s220_s1, %s220_s1 }
  0x9d   :  { %p12334_p5 = scmp.lt.s32.totalorder %s12332_s2, %s12328_s17 }
  0x9f   :  { %p12335_p6 = por %p12334_p5, %p12333_p4 }
  0xa1   :  { %p12336_p7 = pnand %p12335_p6, %p12329_p3 }
  0xa3   :  { %12339 = shalt.err (!%p12336_p7)
}
  0xa4   :  { %222 = dma.hbm_to_vmem [thread:$0]  %s16807_s19, 16, %s220_s1, [#allocation28]  }
  0xa5   :  { %s16990_s15 = sld [smem:[#allocation107_spill]] }
  0xab   :  { %s12340_s9 = scalar_lea.hbm %s16990_s15, 12288 }
  0xac   :  { %p12341_p8 = scmp.ne.s32.totalorder %s16990_s15, %s12340_s9  ;;  %p12344_p9 = scmp.lt.u32.totalorder %s12340_s9, %s16990_s15 }
  0xae   :  { %p12346_p10 = pnand %p12344_p9, %p12341_p8 }
  0xb0   :  { %12349 = shalt.err (!%p12346_p10)
}
  0xb1   :  { %s12350_s6 = scalar_lea.vmem %s53_s27, 12288  ;;  %p12355_p12 = scmp.lt.s32.totalorder %s53_s27, %s53_s27 }
  0xb2   :  { %p12351_p11 = scmp.ne.s32.totalorder %s53_s27, %s12350_s6  ;;  %p12356_p13 = scmp.lt.s32.totalorder %s12350_s6, %s12350_s6 }
  0xb4   :  { %p12357_p0 = por %p12356_p13, %p12355_p12 }
  0xb6   :  { %p12358_p1 = pnand %p12357_p0, %p12351_p11 }
  0xb8   :  { %12361 = shalt.err (!%p12358_p1)
}
  0xb9   :  { %s12621_s19 = smov 768   ;;  %s12622_s1 = smov 48  }
  0xba   :  { %58 = dma.hbm_to_vmem [thread:$0]  %s16990_s15, 12288, %s53_s27, [#allocation4], %s12621_s19, %s12621_s19, %s12622_s1  }
  0xbb   :  { %s12623_s5 = smov [#allocation8]   ;;  %s12624_s17 = smov [#allocation11]  }
  0xbc   :  { %s77_s29 = sshll.u32 %s12623_s5, 4  ;;  %s99_s2 = sshll.u32 %s12624_s17, 4  ;;  %s78_s29 = int_to_ptr.vmem [resolvable:$true] %s77_s29  ;;  %s100_s2 = int_to_ptr.vmem [resolvable:$true] %s99_s2 }
  0xbd   :  { %s16991_s24 = sld [smem:[#allocation110_spill]] }
  0xc3   :  { %s12362_s20 = scalar_lea.hbm %s16991_s24, 64 }
  0xc4   :  { %p12363_p2 = scmp.ne.s32.totalorder %s16991_s24, %s12362_s20  ;;  %p12366_p3 = scmp.lt.u32.totalorder %s12362_s20, %s16991_s24 }
  0xc6   :  { %p12368_p4 = pnand %p12366_p3, %p12363_p2 }
  0xc8   :  { %12371 = shalt.err (!%p12368_p4)
}
  0xc9   :  { %s12372_s27 = scalar_lea.vmem %s78_s29, 64  ;;  %p12377_p6 = scmp.lt.s32.totalorder %s78_s29, %s78_s29 }
  0xca   :  { %p12373_p5 = scmp.ne.s32.totalorder %s78_s29, %s12372_s27  ;;  %p12378_p7 = scmp.lt.s32.totalorder %s12372_s27, %s12372_s27 }
  0xcc   :  { %p12379_p8 = por %p12378_p7, %p12377_p6 }
  0xce   :  { %p12380_p9 = pnand %p12379_p8, %p12373_p5 }
  0xd0   :  { %12383 = shalt.err (!%p12380_p9)
}
  0xd1   :  { %80 = dma.hbm_to_vmem [thread:$0]  %s16991_s24, 64, %s78_s29, [#allocation7]  }
  0xd2   :  { %s12384_s1 = scalar_lea.hbm %s16796_s8, 96 }
  0xd3   :  { %p12385_p10 = scmp.ne.s32.totalorder %s16796_s8, %s12384_s1  ;;  %p12388_p11 = scmp.lt.u32.totalorder %s12384_s1, %s16796_s8 }
  0xd5   :  { %p12390_p12 = pnand %p12388_p11, %p12385_p10 }
  0xd7   :  { %12393 = shalt.err (!%p12390_p12)
}
  0xd8   :  { %s12394_s0 = scalar_lea.vmem %s100_s2, 96  ;;  %p12399_p0 = scmp.lt.s32.totalorder %s100_s2, %s100_s2 }
  0xd9   :  { %p12395_p13 = scmp.ne.s32.totalorder %s100_s2, %s12394_s0  ;;  %p12400_p1 = scmp.lt.s32.totalorder %s12394_s0, %s12394_s0 }
  0xdb   :  { %p12401_p2 = por %p12400_p1, %p12399_p0 }
  0xdd   :  { %p12402_p3 = pnand %p12401_p2, %p12395_p13 }
  0xdf   :  { %12405 = shalt.err (!%p12402_p3)
}
  0xe0   :  { %102 = dma.hbm_to_vmem [thread:$0]  %s16796_s8, 96, %s100_s2, [#allocation10]  }
  0xe1   :  { %s12625_s24 = smov [#allocation14]   ;;  %s12626_s9 = smov [#allocation17]  }
  0xe2   :  { %s121_s20 = sshll.u32 %s12625_s24, 4  ;;  %s143_s4 = sshll.u32 %s12626_s9, 4  ;;  %s122_s20 = int_to_ptr.vmem [resolvable:$true] %s121_s20  ;;  %s144_s4 = int_to_ptr.vmem [resolvable:$true] %s143_s4 }
  0xe3   :  { %s12406_s27 = scalar_lea.hbm %s16798_s10, 32 }
  0xe4   :  { %p12407_p4 = scmp.ne.s32.totalorder %s16798_s10, %s12406_s27  ;;  %p12410_p5 = scmp.lt.u32.totalorder %s12406_s27, %s16798_s10 }
  0xe6   :  { %p12412_p6 = pnand %p12410_p5, %p12407_p4 }
  0xe8   :  { %12415 = shalt.err (!%p12412_p6)
}
  0xe9   :  { %s12416_s8 = scalar_lea.vmem %s122_s20, 32  ;;  %p12421_p8 = scmp.lt.s32.totalorder %s122_s20, %s122_s20 }
  0xea   :  { %p12417_p7 = scmp.ne.s32.totalorder %s122_s20, %s12416_s8  ;;  %p12422_p9 = scmp.lt.s32.totalorder %s12416_s8, %s12416_s8 }
  0xec   :  { %p12423_p10 = por %p12422_p9, %p12421_p8 }
  0xee   :  { %p12424_p11 = pnand %p12423_p10, %p12417_p7 }
  0xf0   :  { %12427 = shalt.err (!%p12424_p11)
}
  0xf1   :  { %124 = dma.hbm_to_vmem [thread:$0]  %s16798_s10, 32, %s122_s20, [#allocation13]  }
  0xf2   :  { %s12428_s5 = scalar_lea.hbm %s16800_s12, 48 }
  0xf3   :  { %p12429_p12 = scmp.ne.s32.totalorder %s16800_s12, %s12428_s5  ;;  %p12432_p13 = scmp.lt.u32.totalorder %s12428_s5, %s16800_s12 }
  0xf5   :  { %p12434_p0 = pnand %p12432_p13, %p12429_p12 }
  0xf7   :  { %12437 = shalt.err (!%p12434_p0)
}
  0xf8   :  { %s12438_s24 = scalar_lea.vmem %s144_s4, 48  ;;  %s12442_s9 = scalar_lea.vmem %s144_s4, 64 }
  0xf9   :  { %p12439_p1 = scmp.ne.s32.totalorder %s144_s4, %s12438_s24  ;;  %p12443_p2 = scmp.lt.s32.totalorder %s144_s4, %s144_s4 }
  0xfa   :  { %p12444_p3 = scmp.lt.s32.totalorder %s12442_s9, %s12438_s24 }
  0xfc   :  { %p12445_p4 = por %p12444_p3, %p12443_p2 }
  0xfe   :  { %p12446_p5 = pnand %p12445_p4, %p12439_p1 }
 0x100   :  { %12449 = shalt.err (!%p12446_p5)
}
 0x101   :  { %146 = dma.hbm_to_vmem [thread:$0]  %s16800_s12, 48, %s144_s4, [#allocation16]  }
 0x102   :  { %s12627_s26 = smov [#allocation20]   ;;  %s12628_s27 = smov [#allocation23]  }
 0x103   :  { %s165_s13 = sshll.u32 %s12627_s26, 4  ;;  %s187_s15 = sshll.u32 %s12628_s27, 4  ;;  %s166_s13 = int_to_ptr.vmem [resolvable:$true] %s165_s13  ;;  %s188_s15 = int_to_ptr.vmem [resolvable:$true] %s187_s15 }
 0x104   :  { %s12450_s19 = scalar_lea.hbm %s16802_s14, 16 }
 0x105   :  { %p12451_p6 = scmp.ne.s32.totalorder %s16802_s14, %s12450_s19  ;;  %p12454_p7 = scmp.lt.u32.totalorder %s12450_s19, %s16802_s14 }
 0x107   :  { %p12456_p8 = pnand %p12454_p7, %p12451_p6 }
 0x109   :  { %12459 = shalt.err (!%p12456_p8)
}
 0x10a   :  { %s12460_s12 = scalar_lea.vmem %s166_s13, 16  ;;  %s12464_s4 = scalar_lea.vmem %s166_s13, 32 }
 0x10b   :  { %p12461_p9 = scmp.ne.s32.totalorder %s166_s13, %s12460_s12  ;;  %p12465_p10 = scmp.lt.s32.totalorder %s166_s13, %s166_s13 }
 0x10c   :  { %p12466_p11 = scmp.lt.s32.totalorder %s12464_s4, %s12460_s12 }
 0x10e   :  { %p12467_p12 = por %p12466_p11, %p12465_p10 }
 0x110   :  { %p12468_p13 = pnand %p12467_p12, %p12461_p9 }
 0x112   :  { %12471 = shalt.err (!%p12468_p13)
}
 0x113   :  { %168 = dma.hbm_to_vmem [thread:$0]  %s16802_s14, 16, %s166_s13, [#allocation19]  }
 0x114   :  { %s12472_s29 = scalar_lea.hbm %s16804_s16, 48 }
 0x115   :  { %p12473_p0 = scmp.ne.s32.totalorder %s16804_s16, %s12472_s29  ;;  %p12476_p1 = scmp.lt.u32.totalorder %s12472_s29, %s16804_s16 }
 0x117   :  { %p12478_p2 = pnand %p12476_p1, %p12473_p0 }
 0x119   :  { %12481 = shalt.err (!%p12478_p2)
}
 0x11a   :  { %s12482_s20 = scalar_lea.vmem %s188_s15, 48  ;;  %s12486_s26 = scalar_lea.vmem %s188_s15, 64 }
 0x11b   :  { %p12483_p3 = scmp.ne.s32.totalorder %s188_s15, %s12482_s20  ;;  %p12487_p4 = scmp.lt.s32.totalorder %s188_s15, %s188_s15 }
 0x11c   :  { %p12488_p5 = scmp.lt.s32.totalorder %s12486_s26, %s12482_s20 }
 0x11e   :  { %p12489_p6 = por %p12488_p5, %p12487_p4 }
 0x120   :  { %p12490_p7 = pnand %p12489_p6, %p12483_p3 }
 0x122   :  { %12493 = shalt.err (!%p12490_p7)
}
 0x123   :  { %190 = dma.hbm_to_vmem [thread:$0]  %s16804_s16, 48, %s188_s15, [#allocation22]  }
 0x124   :  { %s12629_s27 = smov [#allocation26]   ;;  %s12630_s6 = smov [#allocation29]  }
 0x125   :  { %s209_s25 = sshll.u32 %s12629_s27, 4  ;;  %s230_s19 = sshll.u32 %s12630_s6, 4  ;;  %s210_s25 = int_to_ptr.vmem [resolvable:$true] %s209_s25  ;;  %s231_s19 = int_to_ptr.vmem [resolvable:$true] %s230_s19 }
 0x126   :  { %s12494_s1 = scalar_lea.hbm %s16806_s18, 16 }
 0x127   :  { %p12495_p8 = scmp.ne.s32.totalorder %s16806_s18, %s12494_s1  ;;  %p12498_p9 = scmp.lt.u32.totalorder %s12494_s1, %s16806_s18 }
 0x129   :  { %p12500_p10 = pnand %p12498_p9, %p12495_p8 }
 0x12b   :  { %12503 = shalt.err (!%p12500_p10)
}
 0x12c   :  { %s12504_s16 = scalar_lea.vmem %s210_s25, 16  ;;  %s12508_s15 = scalar_lea.vmem %s210_s25, 32 }
 0x12d   :  { %p12505_p11 = scmp.ne.s32.totalorder %s210_s25, %s12504_s16  ;;  %p12509_p12 = scmp.lt.s32.totalorder %s210_s25, %s210_s25 }
 0x12e   :  { %p12510_p13 = scmp.lt.s32.totalorder %s12508_s15, %s12504_s16 }
 0x130   :  { %p12511_p0 = por %p12510_p13, %p12509_p12 }
 0x132   :  { %p12512_p1 = pnand %p12511_p0, %p12505_p11 }
 0x134   :  { %12515 = shalt.err (!%p12512_p1)
}
 0x135   :  { %212 = dma.hbm_to_vmem [thread:$0]  %s16806_s18, 16, %s210_s25, [#allocation25]  }
 0x136   :  { %s12516_s30 = scalar_lea.hbm %s16809_s21, 1024 }
 0x137   :  { %p12517_p2 = scmp.ne.s32.totalorder %s16809_s21, %s12516_s30  ;;  %p12520_p3 = scmp.lt.u32.totalorder %s12516_s30, %s16809_s21 }
 0x139   :  { %p12522_p4 = pnand %p12520_p3, %p12517_p2 }
 0x13b   :  { %12525 = shalt.err (!%p12522_p4)
}
 0x13c   :  { %s12526_s26 = scalar_lea.vmem %s231_s19, 1024  ;;  %p12531_p6 = scmp.lt.s32.totalorder %s231_s19, %s231_s19 }
 0x13d   :  { %p12527_p5 = scmp.ne.s32.totalorder %s231_s19, %s12526_s26  ;;  %p12532_p7 = scmp.lt.s32.totalorder %s12526_s26, %s12526_s26 }
 0x13f   :  { %p12533_p8 = por %p12532_p7, %p12531_p6 }
 0x141   :  { %p12534_p9 = pnand %p12533_p8, %p12527_p5 }
 0x143   :  { %12537 = shalt.err (!%p12534_p9)
}
 0x144   :  { %236 = dma.hbm_to_vmem [thread:$0]  %s16809_s21, 1024, %s231_s19, [#allocation28], %s12615_s11, %s12615_s11, %s12616_s3  }
 0x145   :  { %s12631_s13 = smov [#allocation30]   ;;  %s12538_s8 = scalar_lea.hbm %s16810_s22, 16 }
 0x146   :  { %s243_s27 = sshll.u32 %s12631_s13, 4  ;;  %p12539_p10 = scmp.ne.s32.totalorder %s16810_s22, %s12538_s8  ;;  %s244_s27 = int_to_ptr.vmem [resolvable:$true] %s243_s27 }
 0x147   :  { %p12542_p11 = scmp.lt.u32.totalorder %s12538_s8, %s16810_s22 }
 0x149   :  { %p12544_p12 = pnand %p12542_p11, %p12539_p10 }
 0x14b   :  { %12547 = shalt.err (!%p12544_p12)
}
 0x14c   :  { %s12548_s4 = scalar_lea.vmem %s244_s27, 16  ;;  %s12552_s21 = scalar_lea.vmem %s244_s27, 32 }
 0x14d   :  { %p12549_p13 = scmp.ne.s32.totalorder %s244_s27, %s12548_s4  ;;  %p12553_p0 = scmp.lt.s32.totalorder %s244_s27, %s244_s27 }
 0x14e   :  { %p12554_p1 = scmp.lt.s32.totalorder %s12552_s21, %s12548_s4 }
 0x150   :  { %p12555_p2 = por %p12554_p1, %p12553_p0 }
 0x152   :  { %p12556_p3 = pnand %p12555_p2, %p12549_p13 }
 0x154   :  { %12559 = shalt.err (!%p12556_p3)
}
 0x155   :  { %246 = dma.hbm_to_vmem [thread:$0]  %s16810_s22, 16, %s244_s27, [#allocation31]  }
 0x156   :  { %12582 = dma.done.wait [#allocation4], 12288  }
 0x157   :  { %12583 = vsyncadd [#allocation4], 4294955008 }
 0x158   :  { %12584 = dma.done.wait [#allocation7], 256  }
 0x159   :  { %12585 = vsyncadd [#allocation7], 4294967040 }
 0x15a   :  { %12586 = dma.done.wait [#allocation10], 24672  }
 0x15b   :  { %12587 = vsyncadd [#allocation10], 4294942624 }
 0x15c   :  { %12588 = dma.done.wait [#allocation13], 8224  }
 0x15d   :  { %12589 = vsyncadd [#allocation13], 4294959072 }
 0x15e   :  { %12590 = dma.done.wait [#allocation16], 6192  }
 0x15f   :  { %12591 = vsyncadd [#allocation16], 4294961104 }
 0x160   :  { %12592 = dma.done.wait [#allocation19], 2064  }
 0x161   :  { %12593 = vsyncadd [#allocation19], 4294965232 }
 0x162   :  { %12594 = dma.done.wait [#allocation22], 3120  }
 0x163   :  { %12595 = vsyncadd [#allocation22], 4294964176 }
 0x164   :  { %12596 = dma.done.wait [#allocation25], 1040  }
 0x165   :  { %12597 = vsyncadd [#allocation25], 4294966256 }
 0x166   :  { %12598 = dma.done.wait [#allocation28], 1040  }
 0x167   :  { %12599 = vsyncadd [#allocation28], 4294966256 }
 0x168   :  { %12600 = dma.done.wait [#allocation31], 16  }
 0x169   :  { %12601 = vsyncadd [#allocation31], 4294967280  ;;  %v16819_v1 = vmov 0   ;;  %v10920_v2 = vld [vmem:[#allocation3 + $0x4] ss:$48 sps:$4 sm:$0xff]   ;;  %s16992_s28 = sld [smem:[#allocation104_spill]] }
 0x16a   :  { %1234 = vmatprep.mubr.bf16.mxu0 %v16819_v1  ;;  %1347 = vmatprep.mubr.bf16.mxu1 %v16819_v1  ;;  %v10922_v3 = vld [vmem:[#allocation3] ss:$48 sps:$4 sm:$0xff]   ;;  %v10923_v4 = vld [vmem:[#allocation3 + $0x64] ss:$48 sps:$4 sm:$0xff]   ;;  %v10960_v15 = vld [vmem:[#allocation3 + $0xc] ss:$48 sps:$4 sm:$0xff]  }
 0x16b   :  { %10919 = vset.pattern.permute.xlu0 %v16819_v1  ;;  %1202 = vmatprep.subr.bf16.mxu0 %v10920_v2  ;;  %v10925_v5 = vld [vmem:[#allocation3 + $0x60] ss:$48 sps:$4 sm:$0xff]   ;;  %v10926_v6 = vld [vmem:[#allocation3 + $0xc4] ss:$48 sps:$4 sm:$0xff]   ;;  %v10962_v16 = vld [vmem:[#allocation3 + $0x8] ss:$48 sps:$4 sm:$0xff]  }
 0x16c   :  { %1203 = vmatpush1.bf16.msra.mxu0 %v10922_v3  ;;  %v10928_v7 = vld [vmem:[#allocation3 + $0xc0] ss:$48 sps:$4 sm:$0xff]   ;;  %v10929_v8 = vld [vmem:[#allocation3 + $0x124] ss:$48 sps:$4 sm:$0xff]   ;;  %1315 = vmatprep.subr.bf16.mxu1 %v10960_v15  ;;  %v10967_v19 = vld [vmem:[#allocation3 + $0x6c] ss:$48 sps:$4 sm:$0xff]  }
 0x16d   :  { %1204 = vmatprep.subr.bf16.mxu0 %v10923_v4  ;;  %v10931_v9 = vld [vmem:[#allocation3 + $0x120] ss:$48 sps:$4 sm:$0xff]   ;;  %v10932_v10 = vld [vmem:[#allocation3 + $0x184] ss:$48 sps:$4 sm:$0xff]   ;;  %1316 = vmatpush1.bf16.msra.mxu1 %v10962_v16  ;;  %v10969_v20 = vld [vmem:[#allocation3 + $0x68] ss:$48 sps:$4 sm:$0xff]  }
 0x16e   :  { %v10934_v11 = vld [vmem:[#allocation3 + $0x180] ss:$48 sps:$4 sm:$0xff]   ;;  %v10935_v12 = vld [vmem:[#allocation3 + $0x1e4] ss:$48 sps:$4 sm:$0xff]   ;;  %v10970_v21 = vld [vmem:[#allocation3 + $0xcc] ss:$48 sps:$4 sm:$0xff]   ;;  %1317 = vmatprep.subr.bf16.mxu1 %v10967_v19 }
 0x16f   :  { %v10937_v13 = vld [vmem:[#allocation3 + $0x1e0] ss:$48 sps:$4 sm:$0xff]   ;;  %v10938_v14 = vld [vmem:[#allocation3 + $0x244] ss:$48 sps:$4 sm:$0xff]   ;;  %v10972_v23 = vld [vmem:[#allocation3 + $0xc8] ss:$48 sps:$4 sm:$0xff]  }
 0x170   :  { %1205 = vmatpush1.bf16.msra.mxu0 %v10925_v5  ;;  %v10940_v17 = vld [vmem:[#allocation3 + $0x240] ss:$48 sps:$4 sm:$0xff]   ;;  %v10941_v18 = vld [vmem:[#allocation3 + $0x2a4] ss:$48 sps:$4 sm:$0xff]   ;;  %v10977_v26 = vld [vmem:[#allocation3 + $0x12c] ss:$48 sps:$4 sm:$0xff]  }
 0x171   :  { %1206 = vmatprep.subr.bf16.mxu0 %v10926_v6  ;;  %v10943_v22 = vld [vmem:[#allocation3 + $0x2a0] ss:$48 sps:$4 sm:$0xff]   ;;  %1318 = vmatpush1.bf16.msra.mxu1 %v10969_v20  ;;  %v10947_v24 = vld [vmem:[#allocation3 + $0x14] ss:$48 sps:$4 sm:$0xff]   ;;  %v10979_v29 = vld [vmem:[#allocation3 + $0x128] ss:$48 sps:$4 sm:$0xff]  }
 0x172   :  { %1319 = vmatprep.subr.bf16.mxu1 %v10970_v21  ;;  %v13003_v25 = vld [vmem:[%s16992_s28] sm:$0xff]   ;;  %v10982_v33 = vld [vmem:[#allocation3 + $0x188] ss:$48 sps:$4 sm:$0xff]   ;;  %v13017_v44 = vld [vmem:[%s16992_s28 + $0x10] sm:$0xff]   ;;  %s16993_s25 = sld [smem:[#allocation109_spill]]  ;;  %s17128_s11 = sld [smem:[#allocation105_spill]] }
 0x173   :  { %v10945_v27 = vld [vmem:[#allocation3 + $0x10] ss:$48 sps:$4 sm:$0xff]   ;;  %v10951_v28 = vld [vmem:[#allocation3 + $0x74] ss:$48 sps:$4 sm:$0xff]   ;;  %v10980_v30 = vld [vmem:[#allocation3 + $0x18c] ss:$48 sps:$4 sm:$0xff]  }
 0x174   :  { %1207 = vmatpush1.bf16.msra.mxu0 %v10928_v7  ;;  %v10949_v31 = vld [vmem:[#allocation3 + $0x70] ss:$48 sps:$4 sm:$0xff]   ;;  %v10955_v32 = vld [vmem:[#allocation3 + $0xd4] ss:$48 sps:$4 sm:$0xff]   ;;  %v10987_v34 = vld [vmem:[#allocation3 + $0x1ec] ss:$48 sps:$4 sm:$0xff]  }
 0x175   :  { %1208 = vmatprep.subr.bf16.mxu0 %v10929_v8  ;;  %1320 = vmatpush1.bf16.msra.mxu1 %v10972_v23  ;;  %v13010_v35 = vld [vmem:[%s16992_s28 + $0x8] sm:$0xff]   ;;  %v10953_v36 = vld [vmem:[#allocation3 + $0xd0] ss:$48 sps:$4 sm:$0xff]   ;;  %v13024_v53 = vld [vmem:[%s16992_s28 + $0x18] sm:$0xff]   ;;  %s17299_s13 = sld [smem:[#allocation106_spill]]  ;;  %s12635_s27 = smov [#allocation32]  }
 0x176   :  { %1321 = vmatprep.subr.bf16.mxu1 %v10977_v26  ;;  %v10959_v37 = vld [vmem:[#allocation3 + $0x134] ss:$48 sps:$4 sm:$0xff]   ;;  %v10989_v38 = vld [vmem:[#allocation3 + $0x1e8] ss:$48 sps:$4 sm:$0xff]   ;;  %v10990_v39 = vld [vmem:[#allocation3 + $0x24c] ss:$48 sps:$4 sm:$0xff]  }
 0x177   :  { %v10957_v40 = vld [vmem:[#allocation3 + $0x130] ss:$48 sps:$4 sm:$0xff]   ;;  %v10966_v41 = vld [vmem:[#allocation3 + $0x194] ss:$48 sps:$4 sm:$0xff]   ;;  %v10992_v42 = vld [vmem:[#allocation3 + $0x248] ss:$48 sps:$4 sm:$0xff]  }
 0x178   :  { %1209 = vmatpush1.bf16.msra.mxu0 %v10931_v9  ;;  %v10997_v43 = vld [vmem:[#allocation3 + $0x2ac] ss:$48 sps:$4 sm:$0xff]   ;;  %v10964_v45 = vld [vmem:[#allocation3 + $0x190] ss:$48 sps:$4 sm:$0xff]   ;;  %v10976_v46 = vld [vmem:[#allocation3 + $0x1f4] ss:$48 sps:$4 sm:$0xff]  }
 0x179   :  { %1210 = vmatprep.subr.bf16.mxu0 %v10932_v10  ;;  %1322 = vmatpush1.bf16.msra.mxu1 %v10979_v29  ;;  %v10999_v47 = vld [vmem:[#allocation3 + $0x2a8] ss:$48 sps:$4 sm:$0xff]   ;;  %v11002_v48 = vld [vmem:[#allocation3 + $0x1c] ss:$48 sps:$4 sm:$0xff]   ;;  %v10974_v49 = vld [vmem:[#allocation3 + $0x1f0] ss:$48 sps:$4 sm:$0xff]  }
 0x17a   :  { %1323 = vmatprep.subr.bf16.mxu1 %v10980_v30  ;;  %v10986_v50 = vld [vmem:[#allocation3 + $0x254] ss:$48 sps:$4 sm:$0xff]   ;;  %v11000_v51 = vld [vmem:[#allocation3 + $0x18] ss:$48 sps:$4 sm:$0xff]   ;;  %v11005_v52 = vld [vmem:[#allocation3 + $0x7c] ss:$48 sps:$4 sm:$0xff]  }
 0x17b   :  { %v10984_v54 = vld [vmem:[#allocation3 + $0x250] ss:$48 sps:$4 sm:$0xff]   ;;  %v10996_v55 = vld [vmem:[#allocation3 + $0x2b4] ss:$48 sps:$4 sm:$0xff]   ;;  %v11003_v56 = vld [vmem:[#allocation3 + $0x78] ss:$48 sps:$4 sm:$0xff]  }
 0x17c   :  { %1211 = vmatpush1.bf16.msra.mxu0 %v10934_v11  ;;  %v11008_v57 = vld [vmem:[#allocation3 + $0xdc] ss:$48 sps:$4 sm:$0xff]   ;;  %v10994_v58 = vld [vmem:[#allocation3 + $0x2b0] ss:$48 sps:$4 sm:$0xff]   ;;  %v11006_v59 = vld [vmem:[#allocation3 + $0xd8] ss:$48 sps:$4 sm:$0xff]  }
 0x17d   :  { %1212 = vmatprep.subr.bf16.mxu0 %v10935_v12  ;;  %1324 = vmatpush1.bf16.msra.mxu1 %v10982_v33  ;;  %v13033_v60 = vld [vmem:[%s16992_s28 + $0x20] sm:$0xff]   ;;  %v11009_v63 = vld [vmem:[#allocation3 + $0x138] ss:$48 sps:$4 sm:$0xff]   ;;  %v13051_v9 = vld [vmem:[%s16992_s28 + $0x30] sm:$0xff]   ;;  %s9173_s6 = sshll.u32 %s12635_s27, 4  ;;  %s9174_s6 = int_to_ptr.vmem [resolvable:$true] %s9173_s6 }
 0x17e   :  { %1325 = vmatprep.subr.bf16.mxu1 %v10987_v34  ;;  %v11011_v61 = vld [vmem:[#allocation3 + $0x13c] ss:$48 sps:$4 sm:$0xff]   ;;  %v11017_v62 = vld [vmem:[#allocation3 + $0x24] ss:$48 sps:$4 sm:$0xff]   ;;  %v11012_v2 = vld [vmem:[#allocation3 + $0x198] ss:$48 sps:$4 sm:$0xff]   ;;  %p12565_p5 = scmp.lt.s32.totalorder %s9174_s6, %s9174_s6 }
 0x17f   :  { %v11014_v0 = vld [vmem:[#allocation3 + $0x19c] ss:$48 sps:$4 sm:$0xff]   ;;  %v11021_v5 = vld [vmem:[#allocation3 + $0x1f8] ss:$48 sps:$4 sm:$0xff]   ;;  %v11015_v12 = vld [vmem:[#allocation3 + $0x20] ss:$48 sps:$4 sm:$0xff]  }
 0x180   :  { %1213 = vmatpush1.bf16.msra.mxu0 %v10937_v13  ;;  %v11023_v3 = vld [vmem:[#allocation3 + $0x1fc] ss:$48 sps:$4 sm:$0xff]   ;;  %v11030_v7 = vld [vmem:[#allocation3 + $0x258] ss:$48 sps:$4 sm:$0xff]   ;;  %v11020_v13 = vld [vmem:[#allocation3 + $0x84] ss:$48 sps:$4 sm:$0xff]  }
 0x181   :  { %1214 = vmatprep.subr.bf16.mxu0 %v10938_v14  ;;  %1326 = vmatpush1.bf16.msra.mxu1 %v10989_v38  ;;  %v13042_v4 = vld [vmem:[%s16992_s28 + $0x28] sm:$0xff]   ;;  %v13060_v11 = vld [vmem:[%s16992_s28 + $0x38] sm:$0xff]   ;;  %v11018_v14 = vld [vmem:[#allocation3 + $0x80] ss:$48 sps:$4 sm:$0xff]   ;;  %s12560_s8 = scalar_lea.vmem %s9174_s6, 32 }
 0x182   :  { %1327 = vmatprep.subr.bf16.mxu1 %v10990_v39  ;;  %v11032_v6 = vld [vmem:[#allocation3 + $0x25c] ss:$48 sps:$4 sm:$0xff]   ;;  %v11039_v10 = vld [vmem:[#allocation3 + $0x2b8] ss:$48 sps:$4 sm:$0xff]   ;;  %v11026_v15 = vld [vmem:[#allocation3 + $0xe4] ss:$48 sps:$4 sm:$0xff]   ;;  %p12561_p4 = scmp.ne.s32.totalorder %s9174_s6, %s12560_s8  ;;  %p12566_p6 = scmp.lt.s32.totalorder %s12560_s8, %s12560_s8 }
 0x183   :  { %v11041_v8 = vld [vmem:[#allocation3 + $0x2bc] ss:$48 sps:$4 sm:$0xff]   ;;  %v11024_v16 = vld [vmem:[#allocation3 + $0xe0] ss:$48 sps:$4 sm:$0xff]   ;;  %v11035_v19 = vld [vmem:[#allocation3 + $0x1a4] ss:$48 sps:$4 sm:$0xff]  }
 0x184   :  { %1215 = vmatpush1.bf16.msra.mxu0 %v10940_v17  ;;  %v11029_v17 = vld [vmem:[#allocation3 + $0x144] ss:$48 sps:$4 sm:$0xff]   ;;  %v11033_v20 = vld [vmem:[#allocation3 + $0x1a0] ss:$48 sps:$4 sm:$0xff]   ;;  %p12567_p7 = por %p12566_p6, %p12565_p5 }
 0x185   :  { %1216 = vmatprep.subr.bf16.mxu0 %v10941_v18  ;;  %1328 = vmatpush1.bf16.msra.mxu1 %v10992_v42  ;;  %v11027_v18 = vld [vmem:[#allocation3 + $0x140] ss:$48 sps:$4 sm:$0xff]   ;;  %v11038_v21 = vld [vmem:[#allocation3 + $0x204] ss:$48 sps:$4 sm:$0xff]  }
 0x186   :  { %1329 = vmatprep.subr.bf16.mxu1 %v10997_v43  ;;  %v11044_v23 = vld [vmem:[#allocation3 + $0x264] ss:$48 sps:$4 sm:$0xff]   ;;  %v11051_v30 = vld [vmem:[%s16993_s25 + $0x20] ss:$16 sps:$4 sm:$0xff]   ;;  %p12568_p8 = pnand %p12567_p7, %p12561_p4 }
 0x187   :  { %v11047_v26 = vld [vmem:[#allocation3 + $0x2c4] ss:$48 sps:$4 sm:$0xff]   ;;  %v11054_v33 = vld [vmem:[%s16993_s25 + $0x40] ss:$16 sps:$4 sm:$0xff]  }
 0x188   :  { %1217 = vmatpush1.bf16.msra.mxu0 %v10943_v22  ;;  %v11036_v22 = vld [vmem:[#allocation3 + $0x200] ss:$48 sps:$4 sm:$0xff]  }
 0x189   :  { %1428 = vmatprep.subr.bf16.mxu0 %v10947_v24  ;;  %1330 = vmatpush1.bf16.msra.mxu1 %v10999_v47  ;;  %v11042_v24 = vld [vmem:[#allocation3 + $0x260] ss:$48 sps:$4 sm:$0xff]  }
 0x18a   :  { %1541 = vmatprep.subr.bf16.mxu1 %v11002_v48  ;;  %v11053_v29 = vld [vmem:[%s16993_s25 + $0x24] ss:$16 sps:$4 sm:$0xff]   ;;  %v11060_v38 = vld [vmem:[%s16993_s25 + $0x80] ss:$16 sps:$4 sm:$0xff]   ;;  %v13175_v48 = vld [vmem:[%s16992_s28 + $0x28] sm:$0xff]  }
 0x18b   :  { %1235 = vmatmul.mubr.bf16.vlgmr.msra.gmra.mrb[0].mxu0 %v13003_v25  ;;  %v11059_v34 = vld [vmem:[%s16993_s25 + $0x64] ss:$16 sps:$4 sm:$0xff]   ;;  %v11066_v43 = vld [vmem:[%s16993_s25 + $0xc0] ss:$16 sps:$4 sm:$0xff]  }
 0x18c   :  { %1429 = vmatpush1.bf16.msra.mxu0 %v10945_v27  ;;  %1244 = vmatprep.mubr.bf16.mxu0 %v16819_v1  ;;  %v11045_v27 = vld [vmem:[#allocation3 + $0x2c0] ss:$48 sps:$4 sm:$0xff]  }
 0x18d   :  { %1430 = vmatprep.subr.bf16.mxu0 %v10951_v28  ;;  %1348 = vmatmul.mubr.bf16.vlgmr.msra.gmra.mrb[0].mxu1 %v13003_v25  ;;  %v11050_v28 = vld [vmem:[%s16993_s25 + $0x4] ss:$16 sps:$4 sm:$0xff]  }
 0x18e   :  { %1542 = vmatpush1.bf16.msra.mxu1 %v11000_v51  ;;  %1357 = vmatprep.mubr.bf16.mxu1 %v16819_v1  ;;  %v11065_v39 = vld [vmem:[%s16993_s25 + $0xa4] ss:$16 sps:$4 sm:$0xff]   ;;  %v566_v51 = vlaneseq }
 0x18f   :  { %1543 = vmatprep.subr.bf16.mxu1 %v11005_v52  ;;  %v11068_v42 = vld [vmem:[%s16993_s25 + $0xc4] ss:$16 sps:$4 sm:$0xff]  }
 0x190   :  { %1431 = vmatpush1.bf16.msra.mxu0 %v10949_v31  ;;  %v12148_v31 = vld [vmem:[%s16992_s28] sm:$0xff]   ;;  %v567_v52 = vshrl.u32 %v566_v51, 7 }
 0x191   :  { %1432 = vmatprep.subr.bf16.mxu0 %v10955_v32  ;;  %v11056_v32 = vld [vmem:[%s16993_s25 + $0x44] ss:$16 sps:$4 sm:$0xff]  }
 0x192   :  { %1544 = vmatpush1.bf16.msra.mxu1 %v11003_v56  ;;  %v12152_v47 = vld [vmem:[%s16992_s28 + $0x20] sm:$0xff]   ;;  %v13200_v56 = vsub.s32 2, %v567_v52 }
 0x193   :  { %1245 = vmatmul.mubr.bf16.gmra.mrb[4].mxu0 %v13010_v35  ;;  %1545 = vmatprep.subr.bf16.mxu1 %v11008_v57 }
 0x194   :  { %1254 = vmatprep.mubr.bf16.mxu0 %v16819_v1  ;;  %1433 = vmatpush1.bf16.msra.mxu0 %v10953_v36  ;;  %v12149_v36 = vld [vmem:[%s16992_s28 + $0x8] sm:$0xff]   ;;  %16995 = vst [vmem:[#allocation45_spill] sm:$0xff] %v13200_v56 }
 0x195   :  { %1434 = vmatprep.subr.bf16.mxu0 %v10959_v37  ;;  %1358 = vmatmul.mubr.bf16.gmra.mrb[4].mxu1 %v13010_v35  ;;  %v11062_v37 = vld [vmem:[%s16993_s25 + $0x84] ss:$16 sps:$4 sm:$0xff]  }
 0x196   :  { %1367 = vmatprep.mubr.bf16.mxu1 %v16819_v1  ;;  %1546 = vmatpush1.bf16.msra.mxu1 %v11006_v59 }
 0x197   :  { %1547 = vmatprep.subr.bf16.mxu1 %v11011_v61 }
 0x198   :  { %1435 = vmatpush1.bf16.msra.mxu0 %v10957_v40  ;;  %v11063_v40 = vld [vmem:[%s16993_s25 + $0xa0] ss:$16 sps:$4 sm:$0xff]  }
 0x199   :  { %1436 = vmatprep.subr.bf16.mxu0 %v10966_v41  ;;  %v12150_v41 = vld [vmem:[%s16992_s28 + $0x10] sm:$0xff]  }
 0x19a   :  { %1548 = vmatpush1.bf16.msra.mxu1 %v11009_v63 }
 0x19b   :  { %1255 = vmatmul.mubr.bf16.gmra.mrb[8].mxu0 %v13017_v44  ;;  %1549 = vmatprep.subr.bf16.mxu1 %v11014_v0 }
 0x19c   :  { %1264 = vmatprep.mubr.bf16.mxu0 %v16819_v1  ;;  %1437 = vmatpush1.bf16.msra.mxu0 %v10964_v45  ;;  %v11069_v45 = vld [vmem:[%s16993_s25 + $0xe0] ss:$16 sps:$4 sm:$0xff]  }
 0x19d   :  { %1438 = vmatprep.subr.bf16.mxu0 %v10976_v46  ;;  %1368 = vmatmul.mubr.bf16.gmra.mrb[8].mxu1 %v13017_v44  ;;  %v12151_v46 = vld [vmem:[%s16992_s28 + $0x18] sm:$0xff]  }
 0x19e   :  { %1377 = vmatprep.mubr.bf16.mxu1 %v16819_v1  ;;  %1550 = vmatpush1.bf16.msra.mxu1 %v11012_v2 }
 0x19f   :  { %1551 = vmatprep.subr.bf16.mxu1 %v11023_v3 }
 0x1a0   :  { %1439 = vmatpush1.bf16.msra.mxu0 %v10974_v49  ;;  %v13182_v49 = vld [vmem:[%s16992_s28 + $0x30] sm:$0xff]  }
 0x1a1   :  { %1440 = vmatprep.subr.bf16.mxu0 %v10986_v50  ;;  %v13189_v50 = vld [vmem:[%s16992_s28 + $0x38] sm:$0xff]  }
 0x1a2   :  { %1552 = vmatpush1.bf16.msra.mxu1 %v11021_v5 }
 0x1a3   :  { %1265 = vmatmul.mubr.bf16.gmra.mrb[12].mxu0 %v13024_v53  ;;  %1553 = vmatprep.subr.bf16.mxu1 %v11032_v6 }
 0x1a4   :  { %1274 = vmatprep.mubr.bf16.mxu0 %v16819_v1  ;;  %1441 = vmatpush1.bf16.msra.mxu0 %v10984_v54 }
 0x1a5   :  { %1442 = vmatprep.subr.bf16.mxu0 %v10996_v55  ;;  %1378 = vmatmul.mubr.bf16.gmra.mrb[12].mxu1 %v13024_v53  ;;  %v13197_v55 = vsub.s32 0, %v567_v52 }
 0x1a6   :  { %1387 = vmatprep.mubr.bf16.mxu1 %v16819_v1  ;;  %1554 = vmatpush1.bf16.msra.mxu1 %v11030_v7 }
 0x1a7   :  { %1555 = vmatprep.subr.bf16.mxu1 %v11041_v8  ;;  %16994 = vst [vmem:[#allocation44_spill] sm:$0xff] %v13197_v55 }
 0x1a8   :  { %1443 = vmatpush1.bf16.msra.mxu0 %v10994_v58 }
 0x1a9   :  { %1654 = vmatprep.subr.bf16.mxu0 %v11017_v62 }
 0x1aa   :  { %1556 = vmatpush1.bf16.msra.mxu1 %v11039_v10 }
 0x1ab   :  { %1275 = vmatmul.mubr.bf16.gmra.mrb[16].mxu0 %v13033_v60 }
 0x1ac   :  { %1284 = vmatprep.mubr.bf16.mxu0 %v16819_v1 }
 0x1ad   :  { %1388 = vmatmul.mubr.bf16.gmra.mrb[16].mxu1 %v13033_v60 }
 0x1ae   :  { %1397 = vmatprep.mubr.bf16.mxu1 %v16819_v1 }
 0x1b3   :  { %1285 = vmatmul.mubr.bf16.gmra.mrb[20].mxu0 %v13042_v4 }
 0x1b4   :  { %1294 = vmatprep.mubr.bf16.mxu0 %v16819_v1 }
 0x1b5   :  { %1398 = vmatmul.mubr.bf16.gmra.mrb[20].mxu1 %v13042_v4 }
 0x1b6   :  { %1407 = vmatprep.mubr.bf16.mxu1 %v16819_v1 }
 0x1bb   :  { %1295 = vmatmul.mubr.bf16.gmra.mrb[24].mxu0 %v13051_v9 }
 0x1bc   :  { %1304 = vmatprep.mubr.bf16.mxu0 %v16819_v1 }
 0x1bd   :  { %1408 = vmatmul.mubr.bf16.gmra.mrb[24].mxu1 %v13051_v9 }
 0x1be   :  { %1417 = vmatprep.mubr.bf16.mxu1 %v16819_v1 }
 0x1c3   :  { %1305 = vmatmul.mubr.bf16.gmra.mrb[28].mxu0 %v13060_v11 }
 0x1c4   :  { %1460 = vmatprep.mubr.bf16.mxu0 %v16819_v1 }
 0x1c5   :  { %1418 = vmatmul.mubr.bf16.gmra.mrb[28].mxu1 %v13060_v11 }
 0x1c6   :  { %1573 = vmatprep.mubr.bf16.mxu1 %v16819_v1 }
 0x1cb   :  { %1461 = vmatmul.mubr.bf16.vlgmr.msra.gmra.mrb[32].mxu0 %v13003_v25 }
 0x1cc   :  { %1470 = vmatprep.mubr.bf16.mxu0 %v16819_v1  ;;  %1655 = vmatpush1.bf16.msra.mxu0 %v11015_v12 }
 0x1cd   :  { %1656 = vmatprep.subr.bf16.mxu0 %v11020_v13  ;;  %1574 = vmatmul.mubr.bf16.vlgmr.msra.gmra.mrb[32].mxu1 %v13003_v25  ;;  %v11048_v25 = vld [vmem:[%s16993_s25] ss:$16 sps:$4 sm:$0xff]   ;;  %v13234_v13 = vsub.s32 4, %v567_v52 }
 0x1ce   :  { %1583 = vmatprep.mubr.bf16.mxu1 %v16819_v1 }
 0x1cf   :  { %16996 = vst [vmem:[#allocation46_spill] sm:$0xff] %v13234_v13 }
 0x1d0   :  { %1657 = vmatpush1.bf16.msra.mxu0 %v11018_v14 }
 0x1d1   :  { %1658 = vmatprep.subr.bf16.mxu0 %v11026_v15 }
 0x1d3   :  { %1471 = vmatmul.mubr.bf16.gmra.mrb[36].mxu0 %v13010_v35 }
 0x1d4   :  { %1480 = vmatprep.mubr.bf16.mxu0 %v16819_v1  ;;  %1659 = vmatpush1.bf16.msra.mxu0 %v11024_v16  ;;  %v13239_v16 = vsub.s32 6, %v567_v52 }
 0x1d5   :  { %1660 = vmatprep.subr.bf16.mxu0 %v11029_v17  ;;  %1584 = vmatmul.mubr.bf16.gmra.mrb[36].mxu1 %v13010_v35  ;;  %v11057_v35 = vld [vmem:[%s16993_s25 + $0x60] ss:$16 sps:$4 sm:$0xff]  }
 0x1d6   :  { %1593 = vmatprep.mubr.bf16.mxu1 %v16819_v1  ;;  %16997 = vst [vmem:[#allocation47_spill] sm:$0xff] %v13239_v16 }
 0x1d8   :  { %1661 = vmatpush1.bf16.msra.mxu0 %v11027_v18 }
 0x1d9   :  { %1662 = vmatprep.subr.bf16.mxu0 %v11035_v19 }
 0x1db   :  { %1481 = vmatmul.mubr.bf16.gmra.mrb[40].mxu0 %v13017_v44 }
 0x1dc   :  { %1490 = vmatprep.mubr.bf16.mxu0 %v16819_v1  ;;  %1663 = vmatpush1.bf16.msra.mxu0 %v11033_v20 }
 0x1dd   :  { %1664 = vmatprep.subr.bf16.mxu0 %v11038_v21  ;;  %1594 = vmatmul.mubr.bf16.gmra.mrb[40].mxu1 %v13017_v44  ;;  %v11071_v44 = vld [vmem:[%s16993_s25 + $0xe4] ss:$16 sps:$4 sm:$0xff]  }
 0x1de   :  { %1603 = vmatprep.mubr.bf16.mxu1 %v16819_v1 }
 0x1e0   :  { %1665 = vmatpush1.bf16.msra.mxu0 %v11036_v22 }
 0x1e1   :  { %1666 = vmatprep.subr.bf16.mxu0 %v11044_v23 }
 0x1e3   :  { %1491 = vmatmul.mubr.bf16.gmra.mrb[44].mxu0 %v13024_v53 }
 0x1e4   :  { %1500 = vmatprep.mubr.bf16.mxu0 %v16819_v1  ;;  %1667 = vmatpush1.bf16.msra.mxu0 %v11042_v24 }
 0x1e5   :  { %1668 = vmatprep.subr.bf16.mxu0 %v11047_v26  ;;  %1604 = vmatmul.mubr.bf16.gmra.mrb[44].mxu1 %v13024_v53  ;;  %v13194_v53 = vld [vmem:[#allocation6] sm:$0xff] }
 0x1e6   :  { %1613 = vmatprep.mubr.bf16.mxu1 %v16819_v1  ;;  %v560_v54 = vunpack.c.l.bf16 %v13194_v53 }
 0x1e8   :  { %1669 = vmatpush1.bf16.msra.mxu0 %v11045_v27  ;;  %v569_v57 = vrot.slane %v560_v54, %v13197_v55  ;;  %v573_v58 = vrot.slane %v560_v54, %v13200_v56  ;;  %v577_v19 = vrot.slane %v560_v54, %v13234_v13  ;;  %v581_v21 = vrot.slane %v560_v54, %v13239_v16 }
 0x1e9   :  { %2207 = vmatprep.subr.bf16.mxu0 %v11050_v28 }
 0x1ea   :  { %v13205_v59 = vrot.slane %v569_v57, %v13197_v55  ;;  %v13209_v61 = vrot.slane %v573_v58, %v13197_v55  ;;  %v13258_v28 = vrot.slane %v577_v19, %v13197_v55 }
 0x1eb   :  { %1501 = vmatmul.mubr.bf16.gmra.mrb[48].mxu0 %v13033_v60 }
 0x1ec   :  { %1510 = vmatprep.mubr.bf16.mxu0 %v16819_v1 }
 0x1ed   :  { %1614 = vmatmul.mubr.bf16.gmra.mrb[48].mxu1 %v13033_v60 }
 0x1ee   :  { %1623 = vmatprep.mubr.bf16.mxu1 %v16819_v1 }
 0x1f3   :  { %1511 = vmatmul.mubr.bf16.gmra.mrb[52].mxu0 %v13042_v4 }
 0x1f4   :  { %1520 = vmatprep.mubr.bf16.mxu0 %v16819_v1 }
 0x1f5   :  { %1624 = vmatmul.mubr.bf16.gmra.mrb[52].mxu1 %v13042_v4 }
 0x1f6   :  { %1633 = vmatprep.mubr.bf16.mxu1 %v16819_v1 }
 0x1fb   :  { %1521 = vmatmul.mubr.bf16.gmra.mrb[56].mxu0 %v13051_v9 }
 0x1fc   :  { %1530 = vmatprep.mubr.bf16.mxu0 %v16819_v1 }
 0x1fd   :  { %1634 = vmatmul.mubr.bf16.gmra.mrb[56].mxu1 %v13051_v9 }
 0x1fe   :  { %1643 = vmatprep.mubr.bf16.mxu1 %v16819_v1 }
 0x203   :  { %1531 = vmatmul.mubr.bf16.gmra.mrb[60].mxu0 %v13060_v11 }
 0x204   :  { %1686 = vmatprep.mubr.bf16.mxu0 %v16819_v1 }
 0x205   :  { %1644 = vmatmul.mubr.bf16.gmra.mrb[60].mxu1 %v13060_v11 }
 0x206   :  { %1799 = vmatprep.mubr.bf16.mxu1 %v16819_v1 }
 0x20b   :  { %1687 = vmatmul.mubr.bf16.vlgmr.msra.gmra.mrb[64].mxu0 %v12148_v31 }
 0x20c   :  { %1696 = vmatprep.mubr.bf16.mxu0 %v16819_v1  ;;  %2208 = vmatpush1.bf16.msra.mxu0 %v11048_v25 }
 0x20d   :  { %2209 = vmatprep.subr.bf16.mxu0 %v11053_v29 }
 0x210   :  { %2210 = vmatpush1.bf16.msra.mxu0 %v11051_v30  ;;  %v13264_v30 = vrot.slane %v581_v21, %v13197_v55 }
 0x211   :  { %2211 = vmatprep.subr.bf16.mxu0 %v11056_v32 }
 0x213   :  { %1697 = vmatmul.mubr.bf16.gmra.mrb[68].mxu0 %v12149_v36 }
 0x214   :  { %1706 = vmatprep.mubr.bf16.mxu0 %v16819_v1  ;;  %2212 = vmatpush1.bf16.msra.mxu0 %v11054_v33 }
 0x215   :  { %2213 = vmatprep.subr.bf16.mxu0 %v11059_v34 }
 0x218   :  { %2214 = vmatpush1.bf16.msra.mxu0 %v11057_v35 }
 0x219   :  { %2215 = vmatprep.subr.bf16.mxu0 %v11062_v37 }
 0x21b   :  { %1707 = vmatmul.mubr.bf16.gmra.mrb[72].mxu0 %v12150_v41 }
 0x21c   :  { %1716 = vmatprep.mubr.bf16.mxu0 %v16819_v1  ;;  %2216 = vmatpush1.bf16.msra.mxu0 %v11060_v38 }
 0x21d   :  { %2217 = vmatprep.subr.bf16.mxu0 %v11065_v39 }
 0x220   :  { %2218 = vmatpush1.bf16.msra.mxu0 %v11063_v40 }
 0x221   :  { %2219 = vmatprep.subr.bf16.mxu0 %v11068_v42 }
 0x223   :  { %1717 = vmatmul.mubr.bf16.gmra.mrb[76].mxu0 %v12151_v46 }
 0x224   :  { %1726 = vmatprep.mubr.bf16.mxu0 %v16819_v1  ;;  %2220 = vmatpush1.bf16.msra.mxu0 %v11066_v43 }
 0x225   :  { %2221 = vmatprep.subr.bf16.mxu0 %v11071_v44 }
 0x228   :  { %2222 = vmatpush1.bf16.msra.mxu0 %v11069_v45 }
 0x22b   :  { %1727 = vmatmul.mubr.bf16.gmra.mrb[80].mxu0 %v12152_v47 }
 0x22c   :  { %1736 = vmatprep.mubr.bf16.mxu0 %v16819_v1 }
 0x233   :  { %1737 = vmatmul.mubr.bf16.gmra.mrb[84].mxu0 %v13175_v48 }
 0x234   :  { %1746 = vmatprep.mubr.bf16.mxu0 %v16819_v1 }
 0x23b   :  { %1747 = vmatmul.mubr.bf16.gmra.mrb[88].mxu0 %v13182_v49 }
 0x23c   :  { %1756 = vmatprep.mubr.bf16.mxu0 %v16819_v1 }
 0x243   :  { %1757 = vmatmul.mubr.bf16.gmra.mrb[92].mxu0 %v13189_v50 }
 0x244   :  { %2239 = vmatprep.mubr.bf16.mxu0 %v16819_v1 }
 0x24b   :  { %2240 = vmatmul.mubr.bf16.vlgmr.msra.gmra.mrb[96].mxu0 %v12148_v31 }
 0x24c   :  { %2249 = vmatprep.mubr.bf16.mxu0 %v16819_v1 }
 0x253   :  { %2250 = vmatmul.mubr.bf16.gmra.mrb[100].mxu0 %v12149_v36 }
 0x254   :  { %2259 = vmatprep.mubr.bf16.mxu0 %v16819_v1 }
 0x25b   :  { %2260 = vmatmul.mubr.bf16.gmra.mrb[104].mxu0 %v12150_v41 }
 0x25c   :  { %2269 = vmatprep.mubr.bf16.mxu0 %v16819_v1 }
 0x25e   :  { %v1236_v60 = vpop.f32.mrb[0].mxu0 }
 0x25f   :  { %v13212_v62 = vadd.f32 %v1236_v60, %v13205_v59  ;;  %v1238_v63 = vpop.f32.mrb[1].mxu0 }
 0x260   :  { %v1240_v0 = vpop.f32.mrb[2].mxu0  ;;  %v13218_v4 = vadd.f32 %v1238_v63, %v13209_v61  ;;  %v1349_v32 = vpop.f32.mrb[0].mxu1 }
 0x261   :  { %v13215_v2 = vadd.f32 %v1240_v0, %v13205_v59  ;;  %v1242_v3 = vpop.f32.mrb[3].mxu0  ;;  %v13274_v34 = vadd.f32 %v1349_v32, %v13258_v28  ;;  %v1351_v35 = vpop.f32.mrb[1].mxu1 }
 0x262   :  { %v13221_v5 = vadd.f32 %v1242_v3, %v13209_v61  ;;  %v13279_v37 = vadd.f32 %v1351_v35, %v13264_v30  ;;  %v1353_v38 = vpop.f32.mrb[2].mxu1 }
 0x263   :  { %2270 = vmatmul.mubr.bf16.gmra.mrb[108].mxu0 %v12151_v46  ;;  %16998 = vst [vmem:[#allocation48_spill] sm:$0xff] %v13274_v34  ;;  %v13282_v40 = vadd.f32 %v1353_v38, %v13258_v28  ;;  %v1355_v41 = vpop.f32.mrb[3].mxu1 }
 0x264   :  { %2279 = vmatprep.mubr.bf16.mxu0 %v16819_v1  ;;  %v1881_v7 = vpack.c.bf16 %v13221_v5, %v13218_v4  ;;  %16999 = vst [vmem:[#allocation49_spill] sm:$0xff] %v13279_v37  ;;  %v13288_v44 = vadd.f32 %v1355_v41, %v13264_v30 }
 0x265   :  { %17000 = vst [vmem:[#allocation50_spill] sm:$0xff] %v13282_v40 }
 0x266   :  { %v1246_v8 = vpop.f32.mrb[4].mxu0  ;;  %17001 = vst [vmem:[#allocation51_spill] sm:$0xff] %v13288_v44 }
 0x267   :  { %v13229_v9 = vadd.f32 %v1246_v8, %v13205_v59  ;;  %v1248_v10 = vpop.f32.mrb[5].mxu0 }
 0x268   :  { %v13232_v11 = vadd.f32 %v1248_v10, %v13209_v61  ;;  %v1250_v12 = vpop.f32.mrb[6].mxu0  ;;  %v1359_v57 = vpop.f32.mrb[4].mxu1 }
 0x269   :  { %v13237_v14 = vadd.f32 %v1250_v12, %v13205_v59  ;;  %v1252_v15 = vpop.f32.mrb[7].mxu0  ;;  %v13308_v60 = vadd.f32 %v1359_v57, %v13258_v28  ;;  %v1361_v63 = vpop.f32.mrb[5].mxu1 }
 0x26a   :  { %v13242_v17 = vadd.f32 %v1252_v15, %v13209_v61  ;;  %v13313_v3 = vadd.f32 %v1361_v63, %v13264_v30  ;;  %v1363_v8 = vpop.f32.mrb[6].mxu1 }
 0x26b   :  { %2280 = vmatmul.mubr.bf16.gmra.mrb[112].mxu0 %v12152_v47  ;;  %17002 = vst [vmem:[#allocation52_spill] sm:$0xff] %v13308_v60  ;;  %v1365_v12 = vpop.f32.mrb[7].mxu1 }
 0x26c   :  { %2289 = vmatprep.mubr.bf16.mxu0 %v16819_v1  ;;  %17003 = vst [vmem:[#allocation53_spill] sm:$0xff] %v13313_v3  ;;  %v13322_v21 = vadd.f32 %v1365_v12, %v13264_v30 }
 0x26e   :  { %v1256_v22 = vpop.f32.mrb[8].mxu0  ;;  %17005 = vst [vmem:[#allocation55_spill] sm:$0xff] %v13322_v21 }
 0x26f   :  { %v13252_v23 = vadd.f32 %v1256_v22, %v13205_v59  ;;  %v1258_v24 = vpop.f32.mrb[9].mxu0 }
 0x270   :  { %v13255_v26 = vadd.f32 %v1258_v24, %v13209_v61  ;;  %v1260_v27 = vpop.f32.mrb[10].mxu0 }
 0x271   :  { %v13261_v25 = vadd.f32 %v1260_v27, %v13205_v59  ;;  %v1262_v29 = vpop.f32.mrb[11].mxu0 }
 0x272   :  { %v13267_v31 = vadd.f32 %v1262_v29, %v13209_v61 }
 0x273   :  { %2290 = vmatmul.mubr.bf16.gmra.mrb[116].mxu0 %v13175_v48 }
 0x274   :  { %2299 = vmatprep.mubr.bf16.mxu0 %v16819_v1 }
 0x276   :  { %v1266_v39 = vpop.f32.mrb[12].mxu0 }
 0x277   :  { %v13285_v42 = vadd.f32 %v1266_v39, %v13205_v59  ;;  %v1268_v43 = vpop.f32.mrb[13].mxu0  ;;  %v1369_v39 = vpop.f32.mrb[8].mxu1 }
 0x278   :  { %v13291_v45 = vadd.f32 %v1268_v43, %v13209_v61  ;;  %v1270_v46 = vpop.f32.mrb[14].mxu0  ;;  %v13344_v43 = vadd.f32 %v1369_v39, %v13258_v28 }
 0x279   :  { %v13296_v48 = vadd.f32 %v1270_v46, %v13205_v59  ;;  %v1272_v51 = vpop.f32.mrb[15].mxu0  ;;  %v1371_v46 = vpop.f32.mrb[9].mxu1 }
 0x27a   :  { %v13301_v54 = vadd.f32 %v1272_v51, %v13209_v61  ;;  %17006 = vst [vmem:[#allocation56_spill] sm:$0xff] %v13344_v43  ;;  %v13349_v57 = vadd.f32 %v1371_v46, %v13264_v30  ;;  %v1373_v63 = vpop.f32.mrb[10].mxu1 }
 0x27b   :  { %2300 = vmatmul.mubr.bf16.gmra.mrb[120].mxu0 %v13182_v49  ;;  %v13316_v49 = vadd.f32 %v1363_v8, %v13258_v28  ;;  %v13352_v8 = vadd.f32 %v1373_v63, %v13258_v28 }
 0x27c   :  { %2309 = vmatprep.mubr.bf16.mxu0 %v16819_v1  ;;  %17007 = vst [vmem:[#allocation57_spill] sm:$0xff] %v13349_v57 }
 0x27d   :  { %17004 = vst [vmem:[#allocation54_spill] sm:$0xff] %v13316_v49  ;;  %17008 = vst [vmem:[#allocation58_spill] sm:$0xff] %v13352_v8 }
 0x27e   :  { %v1276_v10 = vpop.f32.mrb[16].mxu0 }
 0x27f   :  { %v13319_v15 = vadd.f32 %v1276_v10, %v13205_v59  ;;  %v1278_v19 = vpop.f32.mrb[17].mxu0  ;;  %v1375_v10 = vpop.f32.mrb[11].mxu1 }
 0x280   :  { %v13325_v22 = vadd.f32 %v1278_v19, %v13209_v61  ;;  %v1280_v24 = vpop.f32.mrb[18].mxu0  ;;  %v13358_v5 = vadd.f32 %v1375_v10, %v13264_v30 }
 0x281   :  { %v13330_v29 = vadd.f32 %v1280_v24, %v13205_v59  ;;  %v1282_v32 = vpop.f32.mrb[19].mxu0 }
 0x282   :  { %v13335_v38 = vadd.f32 %v1282_v32, %v13209_v61  ;;  %17009 = vst [vmem:[#allocation59_spill] sm:$0xff] %v13358_v5 }
 0x283   :  { %2310 = vmatmul.mubr.bf16.gmra.mrb[124].mxu0 %v13189_v50 }
 0x284   :  { %2465 = vmatprep.mubr.bf16.mxu0 %v1881_v7 }
 0x286   :  { %v1286_v50 = vpop.f32.mrb[20].mxu0 }
 0x287   :  { %v13355_v12 = vadd.f32 %v1286_v50, %v13205_v59  ;;  %v1288_v4 = vpop.f32.mrb[21].mxu0  ;;  %v1379_v50 = vpop.f32.mrb[12].mxu1 }
 0x288   :  { %v13361_v7 = vadd.f32 %v1288_v4, %v13209_v61  ;;  %v1290_v19 = vpop.f32.mrb[22].mxu0  ;;  %v13376_v4 = vadd.f32 %v1379_v50, %v13258_v28  ;;  %v1381_v1 = vpop.f32.mrb[13].mxu1 }
 0x289   :  { %v13366_v32 = vadd.f32 %v1290_v19, %v13205_v59  ;;  %v1292_v39 = vpop.f32.mrb[23].mxu0  ;;  %v13381_v19 = vadd.f32 %v1381_v1, %v13264_v30  ;;  %v1383_v27 = vpop.f32.mrb[14].mxu1 }
 0x28a   :  { %v13371_v63 = vadd.f32 %v1292_v39, %v13209_v61  ;;  %17010 = vst [vmem:[#allocation60_spill] sm:$0xff] %v13376_v4  ;;  %v13384_v46 = vadd.f32 %v1383_v27, %v13258_v28  ;;  %v1385_v39 = vpop.f32.mrb[15].mxu1 }
 0x28b   :  { %17011 = vst [vmem:[#allocation61_spill] sm:$0xff] %v13381_v19  ;;  %v13390_v50 = vadd.f32 %v1385_v39, %v13264_v30  ;;  %v1389_v58 = vpop.f32.mrb[16].mxu1 }
 0x28c   :  { %17012 = vst [vmem:[#allocation62_spill] sm:$0xff] %v13384_v46  ;;  %v1391_v0 = vpop.f32.mrb[17].mxu1 }
 0x28d   :  { %17014 = vst [vmem:[#allocation64_spill] sm:$0xff] %v13390_v50  ;;  %v13416_v33 = vadd.f32 %v1391_v0, %v13264_v30  ;;  %v1393_v51 = vpop.f32.mrb[18].mxu1 }
 0x28e   :  { %v1296_v35 = vpop.f32.mrb[24].mxu0  ;;  %v13419_v36 = vadd.f32 %v1393_v51, %v13258_v28  ;;  %v1395_v18 = vpop.f32.mrb[19].mxu1 }
 0x28f   :  { %v13387_v47 = vadd.f32 %v1296_v35, %v13205_v59  ;;  %v1298_v52 = vpop.f32.mrb[25].mxu0  ;;  %17019 = vst [vmem:[#allocation69_spill] sm:$0xff] %v13416_v33  ;;  %v13425_v20 = vadd.f32 %v1395_v18, %v13264_v30  ;;  %v1399_v46 = vpop.f32.mrb[20].mxu1 }
 0x290   :  { %v13393_v10 = vadd.f32 %v1298_v52, %v13209_v61  ;;  %v1300_v24 = vpop.f32.mrb[26].mxu0  ;;  %v13408_v52 = vadd.f32 %v1389_v58, %v13258_v28  ;;  %17020 = vst [vmem:[#allocation70_spill] sm:$0xff] %v13419_v36 }
 0x291   :  { %17013 = vst [vmem:[#allocation63_spill] sm:$0xff] %v13387_v47  ;;  %v13398_v41 = vadd.f32 %v1300_v24, %v13205_v59  ;;  %v1302_v27 = vpop.f32.mrb[27].mxu0  ;;  %v13413_v24 = vunpack.c.h.bf16 %v13194_v53  ;;  %17022 = vst [vmem:[#allocation72_spill] sm:$0xff] %v13425_v20 }
 0x292   :  { %17015 = vst [vmem:[#allocation65_spill] sm:$0xff] %v13393_v10  ;;  %v13403_v35 = vadd.f32 %v1302_v27, %v13209_v61  ;;  %17018 = vst [vmem:[#allocation68_spill] sm:$0xff] %v13408_v52 }
 0x293   :  { %17016 = vst [vmem:[#allocation66_spill] sm:$0xff] %v13398_v41  ;;  %v585_v4 = vrot.slane %v13413_v24, %v13197_v55 }
 0x294   :  { %17017 = vst [vmem:[#allocation67_spill] sm:$0xff] %v13403_v35 }
 0x295   :  { %v13452_v36 = vrot.slane %v585_v4, %v13197_v55 }
 0x296   :  { %v1306_v27 = vpop.f32.mrb[28].mxu0 }
 0x297   :  { %v13422_v39 = vadd.f32 %v1306_v27, %v13205_v59  ;;  %v1308_v58 = vpop.f32.mrb[29].mxu0 }
 0x298   :  { %v13428_v1 = vadd.f32 %v1308_v58, %v13209_v61  ;;  %v1310_v53 = vpop.f32.mrb[30].mxu0  ;;  %v589_v58 = vrot.slane %v13413_v24, %v13200_v56 }
 0x299   :  { %17021 = vst [vmem:[#allocation71_spill] sm:$0xff] %v13422_v39  ;;  %v13433_v6 = vadd.f32 %v1310_v53, %v13205_v59  ;;  %v1312_v51 = vpop.f32.mrb[31].mxu0  ;;  %v13447_v59 = vadd.f32 %v1399_v46, %v13258_v28  ;;  %v1401_v53 = vpop.f32.mrb[21].mxu1 }
 0x29a   :  { %17023 = vst [vmem:[#allocation73_spill] sm:$0xff] %v13428_v1  ;;  %v13440_v18 = vadd.f32 %v1312_v51, %v13209_v61  ;;  %v13455_v61 = vadd.f32 %v1401_v53, %v13264_v30  ;;  %v1403_v51 = vpop.f32.mrb[22].mxu1  ;;  %v13458_v33 = vrot.slane %v589_v58, %v13197_v55 }
 0x29b   :  { %17024 = vst [vmem:[#allocation74_spill] sm:$0xff] %v13433_v6  ;;  %17026 = vst [vmem:[#allocation76_spill] sm:$0xff] %v13447_v59  ;;  %v13461_v0 = vadd.f32 %v1403_v51, %v13258_v28  ;;  %v1405_v46 = vpop.f32.mrb[23].mxu1 }
 0x29c   :  { %17025 = vst [vmem:[#allocation75_spill] sm:$0xff] %v13440_v18  ;;  %17027 = vst [vmem:[#allocation77_spill] sm:$0xff] %v13455_v61  ;;  %v13464_v19 = vadd.f32 %v1405_v46, %v13264_v30  ;;  %v1409_v5 = vpop.f32.mrb[24].mxu1 }
 0x29d   :  { %17028 = vst [vmem:[#allocation78_spill] sm:$0xff] %v13461_v0  ;;  %v13475_v60 = vadd.f32 %v1409_v5, %v13258_v28  ;;  %v1411_v49 = vpop.f32.mrb[25].mxu1 }
 0x29e   :  { %v1462_v27 = vpop.f32.mrb[32].mxu0  ;;  %17029 = vst [vmem:[#allocation79_spill] sm:$0xff] %v13464_v19  ;;  %v13478_v4 = vadd.f32 %v1411_v49, %v13264_v30 }
 0x29f   :  { %v1464_v20 = vpop.f32.mrb[33].mxu0  ;;  %v1463_v53 = vadd.f32 %v1462_v27, %v13452_v36  ;;  %17030 = vst [vmem:[#allocation80_spill] sm:$0xff] %v13475_v60  ;;  %v1413_v27 = vpop.f32.mrb[26].mxu1 }
 0x2a0   :  { %v1466_v52 = vpop.f32.mrb[34].mxu0  ;;  %v1465_v51 = vadd.f32 %v1464_v20, %v13458_v33  ;;  %17031 = vst [vmem:[#allocation81_spill] sm:$0xff] %v13478_v4  ;;  %v13481_v59 = vadd.f32 %v1413_v27, %v13258_v28  ;;  %v1415_v58 = vpop.f32.mrb[27].mxu1 }
 0x2a1   :  { %v1467_v50 = vadd.f32 %v1466_v52, %v13452_v36  ;;  %v1468_v43 = vpop.f32.mrb[35].mxu0  ;;  %v1419_v0 = vpop.f32.mrb[28].mxu1 }
 0x2a2   :  { %v1469_v8 = vadd.f32 %v1468_v43, %v13458_v33  ;;  %17032 = vst [vmem:[#allocation82_spill] sm:$0xff] %v13481_v59  ;;  %v13484_v43 = vadd.f32 %v1415_v58, %v13264_v30  ;;  %v13495_v61 = vadd.f32 %v1419_v0, %v13258_v28  ;;  %v1421_v19 = vpop.f32.mrb[29].mxu1 }
 0x2a3   :  { %v1884_v57 = vpack.c.bf16 %v1467_v50, %v1463_v53  ;;  %v1423_v5 = vpop.f32.mrb[30].mxu1 }
 0x2a4   :  { %v1885_v46 = vpack.c.bf16 %v1469_v8, %v1465_v51  ;;  %17033 = vst [vmem:[#allocation83_spill] sm:$0xff] %v13484_v43  ;;  %17034 = vst [vmem:[#allocation84_spill] sm:$0xff] %v13495_v61  ;;  %v597_v51 = vrot.slane %v13413_v24, %v13239_v16 }
 0x2a6   :  { %v1472_v52 = vpop.f32.mrb[36].mxu0  ;;  %2433 = vmatprep.subr.bf16.mxu0 %v1885_v46 }
 0x2a7   :  { %v1474_v20 = vpop.f32.mrb[37].mxu0  ;;  %2434 = vmatpush1.bf16.xpose.msra.mxu0 %v1884_v57  ;;  %v1473_v50 = vadd.f32 %v1472_v52, %v13452_v36  ;;  %v593_v52 = vrot.slane %v13413_v24, %v13234_v13 }
 0x2a8   :  { %v1476_v8 = vpop.f32.mrb[38].mxu0  ;;  %v1475_v46 = vadd.f32 %v1474_v20, %v13458_v33 }
 0x2a9   :  { %v1477_v49 = vadd.f32 %v1476_v8, %v13452_v36  ;;  %v1478_v53 = vpop.f32.mrb[39].mxu0  ;;  %v13500_v8 = vadd.f32 %v1421_v19, %v13264_v30 }
 0x2aa   :  { %v1479_v27 = vadd.f32 %v1478_v53, %v13458_v33 }
 0x2ab   :  { %v1896_v57 = vpack.c.bf16 %v1477_v49, %v1473_v50  ;;  %17035 = vst [vmem:[#allocation85_spill] sm:$0xff] %v13500_v8  ;;  %v13505_v50 = vadd.f32 %v1423_v5, %v13258_v28  ;;  %v1425_v49 = vpop.f32.mrb[31].mxu1  ;;  %v13518_v28 = vrot.slane %v597_v51, %v13197_v55 }
 0x2ac   :  { %v1897_v58 = vpack.c.bf16 %v1479_v27, %v1475_v46  ;;  %v13508_v0 = vadd.f32 %v1425_v49, %v13264_v30  ;;  %v13511_v27 = vrot.slane %v593_v52, %v13197_v55  ;;  %v1575_v49 = vpop.f32.mrb[32].mxu1 }
 0x2ad   :  { %17036 = vst [vmem:[#allocation86_spill] sm:$0xff] %v13505_v50 }
 0x2ae   :  { %v1482_v20 = vpop.f32.mrb[40].mxu0  ;;  %2435 = vmatprep.subr.bf16.mxu0 %v1897_v58  ;;  %17037 = vst [vmem:[#allocation87_spill] sm:$0xff] %v13508_v0  ;;  %v13525_v19 = vadd.f32 %v1575_v49, %v13511_v27 }
 0x2af   :  { %v1484_v53 = vpop.f32.mrb[41].mxu0  ;;  %2436 = vmatpush1.bf16.xpose.msra.mxu0 %v1896_v57  ;;  %v1483_v24 = vadd.f32 %v1482_v20, %v13452_v36  ;;  %v1577_v20 = vpop.f32.mrb[33].mxu1 }
 0x2b0   :  { %v1486_v46 = vpop.f32.mrb[42].mxu0  ;;  %v1485_v30 = vadd.f32 %v1484_v53, %v13458_v33  ;;  %v1579_v61 = vpop.f32.mrb[34].mxu1 }
 0x2b1   :  { %v1487_v58 = vadd.f32 %v1486_v46, %v13452_v36  ;;  %v1488_v16 = vpop.f32.mrb[43].mxu0  ;;  %v13528_v46 = vadd.f32 %v1577_v20, %v13518_v28  ;;  %v13531_v50 = vadd.f32 %v1579_v61, %v13511_v27  ;;  %v1581_v5 = vpop.f32.mrb[35].mxu1 }
 0x2b2   :  { %v1489_v57 = vadd.f32 %v1488_v16, %v13458_v33  ;;  %v13534_v16 = vadd.f32 %v1581_v5, %v13518_v28  ;;  %v1585_v8 = vpop.f32.mrb[36].mxu1 }
 0x2b3   :  { %v1908_v52 = vpack.c.bf16 %v1487_v58, %v1483_v24  ;;  %v13545_v0 = vadd.f32 %v1585_v8, %v13511_v27  ;;  %v1587_v60 = vpop.f32.mrb[37].mxu1 }
 0x2b4   :  { %v1909_v13 = vpack.c.bf16 %v1489_v57, %v1485_v30  ;;  %v13548_v58 = vadd.f32 %v1587_v60, %v13518_v28 }
 0x2b6   :  { %v1492_v51 = vpop.f32.mrb[44].mxu0  ;;  %2437 = vmatprep.subr.bf16.mxu0 %v1909_v13 }
 0x2b7   :  { %v1494_v53 = vpop.f32.mrb[45].mxu0  ;;  %2438 = vmatpush1.bf16.xpose.msra.mxu0 %v1908_v52  ;;  %v1493_v30 = vadd.f32 %v1492_v51, %v13452_v36  ;;  %v1589_v51 = vpop.f32.mrb[38].mxu1 }
 0x2b8   :  { %v1496_v24 = vpop.f32.mrb[46].mxu0  ;;  %v1495_v61 = vadd.f32 %v1494_v53, %v13458_v33  ;;  %v13551_v59 = vadd.f32 %v1589_v51, %v13511_v27  ;;  %v1591_v13 = vpop.f32.mrb[39].mxu1 }
 0x2b9   :  { %v1497_v57 = vadd.f32 %v1496_v24, %v13452_v36  ;;  %v1498_v49 = vpop.f32.mrb[47].mxu0  ;;  %v1595_v4 = vpop.f32.mrb[40].mxu1 }
 0x2ba   :  { %v1499_v20 = vadd.f32 %v1498_v49, %v13458_v33  ;;  %v13565_v43 = vadd.f32 %v1595_v4, %v13511_v27  ;;  %v1597_v3 = vpop.f32.mrb[41].mxu1 }
 0x2bb   :  { %v1920_v52 = vpack.c.bf16 %v1497_v57, %v1493_v30  ;;  %v13554_v30 = vadd.f32 %v1591_v13, %v13518_v28  ;;  %v13568_v8 = vadd.f32 %v1597_v3, %v13518_v28 }
 0x2bc   :  { %v1921_v5 = vpack.c.bf16 %v1499_v20, %v1495_v61 }
 0x2be   :  { %v1502_v24 = vpop.f32.mrb[48].mxu0  ;;  %2439 = vmatprep.subr.bf16.mxu0 %v1921_v5 }
 0x2bf   :  { %v1504_v53 = vpop.f32.mrb[49].mxu0  ;;  %2440 = vmatpush1.bf16.xpose.msra.mxu0 %v1920_v52  ;;  %v1503_v49 = vadd.f32 %v1502_v24, %v13452_v36  ;;  %v1599_v24 = vpop.f32.mrb[42].mxu1 }
 0x2c0   :  { %v1506_v57 = vpop.f32.mrb[50].mxu0  ;;  %v1505_v5 = vadd.f32 %v1504_v53, %v13458_v33  ;;  %v13571_v21 = vadd.f32 %v1599_v24, %v13511_v27  ;;  %v1601_v20 = vpop.f32.mrb[43].mxu1 }
 0x2c1   :  { %v1507_v60 = vadd.f32 %v1506_v57, %v13452_v36  ;;  %v1508_v61 = vpop.f32.mrb[51].mxu0  ;;  %v1605_v34 = vpop.f32.mrb[44].mxu1 }
 0x2c2   :  { %v1509_v51 = vadd.f32 %v1508_v61, %v13458_v33  ;;  %v13585_v40 = vadd.f32 %v1605_v34, %v13511_v27  ;;  %v1607_v37 = vpop.f32.mrb[45].mxu1 }
 0x2c3   :  { %v1932_v52 = vpack.c.bf16 %v1507_v60, %v1503_v49  ;;  %v13574_v49 = vadd.f32 %v1601_v20, %v13518_v28  ;;  %v13588_v4 = vadd.f32 %v1607_v37, %v13518_v28 }
 0x2c4   :  { %v1933_v13 = vpack.c.bf16 %v1509_v51, %v1505_v5 }
 0x2c6   :  { %v1512_v57 = vpop.f32.mrb[52].mxu0  ;;  %2441 = vmatprep.subr.bf16.mxu0 %v1933_v13 }
 0x2c7   :  { %v1514_v53 = vpop.f32.mrb[53].mxu0  ;;  %2442 = vmatpush1.bf16.xpose.msra.mxu0 %v1932_v52  ;;  %v1513_v61 = vadd.f32 %v1512_v57, %v13452_v36  ;;  %v1609_v57 = vpop.f32.mrb[46].mxu1 }
 0x2c8   :  { %v1516_v60 = vpop.f32.mrb[54].mxu0  ;;  %v1515_v13 = vadd.f32 %v1514_v53, %v13458_v33  ;;  %v13591_v44 = vadd.f32 %v1609_v57, %v13511_v27  ;;  %v1611_v51 = vpop.f32.mrb[47].mxu1 }
 0x2c9   :  { %v1517_v3 = vadd.f32 %v1516_v60, %v13452_v36  ;;  %v1518_v5 = vpop.f32.mrb[55].mxu0 }
 0x2ca   :  { %v1519_v24 = vadd.f32 %v1518_v5, %v13458_v33  ;;  %v559_v5 = vld [vmem:[#allocation6 + $0x8] sm:$0xf] }
 0x2cb   :  { %v1944_v52 = vpack.c.bf16 %v1517_v3, %v1513_v61  ;;  %v13594_v61 = vadd.f32 %v1611_v51, %v13518_v28  ;;  %v1615_v51 = vpop.f32.mrb[48].mxu1  ;;  %v13604_v6 = vunpack.c.l.bf16 %v559_v5 }
 0x2cc   :  { %v1945_v20 = vpack.c.bf16 %v1519_v24, %v1515_v13  ;;  %v13607_v34 = vadd.f32 %v1615_v51, %v13511_v27  ;;  %v1617_v18 = vpop.f32.mrb[49].mxu1 }
 0x2ce   :  { %v1522_v60 = vpop.f32.mrb[56].mxu0  ;;  %2443 = vmatprep.subr.bf16.mxu0 %v1945_v20 }
 0x2cf   :  { %v1524_v53 = vpop.f32.mrb[57].mxu0  ;;  %2444 = vmatpush1.bf16.xpose.msra.mxu0 %v1944_v52  ;;  %v1523_v37 = vadd.f32 %v1522_v60, %v13452_v36  ;;  %v13610_v60 = vadd.f32 %v1617_v18, %v13518_v28 }
 0x2d0   :  { %v1526_v3 = vpop.f32.mrb[58].mxu0  ;;  %v1525_v57 = vadd.f32 %v1524_v53, %v13458_v33 }
 0x2d1   :  { %v1527_v13 = vadd.f32 %v1526_v3, %v13452_v36  ;;  %v1528_v24 = vpop.f32.mrb[59].mxu0  ;;  %v1619_v3 = vpop.f32.mrb[50].mxu1 }
 0x2d2   :  { %v1529_v52 = vadd.f32 %v1528_v24, %v13458_v33  ;;  %v13613_v20 = vadd.f32 %v1619_v3, %v13511_v27  ;;  %v1621_v53 = vpop.f32.mrb[51].mxu1 }
 0x2d3   :  { %v1956_v39 = vpack.c.bf16 %v1527_v13, %v1523_v37  ;;  %v13616_v5 = vadd.f32 %v1621_v53, %v13518_v28  ;;  %v601_v37 = vrot.slane %v13604_v6, %v13197_v55  ;;  %v1625_v10 = vpop.f32.mrb[52].mxu1 }
 0x2d4   :  { %v1957_v1 = vpack.c.bf16 %v1529_v52, %v1525_v57  ;;  %v605_v57 = vrot.slane %v13604_v6, %v13200_v56  ;;  %v13634_v56 = vadd.f32 %v1625_v10, %v13511_v27 }
 0x2d5   :  { %v13631_v35 = vrot.slane %v601_v37, %v13197_v55 }
 0x2d6   :  { %v1532_v47 = vpop.f32.mrb[60].mxu0  ;;  %2445 = vmatprep.subr.bf16.mxu0 %v1957_v1 }
 0x2d7   :  { %v1534_v24 = vpop.f32.mrb[61].mxu0  ;;  %2446 = vmatpush1.bf16.xpose.msra.mxu0 %v1956_v39  ;;  %v1533_v1 = vadd.f32 %v1532_v47, %v13452_v36  ;;  %v1627_v47 = vpop.f32.mrb[53].mxu1 }
 0x2d8   :  { %v1536_v13 = vpop.f32.mrb[62].mxu0  ;;  %v1535_v3 = vadd.f32 %v1534_v24, %v13458_v33  ;;  %v1629_v39 = vpop.f32.mrb[54].mxu1 }
 0x2d9   :  { %v1537_v52 = vadd.f32 %v1536_v13, %v13452_v36  ;;  %v1538_v51 = vpop.f32.mrb[63].mxu0  ;;  %v13637_v36 = vrot.slane %v605_v57, %v13197_v55  ;;  %v13640_v13 = vadd.f32 %v1627_v47, %v13518_v28  ;;  %v1631_v24 = vpop.f32.mrb[55].mxu1  ;;  %v17038_v57 = vpack.c.bf16 %v13534_v16, %v13528_v46 }
 0x2da   :  { %v1539_v53 = vadd.f32 %v1538_v51, %v13458_v33  ;;  %v13643_v33 = vadd.f32 %v1629_v39, %v13511_v27  ;;  %v13646_v37 = vadd.f32 %v1631_v24, %v13518_v28  ;;  %v1635_v24 = vpop.f32.mrb[56].mxu1 }
 0x2db   :  { %v1968_v41 = vpack.c.bf16 %v1537_v52, %v1533_v1  ;;  %v13670_v16 = vadd.f32 %v1635_v24, %v13511_v27  ;;  %v17040_v24 = vpack.c.bf16 %v13242_v17, %v13232_v11 }
 0x2dc   :  { %v1969_v18 = vpack.c.bf16 %v1539_v53, %v1535_v3 }
 0x2de   :  { %2447 = vmatprep.subr.bf16.mxu0 %v1969_v18  ;;  %v1688_v1 = vpop.f32.mrb[64].mxu0  ;;  %v17039_v18 = vpack.c.bf16 %v13215_v2, %v13212_v62  ;;  %v17042_v2 = vpack.c.bf16 %v13554_v30, %v13548_v58 }
 0x2df   :  { %2448 = vmatpush1.bf16.xpose.msra.mxu0 %v1968_v41  ;;  %v13649_v10 = vadd.f32 %v1688_v1, %v13631_v35  ;;  %v1690_v52 = vpop.f32.mrb[65].mxu0  ;;  %v1637_v1 = vpop.f32.mrb[57].mxu1 }
 0x2e0   :  { %2530 = vmatprep.subr.bf16.mxu0 %v17038_v57  ;;  %v13657_v51 = vadd.f32 %v1690_v52, %v13637_v36  ;;  %v1692_v39 = vpop.f32.mrb[66].mxu0  ;;  %v13675_v57 = vadd.f32 %v1637_v1, %v13518_v28  ;;  %v17041_v52 = vpack.c.bf16 %v13531_v50, %v13525_v19 }
 0x2e1   :  { %v13662_v3 = vadd.f32 %v1692_v39, %v13631_v35  ;;  %v1694_v53 = vpop.f32.mrb[67].mxu0  ;;  %v1639_v39 = vpop.f32.mrb[58].mxu1 }
 0x2e2   :  { %v13665_v47 = vadd.f32 %v1694_v53, %v13637_v36  ;;  %v13681_v53 = vadd.f32 %v1639_v39, %v13511_v27  ;;  %v1641_v41 = vpop.f32.mrb[59].mxu1 }
 0x2e3   :  { %v13690_v1 = vadd.f32 %v1641_v41, %v13518_v28 }
 0x2e6   :  { %2466 = vmatmul.mubr.bf16.vlgmr.msra.gmra.mrb[128].mxu0 %v17039_v18  ;;  %v1698_v46 = vpop.f32.mrb[68].mxu0 }
 0x2e7   :  { %2473 = vmatprep.mubr.bf16.mxu0 %v17040_v24  ;;  %2531 = vmatpush1.bf16.xpose.msra.mxu0 %v17041_v52  ;;  %v13693_v55 = vadd.f32 %v1698_v46, %v13631_v35  ;;  %v1700_v62 = vpop.f32.mrb[69].mxu0  ;;  %v1645_v52 = vpop.f32.mrb[60].mxu1  ;;  %v17045_v24 = vpack.c.bf16 %v13551_v59, %v13545_v0 }
 0x2e8   :  { %2532 = vmatprep.subr.bf16.mxu0 %v17042_v2  ;;  %v13701_v11 = vadd.f32 %v1700_v62, %v13637_v36  ;;  %v1702_v17 = vpop.f32.mrb[70].mxu0  ;;  %v13714_v30 = vadd.f32 %v1645_v52, %v13511_v27  ;;  %v1647_v39 = vpop.f32.mrb[61].mxu1  ;;  %v17044_v52 = vpack.c.bf16 %v13267_v31, %v13255_v26 }
 0x2e9   :  { %v13706_v19 = vadd.f32 %v1702_v17, %v13631_v35  ;;  %v1704_v41 = vpop.f32.mrb[71].mxu0  ;;  %v13719_v62 = vadd.f32 %v1647_v39, %v13518_v28  ;;  %v1649_v2 = vpop.f32.mrb[62].mxu1  ;;  %v17043_v17 = vpack.c.bf16 %v13237_v14, %v13229_v9  ;;  %v17046_v14 = vpack.c.bf16 %v13574_v49, %v13568_v8 }
 0x2ea   :  { %v13709_v46 = vadd.f32 %v1704_v41, %v13637_v36  ;;  %v13725_v41 = vadd.f32 %v1649_v2, %v13511_v27  ;;  %v1651_v18 = vpop.f32.mrb[63].mxu1  ;;  %v17048_v2 = vpack.c.bf16 %v13301_v54, %v13291_v45 }
 0x2eb   :  { %v13734_v39 = vadd.f32 %v1651_v18, %v13518_v28 }
 0x2ec   :  { %v1970_v27 = vpack.c.bf16 %v13725_v41, %v13714_v30  ;;  %v17085_v30 = vpack.c.bf16 %v13662_v3, %v13649_v10  ;;  %v17086_v41 = vpack.c.bf16 %v13709_v46, %v13701_v11  ;;  %v17095_v3 = vld [vmem:[#allocation56_spill] sm:$0xff]  ;;  %v17098_v46 = vld [vmem:[#allocation61_spill] sm:$0xff] }
 0x2ed   :  { %v1971_v59 = vpack.c.bf16 %v13734_v39, %v13719_v62  ;;  %v17075_v62 = vld [vmem:[#allocation51_spill] sm:$0xff]  ;;  %v17076_v39 = vld [vmem:[#allocation49_spill] sm:$0xff] }
 0x2ee   :  { %2474 = vmatmul.mubr.bf16.gmra.mrb[132].mxu0 %v17043_v17  ;;  %v1708_v58 = vpop.f32.mrb[72].mxu0  ;;  %v17049_v17 = vpack.c.bf16 %v13571_v21, %v13565_v43 }
 0x2ef   :  { %2481 = vmatprep.mubr.bf16.mxu0 %v17044_v52  ;;  %2533 = vmatpush1.bf16.xpose.msra.mxu0 %v17045_v24  ;;  %v13737_v50 = vadd.f32 %v1708_v58, %v13631_v35  ;;  %v1710_v9 = vpop.f32.mrb[73].mxu0  ;;  %v17047_v58 = vpack.c.bf16 %v13261_v25, %v13252_v23 }
 0x2f0   :  { %2534 = vmatprep.subr.bf16.mxu0 %v17046_v14  ;;  %v13745_v26 = vadd.f32 %v1710_v9, %v13637_v36  ;;  %v1712_v31 = vpop.f32.mrb[74].mxu0  ;;  %v17050_v14 = vpack.c.bf16 %v13594_v61, %v13588_v4  ;;  %v17051_v4 = vpack.c.bf16 %v13296_v48, %v13285_v42 }
 0x2f1   :  { %v13750_v0 = vadd.f32 %v1712_v31, %v13631_v35  ;;  %v1714_v28 = vpop.f32.mrb[75].mxu0 }
 0x2f2   :  { %v13753_v18 = vadd.f32 %v1714_v28, %v13637_v36  ;;  %v17052_v28 = vpack.c.bf16 %v13335_v38, %v13325_v22 }
 0x2f3   :  { %v1912_v8 = vpack.c.bf16 %v13750_v0, %v13737_v50  ;;  %v17100_v50 = vld [vmem:[#allocation62_spill] sm:$0xff]  ;;  %v17101_v0 = vld [vmem:[#allocation60_spill] sm:$0xff] }
 0x2f4   :  { %v1913_v49 = vpack.c.bf16 %v13753_v18, %v13745_v26  ;;  %v17102_v18 = vpack.c.bf16 %v17100_v50, %v17101_v0 }
 0x2f6   :  { %2482 = vmatmul.mubr.bf16.gmra.mrb[136].mxu0 %v17047_v58  ;;  %v1718_v24 = vpop.f32.mrb[76].mxu0  ;;  %v17053_v58 = vpack.c.bf16 %v13591_v44, %v13585_v40 }
 0x2f7   :  { %2489 = vmatprep.mubr.bf16.mxu0 %v17048_v2  ;;  %2535 = vmatpush1.bf16.xpose.msra.mxu0 %v17049_v17  ;;  %v13769_v52 = vadd.f32 %v1718_v24, %v13631_v35  ;;  %v1720_v9 = vpop.f32.mrb[77].mxu0  ;;  %v17054_v17 = vpack.c.bf16 %v13616_v5, %v13610_v60  ;;  %v17056_v5 = vpack.c.bf16 %v13371_v63, %v13361_v7 }
 0x2f8   :  { %2536 = vmatprep.subr.bf16.mxu0 %v17050_v14  ;;  %v13775_v23 = vadd.f32 %v1720_v9, %v13637_v36  ;;  %v1722_v25 = vpop.f32.mrb[78].mxu0  ;;  %v17055_v14 = vpack.c.bf16 %v13330_v29, %v13319_v15 }
 0x2f9   :  { %v13778_v31 = vadd.f32 %v1722_v25, %v13631_v35  ;;  %v1724_v45 = vpop.f32.mrb[79].mxu0  ;;  %v17057_v25 = vpack.c.bf16 %v13613_v20, %v13607_v34  ;;  %v17059_v34 = vpack.c.bf16 %v13366_v32, %v13355_v12 }
 0x2fa   :  { %v13781_v54 = vadd.f32 %v1724_v45, %v13637_v36 }
 0x2fb   :  { %v1924_v21 = vpack.c.bf16 %v13778_v31, %v13769_v52  ;;  %v17107_v31 = vld [vmem:[#allocation68_spill] sm:$0xff] }
 0x2fc   :  { %v1925_v43 = vpack.c.bf16 %v13781_v54, %v13775_v23  ;;  %v17106_v23 = vld [vmem:[#allocation70_spill] sm:$0xff] }
 0x2fd   :  { %v17108_v54 = vpack.c.bf16 %v17106_v23, %v17107_v31 }
 0x2fe   :  { %2490 = vmatmul.mubr.bf16.gmra.mrb[140].mxu0 %v17051_v4  ;;  %v1728_v61 = vpop.f32.mrb[80].mxu0 }
 0x2ff   :  { %2497 = vmatprep.mubr.bf16.mxu0 %v17052_v28  ;;  %2537 = vmatpush1.bf16.xpose.msra.mxu0 %v17053_v58  ;;  %v13797_v24 = vadd.f32 %v1728_v61, %v13631_v35  ;;  %v1730_v2 = vpop.f32.mrb[81].mxu0  ;;  %v17058_v61 = vpack.c.bf16 %v13646_v37, %v13640_v13  ;;  %v17063_v13 = vpack.c.bf16 %v13643_v33, %v13634_v56  ;;  %v17066_v56 = vld [vmem:[#allocation63_spill] sm:$0xff] }
 0x300   :  { %2538 = vmatprep.subr.bf16.mxu0 %v17054_v17  ;;  %v13803_v42 = vadd.f32 %v1730_v2, %v13637_v36  ;;  %v1732_v48 = vpop.f32.mrb[82].mxu0  ;;  %v17060_v2 = vld [vmem:[#allocation67_spill] sm:$0xff]  ;;  %v17061_v17 = vld [vmem:[#allocation65_spill] sm:$0xff] }
 0x301   :  { %v13806_v9 = vadd.f32 %v1732_v48, %v13631_v35  ;;  %v1734_v22 = vpop.f32.mrb[83].mxu0 }
 0x302   :  { %v1735_v38 = vadd.f32 %v1734_v22, %v13637_v36 }
 0x303   :  { %v1936_v40 = vpack.c.bf16 %v13806_v9, %v13797_v24  ;;  %v17064_v9 = vpack.c.bf16 %v13690_v1, %v13675_v57  ;;  %v17071_v57 = vpack.c.bf16 %v13681_v53, %v13670_v16  ;;  %v17073_v16 = vld [vmem:[#allocation71_spill] sm:$0xff] }
 0x304   :  { %v1937_v44 = vpack.c.bf16 %v1735_v38, %v13803_v42  ;;  %v17062_v42 = vpack.c.bf16 %v17060_v2, %v17061_v17 }
 0x306   :  { %2498 = vmatmul.mubr.bf16.gmra.mrb[144].mxu0 %v17055_v14  ;;  %v1738_v60 = vpop.f32.mrb[84].mxu0 }
 0x307   :  { %2505 = vmatprep.mubr.bf16.mxu0 %v17056_v5  ;;  %2539 = vmatpush1.bf16.xpose.msra.mxu0 %v17057_v25  ;;  %v1739_v45 = vadd.f32 %v1738_v60, %v13631_v35  ;;  %v1740_v4 = vpop.f32.mrb[85].mxu0  ;;  %v17065_v25 = vld [vmem:[#allocation66_spill] sm:$0xff] }
 0x308   :  { %2540 = vmatprep.subr.bf16.mxu0 %v17058_v61  ;;  %v1741_v28 = vadd.f32 %v1740_v4, %v13637_v36  ;;  %v1742_v15 = vpop.f32.mrb[86].mxu0  ;;  %v17067_v33 = vpack.c.bf16 %v17065_v25, %v17066_v56  ;;  %v17068_v4 = vld [vmem:[#allocation75_spill] sm:$0xff]  ;;  %v17069_v61 = vld [vmem:[#allocation73_spill] sm:$0xff]  ;;  %v17118_v56 = vld [vmem:[#allocation82_spill] sm:$0xff] }
 0x309   :  { %v1743_v29 = vadd.f32 %v1742_v15, %v13631_v35  ;;  %v1744_v58 = vpop.f32.mrb[87].mxu0 }
 0x30a   :  { %v1745_v7 = vadd.f32 %v1744_v58, %v13637_v36 }
 0x30b   :  { %v1948_v63 = vpack.c.bf16 %v1743_v29, %v1739_v45 }
 0x30c   :  { %v1949_v24 = vpack.c.bf16 %v1745_v7, %v1741_v28  ;;  %v17070_v28 = vpack.c.bf16 %v17068_v4, %v17069_v61  ;;  %v17122_v4 = vld [vmem:[#allocation85_spill] sm:$0xff] }
 0x30e   :  { %2506 = vmatmul.mubr.bf16.gmra.mrb[148].mxu0 %v17059_v34  ;;  %v1748_v20 = vpop.f32.mrb[88].mxu0 }
 0x30f   :  { %2513 = vmatprep.mubr.bf16.mxu0 %v17062_v42  ;;  %2541 = vmatpush1.bf16.xpose.msra.mxu0 %v17063_v13  ;;  %v1749_v37 = vadd.f32 %v1748_v20, %v13631_v35  ;;  %v1750_v48 = vpop.f32.mrb[89].mxu0  ;;  %v17072_v42 = vld [vmem:[#allocation74_spill] sm:$0xff] }
 0x310   :  { %2542 = vmatprep.subr.bf16.mxu0 %v17064_v9  ;;  %v1751_v22 = vadd.f32 %v1750_v48, %v13637_v36  ;;  %v1752_v12 = vpop.f32.mrb[90].mxu0  ;;  %v17074_v53 = vpack.c.bf16 %v17072_v42, %v17073_v16  ;;  %v17079_v13 = vld [vmem:[#allocation50_spill] sm:$0xff]  ;;  %v17082_v48 = vld [vmem:[#allocation55_spill] sm:$0xff]  ;;  %v17083_v9 = vld [vmem:[#allocation53_spill] sm:$0xff] }
 0x311   :  { %v1753_v32 = vadd.f32 %v1752_v12, %v13631_v35  ;;  %v1754_v38 = vpop.f32.mrb[91].mxu0  ;;  %v11081_v42 = vld [vmem:[#allocation3 + $0x148] ss:$48 sps:$4 sm:$0xff]  }
 0x312   :  { %v1755_v14 = vadd.f32 %v1754_v38, %v13637_v36  ;;  %v17092_v38 = vld [vmem:[#allocation57_spill] sm:$0xff] }
 0x313   :  { %v1960_v60 = vpack.c.bf16 %v1753_v32, %v1749_v37  ;;  %v17091_v32 = vld [vmem:[#allocation59_spill] sm:$0xff] }
 0x314   :  { %v1961_v5 = vpack.c.bf16 %v1755_v14, %v1751_v22  ;;  %v17084_v22 = vpack.c.bf16 %v17082_v48, %v17083_v9  ;;  %v17093_v10 = vpack.c.bf16 %v17091_v32, %v17092_v38  ;;  %v17115_v14 = vld [vmem:[#allocation83_spill] sm:$0xff]  ;;  %v13956_v9 = vld [vmem:[%s16992_s28 + $0x10] sm:$0xff]  }
 0x315   :  { %v11084_v16 = vld [vmem:[#allocation3 + $0x1a8] ss:$48 sps:$4 sm:$0xff]  }
 0x316   :  { %2514 = vmatmul.mubr.bf16.gmra.mrb[152].mxu0 %v17067_v33  ;;  %v1758_v45 = vpop.f32.mrb[92].mxu0  ;;  %v13949_v48 = vld [vmem:[%s16992_s28 + $0x8] sm:$0xff]  }
 0x317   :  { %2521 = vmatprep.mubr.bf16.mxu0 %v17070_v28  ;;  %2543 = vmatpush1.bf16.xpose.msra.mxu0 %v17071_v57  ;;  %v1759_v1 = vadd.f32 %v1758_v45, %v13631_v35  ;;  %v1760_v15 = vpop.f32.mrb[93].mxu0  ;;  %v17121_v45 = vld [vmem:[#allocation87_spill] sm:$0xff]  ;;  %v17124_v28 = vld [vmem:[#allocation86_spill] sm:$0xff]  ;;  %v17125_v57 = vld [vmem:[#allocation84_spill] sm:$0xff] }
 0x318   :  { %2544 = vmatprep.subr.bf16.mxu0 %v1971_v59  ;;  %v1761_v29 = vadd.f32 %v1760_v15, %v13637_v36  ;;  %v1762_v58 = vpop.f32.mrb[94].mxu0  ;;  %v17077_v59 = vpack.c.bf16 %v17075_v62, %v17076_v39  ;;  %v17123_v61 = vpack.c.bf16 %v17121_v45, %v17122_v4  ;;  %v17127_v15 = vmov 0   ;;  %v11089_v62 = vld [vmem:[#allocation3 + $0x20c] ss:$48 sps:$4 sm:$0xff]   ;;  %v11087_v39 = vld [vmem:[#allocation3 + $0x208] ss:$48 sps:$4 sm:$0xff]  }
 0x319   :  { %v1763_v7 = vadd.f32 %v1762_v58, %v13631_v35  ;;  %v1764_v34 = vpop.f32.mrb[95].mxu0  ;;  %v17078_v35 = vpack.c.bf16 %v13665_v47, %v13657_v51  ;;  %v17087_v51 = vpack.c.bf16 %v13706_v19, %v13693_v55  ;;  %v17088_v47 = vld [vmem:[#allocation54_spill] sm:$0xff]  ;;  %v17097_v19 = vld [vmem:[#allocation64_spill] sm:$0xff] }
 0x31a   :  { %v1765_v20 = vadd.f32 %v1764_v34, %v13637_v36  ;;  %v17080_v36 = vld [vmem:[#allocation48_spill] sm:$0xff]  ;;  %v17094_v55 = vld [vmem:[#allocation58_spill] sm:$0xff]  ;;  %v17099_v26 = vpack.c.bf16 %v17097_v19, %v17098_v46 }
 0x31b   :  { %v1972_v2 = vpack.c.bf16 %v1763_v7, %v1759_v1  ;;  %v17081_v37 = vpack.c.bf16 %v17079_v13, %v17080_v36  ;;  %v17096_v11 = vpack.c.bf16 %v17094_v55, %v17095_v3  ;;  %v17126_v1 = vpack.c.bf16 %v17124_v28, %v17125_v57  ;;  %v11074_v58 = vld [vmem:[#allocation3 + $0x2c] ss:$48 sps:$4 sm:$0xff]   ;;  %v11075_v34 = vld [vmem:[#allocation3 + $0x88] ss:$48 sps:$4 sm:$0xff]  }
 0x31c   :  { %v1973_v17 = vpack.c.bf16 %v1765_v20, %v1761_v29  ;;  %v11072_v29 = vld [vmem:[#allocation3 + $0x28] ss:$48 sps:$4 sm:$0xff]   ;;  %1767 = vmatprep.subr.bf16.mxu1 %v11074_v58  ;;  %v11077_v7 = vld [vmem:[#allocation3 + $0x8c] ss:$48 sps:$4 sm:$0xff]  }
 0x31d   :  { %1768 = vmatpush1.bf16.msra.mxu1 %v11072_v29  ;;  %v11078_v20 = vld [vmem:[#allocation3 + $0xe8] ss:$48 sps:$4 sm:$0xff]   ;;  %v11095_v13 = vld [vmem:[#allocation3 + $0x2cc] ss:$48 sps:$4 sm:$0xff]  }
 0x31e   :  { %2522 = vmatmul.mubr.bf16.gmra.mrb[156].mxu0 %v17074_v53  ;;  %1769 = vmatprep.subr.bf16.mxu1 %v11077_v7  ;;  %v11086_v53 = vld [vmem:[#allocation3 + $0x1ac] ss:$48 sps:$4 sm:$0xff]   ;;  %v11093_v36 = vld [vmem:[#allocation3 + $0x2c8] ss:$48 sps:$4 sm:$0xff]  }
 0x31f   :  { %2545 = vmatpush1.bf16.xpose.msra.mxu0 %v1970_v27  ;;  %2562 = vmatprep.mubr.bf16.mxu0 %v17077_v59  ;;  %v17089_v27 = vld [vmem:[#allocation52_spill] sm:$0xff] }
 0x320   :  { %2795 = vmatprep.subr.bf16.mxu0 %v17078_v35  ;;  %v17090_v12 = vpack.c.bf16 %v17088_v47, %v17089_v27  ;;  %v11090_v59 = vld [vmem:[#allocation3 + $0x268] ss:$48 sps:$4 sm:$0xff]   ;;  %v11092_v35 = vld [vmem:[#allocation3 + $0x26c] ss:$48 sps:$4 sm:$0xff]  }
 0x321   :  { %1770 = vmatpush1.bf16.msra.mxu1 %v11075_v34  ;;  %v13991_v47 = vld [vmem:[%s16992_s28 + $0x38] sm:$0xff]   ;;  %v13998_v27 = vld [vmem:[%s17128_s11] sm:$0xff]  }
 0x322   :  { %v16883_v38 = vunpack.c.h.bf16 %v13998_v27  ;;  %v14071_v34 = vld [vmem:[%s17128_s11 + $0x20] sm:$0xff]  }
 0x324   :  { %v9192_v3 = vadd.f32 -1.0, %v16883_v38 }
 0x326   :  { %2563 = vmatmul.mubr.bf16.vlgmr.msra.gmra.mrb[128].mxu0 %v17081_v37  ;;  %v13942_v37 = vld [vmem:[%s16992_s28] sm:$0xff]   ;;  %v14017_v50 = vmul.f32 1e+30, %v9192_v3 }
 0x327   :  { %2570 = vmatprep.mubr.bf16.mxu0 %v17084_v22  ;;  %2796 = vmatpush1.bf16.msra.mxu0 %v17085_v30  ;;  %v13963_v22 = vld [vmem:[%s16992_s28 + $0x18] sm:$0xff]   ;;  %v13970_v30 = vld [vmem:[%s16992_s28 + $0x20] sm:$0xff]  }
 0x328   :  { %2797 = vmatprep.subr.bf16.mxu0 %v17086_v41  ;;  %v13977_v41 = vld [vmem:[%s16992_s28 + $0x28] sm:$0xff]   ;;  %17130 = vst [vmem:[#allocation65_spill] sm:$0xff] %v14017_v50 }
 0x32b   :  { %2798 = vmatpush1.bf16.msra.mxu0 %v17087_v51  ;;  %v13984_v51 = vld [vmem:[%s16992_s28 + $0x30] sm:$0xff]  }
 0x32c   :  { %2799 = vmatprep.subr.bf16.mxu0 %v1913_v49  ;;  %v17104_v49 = vld [vmem:[#allocation69_spill] sm:$0xff] }
 0x32e   :  { %2571 = vmatmul.mubr.bf16.gmra.mrb[132].mxu0 %v17090_v12  ;;  %v16884_v12 = vunpack.c.l.bf16 %v13998_v27 }
 0x32f   :  { %2578 = vmatprep.mubr.bf16.mxu0 %v17093_v10  ;;  %2800 = vmatpush1.bf16.msra.mxu0 %v1912_v8  ;;  %v17103_v8 = vld [vmem:[#allocation72_spill] sm:$0xff] }
 0x330   :  { %2801 = vmatprep.subr.bf16.mxu0 %v1925_v43  ;;  %v17105_v52 = vpack.c.bf16 %v17103_v8, %v17104_v49  ;;  %v17110_v43 = vld [vmem:[#allocation77_spill] sm:$0xff]  ;;  %v9191_v32 = vadd.f32 -1.0, %v16884_v12  ;;  %v14007_v10 = vld [vmem:[%s17128_s11 + $0x8] sm:$0xff]  }
 0x331   :  { %v14025_v49 = vld [vmem:[%s17128_s11 + $0x10] sm:$0xff]  }
 0x332   :  { %v14009_v55 = vmul.f32 1e+30, %v9191_v32  ;;  %v14094_v32 = vld [vmem:[%s17128_s11 + $0x28] sm:$0xff]  }
 0x333   :  { %2802 = vmatpush1.bf16.msra.mxu0 %v1924_v21  ;;  %v17109_v21 = vld [vmem:[#allocation79_spill] sm:$0xff] }
 0x334   :  { %2803 = vmatprep.subr.bf16.mxu0 %v1937_v44  ;;  %v17112_v44 = vld [vmem:[#allocation78_spill] sm:$0xff]  ;;  %17129 = vst [vmem:[#allocation67_spill] sm:$0xff] %v14009_v55 }
 0x336   :  { %2579 = vmatmul.mubr.bf16.gmra.mrb[136].mxu0 %v17096_v11  ;;  %v16882_v11 = vunpack.c.l.bf16 %v14007_v10 }
 0x337   :  { %2586 = vmatprep.mubr.bf16.mxu0 %v17099_v26  ;;  %2804 = vmatpush1.bf16.msra.mxu0 %v1936_v40  ;;  %v17111_v40 = vpack.c.bf16 %v17109_v21, %v17110_v43  ;;  %v16880_v21 = vunpack.c.l.bf16 %v14025_v49  ;;  %v16879_v43 = vunpack.c.h.bf16 %v14025_v49 }
 0x338   :  { %2805 = vmatprep.subr.bf16.mxu0 %v1949_v24  ;;  %v9193_v0 = vadd.f32 -1.0, %v16882_v11 }
 0x33a   :  { %v14031_v31 = vmul.f32 1e+30, %v9193_v0 }
 0x33b   :  { %2806 = vmatpush1.bf16.msra.mxu0 %v1948_v63  ;;  %v17113_v63 = vld [vmem:[#allocation76_spill] sm:$0xff] }
 0x33c   :  { %2807 = vmatprep.subr.bf16.mxu0 %v1961_v5  ;;  %v17114_v24 = vpack.c.bf16 %v17112_v44, %v17113_v63  ;;  %v17116_v5 = vld [vmem:[#allocation81_spill] sm:$0xff]  ;;  %17131 = vst [vmem:[#allocation66_spill] sm:$0xff] %v14031_v31 }
 0x33d   :  { %v17117_v25 = vpack.c.bf16 %v17115_v14, %v17116_v5  ;;  %v9195_v14 = vadd.f32 -1.0, %v16880_v21 }
 0x33e   :  { %2587 = vmatmul.mubr.bf16.gmra.mrb[140].mxu0 %v17102_v18  ;;  %v16881_v18 = vunpack.c.h.bf16 %v14007_v10 }
 0x33f   :  { %2594 = vmatprep.mubr.bf16.mxu0 %v17105_v52  ;;  %2808 = vmatpush1.bf16.msra.mxu0 %v1960_v60  ;;  %v17119_v60 = vld [vmem:[#allocation80_spill] sm:$0xff]  ;;  %v14056_v45 = vmul.f32 1e+30, %v9195_v14 }
 0x340   :  { %2809 = vmatprep.subr.bf16.mxu0 %v1973_v17  ;;  %v17120_v33 = vpack.c.bf16 %v17118_v56, %v17119_v60  ;;  %v11083_v17 = vld [vmem:[#allocation3 + $0x14c] ss:$48 sps:$4 sm:$0xff]   ;;  %v9196_v60 = vadd.f32 -1.0, %v16879_v43 }
 0x341   :  { %17133 = vst [vmem:[#allocation75_spill] sm:$0xff] %v14056_v45  ;;  %v17147_v43 = vld [vmem:[#allocation44_spill] sm:$0xff] }
 0x343   :  { %2810 = vmatpush1.bf16.msra.mxu0 %v1972_v2  ;;  %v11080_v2 = vld [vmem:[#allocation3 + $0xec] ss:$48 sps:$4 sm:$0xff]  }
 0x344   :  { %1771 = vmatprep.subr.bf16.mxu1 %v11080_v2 }
 0x345   :  { %1772 = vmatpush1.bf16.msra.mxu1 %v11078_v20 }
 0x346   :  { %2595 = vmatmul.mubr.bf16.gmra.mrb[144].mxu0 %v17108_v54  ;;  %1773 = vmatprep.subr.bf16.mxu1 %v11083_v17  ;;  %v9194_v54 = vadd.f32 -1.0, %v16881_v18 }
 0x347   :  { %2602 = vmatprep.mubr.bf16.mxu0 %v17111_v40 }
 0x349   :  { %1774 = vmatpush1.bf16.msra.mxu1 %v11081_v42 }
 0x34a   :  { %1775 = vmatprep.subr.bf16.mxu1 %v11086_v53 }
 0x34d   :  { %1776 = vmatpush1.bf16.msra.mxu1 %v11084_v16  ;;  %v16874_v16 = vunpack.c.l.bf16 %v14071_v34 }
 0x34e   :  { %2603 = vmatmul.mubr.bf16.gmra.mrb[148].mxu0 %v17114_v24  ;;  %1777 = vmatprep.subr.bf16.mxu1 %v11089_v62  ;;  %v14041_v24 = vmul.f32 1e+30, %v9194_v54  ;;  %v16873_v62 = vunpack.c.h.bf16 %v14071_v34  ;;  %v16870_v54 = vunpack.c.h.bf16 %v14094_v32 }
 0x34f   :  { %2610 = vmatprep.mubr.bf16.mxu0 %v17117_v25  ;;  %v14048_v25 = vld [vmem:[%s17128_s11 + $0x18] sm:$0xff]  }
 0x350   :  { %17132 = vst [vmem:[#allocation63_spill] sm:$0xff] %v14041_v24  ;;  %v16878_v4 = vunpack.c.l.bf16 %v14048_v25  ;;  %v16876_v28 = vunpack.c.h.bf16 %v14048_v25 }
 0x351   :  { %1778 = vmatpush1.bf16.msra.mxu1 %v11087_v39 }
 0x352   :  { %1779 = vmatprep.subr.bf16.mxu1 %v11092_v35  ;;  %v9197_v58 = vadd.f32 -1.0, %v16878_v4  ;;  %v9198_v17 = vadd.f32 -1.0, %v16876_v28  ;;  %v17146_v4 = vld [vmem:[#allocation47_spill] sm:$0xff] }
 0x354   :  { %v14080_v42 = vmul.f32 1e+30, %v9197_v58  ;;  %v14083_v53 = vmul.f32 1e+30, %v9198_v17  ;;  %v9202_v58 = vadd.f32 -1.0, %v16870_v54 }
 0x355   :  { %1780 = vmatpush1.bf16.msra.mxu1 %v11090_v59 }
 0x356   :  { %2611 = vmatmul.mubr.bf16.gmra.mrb[152].mxu0 %v17120_v33  ;;  %1781 = vmatprep.subr.bf16.mxu1 %v11095_v13  ;;  %17135 = vst [vmem:[#allocation74_spill] sm:$0xff] %v14080_v42  ;;  %17136 = vst [vmem:[#allocation71_spill] sm:$0xff] %v14083_v53  ;;  %v9199_v13 = vadd.f32 -1.0, %v16874_v16  ;;  %v14129_v17 = vmul.f32 1e+30, %v9202_v58 }
 0x357   :  { %2618 = vmatprep.mubr.bf16.mxu0 %v17123_v61  ;;  %v14060_v61 = vmul.f32 1e+30, %v9196_v60  ;;  %v14117_v60 = vld [vmem:[%s17128_s11 + $0x30] sm:$0xff]  }
 0x358   :  { %v14103_v0 = vmul.f32 1e+30, %v9199_v13  ;;  %17140 = vst [vmem:[#allocation48_spill] sm:$0xff] %v14129_v17 }
 0x359   :  { %1782 = vmatpush1.bf16.msra.mxu1 %v11093_v36  ;;  %17134 = vst [vmem:[#allocation73_spill] sm:$0xff] %v14060_v61 }
 0x35a   :  { %17137 = vst [vmem:[#allocation51_spill] sm:$0xff] %v14103_v0 }
 0x35c   :  { %1800 = vmatmul.mubr.bf16.vlgmr.msra.gmra.mrb[64].mxu1 %v13942_v37 }
 0x35d   :  { %1809 = vmatprep.mubr.bf16.mxu1 %v17127_v15 }
 0x35e   :  { %2619 = vmatmul.mubr.bf16.gmra.mrb[156].mxu0 %v17126_v1 }
 0x35f   :  { %2827 = vmatprep.mubr.bf16.mxu0 %v17127_v15 }
 0x364   :  { %1810 = vmatmul.mubr.bf16.gmra.mrb[68].mxu1 %v13949_v48 }
 0x365   :  { %1819 = vmatprep.mubr.bf16.mxu1 %v17127_v15 }
 0x36c   :  { %1820 = vmatmul.mubr.bf16.gmra.mrb[72].mxu1 %v13956_v9 }
 0x36d   :  { %1829 = vmatprep.mubr.bf16.mxu1 %v17127_v15 }
 0x374   :  { %1830 = vmatmul.mubr.bf16.gmra.mrb[76].mxu1 %v13963_v22 }
 0x375   :  { %1839 = vmatprep.mubr.bf16.mxu1 %v17127_v15 }
 0x37c   :  { %1840 = vmatmul.mubr.bf16.gmra.mrb[80].mxu1 %v13970_v30 }
 0x37d   :  { %1849 = vmatprep.mubr.bf16.mxu1 %v17127_v15 }
 0x384   :  { %1850 = vmatmul.mubr.bf16.gmra.mrb[84].mxu1 %v13977_v41 }
 0x385   :  { %1859 = vmatprep.mubr.bf16.mxu1 %v17127_v15 }
 0x38c   :  { %1860 = vmatmul.mubr.bf16.gmra.mrb[88].mxu1 %v13984_v51 }
 0x38d   :  { %1869 = vmatprep.mubr.bf16.mxu1 %v17127_v15 }
 0x394   :  { %1870 = vmatmul.mubr.bf16.gmra.mrb[92].mxu1 %v13991_v47 }
 0x395   :  { %2352 = vmatprep.mubr.bf16.mxu1 %v17127_v15 }
 0x3f9   :  { %v2564_v19 = vpop.f32.mrb[128].mxu0 }
 0x3fa   :  { %v14015_v46 = vadd.f32 %v2564_v19, %v14009_v55  ;;  %v2566_v26 = vpop.f32.mrb[129].mxu0 }
 0x3fb   :  { %v2567_v8 = vpop.f32.mrb[130].mxu0  ;;  %v9200_v26 = vadd.f32 -1.0, %v16873_v62 }
 0x3fc   :  { %v2569_v52 = vpop.f32.mrb[131].mxu0  ;;  %2627 = vmax.xlane.f32.xlu0 %v14015_v46  ;;  %v14029_v23 = vadd.f32 %v2567_v8, %v14017_v50  ;;  %v16871_v8 = vunpack.c.l.bf16 %v14094_v32 }
 0x3fd   :  { %v14106_v52 = vmul.f32 1e+30, %v9200_v26 }
 0x3ff   :  { %17138 = vst [vmem:[#allocation49_spill] sm:$0xff] %v14106_v52 }
 0x400   :  { %2629 = vmax.xlane.f32.xlu0 %v14029_v23 }
 0x401   :  { %v2572_v40 = vpop.f32.mrb[132].mxu0 }
 0x402   :  { %v14039_v44 = vadd.f32 %v2572_v40, %v14031_v31  ;;  %v2574_v63 = vpop.f32.mrb[133].mxu0 }
 0x403   :  { %v2575_v5 = vpop.f32.mrb[134].mxu0 }
 0x404   :  { %v2577_v56 = vpop.f32.mrb[135].mxu0  ;;  %2631 = vmax.xlane.f32.xlu1 %v14039_v44  ;;  %v14054_v33 = vadd.f32 %v2575_v5, %v14041_v24  ;;  %v9201_v5 = vadd.f32 -1.0, %v16871_v8 }
 0x408   :  { %2633 = vmax.xlane.f32.xlu1 %v14054_v33 }
 0x409   :  { %v2580_v57 = vpop.f32.mrb[136].mxu0 }
 0x40a   :  { %v14064_v1 = vadd.f32 %v2580_v57, %v14056_v45  ;;  %v2582_v29 = vpop.f32.mrb[137].mxu0 }
 0x40b   :  { %v2583_v7 = vpop.f32.mrb[138].mxu0 }
 0x40c   :  { %v14074_v20 = vadd.f32 %v2583_v7, %v14060_v61  ;;  %v2585_v2 = vpop.f32.mrb[139].mxu0  ;;  %2635 = vmax.xlane.f32.xlu0 %v14064_v1  ;;  %v14126_v7 = vmul.f32 1e+30, %v9201_v5  ;;  %v11233_v61 = vld [vmem:[#allocation9 + $0x36c] ss:$24 sps:$4 sm:$0xff]  }
 0x40d   :  { %v16869_v2 = vunpack.c.l.bf16 %v14117_v60 }
 0x40e   :  { %2637 = vmax.xlane.f32.xlu1 %v14074_v20  ;;  %17139 = vst [vmem:[#allocation50_spill] sm:$0xff] %v14126_v7 }
 0x411   :  { %v2588_v39 = vpop.f32.mrb[140].mxu0 }
 0x412   :  { %v14087_v59 = vadd.f32 %v2588_v39, %v14080_v42  ;;  %v2590_v35 = vpop.f32.mrb[141].mxu0  ;;  %v16872_v39 = vunpack.c.h.bf16 %v14117_v60 }
 0x413   :  { %v2591_v36 = vpop.f32.mrb[142].mxu0 }
 0x414   :  { %v14097_v3 = vadd.f32 %v2591_v36, %v14083_v53  ;;  %v2593_v19 = vpop.f32.mrb[143].mxu0  ;;  %2639 = vmax.xlane.f32.xlu0 %v14087_v59 }
 0x415   :  { %v9203_v19 = vadd.f32 -1.0, %v16869_v2 }
 0x416   :  { %2641 = vmax.xlane.f32.xlu1 %v14097_v3 }
 0x419   :  { %v2596_v40 = vpop.f32.mrb[144].mxu0 }
 0x41a   :  { %v14110_v63 = vadd.f32 %v2596_v40, %v14103_v0  ;;  %v2598_v14 = vpop.f32.mrb[145].mxu0  ;;  %v14140_v40 = vld [vmem:[%s17128_s11 + $0x38] sm:$0xff]  }
 0x41b   :  { %v2599_v56 = vpop.f32.mrb[146].mxu0  ;;  %v16875_v58 = vunpack.c.l.bf16 %v14140_v40 }
 0x41c   :  { %v14120_v57 = vadd.f32 %v2599_v56, %v14106_v52  ;;  %v2601_v29 = vpop.f32.mrb[147].mxu0  ;;  %2643 = vmax.xlane.f32.xlu0 %v14110_v63  ;;  %v9204_v56 = vadd.f32 -1.0, %v16872_v39 }
 0x41d   :  { %v14149_v29 = vmul.f32 1e+30, %v9203_v19  ;;  %v9205_v54 = vadd.f32 -1.0, %v16875_v58 }
 0x41e   :  { %2645 = vmax.xlane.f32.xlu1 %v14120_v57 }
 0x41f   :  { %17141 = vst [vmem:[#allocation55_spill] sm:$0xff] %v14149_v29  ;;  %v14167_v62 = vmul.f32 1e+30, %v9205_v54  ;;  %v11096_v54 = vld [vmem:[%s16993_s25 + $0x8] ss:$16 sps:$4 sm:$0xff]  }
 0x421   :  { %v2604_v35 = vpop.f32.mrb[148].mxu0  ;;  %17143 = vst [vmem:[#allocation54_spill] sm:$0xff] %v14167_v62 }
 0x422   :  { %v14133_v13 = vadd.f32 %v2604_v35, %v14126_v7  ;;  %v2606_v36 = vpop.f32.mrb[149].mxu0  ;;  %v14152_v35 = vmul.f32 1e+30, %v9204_v56 }
 0x423   :  { %v2607_v26 = vpop.f32.mrb[150].mxu0  ;;  %v16877_v36 = vunpack.c.h.bf16 %v14140_v40 }
 0x424   :  { %v14143_v14 = vadd.f32 %v2607_v26, %v14129_v17  ;;  %v2609_v5 = vpop.f32.mrb[151].mxu0  ;;  %2647 = vmax.xlane.f32.xlu0 %v14133_v13  ;;  %17142 = vst [vmem:[#allocation53_spill] sm:$0xff] %v14152_v35 }
 0x425   :  { %v9206_v56 = vadd.f32 -1.0, %v16877_v36 }
 0x426   :  { %2649 = vmax.xlane.f32.xlu1 %v14143_v14 }
 0x429   :  { %v2612_v2 = vpop.f32.mrb[152].mxu0 }
 0x42a   :  { %v14156_v26 = vadd.f32 %v2612_v2, %v14149_v29  ;;  %v2614_v5 = vpop.f32.mrb[153].mxu0  ;;  %v14169_v2 = vmul.f32 1e+30, %v9206_v56  ;;  %v11098_v56 = vld [vmem:[%s16993_s25 + $0xc] ss:$16 sps:$4 sm:$0xff]  }
 0x42b   :  { %v2615_v8 = vpop.f32.mrb[154].mxu0  ;;  %2320 = vmatprep.subr.bf16.mxu1 %v11098_v56  ;;  %v11107_v56 = vld [vmem:[%s16993_s25 + $0x6c] ss:$16 sps:$4 sm:$0xff]  }
 0x42c   :  { %v14161_v39 = vadd.f32 %v2615_v8, %v14152_v35  ;;  %v2617_v19 = vpop.f32.mrb[155].mxu0  ;;  %2651 = vmax.xlane.f32.xlu0 %v14156_v26  ;;  %17144 = vst [vmem:[#allocation52_spill] sm:$0xff] %v14169_v2  ;;  %2321 = vmatpush1.bf16.msra.mxu1 %v11096_v54  ;;  %v11105_v54 = vld [vmem:[%s16993_s25 + $0x68] ss:$16 sps:$4 sm:$0xff]  }
 0x42e   :  { %2653 = vmax.xlane.f32.xlu1 %v14161_v39 }
 0x431   :  { %v2620_v5 = vpop.f32.mrb[156].mxu0 }
 0x432   :  { %v14172_v16 = vadd.f32 %v2620_v5, %v14167_v62  ;;  %v2622_v58 = vpop.f32.mrb[157].mxu0  ;;  %v11104_v5 = vld [vmem:[%s16993_s25 + $0x4c] ss:$16 sps:$4 sm:$0xff]  }
 0x433   :  { %v2623_v28 = vpop.f32.mrb[158].mxu0  ;;  %v11101_v58 = vld [vmem:[%s16993_s25 + $0x2c] ss:$16 sps:$4 sm:$0xff]  }
 0x434   :  { %v14175_v8 = vadd.f32 %v2623_v28, %v14169_v2  ;;  %v2625_v19 = vpop.f32.mrb[159].mxu0  ;;  %2655 = vmax.xlane.f32.xlu0 %v14172_v16  ;;  %v11099_v28 = vld [vmem:[%s16993_s25 + $0x28] ss:$16 sps:$4 sm:$0xff]   ;;  %2322 = vmatprep.subr.bf16.mxu1 %v11101_v58  ;;  %v11110_v58 = vld [vmem:[%s16993_s25 + $0x8c] ss:$16 sps:$4 sm:$0xff]  }
 0x435   :  { %2323 = vmatpush1.bf16.msra.mxu1 %v11099_v28  ;;  %v11102_v19 = vld [vmem:[%s16993_s25 + $0x48] ss:$16 sps:$4 sm:$0xff]  }
 0x436   :  { %2657 = vmax.xlane.f32.xlu1 %v14175_v8  ;;  %2324 = vmatprep.subr.bf16.mxu1 %v11104_v5  ;;  %v11108_v28 = vld [vmem:[%s16993_s25 + $0x88] ss:$16 sps:$4 sm:$0xff]   ;;  %v11113_v5 = vld [vmem:[%s16993_s25 + $0xac] ss:$16 sps:$4 sm:$0xff]  }
 0x439   :  { %2325 = vmatpush1.bf16.msra.mxu1 %v11102_v19  ;;  %v11111_v19 = vld [vmem:[%s16993_s25 + $0xa8] ss:$16 sps:$4 sm:$0xff]  }
 0x43a   :  { %2326 = vmatprep.subr.bf16.mxu1 %v11107_v56  ;;  %v11116_v56 = vld [vmem:[%s16993_s25 + $0xcc] ss:$16 sps:$4 sm:$0xff]  }
 0x43d   :  { %2327 = vmatpush1.bf16.msra.mxu1 %v11105_v54  ;;  %v11114_v54 = vld [vmem:[%s16993_s25 + $0xc8] ss:$16 sps:$4 sm:$0xff]  }
 0x43e   :  { %2328 = vmatprep.subr.bf16.mxu1 %v11110_v58  ;;  %v17145_v58 = vld [vmem:[#allocation46_spill] sm:$0xff] }
 0x43f   :  { %v609_v36 = vrot.slane %v13604_v6, %v17145_v58 }
 0x441   :  { %2329 = vmatpush1.bf16.msra.mxu1 %v11108_v28  ;;  %v11119_v28 = vld [vmem:[%s16993_s25 + $0xec] ss:$16 sps:$4 sm:$0xff]   ;;  %v14232_v21 = vrot.slane %v609_v36, %v17147_v43 }
 0x442   :  { %2330 = vmatprep.subr.bf16.mxu1 %v11113_v5  ;;  %v613_v5 = vrot.slane %v13604_v6, %v17146_v4 }
 0x444   :  { %v14235_v18 = vrot.slane %v613_v5, %v17147_v43 }
 0x445   :  { %2331 = vmatpush1.bf16.msra.mxu1 %v11111_v19  ;;  %v11117_v19 = vld [vmem:[%s16993_s25 + $0xe8] ss:$16 sps:$4 sm:$0xff]  }
 0x446   :  { %2332 = vmatprep.subr.bf16.mxu1 %v11116_v56  ;;  %v1801_v56 = vpop.f32.mrb[64].mxu1 }
 0x447   :  { %v1802_v11 = vadd.f32 %v1801_v56, %v14232_v21  ;;  %v1803_v38 = vpop.f32.mrb[65].mxu1 }
 0x448   :  { %v1804_v12 = vadd.f32 %v1803_v38, %v14235_v18  ;;  %v1805_v6 = vpop.f32.mrb[66].mxu1 }
 0x449   :  { %2333 = vmatpush1.bf16.msra.mxu1 %v11114_v54  ;;  %v1806_v54 = vadd.f32 %v1805_v6, %v14232_v21  ;;  %v1807_v2 = vpop.f32.mrb[67].mxu1 }
 0x44a   :  { %2334 = vmatprep.subr.bf16.mxu1 %v11119_v28  ;;  %v1808_v36 = vadd.f32 %v1807_v2, %v14235_v18  ;;  %v1811_v62 = vpop.f32.mrb[68].mxu1 }
 0x44b   :  { %v1890_v28 = vpack.c.bf16 %v1806_v54, %v1802_v11  ;;  %v1813_v56 = vpop.f32.mrb[69].mxu1 }
 0x44c   :  { %v1891_v5 = vpack.c.bf16 %v1808_v36, %v1804_v12  ;;  %v1814_v38 = vadd.f32 %v1813_v56, %v14235_v18  ;;  %v1815_v35 = vpop.f32.mrb[70].mxu1 }
 0x44d   :  { %2335 = vmatpush1.bf16.msra.mxu1 %v11117_v19  ;;  %v1812_v19 = vadd.f32 %v1811_v62, %v14232_v21  ;;  %v1816_v6 = vadd.f32 %v1815_v35, %v14232_v21  ;;  %v1817_v29 = vpop.f32.mrb[71].mxu1 }
 0x44e   :  { %2908 = vmatprep.subr.bf16.mxu1 %v1891_v5  ;;  %v1821_v62 = vpop.f32.mrb[72].mxu1 }
 0x44f   :  { %v1902_v11 = vpack.c.bf16 %v1816_v6, %v1812_v19  ;;  %v1823_v5 = vpop.f32.mrb[73].mxu1 }
 0x450   :  { %2353 = vmatmul.mubr.bf16.vlgmr.msra.gmra.mrb[96].mxu1 %v13942_v37  ;;  %v1818_v37 = vadd.f32 %v1817_v29, %v14235_v18  ;;  %v1825_v56 = vpop.f32.mrb[74].mxu1 }
 0x451   :  { %2362 = vmatprep.mubr.bf16.mxu1 %v17127_v15  ;;  %2909 = vmatpush1.bf16.msra.mxu1 %v1890_v28  ;;  %v14251_v28 = vadd.f32 %v1821_v62, %v14232_v21  ;;  %v1826_v29 = vadd.f32 %v1825_v56, %v14232_v21  ;;  %v1827_v19 = vpop.f32.mrb[75].mxu1 }
 0x452   :  { %v1903_v2 = vpack.c.bf16 %v1818_v37, %v1814_v38 }
 0x454   :  { %2910 = vmatprep.subr.bf16.mxu1 %v1903_v2 }
 0x455   :  { %2911 = vmatpush1.bf16.msra.mxu1 %v1902_v11  ;;  %v1831_v11 = vpop.f32.mrb[76].mxu1 }
 0x456   :  { %v14260_v2 = vadd.f32 %v1831_v11, %v14232_v21 }
 0x458   :  { %2363 = vmatmul.mubr.bf16.gmra.mrb[100].mxu1 %v13949_v48 }
 0x459   :  { %2372 = vmatprep.mubr.bf16.mxu1 %v17127_v15 }
 0x460   :  { %2373 = vmatmul.mubr.bf16.gmra.mrb[104].mxu1 %v13956_v9 }
 0x461   :  { %2382 = vmatprep.mubr.bf16.mxu1 %v17127_v15 }
 0x468   :  { %2383 = vmatmul.mubr.bf16.gmra.mrb[108].mxu1 %v13963_v22 }
 0x469   :  { %2392 = vmatprep.mubr.bf16.mxu1 %v17127_v15 }
 0x470   :  { %2393 = vmatmul.mubr.bf16.gmra.mrb[112].mxu1 %v13970_v30 }
 0x471   :  { %2402 = vmatprep.mubr.bf16.mxu1 %v17127_v15 }
 0x478   :  { %2403 = vmatmul.mubr.bf16.gmra.mrb[116].mxu1 %v13977_v41 }
 0x479   :  { %2412 = vmatprep.mubr.bf16.mxu1 %v17127_v15 }
 0x480   :  { %2413 = vmatmul.mubr.bf16.gmra.mrb[120].mxu1 %v13984_v51 }
 0x481   :  { %2422 = vmatprep.mubr.bf16.mxu1 %v17127_v15 }
 0x488   :  { %2423 = vmatmul.mubr.bf16.gmra.mrb[124].mxu1 %v13991_v47 }
 0x489   :  { %v2628_v12 = vpop.xlane.xlu0 %2627  ;;  %2940 = vmatprep.mubr.bf16.mxu1 %v17127_v15 }
 0x48a   :  { %v2659_v54 = vsub.f32 %v14015_v46, %v2628_v12  ;;  %v1914_v46 = vpack.c.bf16 %v1826_v29, %v14251_v28 }
 0x48c   :  { %v2675_v36 = vmul.f32 1.442695, %v2659_v54 }
 0x48d   :  { %v2630_v35 = vpop.xlane.xlu0 %2629 }
 0x48e   :  { %11632 = vpow2.f32 %v2675_v36  ;;  %v2660_v48 = vsub.f32 %v14029_v23, %v2630_v35  ;;  %v1833_v23 = vpop.f32.mrb[77].mxu1 }
 0x48f   :  { %v1835_v62 = vpop.f32.mrb[78].mxu1 }
 0x490   :  { %v2677_v38 = vmul.f32 1.442695, %v2660_v48  ;;  %v14264_v36 = vadd.f32 %v1835_v62, %v14232_v21  ;;  %v1837_v35 = vpop.f32.mrb[79].mxu1 }
 0x491   :  { %v2632_v6 = vpop.xlane.xlu1 %2631 }
 0x492   :  { %11634 = vpow2.f32 %v2677_v38  ;;  %v2661_v37 = vsub.f32 %v14039_v44, %v2632_v6  ;;  %v1926_v56 = vpack.c.bf16 %v14264_v36, %v14260_v2  ;;  %v1828_v2 = vadd.f32 %v1827_v19, %v14235_v18 }
 0x493   :  { %v17148_v36 = vunpack.c.l.bf16 %v13998_v27 }
 0x494   :  { %v2679_v12 = vmul.f32 1.442695, %v2661_v37 }
 0x495   :  { %v2634_v54 = vpop.xlane.xlu1 %2633 }
 0x496   :  { %11636 = vpow2.f32 %v2679_v12  ;;  %v2662_v9 = vsub.f32 %v14054_v33, %v2634_v54 }
 0x498   :  { %v14267_v28 = vpop.eup %11632  ;;  %v2681_v44 = vmul.f32 1.442695, %v2662_v9 }
 0x499   :  { %2707 = vadd.xlane.f32.xlu0 %v14267_v28  ;;  %v2636_v48 = vpop.xlane.xlu0 %2635 }
 0x49a   :  { %11638 = vpow2.f32 %v2681_v44  ;;  %v2663_v33 = vsub.f32 %v14064_v1, %v2636_v48  ;;  %v1824_v1 = vadd.f32 %v1823_v5, %v14235_v18  ;;  %v1834_v44 = vadd.f32 %v1833_v23, %v14235_v18 }
 0x49b   :  { %v2638_v29 = vpop.xlane.xlu1 %2637  ;;  %v1838_v5 = vadd.f32 %v1837_v35, %v14235_v18 }
 0x49c   :  { %v14274_v38 = vpop.eup %11634  ;;  %v2683_v6 = vmul.f32 1.442695, %v2663_v33  ;;  %v2664_v22 = vsub.f32 %v14074_v20, %v2638_v29  ;;  %v1915_v48 = vpack.c.bf16 %v1828_v2, %v1824_v1  ;;  %v1841_v33 = vpop.f32.mrb[80].mxu1 }
 0x49d   :  { %2709 = vadd.xlane.f32.xlu1 %v14274_v38  ;;  %v1843_v29 = vpop.f32.mrb[81].mxu1 }
 0x49e   :  { %11640 = vpow2.f32 %v2683_v6  ;;  %v2685_v37 = vmul.f32 1.442695, %v2664_v22  ;;  %2912 = vmatprep.subr.bf16.mxu1 %v1915_v48  ;;  %v1844_v35 = vadd.f32 %v1843_v29, %v14235_v18  ;;  %v1845_v6 = vpop.f32.mrb[82].mxu1  ;;  %v1927_v22 = vpack.c.bf16 %v1838_v5, %v1834_v44 }
 0x49f   :  { %2913 = vmatpush1.bf16.msra.mxu1 %v1914_v46  ;;  %v1847_v46 = vpop.f32.mrb[83].mxu1 }
 0x4a0   :  { %v14279_v11 = vpop.eup %11636  ;;  %11642 = vpow2.f32 %v2685_v37  ;;  %v1842_v37 = vadd.f32 %v1841_v33, %v14232_v21  ;;  %v1848_v2 = vadd.f32 %v1847_v46, %v14235_v18  ;;  %2914 = vmatprep.subr.bf16.mxu1 %v1927_v22 }
 0x4a1   :  { %2711 = vadd.xlane.f32.xlu0 %v14279_v11  ;;  %v2640_v12 = vpop.xlane.xlu0 %2639 }
 0x4a2   :  { %v2665_v20 = vsub.f32 %v14087_v59, %v2640_v12  ;;  %v1846_v12 = vadd.f32 %v1845_v6, %v14232_v21  ;;  %v1939_v48 = vpack.c.bf16 %v1848_v2, %v1844_v35  ;;  %v17151_v35 = vunpack.c.h.bf16 %v14007_v10 }
 0x4a3   :  { %v2642_v54 = vpop.xlane.xlu1 %2641  ;;  %2915 = vmatpush1.bf16.msra.mxu1 %v1926_v56 }
 0x4a4   :  { %v14286_v62 = vpop.eup %11638  ;;  %v2687_v9 = vmul.f32 1.442695, %v2665_v20  ;;  %v2666_v30 = vsub.f32 %v14097_v3, %v2642_v54  ;;  %v17149_v3 = vunpack.c.h.bf16 %v13998_v27  ;;  %v1851_v27 = vpop.f32.mrb[84].mxu1  ;;  %2916 = vmatprep.subr.bf16.mxu1 %v1939_v48 }
 0x4a5   :  { %382 = vadd.xlane.f32.xlu0 %v17148_v36  ;;  %2713 = vadd.xlane.f32.xlu1 %v14286_v62  ;;  %v1852_v36 = vadd.f32 %v1851_v27, %v14232_v21 }
 0x4a6   :  { %11644 = vpow2.f32 %v2687_v9  ;;  %v2689_v19 = vmul.f32 1.442695, %v2666_v30  ;;  %v1853_v30 = vpop.f32.mrb[85].mxu1 }
 0x4a7   :  { %v1854_v44 = vadd.f32 %v1853_v30, %v14235_v18  ;;  %v1855_v5 = vpop.f32.mrb[86].mxu1 }
 0x4a8   :  { %v14295_v59 = vpop.eup %11640  ;;  %11646 = vpow2.f32 %v2689_v19  ;;  %v1856_v33 = vadd.f32 %v1855_v5, %v14232_v21  ;;  %v1857_v29 = vpop.f32.mrb[87].mxu1 }
 0x4a9   :  { %384 = vadd.xlane.f32.xlu1 %v17149_v3  ;;  %2715 = vadd.xlane.f32.xlu0 %v14295_v59  ;;  %v2644_v23 = vpop.xlane.xlu0 %2643  ;;  %v1938_v3 = vpack.c.bf16 %v1846_v12, %v1842_v37  ;;  %v1861_v56 = vpop.f32.mrb[88].mxu1 }
 0x4aa   :  { %v2667_v41 = vsub.f32 %v14110_v63, %v2644_v23  ;;  %v14306_v20 = vpop.eup %11642  ;;  %v17150_v63 = vunpack.c.l.bf16 %v14007_v10  ;;  %v1863_v6 = vpop.f32.mrb[89].mxu1  ;;  %v1862_v46 = vadd.f32 %v1861_v56, %v14232_v21  ;;  %v1950_v27 = vpack.c.bf16 %v1856_v33, %v1852_v36 }
 0x4ab   :  { %v2646_v1 = vpop.xlane.xlu1 %2645  ;;  %2917 = vmatpush1.bf16.msra.mxu1 %v1938_v3  ;;  %v1865_v37 = vpop.f32.mrb[90].mxu1 }
 0x4ac   :  { %v2691_v54 = vmul.f32 1.442695, %v2667_v41  ;;  %v2668_v9 = vsub.f32 %v14120_v57, %v2646_v1  ;;  %v1858_v57 = vadd.f32 %v1857_v29, %v14235_v18  ;;  %v1864_v41 = vadd.f32 %v1863_v6, %v14235_v18  ;;  %v1867_v2 = vpop.f32.mrb[91].mxu1 }
 0x4ad   :  { %2717 = vadd.xlane.f32.xlu1 %v14306_v20  ;;  %386 = vadd.xlane.f32.xlu0 %v17150_v63  ;;  %v1866_v1 = vadd.f32 %v1865_v37, %v14232_v21  ;;  %v1871_v10 = vpop.f32.mrb[92].mxu1 }
 0x4ae   :  { %11648 = vpow2.f32 %v2691_v54  ;;  %v2693_v19 = vmul.f32 1.442695, %v2668_v9  ;;  %v1951_v12 = vpack.c.bf16 %v1858_v57, %v1854_v44  ;;  %v1868_v9 = vadd.f32 %v1867_v2, %v14235_v18  ;;  %v1873_v48 = vpop.f32.mrb[93].mxu1 }
 0x4af   :  { %v1875_v44 = vpop.f32.mrb[94].mxu1  ;;  %v1962_v29 = vpack.c.bf16 %v1866_v1, %v1862_v46  ;;  %v1872_v3 = vadd.f32 %v1871_v10, %v14232_v21  ;;  %v1874_v57 = vadd.f32 %v1873_v48, %v14235_v18  ;;  %v17157_v48 = vunpack.c.h.bf16 %v14071_v34 }
 0x4b0   :  { %v14317_v23 = vpop.eup %11644  ;;  %11650 = vpow2.f32 %v2693_v19  ;;  %2918 = vmatprep.subr.bf16.mxu1 %v1951_v12  ;;  %v1963_v19 = vpack.c.bf16 %v1868_v9, %v1864_v41  ;;  %v1877_v33 = vpop.f32.mrb[95].mxu1  ;;  %v1876_v56 = vadd.f32 %v1875_v44, %v14232_v21  ;;  %v17159_v44 = vunpack.c.h.bf16 %v14094_v32 }
 0x4b1   :  { %388 = vadd.xlane.f32.xlu1 %v17151_v35  ;;  %2719 = vadd.xlane.f32.xlu0 %v14317_v23  ;;  %v2648_v22 = vpop.xlane.xlu0 %2647  ;;  %v17153_v35 = vunpack.c.h.bf16 %v14025_v49 }
 0x4b2   :  { %v2669_v51 = vsub.f32 %v14133_v13, %v2648_v22  ;;  %v14328_v30 = vpop.eup %11646  ;;  %2919 = vmatpush1.bf16.msra.mxu1 %v1950_v27  ;;  %v17152_v13 = vunpack.c.l.bf16 %v14025_v49  ;;  %v1974_v21 = vpack.c.bf16 %v1876_v56, %v1872_v3  ;;  %v17154_v49 = vunpack.c.l.bf16 %v14048_v25  ;;  %v11125_v3 = vld [vmem:[#allocation9 + $0xc] ss:$24 sps:$4 sm:$0xff]  }
 0x4b3   :  { %v2650_v54 = vpop.xlane.xlu1 %2649  ;;  %2920 = vmatprep.subr.bf16.mxu1 %v1963_v19  ;;  %4874 = vmatprep.subr.bf16.mxu0 %v11125_v3 }
 0x4b4   :  { %v2695_v63 = vmul.f32 1.442695, %v2669_v51  ;;  %v2670_v5 = vsub.f32 %v14143_v14, %v2650_v54  ;;  %v1878_v14 = vadd.f32 %v1877_v33, %v14235_v18  ;;  %v17162_v33 = vunpack.c.l.bf16 %v14140_v40 }
 0x4b5   :  { %2721 = vadd.xlane.f32.xlu1 %v14328_v30  ;;  %390 = vadd.xlane.f32.xlu0 %v17152_v13 }
 0x4b6   :  { %11652 = vpow2.f32 %v2695_v63  ;;  %v2697_v36 = vmul.f32 1.442695, %v2670_v5  ;;  %v1975_v41 = vpack.c.bf16 %v1878_v14, %v1874_v57  ;;  %2921 = vmatpush1.bf16.msra.mxu1 %v1962_v29  ;;  %v17156_v63 = vunpack.c.l.bf16 %v14071_v34 }
 0x4b7   :  { %v17160_v34 = vunpack.c.l.bf16 %v14117_v60  ;;  %v17163_v29 = vunpack.c.h.bf16 %v14140_v40 }
 0x4b8   :  { %v14339_v6 = vpop.eup %11648  ;;  %11654 = vpow2.f32 %v2697_v36  ;;  %2922 = vmatprep.subr.bf16.mxu1 %v1975_v41  ;;  %v17161_v36 = vunpack.c.h.bf16 %v14117_v60  ;;  %v16893_v60 = vmov 0.0  }
 0x4b9   :  { %392 = vadd.xlane.f32.xlu1 %v17153_v35  ;;  %2723 = vadd.xlane.f32.xlu0 %v14339_v6  ;;  %v2652_v22 = vpop.xlane.xlu0 %2651 }
 0x4ba   :  { %v2671_v37 = vsub.f32 %v14156_v26, %v2652_v22  ;;  %v14346_v18 = vpop.eup %11650  ;;  %2923 = vmatpush1.bf16.msra.mxu1 %v1974_v21  ;;  %v17155_v26 = vunpack.c.h.bf16 %v14048_v25 }
 0x4bb   :  { %v2654_v47 = vpop.xlane.xlu1 %2653 }
 0x4bc   :  { %v2699_v12 = vmul.f32 1.442695, %v2671_v37  ;;  %v2672_v51 = vsub.f32 %v14161_v39, %v2654_v47 }
 0x4bd   :  { %2725 = vadd.xlane.f32.xlu1 %v14346_v18  ;;  %394 = vadd.xlane.f32.xlu0 %v17154_v49 }
 0x4be   :  { %11656 = vpow2.f32 %v2699_v12  ;;  %v2701_v46 = vmul.f32 1.442695, %v2672_v51 }
 0x4c0   :  { %v14352_v1 = vpop.eup %11652  ;;  %11658 = vpow2.f32 %v2701_v46 }
 0x4c1   :  { %396 = vadd.xlane.f32.xlu1 %v17155_v26  ;;  %2727 = vadd.xlane.f32.xlu0 %v14352_v1  ;;  %v2656_v2 = vpop.xlane.xlu0 %2655 }
 0x4c2   :  { %v2673_v27 = vsub.f32 %v14172_v16, %v2656_v2  ;;  %v14358_v54 = vpop.eup %11654 }
 0x4c3   :  { %v2658_v39 = vpop.xlane.xlu1 %2657 }
 0x4c4   :  { %v2703_v9 = vmul.f32 1.442695, %v2673_v27  ;;  %v2674_v10 = vsub.f32 %v14175_v8, %v2658_v39  ;;  %v17158_v8 = vunpack.c.l.bf16 %v14094_v32  ;;  %v11122_v32 = vld [vmem:[#allocation9 + $0x4] ss:$24 sps:$4 sm:$0xff]  }
 0x4c5   :  { %2729 = vadd.xlane.f32.xlu1 %v14358_v54  ;;  %398 = vadd.xlane.f32.xlu0 %v17156_v63  ;;  %v11123_v63 = vld [vmem:[#allocation9 + $0x8] ss:$24 sps:$4 sm:$0xff]  }
 0x4c6   :  { %11660 = vpow2.f32 %v2703_v9  ;;  %v2705_v25 = vmul.f32 1.442695, %v2674_v10  ;;  %4648 = vmatprep.subr.bf16.mxu1 %v11122_v32  ;;  %v11120_v10 = vld [vmem:[#allocation9] ss:$24 sps:$4 sm:$0xff]  }
 0x4c7   :  { %v11129_v32 = vld [vmem:[#allocation9 + $0x38] ss:$24 sps:$4 sm:$0xff]  }
 0x4c8   :  { %v14364_v5 = vpop.eup %11656  ;;  %11662 = vpow2.f32 %v2705_v25 }
 0x4c9   :  { %400 = vadd.xlane.f32.xlu1 %v17157_v48  ;;  %2731 = vadd.xlane.f32.xlu0 %v14364_v5 }
 0x4ca   :  { %v14369_v16 = vpop.eup %11658 }
 0x4cd   :  { %2733 = vadd.xlane.f32.xlu1 %v14369_v16  ;;  %402 = vadd.xlane.f32.xlu0 %v17158_v8 }
 0x4d0   :  { %v14374_v13 = vpop.eup %11660 }
 0x4d1   :  { %404 = vadd.xlane.f32.xlu1 %v17159_v44  ;;  %2735 = vadd.xlane.f32.xlu0 %v14374_v13  ;;  %v11128_v44 = vld [vmem:[#allocation9 + $0x34] ss:$24 sps:$4 sm:$0xff]  }
 0x4d2   :  { %v14379_v19 = vpop.eup %11662 }
 0x4d5   :  { %2737 = vadd.xlane.f32.xlu1 %v14379_v19  ;;  %406 = vadd.xlane.f32.xlu0 %v17160_v34  ;;  %v11131_v34 = vld [vmem:[#allocation9 + $0x3c] ss:$24 sps:$4 sm:$0xff]  }
 0x4d9   :  { %408 = vadd.xlane.f32.xlu1 %v17161_v36  ;;  %410 = vadd.xlane.f32.xlu0 %v17162_v33 }
 0x4dd   :  { %412 = vadd.xlane.f32.xlu1 %v17163_v29  ;;  %v11126_v29 = vld [vmem:[#allocation9 + $0x30] ss:$24 sps:$4 sm:$0xff]  }
 0x526   :  { %v2708_v57 = vpop.xlane.xlu0 %2707 }
 0x527   :  { %11664 = vrcp.f32 %v2708_v57 }
 0x52a   :  { %v2710_v56 = vpop.xlane.xlu1 %2709 }
 0x52b   :  { %11666 = vrcp.f32 %v2710_v56  ;;  %v11134_v56 = vld [vmem:[#allocation9 + $0x64] ss:$24 sps:$4 sm:$0xff]  }
 0x52e   :  { %v2712_v14 = vpop.xlane.xlu0 %2711 }
 0x52f   :  { %11668 = vrcp.f32 %v2712_v14  ;;  %v11137_v14 = vld [vmem:[#allocation9 + $0x6c] ss:$24 sps:$4 sm:$0xff]  }
 0x531   :  { %v11665_v37 = vpop.eup %11664 }
 0x532   :  { %v2714_v35 = vpop.xlane.xlu1 %2713  ;;  %v383_v22 = vpop.xlane.xlu0 %382 }
 0x533   :  { %vm414_vm0 = vcmp.gt.f32.partialorder %v383_v22, 0.0  ;;  %11670 = vrcp.f32 %v2714_v35 }
 0x534   :  { %v14391_v41 = vsel %vm414_vm0, 1.0, %v16893_v60 }
 0x535   :  { %17164 = vst [vmem:[#allocation59_spill] sm:$0xff] %v14391_v41  ;;  %v2755_v47 = vmul.f32 %v11665_v37, %v14391_v41  ;;  %v11667_v12 = vpop.eup %11666 }
 0x536   :  { %v385_v40 = vpop.xlane.xlu1 %384  ;;  %v2716_v21 = vpop.xlane.xlu0 %2715 }
 0x537   :  { %vm415_vm1 = vcmp.gt.f32.partialorder %v385_v40, 0.0  ;;  %v2771_v2 = vmul.f32 %v14267_v28, %v2755_v47  ;;  %11672 = vrcp.f32 %v2716_v21  ;;  %v11132_v21 = vld [vmem:[#allocation9 + $0x60] ss:$24 sps:$4 sm:$0xff]  }
 0x538   :  { %v14395_v51 = vsel %vm415_vm1, 1.0, %v16893_v60  ;;  %v11135_v47 = vld [vmem:[#allocation9 + $0x68] ss:$24 sps:$4 sm:$0xff]  }
 0x539   :  { %17165 = vst [vmem:[#allocation57_spill] sm:$0xff] %v14395_v51  ;;  %v2756_v49 = vmul.f32 %v11667_v12, %v14395_v51  ;;  %v11669_v25 = vpop.eup %11668 }
 0x53a   :  { %v2718_v46 = vpop.xlane.xlu1 %2717  ;;  %v387_v26 = vpop.xlane.xlu0 %386 }
 0x53b   :  { %v2772_v27 = vmul.f32 %v14274_v38, %v2756_v49  ;;  %vm416_vm2 = vcmp.gt.f32.partialorder %v387_v26, 0.0  ;;  %11674 = vrcp.f32 %v2718_v46  ;;  %v11140_v26 = vld [vmem:[#allocation9 + $0x94] ss:$24 sps:$4 sm:$0xff]  }
 0x53c   :  { %v14401_v39 = vsel %vm416_vm2, 1.0, %v16893_v60 }
 0x53d   :  { %17166 = vst [vmem:[#allocation58_spill] sm:$0xff] %v14401_v39  ;;  %v2787_v9 = vpack.c.bf16 %v2772_v27, %v2771_v2  ;;  %v2757_v36 = vmul.f32 %v11669_v25, %v14401_v39  ;;  %v11671_v28 = vpop.eup %11670  ;;  %v11143_v2 = vld [vmem:[#allocation9 + $0x9c] ss:$24 sps:$4 sm:$0xff]  }
 0x53e   :  { %v389_v48 = vpop.xlane.xlu1 %388  ;;  %v2720_v8 = vpop.xlane.xlu0 %2719 }
 0x53f   :  { %vm417_vm3 = vcmp.gt.f32.partialorder %v389_v48, 0.0  ;;  %2828 = vmatmul.mubr.bf16.vlgmr.msra.gmra.mrb[96].mxu0 %v2787_v9  ;;  %2941 = vmatmul.mubr.bf16.vlgmr.msra.gmra.mrb[96].mxu1 %v2787_v9  ;;  %v2773_v35 = vmul.f32 %v14279_v11, %v2757_v36  ;;  %11676 = vrcp.f32 %v2720_v8  ;;  %v11146_v8 = vld [vmem:[#allocation9 + $0xc4] ss:$24 sps:$4 sm:$0xff]  }
 0x540   :  { %v14405_v38 = vsel %vm417_vm3, 1.0, %v16893_v60  ;;  %2837 = vmatprep.mubr.bf16.mxu0 %v17127_v15  ;;  %2950 = vmatprep.mubr.bf16.mxu1 %v17127_v15 }
 0x541   :  { %17167 = vst [vmem:[#allocation56_spill] sm:$0xff] %v14405_v38  ;;  %v2758_v33 = vmul.f32 %v11671_v28, %v14405_v38  ;;  %4649 = vmatpush1.bf16.msra.mxu1 %v11120_v10  ;;  %4875 = vmatpush1.bf16.msra.mxu0 %v11123_v63  ;;  %v11673_v12 = vpop.eup %11672  ;;  %v11138_v10 = vld [vmem:[#allocation9 + $0x90] ss:$24 sps:$4 sm:$0xff]  }
 0x542   :  { %v2722_v3 = vpop.xlane.xlu1 %2721  ;;  %v391_v57 = vpop.xlane.xlu0 %390  ;;  %4650 = vmatprep.subr.bf16.mxu1 %v11128_v44  ;;  %4876 = vmatprep.subr.bf16.mxu0 %v11131_v34  ;;  %v11141_v63 = vld [vmem:[#allocation9 + $0x98] ss:$24 sps:$4 sm:$0xff]   ;;  %v11149_v44 = vld [vmem:[#allocation9 + $0xcc] ss:$24 sps:$4 sm:$0xff]  }
 0x543   :  { %vm418_vm4 = vcmp.gt.f32.partialorder %v391_v57, 0.0  ;;  %v2774_v22 = vmul.f32 %v14286_v62, %v2758_v33  ;;  %11678 = vrcp.f32 %v2722_v3 }
 0x544   :  { %v14413_v37 = vsel %vm418_vm4, 1.0, %v16893_v60 }
 0x545   :  { %17168 = vst [vmem:[#allocation64_spill] sm:$0xff] %v14413_v37  ;;  %v2788_v40 = vpack.c.bf16 %v2774_v22, %v2773_v35  ;;  %4651 = vmatpush1.bf16.msra.mxu1 %v11126_v29  ;;  %4877 = vmatpush1.bf16.msra.mxu0 %v11129_v32  ;;  %v2759_v11 = vmul.f32 %v11673_v12, %v14413_v37  ;;  %v11675_v62 = vpop.eup %11674  ;;  %v11144_v29 = vld [vmem:[#allocation9 + $0xc0] ss:$24 sps:$4 sm:$0xff]   ;;  %v11155_v35 = vld [vmem:[#allocation9 + $0xfc] ss:$24 sps:$4 sm:$0xff]  }
 0x546   :  { %v393_v49 = vpop.xlane.xlu1 %392  ;;  %v2724_v46 = vpop.xlane.xlu0 %2723  ;;  %4652 = vmatprep.subr.bf16.mxu1 %v11134_v56  ;;  %4878 = vmatprep.subr.bf16.mxu0 %v11137_v14  ;;  %v11147_v32 = vld [vmem:[#allocation9 + $0xc8] ss:$24 sps:$4 sm:$0xff]   ;;  %v11152_v14 = vld [vmem:[#allocation9 + $0xf4] ss:$24 sps:$4 sm:$0xff]  }
 0x547   :  { %vm419_vm5 = vcmp.gt.f32.partialorder %v393_v49, 0.0  ;;  %2838 = vmatmul.mubr.bf16.gmra.mrb[100].mxu0 %v2788_v40  ;;  %2951 = vmatmul.mubr.bf16.gmra.mrb[100].mxu1 %v2788_v40  ;;  %v2775_v34 = vmul.f32 %v14295_v59, %v2759_v11  ;;  %11680 = vrcp.f32 %v2724_v46  ;;  %v11158_v46 = vld [vmem:[#allocation9 + $0x124] ss:$24 sps:$4 sm:$0xff]  }
 0x548   :  { %v14417_v27 = vsel %vm419_vm5, 1.0, %v16893_v60  ;;  %2847 = vmatprep.mubr.bf16.mxu0 %v17127_v15  ;;  %2960 = vmatprep.mubr.bf16.mxu1 %v17127_v15 }
 0x549   :  { %17169 = vst [vmem:[#allocation61_spill] sm:$0xff] %v14417_v27  ;;  %v2760_v9 = vmul.f32 %v11675_v62, %v14417_v27  ;;  %4653 = vmatpush1.bf16.msra.mxu1 %v11132_v21  ;;  %4879 = vmatpush1.bf16.msra.mxu0 %v11135_v47  ;;  %v11677_v3 = vpop.eup %11676  ;;  %v11150_v21 = vld [vmem:[#allocation9 + $0xf0] ss:$24 sps:$4 sm:$0xff]  }
 0x54a   :  { %v2726_v25 = vpop.xlane.xlu1 %2725  ;;  %v395_v48 = vpop.xlane.xlu0 %394  ;;  %4654 = vmatprep.subr.bf16.mxu1 %v11140_v26  ;;  %4880 = vmatprep.subr.bf16.mxu0 %v11143_v2  ;;  %v11153_v47 = vld [vmem:[#allocation9 + $0xf8] ss:$24 sps:$4 sm:$0xff]   ;;  %v11161_v26 = vld [vmem:[#allocation9 + $0x12c] ss:$24 sps:$4 sm:$0xff]  }
 0x54b   :  { %vm420_vm6 = vcmp.gt.f32.partialorder %v395_v48, 0.0  ;;  %v2776_v36 = vmul.f32 %v14306_v20, %v2760_v9  ;;  %11682 = vrcp.f32 %v2726_v25 }
 0x54c   :  { %v14425_v28 = vsel %vm420_vm6, 1.0, %v16893_v60 }
 0x54d   :  { %17170 = vst [vmem:[#allocation62_spill] sm:$0xff] %v14425_v28  ;;  %v2789_v33 = vpack.c.bf16 %v2776_v36, %v2775_v34  ;;  %4655 = vmatpush1.bf16.msra.mxu1 %v11138_v10  ;;  %4881 = vmatpush1.bf16.msra.mxu0 %v11141_v63  ;;  %v2761_v59 = vmul.f32 %v11677_v3, %v14425_v28  ;;  %v11679_v20 = vpop.eup %11678  ;;  %v11156_v10 = vld [vmem:[#allocation9 + $0x120] ss:$24 sps:$4 sm:$0xff]   ;;  %v11167_v34 = vld [vmem:[#allocation9 + $0x15c] ss:$24 sps:$4 sm:$0xff]  }
 0x54e   :  { %v397_v57 = vpop.xlane.xlu1 %396  ;;  %v2728_v56 = vpop.xlane.xlu0 %2727  ;;  %4656 = vmatprep.subr.bf16.mxu1 %v11146_v8  ;;  %4882 = vmatprep.subr.bf16.mxu0 %v11149_v44  ;;  %v11159_v63 = vld [vmem:[#allocation9 + $0x128] ss:$24 sps:$4 sm:$0xff]   ;;  %v11164_v44 = vld [vmem:[#allocation9 + $0x154] ss:$24 sps:$4 sm:$0xff]  }
 0x54f   :  { %vm421_vm7 = vcmp.gt.f32.partialorder %v397_v57, 0.0  ;;  %2848 = vmatmul.mubr.bf16.gmra.mrb[104].mxu0 %v2789_v33  ;;  %2961 = vmatmul.mubr.bf16.gmra.mrb[104].mxu1 %v2789_v33  ;;  %v2777_v2 = vmul.f32 %v14317_v23, %v2761_v59  ;;  %11684 = vrcp.f32 %v2728_v56  ;;  %v11170_v56 = vld [vmem:[#allocation9 + $0x184] ss:$24 sps:$4 sm:$0xff]  }
 0x550   :  { %v14429_v22 = vsel %vm421_vm7, 1.0, %v16893_v60  ;;  %2857 = vmatprep.mubr.bf16.mxu0 %v17127_v15  ;;  %2970 = vmatprep.mubr.bf16.mxu1 %v17127_v15 }
 0x551   :  { %17171 = vst [vmem:[#allocation60_spill] sm:$0xff] %v14429_v22  ;;  %v2762_v40 = vmul.f32 %v11679_v20, %v14429_v22  ;;  %4657 = vmatpush1.bf16.msra.mxu1 %v11144_v29  ;;  %4883 = vmatpush1.bf16.msra.mxu0 %v11147_v32  ;;  %v11681_v25 = vpop.eup %11680  ;;  %v11162_v29 = vld [vmem:[#allocation9 + $0x150] ss:$24 sps:$4 sm:$0xff]  }
 0x552   :  { %v2730_v12 = vpop.xlane.xlu1 %2729  ;;  %v399_v49 = vpop.xlane.xlu0 %398  ;;  %4658 = vmatprep.subr.bf16.mxu1 %v11152_v14  ;;  %4884 = vmatprep.subr.bf16.mxu0 %v11155_v35  ;;  %v11165_v32 = vld [vmem:[#allocation9 + $0x158] ss:$24 sps:$4 sm:$0xff]   ;;  %v11173_v14 = vld [vmem:[#allocation9 + $0x18c] ss:$24 sps:$4 sm:$0xff]  }
 0x553   :  { %vm422_vm8 = vcmp.gt.f32.partialorder %v399_v49, 0.0  ;;  %v2778_v11 = vmul.f32 %v14328_v30, %v2762_v40  ;;  %11686 = vrcp.f32 %v2730_v12 }
 0x554   :  { %v14437_v62 = vsel %vm422_vm8, 1.0, %v16893_v60 }
 0x555   :  { %17172 = vst [vmem:[#allocation72_spill] sm:$0xff] %v14437_v62  ;;  %v2790_v9 = vpack.c.bf16 %v2778_v11, %v2777_v2  ;;  %4659 = vmatpush1.bf16.msra.mxu1 %v11150_v21  ;;  %4885 = vmatpush1.bf16.msra.mxu0 %v11153_v47  ;;  %v2763_v23 = vmul.f32 %v11681_v25, %v14437_v62  ;;  %v11683_v30 = vpop.eup %11682  ;;  %v11168_v21 = vld [vmem:[#allocation9 + $0x180] ss:$24 sps:$4 sm:$0xff]   ;;  %v11179_v2 = vld [vmem:[#allocation9 + $0x1bc] ss:$24 sps:$4 sm:$0xff]  }
 0x556   :  { %v401_v48 = vpop.xlane.xlu1 %400  ;;  %v2732_v8 = vpop.xlane.xlu0 %2731  ;;  %4660 = vmatprep.subr.bf16.mxu1 %v11158_v46  ;;  %4886 = vmatprep.subr.bf16.mxu0 %v11161_v26  ;;  %v11171_v47 = vld [vmem:[#allocation9 + $0x188] ss:$24 sps:$4 sm:$0xff]   ;;  %v11176_v26 = vld [vmem:[#allocation9 + $0x1b4] ss:$24 sps:$4 sm:$0xff]  }
 0x557   :  { %vm423_vm9 = vcmp.gt.f32.partialorder %v401_v48, 0.0  ;;  %2858 = vmatmul.mubr.bf16.gmra.mrb[108].mxu0 %v2790_v9  ;;  %2971 = vmatmul.mubr.bf16.gmra.mrb[108].mxu1 %v2790_v9  ;;  %v2779_v35 = vmul.f32 %v14339_v6, %v2763_v23  ;;  %11688 = vrcp.f32 %v2732_v8 }
 0x558   :  { %v14441_v36 = vsel %vm423_vm9, 1.0, %v16893_v60  ;;  %2867 = vmatprep.mubr.bf16.mxu0 %v17127_v15  ;;  %2980 = vmatprep.mubr.bf16.mxu1 %v17127_v15 }
 0x559   :  { %17173 = vst [vmem:[#allocation69_spill] sm:$0xff] %v14441_v36  ;;  %v2764_v33 = vmul.f32 %v11683_v30, %v14441_v36  ;;  %4661 = vmatpush1.bf16.msra.mxu1 %v11156_v10  ;;  %4887 = vmatpush1.bf16.msra.mxu0 %v11159_v63  ;;  %v11685_v12 = vpop.eup %11684  ;;  %v11174_v10 = vld [vmem:[#allocation9 + $0x1b0] ss:$24 sps:$4 sm:$0xff]  }
 0x55a   :  { %v2734_v3 = vpop.xlane.xlu1 %2733  ;;  %v403_v57 = vpop.xlane.xlu0 %402  ;;  %4662 = vmatprep.subr.bf16.mxu1 %v11164_v44  ;;  %4888 = vmatprep.subr.bf16.mxu0 %v11167_v34  ;;  %v11177_v63 = vld [vmem:[#allocation9 + $0x1b8] ss:$24 sps:$4 sm:$0xff]  }
 0x55b   :  { %vm424_vm10 = vcmp.gt.f32.partialorder %v403_v57, 0.0  ;;  %v2780_v59 = vmul.f32 %v14346_v18, %v2764_v33  ;;  %11690 = vrcp.f32 %v2734_v3 }
 0x55c   :  { %v14449_v20 = vsel %vm424_vm10, 1.0, %v16893_v60 }
 0x55d   :  { %17174 = vst [vmem:[#allocation70_spill] sm:$0xff] %v14449_v20  ;;  %v2791_v40 = vpack.c.bf16 %v2780_v59, %v2779_v35  ;;  %4663 = vmatpush1.bf16.msra.mxu1 %v11162_v29  ;;  %4889 = vmatpush1.bf16.msra.mxu0 %v11165_v32  ;;  %v2765_v6 = vmul.f32 %v11685_v12, %v14449_v20  ;;  %v11687_v18 = vpop.eup %11686 }
 0x55e   :  { %v405_v49 = vpop.xlane.xlu1 %404  ;;  %v2736_v46 = vpop.xlane.xlu0 %2735  ;;  %4664 = vmatprep.subr.bf16.mxu1 %v11170_v56  ;;  %4890 = vmatprep.subr.bf16.mxu0 %v11173_v14 }
 0x55f   :  { %vm425_vm11 = vcmp.gt.f32.partialorder %v405_v49, 0.0  ;;  %2868 = vmatmul.mubr.bf16.gmra.mrb[112].mxu0 %v2791_v40  ;;  %2981 = vmatmul.mubr.bf16.gmra.mrb[112].mxu1 %v2791_v40  ;;  %11692 = vrcp.f32 %v2736_v46  ;;  %v2781_v8 = vmul.f32 %v14352_v1, %v2765_v6  ;;  %v11180_v6 = vld [vmem:[#allocation9 + $0x1e0] ss:$24 sps:$4 sm:$0xff]  }
 0x560   :  { %v14453_v11 = vsel %vm425_vm11, 1.0, %v16893_v60  ;;  %2877 = vmatprep.mubr.bf16.mxu0 %v17127_v15  ;;  %2990 = vmatprep.mubr.bf16.mxu1 %v17127_v15 }
 0x561   :  { %17175 = vst [vmem:[#allocation68_spill] sm:$0xff] %v14453_v11  ;;  %v2766_v9 = vmul.f32 %v11687_v18, %v14453_v11  ;;  %4665 = vmatpush1.bf16.msra.mxu1 %v11168_v21  ;;  %4891 = vmatpush1.bf16.msra.mxu0 %v11171_v47  ;;  %v11689_v30 = vpop.eup %11688  ;;  %v11183_v18 = vld [vmem:[#allocation9 + $0x1e8] ss:$24 sps:$4 sm:$0xff]  }
 0x562   :  { %v2738_v25 = vpop.xlane.xlu1 %2737  ;;  %v407_v48 = vpop.xlane.xlu0 %406  ;;  %4666 = vmatprep.subr.bf16.mxu1 %v11176_v26  ;;  %4892 = vmatprep.subr.bf16.mxu0 %v11179_v2  ;;  %v11182_v26 = vld [vmem:[#allocation9 + $0x1e4] ss:$24 sps:$4 sm:$0xff]  }
 0x563   :  { %11694 = vrcp.f32 %v2738_v25  ;;  %vm426_vm12 = vcmp.gt.f32.partialorder %v407_v48, 0.0  ;;  %v2782_v44 = vmul.f32 %v14358_v54, %v2766_v9  ;;  %v11185_v2 = vld [vmem:[#allocation9 + $0x1ec] ss:$24 sps:$4 sm:$0xff]   ;;  %v11189_v25 = vld [vmem:[#allocation9 + $0x218] ss:$24 sps:$4 sm:$0xff]  }
 0x564   :  { %v14461_v34 = vsel %vm426_vm12, 1.0, %v16893_v60  ;;  %v11188_v9 = vld [vmem:[#allocation9 + $0x214] ss:$24 sps:$4 sm:$0xff]   ;;  %v11192_v48 = vld [vmem:[#allocation9 + $0x240] ss:$24 sps:$4 sm:$0xff]  }
 0x565   :  { %17176 = vst [vmem:[#allocation79_spill] sm:$0xff] %v14461_v34  ;;  %v2792_v23 = vpack.c.bf16 %v2782_v44, %v2781_v8  ;;  %4667 = vmatpush1.bf16.msra.mxu1 %v11174_v10  ;;  %4893 = vmatpush1.bf16.msra.mxu0 %v11177_v63  ;;  %v2767_v32 = vmul.f32 %v11689_v30, %v14461_v34  ;;  %v11691_v3 = vpop.eup %11690  ;;  %v11191_v10 = vld [vmem:[#allocation9 + $0x21c] ss:$24 sps:$4 sm:$0xff]   ;;  %v11186_v63 = vld [vmem:[#allocation9 + $0x210] ss:$24 sps:$4 sm:$0xff]  }
 0x566   :  { %v409_v33 = vpop.xlane.xlu1 %408  ;;  %v411_v29 = vpop.xlane.xlu0 %410  ;;  %4668 = vmatprep.subr.bf16.mxu1 %v11182_v26  ;;  %4894 = vmatprep.subr.bf16.mxu0 %v11185_v2  ;;  %v11195_v8 = vld [vmem:[#allocation9 + $0x248] ss:$24 sps:$4 sm:$0xff]   ;;  %v11200_v44 = vld [vmem:[#allocation9 + $0x274] ss:$24 sps:$4 sm:$0xff]  }
 0x567   :  { %vm427_vm13 = vcmp.gt.f32.partialorder %v409_v33, 0.0  ;;  %2878 = vmatmul.mubr.bf16.gmra.mrb[116].mxu0 %v2792_v23  ;;  %2991 = vmatmul.mubr.bf16.gmra.mrb[116].mxu1 %v2792_v23  ;;  %vm428_vm14 = vcmp.gt.f32.partialorder %v411_v29, 0.0  ;;  %v2783_v56 = vmul.f32 %v14364_v5, %v2767_v32  ;;  %v11203_v23 = vld [vmem:[#allocation9 + $0x27c] ss:$24 sps:$4 sm:$0xff]   ;;  %v11198_v30 = vld [vmem:[#allocation9 + $0x270] ss:$24 sps:$4 sm:$0xff]  }
 0x568   :  { %v14465_v57 = vsel %vm427_vm13, 1.0, %v16893_v60  ;;  %2887 = vmatprep.mubr.bf16.mxu0 %v17127_v15  ;;  %3000 = vmatprep.mubr.bf16.mxu1 %v17127_v15  ;;  %v14473_v59 = vsel %vm428_vm14, 1.0, %v16893_v60  ;;  %v11201_v33 = vld [vmem:[#allocation9 + $0x278] ss:$24 sps:$4 sm:$0xff]   ;;  %v11206_v29 = vld [vmem:[#allocation9 + $0x2a4] ss:$24 sps:$4 sm:$0xff]  }
 0x569   :  { %17177 = vst [vmem:[#allocation77_spill] sm:$0xff] %v14465_v57  ;;  %v2768_v1 = vmul.f32 %v11691_v3, %v14465_v57  ;;  %v11693_v35 = vpop.eup %11692  ;;  %17178 = vst [vmem:[#allocation78_spill] sm:$0xff] %v14473_v59  ;;  %4669 = vmatpush1.bf16.msra.mxu1 %v11180_v6  ;;  %4895 = vmatpush1.bf16.msra.mxu0 %v11183_v18  ;;  %v11209_v32 = vld [vmem:[#allocation9 + $0x2ac] ss:$24 sps:$4 sm:$0xff]   ;;  %v11204_v3 = vld [vmem:[#allocation9 + $0x2a0] ss:$24 sps:$4 sm:$0xff]  }
 0x56a   :  { %v413_v54 = vpop.xlane.xlu1 %412  ;;  %v2769_v49 = vmul.f32 %v11693_v35, %v14473_v59  ;;  %4670 = vmatprep.subr.bf16.mxu1 %v11188_v9  ;;  %4896 = vmatprep.subr.bf16.mxu0 %v11191_v10  ;;  %v11213_v35 = vld [vmem:[#allocation9 + $0x2d8] ss:$24 sps:$4 sm:$0xff]  }
 0x56b   :  { %vm429_vm15 = vcmp.gt.f32.partialorder %v413_v54, 0.0  ;;  %v2784_v14 = vmul.f32 %v14369_v16, %v2768_v1  ;;  %v11207_v1 = vld [vmem:[#allocation9 + $0x2a8] ss:$24 sps:$4 sm:$0xff]   ;;  %v11212_v54 = vld [vmem:[#allocation9 + $0x2d4] ss:$24 sps:$4 sm:$0xff]  }
 0x56c   :  { %v14476_v40 = vsel %vm429_vm15, 1.0, %v16893_v60  ;;  %v2785_v16 = vmul.f32 %v14374_v13, %v2769_v49  ;;  %v11194_v13 = vld [vmem:[#allocation9 + $0x244] ss:$24 sps:$4 sm:$0xff]  }
 0x56d   :  { %17179 = vst [vmem:[#allocation76_spill] sm:$0xff] %v14476_v40  ;;  %v11695_v21 = vpop.eup %11694  ;;  %v2793_v47 = vpack.c.bf16 %v2784_v14, %v2783_v56  ;;  %4671 = vmatpush1.bf16.msra.mxu1 %v11186_v63  ;;  %4897 = vmatpush1.bf16.msra.mxu0 %v11189_v25  ;;  %v11215_v56 = vld [vmem:[#allocation9 + $0x2dc] ss:$24 sps:$4 sm:$0xff]   ;;  %v11210_v14 = vld [vmem:[#allocation9 + $0x2d0] ss:$24 sps:$4 sm:$0xff]  }
 0x56e   :  { %v2770_v12 = vmul.f32 %v11695_v21, %v14476_v40  ;;  %4672 = vmatprep.subr.bf16.mxu1 %v11194_v13  ;;  %v11218_v21 = vld [vmem:[#allocation9 + $0x304] ss:$24 sps:$4 sm:$0xff]  }
 0x56f   :  { %2888 = vmatmul.mubr.bf16.gmra.mrb[120].mxu0 %v2793_v47  ;;  %3001 = vmatmul.mubr.bf16.gmra.mrb[120].mxu1 %v2793_v47  ;;  %v11221_v47 = vld [vmem:[#allocation9 + $0x30c] ss:$24 sps:$4 sm:$0xff]  }
 0x570   :  { %2897 = vmatprep.mubr.bf16.mxu0 %v17127_v15  ;;  %3010 = vmatprep.mubr.bf16.mxu1 %v17127_v15  ;;  %v2786_v5 = vmul.f32 %v14379_v19, %v2770_v12  ;;  %v11197_v19 = vld [vmem:[#allocation9 + $0x24c] ss:$24 sps:$4 sm:$0xff]   ;;  %v2008_v12 = vld [vmem:[#allocation8] sm:$0xf] }
 0x571   :  { %4898 = vmatprep.subr.bf16.mxu0 %v11197_v19  ;;  %4673 = vmatpush1.bf16.msra.mxu1 %v11192_v48  ;;  %v2009_v49 = vunpack.c.l.bf16 %v2008_v12  ;;  %v11251_v15 = vld [vmem:[#allocation9 + $0x3fc] ss:$24 sps:$4 sm:$0xff]  }
 0x572   :  { %v2794_v46 = vpack.c.bf16 %v2786_v5, %v2785_v16  ;;  %4899 = vmatpush1.bf16.msra.mxu0 %v11195_v8  ;;  %4674 = vmatprep.subr.bf16.mxu1 %v11200_v44 }
 0x573   :  { %4900 = vmatprep.subr.bf16.mxu0 %v11203_v23  ;;  %v2014_v5 = vrot.slane %v2009_v49, %v17147_v43  ;;  %v2022_v16 = vrot.slane %v2009_v49, %v17145_v58  ;;  %v2026_v63 = vrot.slane %v2009_v49, %v17146_v4 }
 0x575   :  { %4675 = vmatpush1.bf16.msra.mxu1 %v11198_v30  ;;  %v14488_v2 = vrot.slane %v2014_v5, %v17147_v43  ;;  %v14491_v6 = vrot.slane %v2022_v16, %v17147_v43 }
 0x576   :  { %4901 = vmatpush1.bf16.msra.mxu0 %v11201_v33  ;;  %4676 = vmatprep.subr.bf16.mxu1 %v11206_v29 }
 0x577   :  { %2898 = vmatmul.mubr.bf16.gmra.mrb[124].mxu0 %v2794_v46  ;;  %3011 = vmatmul.mubr.bf16.gmra.mrb[124].mxu1 %v2794_v46  ;;  %v17180_v46 = vld [vmem:[#allocation45_spill] sm:$0xff] }
 0x578   :  { %4902 = vmatprep.subr.bf16.mxu0 %v11209_v32  ;;  %v2018_v26 = vrot.slane %v2009_v49, %v17180_v46 }
 0x579   :  { %4677 = vmatpush1.bf16.msra.mxu1 %v11204_v3 }
 0x57a   :  { %4903 = vmatpush1.bf16.msra.mxu0 %v11207_v1  ;;  %4678 = vmatprep.subr.bf16.mxu1 %v11212_v54  ;;  %v14494_v18 = vrot.slane %v2018_v26, %v17147_v43  ;;  %v14510_v1 = vrot.slane %v2026_v63, %v17147_v43 }
 0x57b   :  { %4904 = vmatprep.subr.bf16.mxu0 %v11215_v56 }
 0x57d   :  { %4679 = vmatpush1.bf16.msra.mxu1 %v11210_v14 }
 0x57e   :  { %4905 = vmatpush1.bf16.msra.mxu0 %v11213_v35  ;;  %4761 = vmatprep.subr.bf16.mxu1 %v11218_v21 }
 0x57f   :  { %4987 = vmatprep.subr.bf16.mxu0 %v11221_v47 }
 0x612   :  { %v2829_v9 = vpop.f32.mrb[96].mxu0  ;;  %v2942_v10 = vpop.f32.mrb[96].mxu1 }
 0x613   :  { %v14498_v25 = vadd.f32 %v2829_v9, %v14488_v2  ;;  %v14501_v13 = vadd.f32 %v2942_v10, %v14491_v6  ;;  %v2831_v19 = vpop.f32.mrb[97].mxu0  ;;  %v2944_v48 = vpop.f32.mrb[97].mxu1 }
 0x614   :  { %v14504_v8 = vadd.f32 %v2831_v19, %v14494_v18  ;;  %v2833_v44 = vpop.f32.mrb[98].mxu0  ;;  %v2946_v23 = vpop.f32.mrb[98].mxu1  ;;  %v14523_v49 = vadd.f32 %v2944_v48, %v14510_v1 }
 0x615   :  { %v3085_v30 = vmin.f32 %v14498_v25, 0.0  ;;  %v3087_v33 = vmin.f32 %v14501_v13, 0.0  ;;  %v2835_v29 = vpop.f32.mrb[99].mxu0  ;;  %v2948_v32 = vpop.f32.mrb[99].mxu1  ;;  %v14513_v14 = vadd.f32 %v2833_v44, %v14488_v2  ;;  %v14516_v35 = vadd.f32 %v2946_v23, %v14491_v6 }
 0x616   :  { %v3086_v3 = vmin.f32 %v14504_v8, 0.0  ;;  %v14519_v47 = vadd.f32 %v2835_v29, %v14494_v18  ;;  %vm3021_vm0 = vcmp.gt.f32.partialorder %v14498_v25, 0.0  ;;  %vm3023_vm1 = vcmp.gt.f32.partialorder %v14501_v13, 0.0 }
 0x617   :  { %v3149_v54 = vmul.f32 1.442695, %v3085_v30  ;;  %v3153_v56 = vmul.f32 1.442695, %v3087_v33  ;;  %v3089_v12 = vmin.f32 %v14513_v14, 0.0  ;;  %v3091_v5 = vmin.f32 %v14516_v35, 0.0 }
 0x618   :  { %v3151_v21 = vmul.f32 1.442695, %v3086_v3  ;;  %v3090_v16 = vmin.f32 %v14519_v47, 0.0  ;;  %vm3022_vm2 = vcmp.gt.f32.partialorder %v14504_v8, 0.0  ;;  %vm3025_vm3 = vcmp.gt.f32.partialorder %v14513_v14, 0.0 }
 0x619   :  { %11696 = vpow2.f32 %v3149_v54  ;;  %v3157_v10 = vmul.f32 1.442695, %v3089_v12  ;;  %v3161_v44 = vmul.f32 1.442695, %v3091_v5  ;;  %v14538_v12 = vadd.f32 %v2948_v32, %v14510_v1 }
 0x61a   :  { %11698 = vpow2.f32 %v3153_v56  ;;  %v2839_v26 = vpop.f32.mrb[100].mxu0  ;;  %v2952_v9 = vpop.f32.mrb[100].mxu1  ;;  %v3159_v23 = vmul.f32 1.442695, %v3090_v16  ;;  %v3088_v56 = vmin.f32 %v14523_v49, 0.0  ;;  %vm3027_vm4 = vcmp.gt.f32.partialorder %v14516_v35, 0.0 }
 0x61b   :  { %11700 = vpow2.f32 %v3151_v21  ;;  %v2841_v63 = vpop.f32.mrb[101].mxu0  ;;  %v2954_v19 = vpop.f32.mrb[101].mxu1  ;;  %v14528_v30 = vadd.f32 %v2839_v26, %v14488_v2  ;;  %v14541_v5 = vadd.f32 %v2952_v9, %v14491_v6  ;;  %v3092_v32 = vmin.f32 %v14538_v12, 0.0 }
 0x61c   :  { %v2843_v33 = vpop.f32.mrb[102].mxu0  ;;  %v2956_v29 = vpop.f32.mrb[102].mxu1  ;;  %11702 = vpow2.f32 %v3157_v10  ;;  %v14531_v48 = vadd.f32 %v2841_v63, %v14494_v18  ;;  %v3155_v63 = vmul.f32 1.442695, %v3088_v56  ;;  %vm3026_vm5 = vcmp.gt.f32.partialorder %v14519_v47, 0.0 }
 0x61d   :  { %v2845_v3 = vpop.f32.mrb[103].mxu0  ;;  %v14533_v54 = vpop.f32.mrb[103].mxu1  ;;  %11704 = vpow2.f32 %v3161_v44  ;;  %v3093_v21 = vmin.f32 %v14528_v30, 0.0  ;;  %v14545_v10 = vadd.f32 %v2843_v33, %v14488_v2  ;;  %v3095_v9 = vmin.f32 %v14541_v5, 0.0 }
 0x61e   :  { %11706 = vpow2.f32 %v3159_v23  ;;  %v3094_v26 = vmin.f32 %v14531_v48, 0.0  ;;  %v14548_v40 = vadd.f32 %v2845_v3, %v14494_v18  ;;  %v14561_v3 = vadd.f32 %v2954_v19, %v14510_v1 }
 0x61f   :  { %v3165_v16 = vmul.f32 1.442695, %v3093_v21  ;;  %v3097_v21 = vmin.f32 %v14545_v10, 0.0  ;;  %v3163_v27 = vmul.f32 1.442695, %v3092_v32  ;;  %v14580_v17 = vadd.f32 %v2956_v29, %v14491_v6 }
 0x620   :  { %v3167_v60 = vmul.f32 1.442695, %v3094_v26  ;;  %v3098_v19 = vmin.f32 %v14548_v40, 0.0  ;;  %v3169_v37 = vmul.f32 1.442695, %v3095_v9  ;;  %vm3029_vm6 = vcmp.gt.f32.partialorder %v14528_v30, 0.0 }
 0x621   :  { %11708 = vpow2.f32 %v3165_v16  ;;  %v3173_v20 = vmul.f32 1.442695, %v3097_v21  ;;  %v3096_v21 = vmin.f32 %v14561_v3, 0.0  ;;  %17181 = vst [vmem:[#allocation83_spill] sm:$0xff] %v14580_v17  ;;  %vm3030_vm7 = vcmp.gt.f32.partialorder %v14531_v48, 0.0 }
 0x622   :  { %v2849_v44 = vpop.f32.mrb[104].mxu0  ;;  %v2962_v59 = vpop.f32.mrb[104].mxu1  ;;  %11710 = vpow2.f32 %v3167_v60  ;;  %v3175_v39 = vmul.f32 1.442695, %v3098_v19  ;;  %vm3033_vm8 = vcmp.gt.f32.partialorder %v14545_v10, 0.0  ;;  %vm3034_vm9 = vcmp.gt.f32.partialorder %v14548_v40, 0.0 }
 0x623   :  { %v11697_v23 = vpop.eup %11696  ;;  %v14553_v57 = vpop.f32.mrb[105].mxu0  ;;  %11712 = vpow2.f32 %v3155_v63  ;;  %v14589_v32 = vadd.f32 %v2962_v59, %v14491_v6  ;;  %vm3024_vm10 = vcmp.gt.f32.partialorder %v14523_v49, 0.0 }
 0x624   :  { %v14555_v34 = vpop.f32.mrb[105].mxu1  ;;  %v11699_v33 = vpop.eup %11698  ;;  %v9359_v11 = vadd.f32 -1.0, %v11697_v23  ;;  %11714 = vpow2.f32 %v3173_v20 }
 0x625   :  { %v14563_v56 = vpop.f32.mrb[106].mxu0  ;;  %v14565_v16 = vpop.f32.mrb[106].mxu1  ;;  %v9361_v28 = vadd.f32 -1.0, %v11699_v33  ;;  %v14583_v33 = vadd.f32 %v2849_v44, %v14488_v2  ;;  %11716 = vpow2.f32 %v3175_v39  ;;  %v11219_v44 = vld [vmem:[#allocation9 + $0x308] ss:$24 sps:$4 sm:$0xff]   ;;  %vm3039_vm12 = vcmp.gt.f32.partialorder %v14589_v32, 0.0 }
 0x626   :  { %v11701_v26 = vpop.eup %11700  ;;  %v14568_v36 = vpop.f32.mrb[107].mxu0  ;;  %v3341_v63 = vsel %vm3021_vm0, %v14498_v25, %v9359_v11  ;;  %11718 = vpow2.f32 %v3163_v27  ;;  %v11222_v27 = vld [vmem:[#allocation9 + $0x330] ss:$24 sps:$4 sm:$0xff]   ;;  %v14657_v31 = vadd.f32 %v14563_v56, %v14488_v2 }
 0x627   :  { %v14570_v62 = vpop.f32.mrb[107].mxu1  ;;  %v11703_v22 = vpop.eup %11702  ;;  %v9360_v38 = vadd.f32 -1.0, %v11701_v26  ;;  %v3343_v11 = vsel %vm3023_vm1, %v14501_v13, %v9361_v28  ;;  %11720 = vpow2.f32 %v3169_v37  ;;  %v14675_v56 = vadd.f32 %v14568_v36, %v14494_v18  ;;  %v11231_v36 = vld [vmem:[#allocation9 + $0x368] ss:$24 sps:$4 sm:$0xff]  }
 0x628   :  { %v11705_v23 = vpop.eup %11704  ;;  %v9363_v60 = vadd.f32 -1.0, %v11703_v22  ;;  %vm3037_vm11 = vcmp.gt.f32.partialorder %v14583_v33, 0.0  ;;  %vm3041_vm14 = vcmp.gt.f32.partialorder %v14657_v31, 0.0 }
 0x629   :  { %v11707_v51 = vpop.eup %11706  ;;  %v9365_v41 = vadd.f32 -1.0, %v11705_v23  ;;  %v3342_v28 = vsel %vm3022_vm2, %v14504_v8, %v9360_v38  ;;  %v11224_v23 = vld [vmem:[#allocation9 + $0x334] ss:$24 sps:$4 sm:$0xff]   ;;  %v3099_v38 = vmin.f32 %v14580_v17, 0.0  ;;  %vm3042_vm1 = vcmp.gt.f32.partialorder %v14675_v56, 0.0 }
 0x62a   :  { %v3345_v20 = vsel %vm3025_vm3, %v14513_v14, %v9363_v60  ;;  %v9364_v22 = vadd.f32 -1.0, %v11707_v51  ;;  %v14591_v9 = vpop.f32.mrb[108].mxu0  ;;  %v14593_v26 = vpop.f32.mrb[108].mxu1  ;;  %v14605_v51 = vadd.f32 %v14533_v54, %v14510_v1  ;;  %v11216_v14 = vld [vmem:[#allocation9 + $0x300] ss:$24 sps:$4 sm:$0xff]  }
 0x62b   :  { %v14598_v25 = vpack.c.bf16 %v3345_v20, %v3341_v63  ;;  %v3347_v29 = vsel %vm3027_vm4, %v14516_v35, %v9365_v41  ;;  %v14607_v39 = vpop.f32.mrb[109].mxu0  ;;  %v14609_v59 = vpop.f32.mrb[109].mxu1  ;;  %v3101_v35 = vmin.f32 %v14583_v33, 0.0  ;;  %v3171_v20 = vmul.f32 1.442695, %v3096_v21 }
 0x62c   :  { %17183 = vst [vmem:[#allocation82_spill] sm:$0xff] %v14605_v51  ;;  %v14614_v13 = vpack.c.bf16 %v3347_v29, %v3343_v11  ;;  %v3346_v41 = vsel %vm3026_vm5, %v14519_v47, %v9364_v22  ;;  %v14620_v54 = vpop.f32.mrb[110].mxu0  ;;  %v14622_v19 = vpop.f32.mrb[110].mxu1  ;;  %v3103_v22 = vmin.f32 %v14589_v32, 0.0  ;;  %v11227_v29 = vld [vmem:[#allocation9 + $0x33c] ss:$24 sps:$4 sm:$0xff]   ;;  %v14637_v21 = vadd.f32 %v14553_v57, %v14494_v18 }
 0x62d   :  { %17182 = vst [vmem:[#allocation81_spill] sm:$0xff] %v14598_v25  ;;  %v11709_v60 = vpop.eup %11708  ;;  %v14624_v63 = vpack.c.bf16 %v3346_v41, %v3342_v28  ;;  %v14628_v8 = vpop.f32.mrb[111].mxu0  ;;  %v3181_v47 = vmul.f32 1.442695, %v3101_v35  ;;  %v3100_v28 = vmin.f32 %v14605_v51, 0.0  ;;  %v14641_v41 = vadd.f32 %v14555_v34, %v14510_v1 }
 0x62e   :  { %17184 = vst [vmem:[#allocation80_spill] sm:$0xff] %v14614_v13  ;;  %v14630_v11 = vpop.f32.mrb[111].mxu1  ;;  %v11711_v7 = vpop.eup %11710  ;;  %v11225_v35 = vld [vmem:[#allocation9 + $0x338] ss:$24 sps:$4 sm:$0xff]   ;;  %v9367_v0 = vadd.f32 -1.0, %v11709_v60  ;;  %v3102_v42 = vmin.f32 %v14637_v21, 0.0  ;;  %v14750_v13 = vadd.f32 %v14609_v59, %v14510_v1 }
 0x62f   :  { %17185 = vst [vmem:[#allocation87_spill] sm:$0xff] %v14624_v63  ;;  %4680 = vmatprep.mubr.bf16.mxu1 %v14624_v63  ;;  %4906 = vmatprep.mubr.bf16.mxu0 %v14624_v63  ;;  %v11713_v52 = vpop.eup %11712  ;;  %11722 = vpow2.f32 %v3181_v47  ;;  %v3185_v37 = vmul.f32 1.442695, %v3103_v22  ;;  %v11230_v57 = vld [vmem:[#allocation9 + $0x364] ss:$24 sps:$4 sm:$0xff]   ;;  %v9368_v60 = vadd.f32 -1.0, %v11711_v7 }
 0x630   :  { %4681 = vmatmul.mubr.bf16.vlgmr.msra.gmra.mrb[128].mxu1 %v14598_v25  ;;  %4907 = vmatmul.mubr.bf16.vlgmr.msra.gmra.mrb[160].mxu0 %v14598_v25  ;;  %v11715_v53 = vpop.eup %11714  ;;  %11724 = vpow2.f32 %v3171_v20  ;;  %v3177_v34 = vmul.f32 1.442695, %v3099_v38  ;;  %v3104_v47 = vmin.f32 %v14641_v41, 0.0  ;;  %v3179_v20 = vmul.f32 1.442695, %v3100_v28 }
 0x631   :  { %4762 = vmatpush1.bf16.msra.mxu1 %v11216_v14  ;;  %4988 = vmatpush1.bf16.msra.mxu0 %v11219_v44  ;;  %v9371_v45 = vadd.f32 -1.0, %v11715_v53  ;;  %11726 = vpow2.f32 %v3185_v37  ;;  %v3183_v38 = vmul.f32 1.442695, %v3102_v42  ;;  %v14661_v14 = vadd.f32 %v14565_v16, %v14491_v6  ;;  %v11717_v44 = vpop.eup %11716  ;;  %v11228_v37 = vld [vmem:[#allocation9 + $0x360] ss:$24 sps:$4 sm:$0xff]  }
 0x632   :  { %4763 = vmatprep.subr.bf16.mxu1 %v11224_v23  ;;  %4989 = vmatprep.subr.bf16.mxu0 %v11227_v29  ;;  %v14651_v22 = vpop.f32.mrb[112].mxu0  ;;  %v14653_v24 = vpop.f32.mrb[112].mxu1  ;;  %v3349_v23 = vsel %vm3029_vm6, %v14528_v30, %v9367_v0  ;;  %v3187_v29 = vmul.f32 1.442695, %v3104_v47  ;;  %11728 = vpow2.f32 %v3177_v34  ;;  %v9372_v55 = vadd.f32 -1.0, %v11717_v44 }
 0x633   :  { %v14663_v53 = vpop.f32.mrb[113].mxu0  ;;  %v14665_v7 = vpop.f32.mrb[113].mxu1  ;;  %v3353_v42 = vsel %vm3033_vm8, %v14545_v10, %v9371_v45  ;;  %v14685_v0 = vadd.f32 %v14570_v62, %v14510_v1  ;;  %v9362_v10 = vadd.f32 -1.0, %v11713_v52  ;;  %v3350_v47 = vsel %vm3030_vm7, %v14531_v48, %v9368_v60  ;;  %v11236_v44 = vld [vmem:[#allocation9 + $0x394] ss:$24 sps:$4 sm:$0xff]  }
 0x634   :  { %v14677_v16 = vpop.f32.mrb[114].mxu0  ;;  %v14679_v28 = vpop.f32.mrb[114].mxu1  ;;  %v14681_v50 = vpack.c.bf16 %v3353_v42, %v3349_v23  ;;  %11730 = vpow2.f32 %v3183_v38  ;;  %v3105_v34 = vmin.f32 %v14657_v31, 0.0  ;;  %v3354_v62 = vsel %vm3034_vm9, %v14548_v40, %v9372_v55  ;;  %v11234_v52 = vld [vmem:[#allocation9 + $0x390] ss:$24 sps:$4 sm:$0xff]  }
 0x635   :  { %4764 = vmatpush1.bf16.msra.mxu1 %v11222_v27  ;;  %4990 = vmatpush1.bf16.msra.mxu0 %v11225_v35  ;;  %v14687_v45 = vpop.f32.mrb[115].mxu0  ;;  %v14689_v30 = vpop.f32.mrb[115].mxu1  ;;  %11732 = vpow2.f32 %v3187_v29  ;;  %v3107_v27 = vmin.f32 %v14661_v14, 0.0  ;;  %v3106_v35 = vmin.f32 %v14675_v56, 0.0  ;;  %v11239_v23 = vld [vmem:[#allocation9 + $0x39c] ss:$24 sps:$4 sm:$0xff]   ;;  %v14700_v4 = vpack.c.bf16 %v3354_v62, %v3350_v47 }
 0x636   :  { %17186 = vst [vmem:[#allocation85_spill] sm:$0xff] %v14681_v50  ;;  %4765 = vmatprep.subr.bf16.mxu1 %v11230_v57  ;;  %4991 = vmatprep.subr.bf16.mxu0 %v11233_v61  ;;  %v11719_v42 = vpop.eup %11718  ;;  %11734 = vpow2.f32 %v3179_v20  ;;  %v3189_v48 = vmul.f32 1.442695, %v3105_v34  ;;  %v11237_v60 = vld [vmem:[#allocation9 + $0x398] ss:$24 sps:$4 sm:$0xff]   ;;  %v3108_v58 = vmin.f32 %v14685_v0, 0.0  ;;  %v14705_v55 = vadd.f32 %v14591_v9, %v14488_v2 }
 0x637   :  { %17187 = vst [vmem:[#allocation86_spill] sm:$0xff] %v14700_v4  ;;  %v11242_v57 = vld [vmem:[#allocation9 + $0x3c4] ss:$24 sps:$4 sm:$0xff]   ;;  %v11721_v61 = vpop.eup %11720  ;;  %v3193_v38 = vmul.f32 1.442695, %v3107_v27  ;;  %v14710_v20 = vadd.f32 %v14593_v26, %v14491_v6  ;;  %v14714_v29 = vadd.f32 %v14607_v39, %v14494_v18  ;;  %4690 = vmatprep.mubr.bf16.mxu1 %v14700_v4  ;;  %4916 = vmatprep.mubr.bf16.mxu0 %v14700_v4  ;;  %v14725_v62 = vadd.f32 -1.0, %v11719_v42 }
 0x638   :  { %v3191_v46 = vmul.f32 1.442695, %v3106_v35  ;;  %11736 = vpow2.f32 %v3189_v48  ;;  %v14723_v34 = vsel %vm3024_vm10, %v14523_v49, %v9362_v10  ;;  %v3195_v26 = vmul.f32 1.442695, %v3108_v58  ;;  %4691 = vmatmul.mubr.bf16.gmra.mrb[132].mxu1 %v14681_v50  ;;  %4917 = vmatmul.mubr.bf16.gmra.mrb[164].mxu0 %v14681_v50  ;;  %v11240_v35 = vld [vmem:[#allocation9 + $0x3c0] ss:$24 sps:$4 sm:$0xff]  }
 0x639   :  { %4766 = vmatpush1.bf16.msra.mxu1 %v11228_v37  ;;  %4992 = vmatpush1.bf16.msra.mxu0 %v11231_v36  ;;  %v11723_v40 = vpop.eup %11722  ;;  %v11245_v36 = vld [vmem:[#allocation9 + $0x3cc] ss:$24 sps:$4 sm:$0xff]   ;;  %17188 = vst [vmem:[#allocation84_spill] sm:$0xff] %v14723_v34  ;;  %11738 = vpow2.f32 %v3193_v38  ;;  %v11243_v48 = vld [vmem:[#allocation9 + $0x3c8] ss:$24 sps:$4 sm:$0xff]   ;;  %v3109_v49 = vmin.f32 %v14705_v55, 0.0 }
 0x63a   :  { %v14718_v9 = vpop.f32.mrb[116].mxu0  ;;  %v14720_v37 = vpop.f32.mrb[116].mxu1  ;;  %11740 = vpow2.f32 %v3191_v46  ;;  %v3111_v10 = vmin.f32 %v14710_v20, 0.0  ;;  %4767 = vmatprep.subr.bf16.mxu1 %v11236_v44  ;;  %4993 = vmatprep.subr.bf16.mxu0 %v11239_v23  ;;  %v11248_v38 = vld [vmem:[#allocation9 + $0x3f4] ss:$24 sps:$4 sm:$0xff]   ;;  %v14740_v50 = vadd.f32 -1.0, %v11721_v61 }
 0x63b   :  { %v11725_v47 = vpop.eup %11724  ;;  %v14729_v39 = vpop.f32.mrb[117].mxu0  ;;  %v9375_v4 = vadd.f32 -1.0, %v11723_v40  ;;  %11742 = vpow2.f32 %v3195_v26  ;;  %v3197_v44 = vmul.f32 1.442695, %v3109_v49  ;;  %v3110_v63 = vmin.f32 %v14714_v29, 0.0 }
 0x63c   :  { %v14731_v27 = vpop.f32.mrb[117].mxu1  ;;  %v11727_v43 = vpop.eup %11726  ;;  %v3201_v23 = vmul.f32 1.442695, %v3111_v10  ;;  %v14754_v40 = vadd.f32 -1.0, %v11725_v47  ;;  %v14762_v26 = vadd.f32 %v14622_v19, %v14491_v6  ;;  %v11246_v49 = vld [vmem:[#allocation9 + $0x3f0] ss:$24 sps:$4 sm:$0xff]  }
 0x63d   :  { %v14736_v58 = vpop.f32.mrb[118].mxu0  ;;  %v14738_v42 = vpop.f32.mrb[118].mxu1  ;;  %4768 = vmatpush1.bf16.msra.mxu1 %v11234_v52  ;;  %4994 = vmatpush1.bf16.msra.mxu0 %v11237_v60  ;;  %v9377_v52 = vadd.f32 -1.0, %v11727_v43  ;;  %v14758_v60 = vadd.f32 %v14620_v54, %v14488_v2  ;;  %vm3038_vm13 = vcmp.gt.f32.partialorder %v14637_v21, 0.0  ;;  %11744 = vpow2.f32 %v3197_v44  ;;  %v11249_v43 = vld [vmem:[#allocation9 + $0x3f8] ss:$24 sps:$4 sm:$0xff]  }
 0x63e   :  { %17189 = vst [vmem:[#allocation88_spill] sm:$0xff] %v14738_v42  ;;  %v14743_v46 = vpop.f32.mrb[119].mxu0  ;;  %v14745_v25 = vpop.f32.mrb[119].mxu1  ;;  %4769 = vmatprep.subr.bf16.mxu1 %v11242_v57  ;;  %4995 = vmatprep.subr.bf16.mxu0 %v11245_v36  ;;  %v3199_v59 = vmul.f32 1.442695, %v3110_v63  ;;  %v14768_v57 = vadd.f32 %v14628_v8, %v14494_v18  ;;  %vm3040_vm15 = vcmp.gt.f32.partialorder %v14641_v41, 0.0  ;;  %11746 = vpow2.f32 %v3201_v23 }
 0x63f   :  { %17190 = vst [vmem:[#allocation89_spill] sm:$0xff] %v14743_v46  ;;  %17191 = vst [vmem:[#allocation90_spill] sm:$0xff] %v14745_v25  ;;  %v14752_v61 = vpop.eup %11728  ;;  %vm3043_vm0 = vcmp.gt.f32.partialorder %v14661_v14, 0.0  ;;  %v3112_v54 = vmin.f32 %v14750_v13, 0.0  ;;  %v11254_v19 = vld [vmem:[#allocation9 + $0x424] ss:$24 sps:$4 sm:$0xff]   ;;  %v3357_v63 = vsel %vm3037_vm11, %v14583_v33, %v9375_v4  ;;  %v14796_v25 = vadd.f32 %v14630_v11, %v14510_v1 }
 0x640   :  { %v11731_v10 = vpop.eup %11730  ;;  %vm3044_vm2 = vcmp.gt.f32.partialorder %v14685_v0, 0.0  ;;  %11748 = vpow2.f32 %v3199_v59  ;;  %v3113_v8 = vmin.f32 %v14758_v60, 0.0  ;;  %v3115_v4 = vmin.f32 %v14762_v26, 0.0  ;;  %v11252_v17 = vld [vmem:[#allocation9 + $0x420] ss:$24 sps:$4 sm:$0xff]  }
 0x641   :  { %v11733_v36 = vpop.eup %11732  ;;  %4770 = vmatpush1.bf16.msra.mxu1 %v11240_v35  ;;  %4996 = vmatpush1.bf16.msra.mxu0 %v11243_v48  ;;  %v11257_v35 = vld [vmem:[#allocation9 + $0x42c] ss:$24 sps:$4 sm:$0xff]   ;;  %v3359_v48 = vsel %vm3039_vm12, %v14589_v32, %v9377_v52  ;;  %v9376_v34 = vadd.f32 -1.0, %v11731_v10  ;;  %v3203_v51 = vmul.f32 1.442695, %v3112_v54  ;;  %v14804_v46 = vadd.f32 %v14651_v22, %v14488_v2 }
 0x642   :  { %v14774_v47 = vpop.eup %11734  ;;  %4771 = vmatprep.subr.bf16.mxu1 %v11248_v38  ;;  %4997 = vmatprep.subr.bf16.mxu0 %v11251_v15  ;;  %v14781_v44 = vpop.f32.mrb[120].mxu0  ;;  %v11255_v38 = vld [vmem:[#allocation9 + $0x428] ss:$24 sps:$4 sm:$0xff]   ;;  %v11260_v10 = vld [vmem:[#allocation9 + $0x454] ss:$24 sps:$4 sm:$0xff]   ;;  %vm3045_vm3 = vcmp.gt.f32.partialorder %v14705_v55, 0.0 }
 0x643   :  { %17192 = vst [vmem:[#allocation91_spill] sm:$0xff] %v14774_v47  ;;  %17193 = vst [vmem:[#allocation92_spill] sm:$0xff] %v14781_v44  ;;  %v14783_v23 = vpop.f32.mrb[120].mxu1  ;;  %v14789_v33 = vpop.f32.mrb[121].mxu0  ;;  %v9378_v47 = vadd.f32 -1.0, %v11733_v36  ;;  %11750 = vpow2.f32 %v3203_v51  ;;  %vm3047_vm4 = vcmp.gt.f32.partialorder %v14710_v20, 0.0 }
 0x644   :  { %17194 = vst [vmem:[#allocation93_spill] sm:$0xff] %v14783_v23  ;;  %17195 = vst [vmem:[#allocation94_spill] sm:$0xff] %v14789_v33  ;;  %v14791_v59 = vpop.f32.mrb[121].mxu1  ;;  %v11737_v15 = vpop.eup %11736  ;;  %v3205_v44 = vmul.f32 1.442695, %v3113_v8  ;;  %v3114_v23 = vmin.f32 %v14768_v57, 0.0 }
 0x645   :  { %17196 = vst [vmem:[#allocation95_spill] sm:$0xff] %v14791_v59  ;;  %v14798_v32 = vpop.f32.mrb[122].mxu0  ;;  %v14800_v52 = vpop.f32.mrb[122].mxu1  ;;  %v9379_v33 = vadd.f32 -1.0, %v11737_v15  ;;  %v3209_v59 = vmul.f32 1.442695, %v3115_v4  ;;  %4772 = vmatpush1.bf16.msra.mxu1 %v11246_v49  ;;  %4998 = vmatpush1.bf16.msra.mxu0 %v11249_v43 }
 0x646   :  { %17197 = vst [vmem:[#allocation96_spill] sm:$0xff] %v14798_v32  ;;  %17198 = vst [vmem:[#allocation97_spill] sm:$0xff] %v14800_v52  ;;  %v11739_v54 = vpop.eup %11738  ;;  %v14806_v36 = vpop.f32.mrb[123].mxu0  ;;  %11752 = vpow2.f32 %v3205_v44  ;;  %v3207_v32 = vmul.f32 1.442695, %v3114_v23  ;;  %v14812_v52 = vadd.f32 %v14653_v24, %v14491_v6  ;;  %4773 = vmatprep.subr.bf16.mxu1 %v11254_v19  ;;  %4999 = vmatprep.subr.bf16.mxu0 %v11257_v35  ;;  %v3116_v43 = vmin.f32 %v14796_v25, 0.0 }
 0x647   :  { %v14808_v8 = vpop.f32.mrb[123].mxu1  ;;  %v11741_v11 = vpop.eup %11740  ;;  %v9381_v42 = vadd.f32 -1.0, %v11739_v54  ;;  %v11263_v51 = vld [vmem:[#allocation9 + $0x45c] ss:$24 sps:$4 sm:$0xff]   ;;  %v3361_v22 = vsel %vm3041_vm14, %v14657_v31, %v9379_v33  ;;  %11754 = vpow2.f32 %v3209_v59  ;;  %v3358_v23 = vsel %vm3038_vm13, %v14637_v21, %v9376_v34  ;;  %v11261_v59 = vld [vmem:[#allocation9 + $0x458] ss:$24 sps:$4 sm:$0xff]  }
 0x648   :  { %v11743_v4 = vpop.eup %11742  ;;  %v9380_v49 = vadd.f32 -1.0, %v11741_v11  ;;  %v14819_v44 = vpack.c.bf16 %v3361_v22, %v3357_v63  ;;  %11756 = vpow2.f32 %v3207_v32  ;;  %v3211_v33 = vmul.f32 1.442695, %v3116_v43  ;;  %v11258_v63 = vld [vmem:[#allocation9 + $0x450] ss:$24 sps:$4 sm:$0xff]  }
 0x649   :  { %v3363_v24 = vsel %vm3043_vm0, %v14661_v14, %v9381_v42  ;;  %v9382_v19 = vadd.f32 -1.0, %v11743_v4  ;;  %4774 = vmatpush1.bf16.msra.mxu1 %v11252_v17  ;;  %5000 = vmatpush1.bf16.msra.mxu0 %v11255_v38  ;;  %v11745_v15 = vpop.eup %11744  ;;  %v3360_v14 = vsel %vm3040_vm15, %v14641_v41, %v9378_v47  ;;  %v3117_v34 = vmin.f32 %v14804_v46, 0.0 }
 0x64a   :  { %17199 = vst [vmem:[#allocation98_spill] sm:$0xff] %v14819_v44  ;;  %v14827_v35 = vpack.c.bf16 %v3363_v24, %v3359_v48  ;;  %v3362_v31 = vsel %vm3042_vm1, %v14675_v56, %v9380_v49  ;;  %4775 = vmatprep.subr.bf16.mxu1 %v11260_v10  ;;  %5001 = vmatprep.subr.bf16.mxu0 %v11263_v51  ;;  %v14841_v56 = vpop.f32.mrb[124].mxu0  ;;  %v14843_v17 = vpop.f32.mrb[124].mxu1  ;;  %v11266_v48 = vld [vmem:[#allocation9 + $0x484] ss:$24 sps:$4 sm:$0xff]   ;;  %v9383_v54 = vadd.f32 -1.0, %v11745_v15  ;;  %11758 = vpow2.f32 %v3211_v33 }
 0x64b   :  { %v14835_v42 = vpack.c.bf16 %v3362_v31, %v3358_v23  ;;  %v3364_v21 = vsel %vm3044_vm2, %v14685_v0, %v9382_v19  ;;  %v11747_v38 = vpop.eup %11746  ;;  %v3119_v41 = vmin.f32 %v14812_v52, 0.0  ;;  %v14848_v47 = vpop.f32.mrb[125].mxu0  ;;  %v11269_v0 = vld [vmem:[#allocation9 + $0x48c] ss:$24 sps:$4 sm:$0xff]   ;;  %v3213_v51 = vmul.f32 1.442695, %v3117_v34 }
 0x64c   :  { %17200 = vst [vmem:[#allocation99_spill] sm:$0xff] %v14827_v35  ;;  %v14845_v32 = vpack.c.bf16 %v3364_v21, %v3360_v14  ;;  %v14850_v11 = vpop.f32.mrb[125].mxu1  ;;  %v11749_v4 = vpop.eup %11748  ;;  %v9385_v10 = vadd.f32 -1.0, %v11747_v38  ;;  %v14854_v22 = vadd.f32 %v14663_v53, %v14494_v18  ;;  %v14858_v49 = vadd.f32 %v14665_v7, %v14510_v1  ;;  %v11264_v19 = vld [vmem:[#allocation9 + $0x480] ss:$24 sps:$4 sm:$0xff]  }
 0x64d   :  { %17201 = vst [vmem:[#allocation100_spill] sm:$0xff] %v14835_v42  ;;  %4700 = vmatprep.mubr.bf16.mxu1 %v14835_v42  ;;  %4926 = vmatprep.mubr.bf16.mxu0 %v14835_v42  ;;  %v14862_v43 = vpop.f32.mrb[126].mxu0  ;;  %v14864_v24 = vpop.f32.mrb[126].mxu1  ;;  %v11267_v23 = vld [vmem:[#allocation9 + $0x488] ss:$24 sps:$4 sm:$0xff]   ;;  %vm3046_vm5 = vcmp.gt.f32.partialorder %v14714_v29, 0.0  ;;  %v14871_v53 = vadd.f32 %v14677_v16, %v14488_v2  ;;  %11760 = vpow2.f32 %v3213_v51  ;;  %v14897_v42 = vadd.f32 %v14679_v28, %v14491_v6 }
 0x64e   :  { %17202 = vst [vmem:[#allocation101_spill] sm:$0xff] %v14845_v32  ;;  %vm3049_vm6 = vcmp.gt.f32.partialorder %v14758_v60, 0.0  ;;  %4701 = vmatmul.mubr.bf16.gmra.mrb[136].mxu1 %v14819_v44  ;;  %4927 = vmatmul.mubr.bf16.gmra.mrb[168].mxu0 %v14819_v44  ;;  %v14875_v7 = vpop.f32.mrb[127].mxu0  ;;  %v14877_v31 = vpop.f32.mrb[127].mxu1  ;;  %v11272_v33 = vld [vmem:[#allocation9 + $0x4b4] ss:$24 sps:$4 sm:$0xff]   ;;  %v14901_v35 = vadd.f32 %v14687_v45, %v14494_v18 }
 0x64f   :  { %17203 = vst [vmem:[#allocation102_spill] sm:$0xff] %v14875_v7  ;;  %17204 = vst [vmem:[#allocation103_spill] sm:$0xff] %v14877_v31  ;;  %v9384_v15 = vadd.f32 -1.0, %v11749_v4  ;;  %vm3051_vm7 = vcmp.gt.f32.partialorder %v14762_v26, 0.0  ;;  %v3217_v14 = vmul.f32 1.442695, %v3119_v41  ;;  %4776 = vmatpush1.bf16.msra.mxu1 %v11258_v63  ;;  %5002 = vmatpush1.bf16.msra.mxu0 %v11261_v59  ;;  %v11751_v34 = vpop.eup %11750  ;;  %v3365_v63 = vsel %vm3045_vm3, %v14705_v55, %v9383_v54 }
 0x650   :  { %v3118_v21 = vmin.f32 %v14854_v22, 0.0  ;;  %vm3048_vm8 = vcmp.gt.f32.partialorder %v14750_v13, 0.0  ;;  %vm3050_vm9 = vcmp.gt.f32.partialorder %v14768_v57, 0.0  ;;  %vm3052_vm10 = vcmp.gt.f32.partialorder %v14796_v25, 0.0  ;;  %4777 = vmatprep.subr.bf16.mxu1 %v11266_v48  ;;  %5003 = vmatprep.subr.bf16.mxu0 %v11269_v0  ;;  %v11275_v38 = vld [vmem:[#allocation9 + $0x4bc] ss:$24 sps:$4 sm:$0xff]   ;;  %v11753_v4 = vpop.eup %11752 }
 0x651   :  { %v3120_v16 = vmin.f32 %v14858_v49, 0.0  ;;  %vm3028_vm11 = vcmp.gt.f32.partialorder %v14538_v12, 0.0  ;;  %vm3031_vm12 = vcmp.gt.f32.partialorder %v14541_v5, 0.0  ;;  %v3367_v59 = vsel %vm3047_vm4, %v14710_v20, %v9385_v10  ;;  %v11755_v44 = vpop.eup %11754  ;;  %v11270_v55 = vld [vmem:[#allocation9 + $0x4b0] ss:$24 sps:$4 sm:$0xff]  }
 0x652   :  { %v3215_v41 = vmul.f32 1.442695, %v3118_v21  ;;  %v3121_v51 = vmin.f32 %v14871_v53, 0.0  ;;  %vm3032_vm13 = vcmp.gt.f32.partialorder %v14561_v3, 0.0  ;;  %v9387_v48 = vadd.f32 -1.0, %v11753_v4  ;;  %v11757_v54 = vpop.eup %11756 }
 0x653   :  { %v3219_v0 = vmul.f32 1.442695, %v3120_v16  ;;  %v3366_v20 = vsel %vm3046_vm5, %v14714_v29, %v9384_v15  ;;  %v9389_v10 = vadd.f32 -1.0, %v11755_v44  ;;  %11762 = vpow2.f32 %v3217_v14  ;;  %4778 = vmatpush1.bf16.msra.mxu1 %v11264_v19  ;;  %5004 = vmatpush1.bf16.msra.mxu0 %v11267_v23  ;;  %v11273_v16 = vld [vmem:[#allocation9 + $0x4b8] ss:$24 sps:$4 sm:$0xff]  }
 0x654   :  { %v3221_v21 = vmul.f32 1.442695, %v3121_v51  ;;  %v9386_v4 = vadd.f32 -1.0, %v11751_v34  ;;  %v3369_v28 = vsel %vm3049_vm6, %v14758_v60, %v9387_v48  ;;  %v9388_v32 = vadd.f32 -1.0, %v11757_v54  ;;  %4779 = vmatprep.subr.bf16.mxu1 %v11272_v33  ;;  %5005 = vmatprep.subr.bf16.mxu0 %v11275_v38  ;;  %v11278_v45 = vld [vmem:[#allocation9 + $0x4e4] ss:$24 sps:$4 sm:$0xff]   ;;  %v11759_v19 = vpop.eup %11758 }
 0x655   :  { %11764 = vpow2.f32 %v3215_v41  ;;  %v11281_v31 = vld [vmem:[#allocation9 + $0x4ec] ss:$24 sps:$4 sm:$0xff]   ;;  %v14909_v7 = vpack.c.bf16 %v3369_v28, %v3365_v63  ;;  %v3371_v29 = vsel %vm3051_vm7, %v14762_v26, %v9389_v10  ;;  %v3123_v44 = vmin.f32 %v14897_v42, 0.0  ;;  %v11276_v15 = vld [vmem:[#allocation9 + $0x4e0] ss:$24 sps:$4 sm:$0xff]  }
 0x656   :  { %11766 = vpow2.f32 %v3221_v21  ;;  %v14915_v23 = vpack.c.bf16 %v3371_v29, %v3367_v59  ;;  %v3370_v60 = vsel %vm3050_vm9, %v14768_v57, %v9388_v32  ;;  %v3122_v33 = vmin.f32 %v14901_v35, 0.0  ;;  %v11279_v63 = vld [vmem:[#allocation9 + $0x4e8] ss:$24 sps:$4 sm:$0xff]   ;;  %v11287_v51 = vld [vmem:[#allocation9 + $0x51c] ss:$24 sps:$4 sm:$0xff]  }
 0x657   :  { %11768 = vpow2.f32 %v3219_v0  ;;  %v14921_v14 = vpack.c.bf16 %v3370_v60, %v3366_v20  ;;  %v9390_v34 = vadd.f32 -1.0, %v11759_v19  ;;  %v3225_v38 = vmul.f32 1.442695, %v3123_v44  ;;  %4780 = vmatpush1.bf16.msra.mxu1 %v11270_v55  ;;  %5006 = vmatpush1.bf16.msra.mxu0 %v11273_v16  ;;  %v11282_v0 = vld [vmem:[#allocation9 + $0x510] ss:$24 sps:$4 sm:$0xff]  }
 0x658   :  { %v14925_v26 = vadd.f32 %v14689_v30, %v14510_v1  ;;  %v3223_v59 = vmul.f32 1.442695, %v3122_v33  ;;  %v14929_v41 = vadd.f32 %v14718_v9, %v14488_v2  ;;  %v14933_v57 = vadd.f32 %v14720_v37, %v14491_v6  ;;  %4781 = vmatprep.subr.bf16.mxu1 %v11278_v45  ;;  %5007 = vmatprep.subr.bf16.mxu0 %v11281_v31  ;;  %v11284_v30 = vld [vmem:[#allocation9 + $0x514] ss:$24 sps:$4 sm:$0xff]   ;;  %v11285_v55 = vld [vmem:[#allocation9 + $0x518] ss:$24 sps:$4 sm:$0xff]  }
 0x659   :  { %v14937_v32 = vadd.f32 %v14729_v39, %v14494_v18  ;;  %v3368_v48 = vsel %vm3048_vm8, %v14750_v13, %v9386_v4  ;;  %v3372_v9 = vsel %vm3052_vm10, %v14796_v25, %v9390_v34  ;;  %11770 = vpow2.f32 %v3225_v38  ;;  %4710 = vmatprep.mubr.bf16.mxu1 %v14921_v14  ;;  %4936 = vmatprep.mubr.bf16.mxu0 %v14921_v14  ;;  %v11761_v39 = vpop.eup %11760  ;;  %v11290_v54 = vld [vmem:[#allocation9 + $0x544] ss:$24 sps:$4 sm:$0xff]   ;;  %v11288_v4 = vld [vmem:[#allocation9 + $0x540] ss:$24 sps:$4 sm:$0xff]   ;;  %v11296_v33 = vld [vmem:[#allocation9 + $0x574] ss:$24 sps:$4 sm:$0xff]  }
 0x65a   :  { %v3124_v37 = vmin.f32 %v14925_v26, 0.0  ;;  %v14952_v31 = vsel %vm3028_vm11, %v14538_v12, %v14725_v62  ;;  %v14958_v13 = vsel %vm3031_vm12, %v14541_v5, %v14740_v50  ;;  %v14960_v25 = vpack.c.bf16 %v3372_v9, %v3368_v48  ;;  %4711 = vmatmul.mubr.bf16.gmra.mrb[140].mxu1 %v14909_v7  ;;  %4937 = vmatmul.mubr.bf16.gmra.mrb[172].mxu0 %v14909_v7  ;;  %v11291_v44 = vld [vmem:[#allocation9 + $0x548] ss:$24 sps:$4 sm:$0xff]  }
 0x65b   :  { %11772 = vpow2.f32 %v3223_v59  ;;  %v14968_v12 = vsel %vm3032_vm13, %v14561_v3, %v14754_v40  ;;  %v14971_v62 = vadd.f32 -1.0, %v14752_v61  ;;  %v3125_v5 = vmin.f32 %v14929_v41, 0.0  ;;  %4782 = vmatpush1.bf16.msra.mxu1 %v11276_v15  ;;  %5008 = vmatpush1.bf16.msra.mxu0 %v11279_v63  ;;  %v11293_v3 = vld [vmem:[#allocation9 + $0x54c] ss:$24 sps:$4 sm:$0xff]   ;;  %v17205_v9 = vld [vmem:[#allocation88_spill] sm:$0xff] }
 0x65c   :  { %v3227_v50 = vmul.f32 1.442695, %v3124_v37  ;;  %vm3053_vm14 = vcmp.gt.f32.partialorder %v14804_v46, 0.0  ;;  %vm3055_vm15 = vcmp.gt.f32.partialorder %v14812_v52, 0.0  ;;  %v3127_v20 = vmin.f32 %v14933_v57, 0.0  ;;  %4783 = vmatprep.subr.bf16.mxu1 %v11284_v30  ;;  %5009 = vmatprep.subr.bf16.mxu0 %v11287_v51 }
 0x65d   :  { %v3126_v10 = vmin.f32 %v14937_v32, 0.0  ;;  %v11763_v40 = vpop.eup %11762  ;;  %v9391_v61 = vadd.f32 -1.0, %v11761_v39  ;;  %v3229_v21 = vmul.f32 1.442695, %v3125_v5  ;;  %v14980_v16 = vadd.f32 %v14731_v27, %v14510_v1  ;;  %v17206_v39 = vld [vmem:[#allocation89_spill] sm:$0xff] }
 0x65e   :  { %11774 = vpow2.f32 %v3227_v50  ;;  %vm3054_vm0 = vcmp.gt.f32.partialorder %v14854_v22, 0.0  ;;  %vm3057_vm1 = vcmp.gt.f32.partialorder %v14871_v53, 0.0  ;;  %v3233_v45 = vmul.f32 1.442695, %v3127_v20  ;;  %v17208_v20 = vld [vmem:[#allocation92_spill] sm:$0xff] }
 0x65f   :  { %v11765_v28 = vpop.eup %11764  ;;  %v14986_v29 = vadd.f32 %v14736_v58, %v14488_v2  ;;  %vm3059_vm2 = vcmp.gt.f32.partialorder %v14897_v42, 0.0  ;;  %11776 = vpow2.f32 %v3229_v21  ;;  %v3231_v60 = vmul.f32 1.442695, %v3126_v10  ;;  %4784 = vmatpush1.bf16.msra.mxu1 %v11282_v0  ;;  %5010 = vmatpush1.bf16.msra.mxu0 %v11285_v55  ;;  %v11299_v58 = vld [vmem:[#allocation9 + $0x57c] ss:$24 sps:$4 sm:$0xff]  }
 0x660   :  { %v11767_v19 = vpop.eup %11766  ;;  %v3128_v27 = vmin.f32 %v14980_v16, 0.0  ;;  %v9393_v34 = vadd.f32 -1.0, %v11763_v40  ;;  %vm3058_vm3 = vcmp.gt.f32.partialorder %v14901_v35, 0.0  ;;  %11778 = vpow2.f32 %v3233_v45  ;;  %4785 = vmatprep.subr.bf16.mxu1 %v11290_v54  ;;  %5011 = vmatprep.subr.bf16.mxu0 %v11293_v3  ;;  %v11294_v10 = vld [vmem:[#allocation9 + $0x570] ss:$24 sps:$4 sm:$0xff]  }
 0x661   :  { %v11769_v15 = vpop.eup %11768  ;;  %v9395_v38 = vadd.f32 -1.0, %v11767_v19  ;;  %v3373_v63 = vsel %vm3053_vm14, %v14804_v46, %v9391_v61  ;;  %v9392_v59 = vadd.f32 -1.0, %v11765_v28  ;;  %vm3056_vm4 = vcmp.gt.f32.partialorder %v14858_v49, 0.0  ;;  %v17207_v46 = vld [vmem:[#allocation90_spill] sm:$0xff]  ;;  %v11302_v45 = vld [vmem:[#allocation9 + $0x5a4] ss:$24 sps:$4 sm:$0xff]  }
 0x662   :  { %vm3060_vm5 = vcmp.gt.f32.partialorder %v14925_v26, 0.0  ;;  %v3235_v30 = vmul.f32 1.442695, %v3128_v27  ;;  %v3129_v51 = vmin.f32 %v14986_v29, 0.0  ;;  %v15002_v37 = vadd.f32 %v17205_v9, %v14491_v6  ;;  %v11297_v3 = vld [vmem:[#allocation9 + $0x578] ss:$24 sps:$4 sm:$0xff]  }
 0x663   :  { %v3377_v48 = vsel %vm3057_vm1, %v14871_v53, %v9395_v38  ;;  %v15006_v0 = vadd.f32 %v17206_v39, %v14494_v18  ;;  %v15010_v55 = vadd.f32 %v17207_v46, %v14510_v1  ;;  %v11771_v50 = vpop.eup %11770  ;;  %11780 = vpow2.f32 %v3231_v60  ;;  %4786 = vmatpush1.bf16.msra.mxu1 %v11288_v4  ;;  %5012 = vmatpush1.bf16.msra.mxu0 %v11291_v44  ;;  %v11305_v19 = vld [vmem:[#allocation9 + $0x5ac] ss:$24 sps:$4 sm:$0xff]  }
 0x664   :  { %v15012_v5 = vpack.c.bf16 %v3377_v48, %v3373_v63  ;;  %v3237_v54 = vmul.f32 1.442695, %v3129_v51  ;;  %v15016_v53 = vadd.f32 %v17208_v20, %v14488_v2  ;;  %v3375_v61 = vsel %vm3055_vm15, %v14812_v52, %v9393_v34  ;;  %4787 = vmatprep.subr.bf16.mxu1 %v11296_v33  ;;  %5013 = vmatprep.subr.bf16.mxu0 %v11299_v58  ;;  %v11303_v48 = vld [vmem:[#allocation9 + $0x5a8] ss:$24 sps:$4 sm:$0xff]   ;;  %v11308_v20 = vld [vmem:[#allocation9 + $0x5d4] ss:$24 sps:$4 sm:$0xff]  }
 0x665   :  { %v11773_v40 = vpop.eup %11772  ;;  %v9397_v21 = vadd.f32 -1.0, %v11771_v50  ;;  %11782 = vpow2.f32 %v3235_v30  ;;  %v3131_v28 = vmin.f32 %v15002_v37, 0.0  ;;  %v9394_v60 = vadd.f32 -1.0, %v11769_v15  ;;  %v17209_v46 = vld [vmem:[#allocation93_spill] sm:$0xff]  ;;  %v17210_v50 = vld [vmem:[#allocation94_spill] sm:$0xff] }
 0x666   :  { %v9396_v27 = vadd.f32 -1.0, %v11773_v40  ;;  %11784 = vpow2.f32 %v3237_v54  ;;  %v3130_v4 = vmin.f32 %v15006_v0, 0.0  ;;  %v3374_v44 = vsel %vm3054_vm0, %v14854_v22, %v9392_v59  ;;  %v11300_v22 = vld [vmem:[#allocation9 + $0x5a0] ss:$24 sps:$4 sm:$0xff]  }
 0x667   :  { %v3379_v52 = vsel %vm3059_vm2, %v14897_v42, %v9397_v21  ;;  %v3241_v34 = vmul.f32 1.442695, %v3131_v28  ;;  %v3132_v38 = vmin.f32 %v15010_v55, 0.0  ;;  %v3133_v30 = vmin.f32 %v15016_v53, 0.0  ;;  %4788 = vmatpush1.bf16.msra.mxu1 %v11294_v10  ;;  %5014 = vmatpush1.bf16.msra.mxu0 %v11297_v3  ;;  %v11311_v10 = vld [vmem:[#allocation9 + $0x5dc] ss:$24 sps:$4 sm:$0xff]  }
 0x668   :  { %v11775_v33 = vpop.eup %11774  ;;  %v15030_v58 = vpack.c.bf16 %v3379_v52, %v3375_v61  ;;  %v3378_v15 = vsel %vm3058_vm3, %v14901_v35, %v9396_v27  ;;  %v3239_v63 = vmul.f32 1.442695, %v3130_v4  ;;  %4789 = vmatprep.subr.bf16.mxu1 %v11302_v45  ;;  %5015 = vmatprep.subr.bf16.mxu0 %v11305_v19  ;;  %v15040_v35 = vadd.f32 %v17209_v46, %v14491_v6  ;;  %v17211_v21 = vld [vmem:[#allocation95_spill] sm:$0xff] }
 0x669   :  { %v15036_v59 = vpack.c.bf16 %v3378_v15, %v3374_v44  ;;  %v9398_v51 = vadd.f32 -1.0, %v11775_v33  ;;  %11786 = vpow2.f32 %v3241_v34  ;;  %v3243_v42 = vmul.f32 1.442695, %v3132_v38  ;;  %v11777_v9 = vpop.eup %11776  ;;  %v11306_v45 = vld [vmem:[#allocation9 + $0x5d0] ss:$24 sps:$4 sm:$0xff]  }
 0x66a   :  { %11788 = vpow2.f32 %v3239_v63  ;;  %v3245_v39 = vmul.f32 1.442695, %v3133_v30  ;;  %v15044_v54 = vadd.f32 %v17210_v50, %v14494_v18  ;;  %v11779_v3 = vpop.eup %11778  ;;  %v3376_v40 = vsel %vm3056_vm4, %v14858_v49, %v9394_v60  ;;  %v17212_v19 = vld [vmem:[#allocation91_spill] sm:$0xff]  ;;  %v17216_v50 = vld [vmem:[#allocation97_spill] sm:$0xff] }
 0x66b   :  { %v3380_v61 = vsel %vm3060_vm5, %v14925_v26, %v9398_v51  ;;  %11790 = vpow2.f32 %v3243_v42  ;;  %v15054_v28 = vadd.f32 %v17211_v21, %v14510_v1  ;;  %4720 = vmatprep.mubr.bf16.mxu1 %v15036_v59  ;;  %4946 = vmatprep.mubr.bf16.mxu0 %v15036_v59  ;;  %v15059_v27 = vadd.f32 -1.0, %v17212_v19  ;;  %v11309_v49 = vld [vmem:[#allocation9 + $0x5d8] ss:$24 sps:$4 sm:$0xff]   ;;  %v11314_v44 = vld [vmem:[#allocation9 + $0x14] ss:$24 sps:$4 sm:$0xff]  }
 0x66c   :  { %v15061_v4 = vpack.c.bf16 %v3380_v61, %v3376_v40  ;;  %vm3061_vm6 = vcmp.gt.f32.partialorder %v14929_v41, 0.0  ;;  %vm3063_vm7 = vcmp.gt.f32.partialorder %v14933_v57, 0.0  ;;  %4721 = vmatmul.mubr.bf16.gmra.mrb[144].mxu1 %v15012_v5  ;;  %4947 = vmatmul.mubr.bf16.gmra.mrb[176].mxu0 %v15012_v5  ;;  %v9399_v26 = vadd.f32 -1.0, %v11777_v9  ;;  %v11317_v15 = vld [vmem:[#allocation12 + $0x4] ss:$8 sps:$4 sm:$0xff]  }
 0x66d   :  { %vm3065_vm8 = vcmp.gt.f32.partialorder %v14986_v29, 0.0  ;;  %vm3067_vm9 = vcmp.gt.f32.partialorder %v15002_v37, 0.0  ;;  %v3135_v60 = vmin.f32 %v15040_v35, 0.0  ;;  %4790 = vmatpush1.bf16.msra.mxu1 %v11300_v22  ;;  %5016 = vmatpush1.bf16.msra.mxu0 %v11303_v48  ;;  %v11781_v52 = vpop.eup %11780  ;;  %v9401_v34 = vadd.f32 -1.0, %v11779_v3  ;;  %v17213_v22 = vld [vmem:[#allocation96_spill] sm:$0xff]  ;;  %v17214_v48 = vld [vmem:[#allocation83_spill] sm:$0xff] }
 0x66e   :  { %vm3062_vm10 = vcmp.gt.f32.partialorder %v14937_v32, 0.0  ;;  %11792 = vpow2.f32 %v3245_v39  ;;  %v3134_v38 = vmin.f32 %v15044_v54, 0.0  ;;  %v3136_v33 = vmin.f32 %v15054_v28, 0.0  ;;  %4791 = vmatprep.subr.bf16.mxu1 %v11308_v20  ;;  %5017 = vmatprep.subr.bf16.mxu0 %v11311_v10  ;;  %v17215_v9 = vld [vmem:[#allocation82_spill] sm:$0xff] }
 0x66f   :  { %v11783_v63 = vpop.eup %11782  ;;  %vm3064_vm11 = vcmp.gt.f32.partialorder %v14980_v16, 0.0  ;;  %vm3066_vm12 = vcmp.gt.f32.partialorder %v15006_v0, 0.0  ;;  %vm3068_vm13 = vcmp.gt.f32.partialorder %v15010_v55, 0.0  ;;  %v3249_v30 = vmul.f32 1.442695, %v3135_v60 }
 0x670   :  { %v15078_v51 = vadd.f32 %v17213_v22, %v14488_v2  ;;  %v11785_v42 = vpop.eup %11784  ;;  %vm3035_vm14 = vcmp.gt.f32.partialorder %v17214_v48, 0.0  ;;  %vm3036_vm15 = vcmp.gt.f32.partialorder %v17215_v9, 0.0  ;;  %v3247_v39 = vmul.f32 1.442695, %v3134_v38 }
 0x671   :  { %v3251_v46 = vmul.f32 1.442695, %v3136_v33  ;;  %v15084_v20 = vadd.f32 %v17216_v50, %v14491_v6  ;;  %v15088_v10 = vadd.f32 %v14806_v36, %v14494_v18  ;;  %v3381_v3 = vsel %vm3061_vm6, %v14929_v41, %v9399_v26  ;;  %4792 = vmatpush1.bf16.msra.mxu1 %v11306_v45  ;;  %5018 = vmatpush1.bf16.msra.mxu0 %v11309_v49 }
 0x672   :  { %v9400_v40 = vadd.f32 -1.0, %v11781_v52  ;;  %v9403_v61 = vadd.f32 -1.0, %v11785_v42  ;;  %11794 = vpow2.f32 %v3249_v30  ;;  %v3383_v21 = vsel %vm3063_vm7, %v14933_v57, %v9401_v34  ;;  %5100 = vmatprep.subr.bf16.mxu1 %v11314_v44  ;;  %5779 = vmatprep.subr.bf16.mxu0 %v11317_v15 }
 0x673   :  { %11796 = vpow2.f32 %v3247_v39  ;;  %v3137_v19 = vmin.f32 %v15078_v51, 0.0  ;;  %v3139_v60 = vmin.f32 %v15084_v20, 0.0  ;;  %v11787_v36 = vpop.eup %11786  ;;  %v9402_v38 = vadd.f32 -1.0, %v11783_v63 }
 0x674   :  { %v3385_v41 = vsel %vm3065_vm8, %v14986_v29, %v9403_v61  ;;  %11798 = vpow2.f32 %v3251_v46  ;;  %v3138_v45 = vmin.f32 %v15088_v10, 0.0  ;;  %v11789_v49 = vpop.eup %11788  ;;  %v9405_v57 = vadd.f32 -1.0, %v11787_v36 }
 0x675   :  { %v15102_v26 = vpack.c.bf16 %v3385_v41, %v3381_v3  ;;  %v3253_v52 = vmul.f32 1.442695, %v3137_v19  ;;  %v3257_v34 = vmul.f32 1.442695, %v3139_v60  ;;  %v11791_v33 = vpop.eup %11790  ;;  %v9404_v30 = vadd.f32 -1.0, %v11789_v49 }
 0x676   :  { %v3255_v22 = vmul.f32 1.442695, %v3138_v45  ;;  %v15106_v44 = vadd.f32 %v14808_v8, %v14510_v1  ;;  %v15110_v15 = vadd.f32 %v14841_v56, %v14488_v2  ;;  %v3387_v29 = vsel %vm3067_vm9, %v15002_v37, %v9405_v57 }
 0x677   :  { %v9406_v63 = vadd.f32 -1.0, %v11791_v33  ;;  %11800 = vpow2.f32 %v3253_v52  ;;  %v15117_v42 = vadd.f32 %v14843_v17, %v14491_v6  ;;  %v3382_v39 = vsel %vm3062_vm10, %v14937_v32, %v9400_v40 }
 0x678   :  { %v15122_v8 = vpack.c.bf16 %v3387_v29, %v3383_v21  ;;  %v3386_v56 = vsel %vm3066_vm12, %v15006_v0, %v9404_v30  ;;  %11802 = vpow2.f32 %v3257_v34  ;;  %v11793_v46 = vpop.eup %11792  ;;  %v3384_v37 = vsel %vm3064_vm11, %v14980_v16, %v9402_v38  ;;  %v17217_v29 = vld [vmem:[#allocation102_spill] sm:$0xff] }
 0x679   :  { %v15130_v50 = vpack.c.bf16 %v3386_v56, %v3382_v39  ;;  %v3388_v17 = vsel %vm3068_vm13, %v15010_v55, %v9406_v63  ;;  %11804 = vpow2.f32 %v3255_v22  ;;  %v15139_v32 = vsel %vm3035_vm14, %v17214_v48, %v14971_v62  ;;  %v17218_v56 = vld [vmem:[#allocation103_spill] sm:$0xff] }
 0x67a   :  { %v15145_v0 = vsel %vm3036_vm15, %v17215_v9, %v15059_v27  ;;  %v15147_v16 = vpack.c.bf16 %v3388_v17, %v3384_v37  ;;  %v3140_v3 = vmin.f32 %v15106_v44, 0.0  ;;  %vm3069_vm0 = vcmp.gt.f32.partialorder %v15016_v53, 0.0 }
 0x67b   :  { %v3141_v55 = vmin.f32 %v15110_v15, 0.0  ;;  %v3143_v40 = vmin.f32 %v15117_v42, 0.0  ;;  %v15155_v62 = vadd.f32 %v14848_v47, %v14494_v18  ;;  %4730 = vmatprep.mubr.bf16.mxu1 %v15130_v50  ;;  %4956 = vmatprep.mubr.bf16.mxu0 %v15130_v50  ;;  %v9407_v48 = vadd.f32 -1.0, %v11793_v46 }
 0x67c   :  { %v11795_v27 = vpop.eup %11794  ;;  %vm3071_vm1 = vcmp.gt.f32.partialorder %v15040_v35, 0.0  ;;  %v3259_v9 = vmul.f32 1.442695, %v3140_v3  ;;  %v15162_v61 = vadd.f32 %v14850_v11, %v14510_v1  ;;  %4731 = vmatmul.mubr.bf16.gmra.mrb[148].mxu1 %v15102_v26  ;;  %4957 = vmatmul.mubr.bf16.gmra.mrb[180].mxu0 %v15102_v26  ;;  %vm3070_vm2 = vcmp.gt.f32.partialorder %v15044_v54, 0.0 }
 0x67d   :  { %v11797_v21 = vpop.eup %11796  ;;  %v9409_v47 = vadd.f32 -1.0, %v11795_v27  ;;  %v3261_v19 = vmul.f32 1.442695, %v3141_v55  ;;  %v15169_v60 = vadd.f32 %v14862_v43, %v14488_v2  ;;  %v3265_v38 = vmul.f32 1.442695, %v3143_v40 }
 0x67e   :  { %v11799_v36 = vpop.eup %11798  ;;  %11806 = vpow2.f32 %v3259_v9  ;;  %v3142_v41 = vmin.f32 %v15155_v62, 0.0  ;;  %v15174_v11 = vadd.f32 %v14864_v24, %v14491_v6  ;;  %vm3073_vm3 = vcmp.gt.f32.partialorder %v15078_v51, 0.0 }
 0x67f   :  { %vm3075_vm4 = vcmp.gt.f32.partialorder %v15084_v20, 0.0  ;;  %vm3074_vm5 = vcmp.gt.f32.partialorder %v15088_v10, 0.0  ;;  %v3144_v45 = vmin.f32 %v15162_v61, 0.0  ;;  %v3389_v2 = vsel %vm3069_vm0, %v15016_v53, %v9407_v48 }
 0x680   :  { %v3391_v43 = vsel %vm3071_vm1, %v15040_v35, %v9409_v47  ;;  %v9408_v49 = vadd.f32 -1.0, %v11797_v21  ;;  %v3263_v57 = vmul.f32 1.442695, %v3142_v41  ;;  %v9410_v24 = vadd.f32 -1.0, %v11799_v36 }
 0x681   :  { %v11801_v6 = vpop.eup %11800  ;;  %11808 = vpow2.f32 %v3261_v19  ;;  %v3267_v52 = vmul.f32 1.442695, %v3144_v45  ;;  %v3145_v34 = vmin.f32 %v15169_v60, 0.0  ;;  %v3147_v22 = vmin.f32 %v15174_v11, 0.0 }
 0x682   :  { %v11803_v33 = vpop.eup %11802  ;;  %v9411_v30 = vadd.f32 -1.0, %v11801_v6  ;;  %11810 = vpow2.f32 %v3265_v38  ;;  %v15190_v53 = vadd.f32 %v17217_v29, %v14494_v18  ;;  %v15194_v46 = vadd.f32 %v17218_v56, %v14510_v1 }
 0x683   :  { %v11805_v63 = vpop.eup %11804  ;;  %v9413_v39 = vadd.f32 -1.0, %v11803_v33  ;;  %11812 = vpow2.f32 %v3263_v57  ;;  %v3269_v35 = vmul.f32 1.442695, %v3145_v34  ;;  %v3273_v3 = vmul.f32 1.442695, %v3147_v22 }
 0x684   :  { %v3393_v37 = vsel %vm3073_vm3, %v15078_v51, %v9411_v30  ;;  %v9412_v17 = vadd.f32 -1.0, %v11805_v63  ;;  %11814 = vpow2.f32 %v3267_v52  ;;  %v3146_v40 = vmin.f32 %v15190_v53, 0.0 }
 0x685   :  { %v15199_v55 = vpack.c.bf16 %v3393_v37, %v3389_v2  ;;  %v3395_v18 = vsel %vm3075_vm4, %v15084_v20, %v9413_v39  ;;  %11816 = vpow2.f32 %v3269_v35  ;;  %v3390_v1 = vsel %vm3070_vm2, %v15044_v54, %v9408_v49  ;;  %v17219_v20 = vld [vmem:[#allocation84_spill] sm:$0xff] }
 0x686   :  { %v15208_v27 = vpack.c.bf16 %v3395_v18, %v3391_v43  ;;  %v3394_v51 = vsel %vm3074_vm5, %v15088_v10, %v9412_v17  ;;  %11818 = vpow2.f32 %v3273_v3  ;;  %v3271_v9 = vmul.f32 1.442695, %v3146_v40  ;;  %v11320_v3 = vld [vmem:[#allocation9 + $0x44] ss:$24 sps:$4 sm:$0xff]  }
 0x687   :  { %v15213_v48 = vpack.c.bf16 %v3394_v51, %v3390_v1  ;;  %v3148_v21 = vmin.f32 %v15194_v46, 0.0  ;;  %v15218_v47 = vpack.c.bf16 %v14952_v31, %v17219_v20  ;;  %v15222_v54 = vpack.c.bf16 %v15145_v0, %v14968_v12  ;;  %v17220_v18 = vld [vmem:[#allocation80_spill] sm:$0xff]  ;;  %v11326_v1 = vld [vmem:[#allocation9 + $0x74] ss:$24 sps:$4 sm:$0xff]  }
 0x688   :  { %v11807_v19 = vpop.eup %11806  ;;  %v15226_v36 = vpack.c.bf16 %v15139_v32, %v14958_v13  ;;  %11820 = vpow2.f32 %v3271_v9  ;;  %vm3072_vm6 = vcmp.gt.f32.partialorder %v15054_v28, 0.0  ;;  %vm3076_vm7 = vcmp.gt.f32.partialorder %v15106_v44, 0.0  ;;  %v11321_v40 = vld [vmem:[#allocation12 + $0x10] ss:$8 sps:$4 sm:$0xff]   ;;  %v11329_v51 = vld [vmem:[#allocation12 + $0x24] ss:$8 sps:$4 sm:$0xff]  }
 0x689   :  { %v9414_v10 = vadd.f32 -1.0, %v11807_v19  ;;  %v3275_v38 = vmul.f32 1.442695, %v3148_v21  ;;  %4740 = vmatprep.mubr.bf16.mxu1 %v15213_v48  ;;  %4966 = vmatprep.mubr.bf16.mxu0 %v15213_v48  ;;  %v3392_v12 = vsel %vm3072_vm6, %v15054_v28, %v9410_v24  ;;  %vm3077_vm8 = vcmp.gt.f32.partialorder %v15110_v15, 0.0  ;;  %v11324_v9 = vld [vmem:[#allocation9 + $0x70] ss:$24 sps:$4 sm:$0xff]  }
 0x68a   :  { %4741 = vmatmul.mubr.bf16.gmra.mrb[152].mxu1 %v15199_v55  ;;  %4967 = vmatmul.mubr.bf16.gmra.mrb[184].mxu0 %v15199_v55  ;;  %vm3079_vm9 = vcmp.gt.f32.partialorder %v15117_v42, 0.0  ;;  %vm3081_vm10 = vcmp.gt.f32.partialorder %v15169_v60, 0.0  ;;  %vm3083_vm11 = vcmp.gt.f32.partialorder %v15174_v11, 0.0  ;;  %vm3078_vm12 = vcmp.gt.f32.partialorder %v15155_v62, 0.0  ;;  %v11327_v21 = vld [vmem:[#allocation12 + $0x20] ss:$8 sps:$4 sm:$0xff]  }
 0x68b   :  { %v11809_v31 = vpop.eup %11808  ;;  %v3396_v13 = vsel %vm3076_vm7, %v15106_v44, %v9414_v10  ;;  %11822 = vpow2.f32 %v3275_v38  ;;  %vm3082_vm13 = vcmp.gt.f32.partialorder %v15190_v53, 0.0  ;;  %vm3080_vm14 = vcmp.gt.f32.partialorder %v15162_v61, 0.0  ;;  %v11332_v20 = vld [vmem:[#allocation9 + $0xa4] ss:$24 sps:$4 sm:$0xff]   ;;  %v11330_v38 = vld [vmem:[#allocation9 + $0xa0] ss:$24 sps:$4 sm:$0xff]  }
 0x68c   :  { %v11811_v32 = vpop.eup %11810  ;;  %v15236_v0 = vpack.c.bf16 %v3396_v13, %v3392_v12  ;;  %v9415_v2 = vadd.f32 -1.0, %v11809_v31  ;;  %vm3084_vm15 = vcmp.gt.f32.partialorder %v15194_v46, 0.0  ;;  %v11335_v19 = vld [vmem:[#allocation12 + $0x34] ss:$8 sps:$4 sm:$0xff]   ;;  %v11333_v31 = vld [vmem:[#allocation12 + $0x30] ss:$8 sps:$4 sm:$0xff]  }
 0x68d   :  { %v11813_v41 = vpop.eup %11812  ;;  %v9417_v49 = vadd.f32 -1.0, %v11811_v32  ;;  %v17221_v10 = vld [vmem:[#allocation101_spill] sm:$0xff]  ;;  %v11338_v12 = vld [vmem:[#allocation9 + $0xd4] ss:$24 sps:$4 sm:$0xff]  }
 0x68e   :  { %v11815_v45 = vpop.eup %11814  ;;  %v3397_v44 = vsel %vm3077_vm8, %v15110_v15, %v9415_v2  ;;  %v9416_v24 = vadd.f32 -1.0, %v11813_v41  ;;  %v11341_v13 = vld [vmem:[#allocation12 + $0x44] ss:$8 sps:$4 sm:$0xff]   ;;  %v11339_v41 = vld [vmem:[#allocation12 + $0x40] ss:$8 sps:$4 sm:$0xff]  }
 0x68f   :  { %v11817_v43 = vpop.eup %11816  ;;  %v3399_v33 = vsel %vm3079_vm9, %v15117_v42, %v9417_v49  ;;  %v9418_v29 = vadd.f32 -1.0, %v11815_v45  ;;  %v11336_v32 = vld [vmem:[#allocation9 + $0xd0] ss:$24 sps:$4 sm:$0xff]   ;;  %v11344_v45 = vld [vmem:[#allocation9 + $0x104] ss:$24 sps:$4 sm:$0xff]  }
 0x690   :  { %v11819_v57 = vpop.eup %11818  ;;  %v9419_v6 = vadd.f32 -1.0, %v11817_v43  ;;  %v3398_v15 = vsel %vm3078_vm12, %v15155_v62, %v9416_v24  ;;  %v11312_v62 = vld [vmem:[#allocation9 + $0x10] ss:$24 sps:$4 sm:$0xff]   ;;  %v11347_v2 = vld [vmem:[#allocation12 + $0x54] ss:$8 sps:$4 sm:$0xff]  }
 0x691   :  { %v9421_v28 = vadd.f32 -1.0, %v11819_v57  ;;  %v17222_v43 = vld [vmem:[#allocation99_spill] sm:$0xff]  ;;  %v11351_v24 = vld [vmem:[#allocation12 + $0x60] ss:$8 sps:$4 sm:$0xff]  }
 0x692   :  { %v3401_v52 = vsel %vm3081_vm10, %v15169_v60, %v9419_v6  ;;  %v11821_v34 = vpop.eup %11820  ;;  %v11342_v49 = vld [vmem:[#allocation9 + $0x100] ss:$24 sps:$4 sm:$0xff]   ;;  %v11350_v6 = vld [vmem:[#allocation9 + $0x134] ss:$24 sps:$4 sm:$0xff]  }
 0x693   :  { %v15245_v30 = vpack.c.bf16 %v3401_v52, %v3397_v44  ;;  %v3403_v22 = vsel %vm3083_vm11, %v15174_v11, %v9421_v28  ;;  %v9420_v39 = vadd.f32 -1.0, %v11821_v34  ;;  %v3400_v11 = vsel %vm3080_vm14, %v15162_v61, %v9418_v29  ;;  %v11323_v61 = vld [vmem:[#allocation12 + $0x14] ss:$8 sps:$4 sm:$0xff]   ;;  %v11345_v57 = vld [vmem:[#allocation12 + $0x50] ss:$8 sps:$4 sm:$0xff]  }
 0x694   :  { %v15248_v63 = vpack.c.bf16 %v3403_v22, %v3399_v33  ;;  %v11353_v28 = vld [vmem:[#allocation12 + $0x64] ss:$8 sps:$4 sm:$0xff]   ;;  %v11356_v52 = vld [vmem:[#allocation9 + $0x164] ss:$24 sps:$4 sm:$0xff]   ;;  %v11354_v33 = vld [vmem:[#allocation9 + $0x160] ss:$24 sps:$4 sm:$0xff]  }
 0x695   :  { %v11823_v35 = vpop.eup %11822  ;;  %v3402_v60 = vsel %vm3082_vm13, %v15190_v53, %v9420_v39  ;;  %v11315_v53 = vld [vmem:[#allocation12] ss:$8 sps:$4 sm:$0xff]   ;;  %v11359_v34 = vld [vmem:[#allocation12 + $0x74] ss:$8 sps:$4 sm:$0xff]   ;;  %v11357_v22 = vld [vmem:[#allocation12 + $0x70] ss:$8 sps:$4 sm:$0xff]  }
 0x696   :  { %v9422_v56 = vadd.f32 -1.0, %v11823_v35  ;;  %v15255_v42 = vpack.c.bf16 %v3402_v60, %v3398_v15  ;;  %v11348_v44 = vld [vmem:[#allocation9 + $0x130] ss:$24 sps:$4 sm:$0xff]   ;;  %v11362_v29 = vld [vmem:[#allocation9 + $0x194] ss:$24 sps:$4 sm:$0xff]  }
 0x697   :  { %v11365_v39 = vld [vmem:[#allocation12 + $0x84] ss:$8 sps:$4 sm:$0xff]   ;;  %v11363_v15 = vld [vmem:[#allocation12 + $0x80] ss:$8 sps:$4 sm:$0xff]  }
 0x698   :  { %v3404_v37 = vsel %vm3084_vm15, %v15194_v46, %v9422_v56  ;;  %4750 = vmatprep.mubr.bf16.mxu1 %v15255_v42  ;;  %4976 = vmatprep.mubr.bf16.mxu0 %v15255_v42  ;;  %v11318_v46 = vld [vmem:[#allocation9 + $0x40] ss:$24 sps:$4 sm:$0xff]   ;;  %v11360_v35 = vld [vmem:[#allocation9 + $0x190] ss:$24 sps:$4 sm:$0xff]   ;;  %v11368_v60 = vld [vmem:[#allocation9 + $0x1c4] ss:$24 sps:$4 sm:$0xff]  }
 0x699   :  { %v15260_v17 = vpack.c.bf16 %v3404_v37, %v3400_v11  ;;  %4751 = vmatmul.mubr.bf16.gmra.mrb[156].mxu1 %v15245_v30  ;;  %4977 = vmatmul.mubr.bf16.gmra.mrb[188].mxu0 %v15245_v30  ;;  %v11371_v56 = vld [vmem:[#allocation12 + $0x94] ss:$8 sps:$4 sm:$0xff]   ;;  %v11369_v37 = vld [vmem:[#allocation12 + $0x90] ss:$8 sps:$4 sm:$0xff]  }
 0x69a   :  { %4793 = vmatprep.mubr.bf16.mxu1 %v15218_v47  ;;  %5019 = vmatprep.mubr.bf16.mxu0 %v15218_v47  ;;  %v11366_v11 = vld [vmem:[#allocation9 + $0x1c0] ss:$24 sps:$4 sm:$0xff]  }
 0x6a1   :  { %4794 = vmatmul.mubr.bf16.vlgmr.msra.gmra.mrb[128].mxu1 %v17220_v18  ;;  %5020 = vmatmul.mubr.bf16.vlgmr.msra.gmra.mrb[160].mxu0 %v17220_v18 }
 0x6a2   :  { %4803 = vmatprep.mubr.bf16.mxu1 %v15222_v54  ;;  %5029 = vmatprep.mubr.bf16.mxu0 %v15222_v54 }
 0x6a3   :  { %5101 = vmatpush1.bf16.msra.mxu1 %v11312_v62  ;;  %5780 = vmatpush1.bf16.msra.mxu0 %v11315_v53  ;;  %v11374_v62 = vld [vmem:[#allocation9 + $0x1f4] ss:$24 sps:$4 sm:$0xff]  }
 0x6a4   :  { %5102 = vmatprep.subr.bf16.mxu1 %v11320_v3  ;;  %5781 = vmatprep.subr.bf16.mxu0 %v11323_v61  ;;  %v11377_v53 = vld [vmem:[#allocation12 + $0xa4] ss:$8 sps:$4 sm:$0xff]   ;;  %v11375_v61 = vld [vmem:[#allocation12 + $0xa0] ss:$8 sps:$4 sm:$0xff]  }
 0x6a5   :  { %v11372_v3 = vld [vmem:[#allocation9 + $0x1f0] ss:$24 sps:$4 sm:$0xff]  }
 0x6a7   :  { %5103 = vmatpush1.bf16.msra.mxu1 %v11318_v46  ;;  %5782 = vmatpush1.bf16.msra.mxu0 %v11321_v40  ;;  %v11380_v46 = vld [vmem:[#allocation9 + $0x224] ss:$24 sps:$4 sm:$0xff]  }
 0x6a8   :  { %5104 = vmatprep.subr.bf16.mxu1 %v11326_v1  ;;  %5783 = vmatprep.subr.bf16.mxu0 %v11329_v51  ;;  %v11383_v40 = vld [vmem:[#allocation12 + $0xb4] ss:$8 sps:$4 sm:$0xff]   ;;  %v11381_v51 = vld [vmem:[#allocation12 + $0xb0] ss:$8 sps:$4 sm:$0xff]  }
 0x6a9   :  { %4804 = vmatmul.mubr.bf16.gmra.mrb[132].mxu1 %v15226_v36  ;;  %5030 = vmatmul.mubr.bf16.gmra.mrb[164].mxu0 %v15226_v36  ;;  %v11378_v1 = vld [vmem:[#allocation9 + $0x220] ss:$24 sps:$4 sm:$0xff]  }
 0x6aa   :  { %4813 = vmatprep.mubr.bf16.mxu1 %v17221_v10  ;;  %5039 = vmatprep.mubr.bf16.mxu0 %v17221_v10 }
 0x6ab   :  { %5105 = vmatpush1.bf16.msra.mxu1 %v11324_v9  ;;  %5784 = vmatpush1.bf16.msra.mxu0 %v11327_v21  ;;  %v11386_v9 = vld [vmem:[#allocation9 + $0x254] ss:$24 sps:$4 sm:$0xff]  }
 0x6ac   :  { %5106 = vmatprep.subr.bf16.mxu1 %v11332_v20  ;;  %5785 = vmatprep.subr.bf16.mxu0 %v11335_v19  ;;  %v11389_v21 = vld [vmem:[#allocation12 + $0xc4] ss:$8 sps:$4 sm:$0xff]   ;;  %v11387_v19 = vld [vmem:[#allocation12 + $0xc0] ss:$8 sps:$4 sm:$0xff]  }
 0x6ad   :  { %v11384_v20 = vld [vmem:[#allocation9 + $0x250] ss:$24 sps:$4 sm:$0xff]  }
 0x6af   :  { %5107 = vmatpush1.bf16.msra.mxu1 %v11330_v38  ;;  %5786 = vmatpush1.bf16.msra.mxu0 %v11333_v31  ;;  %v11392_v38 = vld [vmem:[#allocation9 + $0x284] ss:$24 sps:$4 sm:$0xff]  }
 0x6b0   :  { %5108 = vmatprep.subr.bf16.mxu1 %v11338_v12  ;;  %5787 = vmatprep.subr.bf16.mxu0 %v11341_v13  ;;  %v11395_v31 = vld [vmem:[#allocation12 + $0xd4] ss:$8 sps:$4 sm:$0xff]   ;;  %v11393_v13 = vld [vmem:[#allocation12 + $0xd0] ss:$8 sps:$4 sm:$0xff]  }
 0x6b1   :  { %4814 = vmatmul.mubr.bf16.gmra.mrb[136].mxu1 %v17222_v43  ;;  %5040 = vmatmul.mubr.bf16.gmra.mrb[168].mxu0 %v17222_v43  ;;  %v11390_v12 = vld [vmem:[#allocation9 + $0x280] ss:$24 sps:$4 sm:$0xff]  }
 0x6b2   :  { %4823 = vmatprep.mubr.bf16.mxu1 %v14960_v25  ;;  %5049 = vmatprep.mubr.bf16.mxu0 %v14960_v25 }
 0x6b3   :  { %5109 = vmatpush1.bf16.msra.mxu1 %v11336_v32  ;;  %5788 = vmatpush1.bf16.msra.mxu0 %v11339_v41  ;;  %v11398_v32 = vld [vmem:[#allocation9 + $0x2b4] ss:$24 sps:$4 sm:$0xff]  }
 0x6b4   :  { %5110 = vmatprep.subr.bf16.mxu1 %v11344_v45  ;;  %5789 = vmatprep.subr.bf16.mxu0 %v11347_v2  ;;  %v11401_v41 = vld [vmem:[#allocation12 + $0xe4] ss:$8 sps:$4 sm:$0xff]   ;;  %v11399_v2 = vld [vmem:[#allocation12 + $0xe0] ss:$8 sps:$4 sm:$0xff]  }
 0x6b5   :  { %v11396_v45 = vld [vmem:[#allocation9 + $0x2b0] ss:$24 sps:$4 sm:$0xff]  }
 0x6b7   :  { %5111 = vmatpush1.bf16.msra.mxu1 %v11342_v49  ;;  %5790 = vmatpush1.bf16.msra.mxu0 %v11345_v57  ;;  %v11404_v49 = vld [vmem:[#allocation9 + $0x2e4] ss:$24 sps:$4 sm:$0xff]  }
 0x6b8   :  { %5112 = vmatprep.subr.bf16.mxu1 %v11350_v6  ;;  %5791 = vmatprep.subr.bf16.mxu0 %v11353_v28  ;;  %v11407_v57 = vld [vmem:[#allocation12 + $0xf4] ss:$8 sps:$4 sm:$0xff]   ;;  %v17223_v6 = vld [vmem:[#allocation87_spill] sm:$0xff] }
 0x6b9   :  { %4824 = vmatmul.mubr.bf16.gmra.mrb[140].mxu1 %v14915_v23  ;;  %5050 = vmatmul.mubr.bf16.gmra.mrb[172].mxu0 %v14915_v23  ;;  %v11402_v28 = vld [vmem:[#allocation9 + $0x2e0] ss:$24 sps:$4 sm:$0xff]  }
 0x6ba   :  { %4833 = vmatprep.mubr.bf16.mxu1 %v15061_v4  ;;  %5059 = vmatprep.mubr.bf16.mxu0 %v15061_v4 }
 0x6bb   :  { %5113 = vmatpush1.bf16.msra.mxu1 %v11348_v44  ;;  %5792 = vmatpush1.bf16.msra.mxu0 %v11351_v24  ;;  %v11405_v44 = vld [vmem:[#allocation12 + $0xf0] ss:$8 sps:$4 sm:$0xff]  }
 0x6bc   :  { %5114 = vmatprep.subr.bf16.mxu1 %v11356_v52  ;;  %5793 = vmatprep.subr.bf16.mxu0 %v11359_v34  ;;  %v11410_v24 = vld [vmem:[#allocation9 + $0x314] ss:$24 sps:$4 sm:$0xff]   ;;  %v11408_v34 = vld [vmem:[#allocation9 + $0x310] ss:$24 sps:$4 sm:$0xff]  }
 0x6bd   :  { %v11413_v52 = vld [vmem:[#allocation12 + $0x104] ss:$8 sps:$4 sm:$0xff]  }
 0x6bf   :  { %5115 = vmatpush1.bf16.msra.mxu1 %v11354_v33  ;;  %5794 = vmatpush1.bf16.msra.mxu0 %v11357_v22  ;;  %v11411_v33 = vld [vmem:[#allocation12 + $0x100] ss:$8 sps:$4 sm:$0xff]  }
 0x6c0   :  { %5116 = vmatprep.subr.bf16.mxu1 %v11362_v29  ;;  %5795 = vmatprep.subr.bf16.mxu0 %v11365_v39  ;;  %v11416_v22 = vld [vmem:[#allocation9 + $0x344] ss:$24 sps:$4 sm:$0xff]  }
 0x6c1   :  { %4834 = vmatmul.mubr.bf16.gmra.mrb[144].mxu1 %v15030_v58  ;;  %5060 = vmatmul.mubr.bf16.gmra.mrb[176].mxu0 %v15030_v58  ;;  %v11419_v29 = vld [vmem:[#allocation12 + $0x114] ss:$8 sps:$4 sm:$0xff]  }
 0x6c2   :  { %4843 = vmatprep.mubr.bf16.mxu1 %v15147_v16  ;;  %5069 = vmatprep.mubr.bf16.mxu0 %v15147_v16  ;;  %v17224_v39 = vld [vmem:[#allocation81_spill] sm:$0xff] }
 0x6c3   :  { %5117 = vmatpush1.bf16.msra.mxu1 %v11360_v35  ;;  %5796 = vmatpush1.bf16.msra.mxu0 %v11363_v15  ;;  %v17225_v35 = vld [vmem:[#allocation86_spill] sm:$0xff]  ;;  %v11414_v15 = vld [vmem:[#allocation9 + $0x340] ss:$24 sps:$4 sm:$0xff]  }
 0x6c4   :  { %5118 = vmatprep.subr.bf16.mxu1 %v11368_v60  ;;  %5797 = vmatprep.subr.bf16.mxu0 %v11371_v56  ;;  %v11417_v60 = vld [vmem:[#allocation12 + $0x110] ss:$8 sps:$4 sm:$0xff]  }
 0x6c5   :  { %v11422_v56 = vld [vmem:[#allocation9 + $0x374] ss:$24 sps:$4 sm:$0xff]  }
 0x6c7   :  { %5119 = vmatpush1.bf16.msra.mxu1 %v11366_v11  ;;  %5798 = vmatpush1.bf16.msra.mxu0 %v11369_v37  ;;  %v11425_v11 = vld [vmem:[#allocation12 + $0x124] ss:$8 sps:$4 sm:$0xff]  }
 0x6c8   :  { %5120 = vmatprep.subr.bf16.mxu1 %v11374_v62  ;;  %5799 = vmatprep.subr.bf16.mxu0 %v11377_v53  ;;  %v11420_v37 = vld [vmem:[#allocation9 + $0x370] ss:$24 sps:$4 sm:$0xff]   ;;  %v11428_v53 = vld [vmem:[#allocation9 + $0x3a4] ss:$24 sps:$4 sm:$0xff]  }
 0x6c9   :  { %4844 = vmatmul.mubr.bf16.gmra.mrb[148].mxu1 %v15122_v8  ;;  %5070 = vmatmul.mubr.bf16.gmra.mrb[180].mxu0 %v15122_v8  ;;  %v11423_v62 = vld [vmem:[#allocation12 + $0x120] ss:$8 sps:$4 sm:$0xff]  }
 0x6ca   :  { %4853 = vmatprep.mubr.bf16.mxu1 %v15236_v0  ;;  %5079 = vmatprep.mubr.bf16.mxu0 %v15236_v0 }
 0x6cb   :  { %5121 = vmatpush1.bf16.msra.mxu1 %v11372_v3  ;;  %5800 = vmatpush1.bf16.msra.mxu0 %v11375_v61  ;;  %v11431_v3 = vld [vmem:[#allocation12 + $0x134] ss:$8 sps:$4 sm:$0xff]  }
 0x6cc   :  { %5122 = vmatprep.subr.bf16.mxu1 %v11380_v46  ;;  %5801 = vmatprep.subr.bf16.mxu0 %v11383_v40  ;;  %v17226_v61 = vld [vmem:[#allocation85_spill] sm:$0xff]  ;;  %v17227_v46 = vld [vmem:[#allocation100_spill] sm:$0xff] }
 0x6cd   :  { %v11426_v40 = vld [vmem:[#allocation9 + $0x3a0] ss:$24 sps:$4 sm:$0xff]  }
 0x6cf   :  { %5123 = vmatpush1.bf16.msra.mxu1 %v11378_v1  ;;  %5802 = vmatpush1.bf16.msra.mxu0 %v11381_v51  ;;  %v11429_v1 = vld [vmem:[#allocation12 + $0x130] ss:$8 sps:$4 sm:$0xff]  }
 0x6d0   :  { %5124 = vmatprep.subr.bf16.mxu1 %v11386_v9  ;;  %5803 = vmatprep.subr.bf16.mxu0 %v11389_v21  ;;  %v11434_v51 = vld [vmem:[#allocation9 + $0x3d4] ss:$24 sps:$4 sm:$0xff]   ;;  %v11432_v21 = vld [vmem:[#allocation9 + $0x3d0] ss:$24 sps:$4 sm:$0xff]  }
 0x6d1   :  { %4854 = vmatmul.mubr.bf16.gmra.mrb[152].mxu1 %v15208_v27  ;;  %5080 = vmatmul.mubr.bf16.gmra.mrb[184].mxu0 %v15208_v27  ;;  %v11437_v9 = vld [vmem:[#allocation12 + $0x144] ss:$8 sps:$4 sm:$0xff]  }
 0x6d2   :  { %4863 = vmatprep.mubr.bf16.mxu1 %v15260_v17  ;;  %5089 = vmatprep.mubr.bf16.mxu0 %v15260_v17 }
 0x6d3   :  { %5125 = vmatpush1.bf16.msra.mxu1 %v11384_v20  ;;  %5804 = vmatpush1.bf16.msra.mxu0 %v11387_v19  ;;  %v11435_v20 = vld [vmem:[#allocation12 + $0x140] ss:$8 sps:$4 sm:$0xff]  }
 0x6d4   :  { %5126 = vmatprep.subr.bf16.mxu1 %v11392_v38  ;;  %5805 = vmatprep.subr.bf16.mxu0 %v11395_v31  ;;  %v11440_v19 = vld [vmem:[#allocation9 + $0x404] ss:$24 sps:$4 sm:$0xff]   ;;  %v17228_v31 = vld [vmem:[#allocation98_spill] sm:$0xff] }
 0x6d5   :  { %v11443_v38 = vld [vmem:[#allocation12 + $0x154] ss:$8 sps:$4 sm:$0xff]  }
 0x6d7   :  { %5127 = vmatpush1.bf16.msra.mxu1 %v11390_v12  ;;  %5806 = vmatpush1.bf16.msra.mxu0 %v11393_v13  ;;  %v11438_v12 = vld [vmem:[#allocation9 + $0x400] ss:$24 sps:$4 sm:$0xff]  }
 0x6d8   :  { %5128 = vmatprep.subr.bf16.mxu1 %v11398_v32  ;;  %5807 = vmatprep.subr.bf16.mxu0 %v11401_v41  ;;  %v11441_v13 = vld [vmem:[#allocation12 + $0x150] ss:$8 sps:$4 sm:$0xff]   ;;  %v11449_v41 = vld [vmem:[#allocation12 + $0x164] ss:$8 sps:$4 sm:$0xff]  }
 0x6d9   :  { %4864 = vmatmul.mubr.bf16.gmra.mrb[156].mxu1 %v15248_v63  ;;  %5090 = vmatmul.mubr.bf16.gmra.mrb[188].mxu0 %v15248_v63  ;;  %v11446_v32 = vld [vmem:[#allocation9 + $0x434] ss:$24 sps:$4 sm:$0xff]  }
 0x6da   :  { %5132 = vmatprep.mubr.bf16.mxu1 %v17223_v6  ;;  %5811 = vmatprep.mubr.bf16.mxu0 %v17223_v6  ;;  %v11453_v6 = vld [vmem:[#allocation12 + $0x170] ss:$8 sps:$4 sm:$0xff]  }
 0x6db   :  { %5129 = vmatpush1.bf16.msra.mxu1 %v11396_v45  ;;  %5808 = vmatpush1.bf16.msra.mxu0 %v11399_v2  ;;  %v11444_v45 = vld [vmem:[#allocation9 + $0x430] ss:$24 sps:$4 sm:$0xff]  }
 0x6dc   :  { %5130 = vmatprep.subr.bf16.mxu1 %v11404_v49  ;;  %5809 = vmatprep.subr.bf16.mxu0 %v11407_v57  ;;  %v11447_v2 = vld [vmem:[#allocation12 + $0x160] ss:$8 sps:$4 sm:$0xff]   ;;  %v11455_v57 = vld [vmem:[#allocation12 + $0x174] ss:$8 sps:$4 sm:$0xff]  }
 0x6dd   :  { %v11452_v49 = vld [vmem:[#allocation9 + $0x464] ss:$24 sps:$4 sm:$0xff]  }
 0x6df   :  { %5131 = vmatpush1.bf16.msra.mxu1 %v11402_v28  ;;  %5810 = vmatpush1.bf16.msra.mxu0 %v11405_v44  ;;  %v11458_v28 = vld [vmem:[#allocation9 + $0x494] ss:$24 sps:$4 sm:$0xff]  }
 0x6e0   :  { %5213 = vmatprep.subr.bf16.mxu1 %v11410_v24  ;;  %5892 = vmatprep.subr.bf16.mxu0 %v11413_v52  ;;  %v11461_v44 = vld [vmem:[#allocation12 + $0x184] ss:$8 sps:$4 sm:$0xff]   ;;  %v11459_v52 = vld [vmem:[#allocation12 + $0x180] ss:$8 sps:$4 sm:$0xff]  }
 0x6e1   :  { %v11456_v24 = vld [vmem:[#allocation9 + $0x490] ss:$24 sps:$4 sm:$0xff]  }
 0x6e2   :  { %5133 = vmatmul.mubr.bf16.vlgmr.msra.gmra.mrb[160].mxu1 %v17224_v39  ;;  %5812 = vmatmul.mubr.bf16.vlgmr.msra.gmra.mrb[192].mxu0 %v17224_v39  ;;  %v11468_v39 = vld [vmem:[#allocation9 + $0x4f0] ss:$24 sps:$4 sm:$0xff]  }
 0x6e3   :  { %5142 = vmatprep.mubr.bf16.mxu1 %v17225_v35  ;;  %5214 = vmatpush1.bf16.msra.mxu1 %v11408_v34  ;;  %v11464_v34 = vld [vmem:[#allocation9 + $0x4c4] ss:$24 sps:$4 sm:$0xff]  }
 0x6e4   :  { %5821 = vmatprep.mubr.bf16.mxu0 %v17225_v35  ;;  %5893 = vmatpush1.bf16.msra.mxu0 %v11411_v33  ;;  %v11465_v33 = vld [vmem:[#allocation12 + $0x190] ss:$8 sps:$4 sm:$0xff]   ;;  %v11471_v35 = vld [vmem:[#allocation12 + $0x1a0] ss:$8 sps:$4 sm:$0xff]  }
 0x6e5   :  { %5215 = vmatprep.subr.bf16.mxu1 %v11416_v22  ;;  %5894 = vmatprep.subr.bf16.mxu0 %v11419_v29  ;;  %v11470_v22 = vld [vmem:[#allocation9 + $0x4f4] ss:$24 sps:$4 sm:$0xff]  }
 0x6e6   :  { %v11473_v29 = vld [vmem:[#allocation12 + $0x1a4] ss:$8 sps:$4 sm:$0xff]  }
 0x6e7   :  { %5216 = vmatpush1.bf16.msra.mxu1 %v11414_v15  ;;  %v11476_v15 = vld [vmem:[#allocation9 + $0x524] ss:$24 sps:$4 sm:$0xff]  }
 0x6e8   :  { %5895 = vmatpush1.bf16.msra.mxu0 %v11417_v60  ;;  %5217 = vmatprep.subr.bf16.mxu1 %v11422_v56  ;;  %v11477_v60 = vld [vmem:[#allocation12 + $0x1b0] ss:$8 sps:$4 sm:$0xff]  }
 0x6e9   :  { %5896 = vmatprep.subr.bf16.mxu0 %v11425_v11  ;;  %v11482_v56 = vld [vmem:[#allocation9 + $0x554] ss:$24 sps:$4 sm:$0xff]  }
 0x6ea   :  { %5143 = vmatmul.mubr.bf16.gmra.mrb[164].mxu1 %v17226_v61  ;;  %5822 = vmatmul.mubr.bf16.gmra.mrb[196].mxu0 %v17226_v61  ;;  %v11485_v11 = vld [vmem:[#allocation12 + $0x1c4] ss:$8 sps:$4 sm:$0xff]  }
 0x6eb   :  { %5152 = vmatprep.mubr.bf16.mxu1 %v17227_v46  ;;  %5218 = vmatpush1.bf16.msra.mxu1 %v11420_v37  ;;  %v11480_v37 = vld [vmem:[#allocation9 + $0x550] ss:$24 sps:$4 sm:$0xff]   ;;  %v11494_v61 = vld [vmem:[#allocation9 + $0x5b4] ss:$24 sps:$4 sm:$0xff]  }
 0x6ec   :  { %5831 = vmatprep.mubr.bf16.mxu0 %v17227_v46  ;;  %5897 = vmatpush1.bf16.msra.mxu0 %v11423_v62  ;;  %v11483_v62 = vld [vmem:[#allocation12 + $0x1c0] ss:$8 sps:$4 sm:$0xff]   ;;  %v11497_v46 = vld [vmem:[#allocation12 + $0x1e4] ss:$8 sps:$4 sm:$0xff]  }
 0x6ed   :  { %5219 = vmatprep.subr.bf16.mxu1 %v11428_v53  ;;  %5898 = vmatprep.subr.bf16.mxu0 %v11431_v3  ;;  %v11488_v53 = vld [vmem:[#allocation9 + $0x584] ss:$24 sps:$4 sm:$0xff]  }
 0x6ee   :  { %v11489_v3 = vld [vmem:[#allocation12 + $0x1d0] ss:$8 sps:$4 sm:$0xff]  }
 0x6ef   :  { %5220 = vmatpush1.bf16.msra.mxu1 %v11426_v40  ;;  %v11492_v40 = vld [vmem:[#allocation9 + $0x5b0] ss:$24 sps:$4 sm:$0xff]  }
 0x6f0   :  { %5899 = vmatpush1.bf16.msra.mxu0 %v11429_v1  ;;  %5221 = vmatprep.subr.bf16.mxu1 %v11434_v51  ;;  %v11495_v1 = vld [vmem:[#allocation12 + $0x1e0] ss:$8 sps:$4 sm:$0xff]  }
 0x6f1   :  { %5900 = vmatprep.subr.bf16.mxu0 %v11437_v9  ;;  %v11500_v51 = vld [vmem:[#allocation9 + $0x5e4] ss:$24 sps:$4 sm:$0xff]  }
 0x6f2   :  { %5153 = vmatmul.mubr.bf16.gmra.mrb[168].mxu1 %v17228_v31  ;;  %5832 = vmatmul.mubr.bf16.gmra.mrb[200].mxu0 %v17228_v31  ;;  %v11501_v9 = vld [vmem:[#allocation12 + $0x1f0] ss:$8 sps:$4 sm:$0xff]  }
 0x6f3   :  { %5162 = vmatprep.mubr.bf16.mxu1 %v14921_v14  ;;  %5222 = vmatpush1.bf16.msra.mxu1 %v11432_v21 }
 0x6f4   :  { %5841 = vmatprep.mubr.bf16.mxu0 %v14921_v14  ;;  %5901 = vmatpush1.bf16.msra.mxu0 %v11435_v20  ;;  %v11450_v14 = vld [vmem:[#allocation9 + $0x460] ss:$24 sps:$4 sm:$0xff]  }
 0x6f5   :  { %5223 = vmatprep.subr.bf16.mxu1 %v11440_v19  ;;  %5902 = vmatprep.subr.bf16.mxu0 %v11443_v38 }
 0x6f7   :  { %5224 = vmatpush1.bf16.msra.mxu1 %v11438_v12 }
 0x6f8   :  { %5903 = vmatpush1.bf16.msra.mxu0 %v11441_v13  ;;  %5225 = vmatprep.subr.bf16.mxu1 %v11446_v32 }
 0x6f9   :  { %5904 = vmatprep.subr.bf16.mxu0 %v11449_v41 }
 0x6fa   :  { %5163 = vmatmul.mubr.bf16.gmra.mrb[172].mxu1 %v14909_v7  ;;  %5842 = vmatmul.mubr.bf16.gmra.mrb[204].mxu0 %v14909_v7  ;;  %v11467_v7 = vld [vmem:[#allocation12 + $0x194] ss:$8 sps:$4 sm:$0xff]  }
 0x6fb   :  { %5172 = vmatprep.mubr.bf16.mxu1 %v15036_v59  ;;  %5226 = vmatpush1.bf16.msra.mxu1 %v11444_v45 }
 0x6fc   :  { %5851 = vmatprep.mubr.bf16.mxu0 %v15036_v59  ;;  %5905 = vmatpush1.bf16.msra.mxu0 %v11447_v2  ;;  %v11462_v59 = vld [vmem:[#allocation9 + $0x4c0] ss:$24 sps:$4 sm:$0xff]  }
 0x6fd   :  { %5227 = vmatprep.subr.bf16.mxu1 %v11452_v49  ;;  %5906 = vmatprep.subr.bf16.mxu0 %v11455_v57 }
 0x6ff   :  { %5228 = vmatpush1.bf16.msra.mxu1 %v11450_v14 }
 0x700   :  { %5907 = vmatpush1.bf16.msra.mxu0 %v11453_v6  ;;  %5229 = vmatprep.subr.bf16.mxu1 %v11458_v28 }
 0x701   :  { %5908 = vmatprep.subr.bf16.mxu0 %v11461_v44 }
 0x702   :  { %5173 = vmatmul.mubr.bf16.gmra.mrb[176].mxu1 %v15012_v5  ;;  %5852 = vmatmul.mubr.bf16.gmra.mrb[208].mxu0 %v15012_v5  ;;  %v11479_v5 = vld [vmem:[#allocation12 + $0x1b4] ss:$8 sps:$4 sm:$0xff]  }
 0x703   :  { %5182 = vmatprep.mubr.bf16.mxu1 %v15130_v50  ;;  %5230 = vmatpush1.bf16.msra.mxu1 %v11456_v24 }
 0x704   :  { %5861 = vmatprep.mubr.bf16.mxu0 %v15130_v50  ;;  %5909 = vmatpush1.bf16.msra.mxu0 %v11459_v52  ;;  %v11474_v50 = vld [vmem:[#allocation9 + $0x520] ss:$24 sps:$4 sm:$0xff]  }
 0x705   :  { %5231 = vmatprep.subr.bf16.mxu1 %v11464_v34  ;;  %5910 = vmatprep.subr.bf16.mxu0 %v11467_v7 }
 0x707   :  { %5232 = vmatpush1.bf16.msra.mxu1 %v11462_v59 }
 0x708   :  { %5911 = vmatpush1.bf16.msra.mxu0 %v11465_v33  ;;  %5233 = vmatprep.subr.bf16.mxu1 %v11470_v22 }
 0x709   :  { %5912 = vmatprep.subr.bf16.mxu0 %v11473_v29 }
 0x70a   :  { %5183 = vmatmul.mubr.bf16.gmra.mrb[180].mxu1 %v15102_v26  ;;  %5862 = vmatmul.mubr.bf16.gmra.mrb[212].mxu0 %v15102_v26  ;;  %v11491_v26 = vld [vmem:[#allocation12 + $0x1d4] ss:$8 sps:$4 sm:$0xff]  }
 0x70b   :  { %5192 = vmatprep.mubr.bf16.mxu1 %v15213_v48  ;;  %5234 = vmatpush1.bf16.msra.mxu1 %v11468_v39 }
 0x70c   :  { %5871 = vmatprep.mubr.bf16.mxu0 %v15213_v48  ;;  %5913 = vmatpush1.bf16.msra.mxu0 %v11471_v35  ;;  %v11486_v48 = vld [vmem:[#allocation9 + $0x580] ss:$24 sps:$4 sm:$0xff]  }
 0x70d   :  { %5235 = vmatprep.subr.bf16.mxu1 %v11476_v15  ;;  %5914 = vmatprep.subr.bf16.mxu0 %v11479_v5 }
 0x70f   :  { %5236 = vmatpush1.bf16.msra.mxu1 %v11474_v50 }
 0x710   :  { %5915 = vmatpush1.bf16.msra.mxu0 %v11477_v60  ;;  %5237 = vmatprep.subr.bf16.mxu1 %v11482_v56 }
 0x711   :  { %5916 = vmatprep.subr.bf16.mxu0 %v11485_v11 }
 0x712   :  { %5193 = vmatmul.mubr.bf16.gmra.mrb[184].mxu1 %v15199_v55  ;;  %5872 = vmatmul.mubr.bf16.gmra.mrb[216].mxu0 %v15199_v55  ;;  %v11503_v55 = vld [vmem:[#allocation12 + $0x1f4] ss:$8 sps:$4 sm:$0xff]  }
 0x713   :  { %5202 = vmatprep.mubr.bf16.mxu1 %v15255_v42  ;;  %5238 = vmatpush1.bf16.msra.mxu1 %v11480_v37 }
 0x714   :  { %5881 = vmatprep.mubr.bf16.mxu0 %v15255_v42  ;;  %5917 = vmatpush1.bf16.msra.mxu0 %v11483_v62  ;;  %v11498_v42 = vld [vmem:[#allocation9 + $0x5e0] ss:$24 sps:$4 sm:$0xff]  }
 0x715   :  { %5239 = vmatprep.subr.bf16.mxu1 %v11488_v53  ;;  %5918 = vmatprep.subr.bf16.mxu0 %v11491_v26 }
 0x717   :  { %5240 = vmatpush1.bf16.msra.mxu1 %v11486_v48 }
 0x718   :  { %5919 = vmatpush1.bf16.msra.mxu0 %v11489_v3  ;;  %5241 = vmatprep.subr.bf16.mxu1 %v11494_v61 }
 0x719   :  { %5920 = vmatprep.subr.bf16.mxu0 %v11497_v46 }
 0x71a   :  { %5203 = vmatmul.mubr.bf16.gmra.mrb[188].mxu1 %v15245_v30  ;;  %5882 = vmatmul.mubr.bf16.gmra.mrb[220].mxu0 %v15245_v30 }
 0x71b   :  { %5242 = vmatpush1.bf16.msra.mxu1 %v11492_v40  ;;  %5245 = vmatprep.mubr.bf16.mxu1 %v15218_v47 }
 0x71c   :  { %5921 = vmatpush1.bf16.msra.mxu0 %v11495_v1  ;;  %5924 = vmatprep.mubr.bf16.mxu0 %v15218_v47 }
 0x71d   :  { %5243 = vmatprep.subr.bf16.mxu1 %v11500_v51  ;;  %5922 = vmatprep.subr.bf16.mxu0 %v11503_v55 }
 0x71f   :  { %5244 = vmatpush1.bf16.msra.mxu1 %v11498_v42 }
 0x720   :  { %5923 = vmatpush1.bf16.msra.mxu0 %v11501_v9 }
 0x722   :  { %5246 = vmatmul.mubr.bf16.vlgmr.msra.gmra.mrb[160].mxu1 %v17220_v18 }
 0x723   :  { %5925 = vmatmul.mubr.bf16.vlgmr.msra.gmra.mrb[192].mxu0 %v17220_v18  ;;  %5255 = vmatprep.mubr.bf16.mxu1 %v15222_v54 }
 0x724   :  { %5934 = vmatprep.mubr.bf16.mxu0 %v15222_v54  ;;  %v17232_v54 = vld [vmem:[#allocation45_spill] sm:$0xff] }
 0x72a   :  { %5256 = vmatmul.mubr.bf16.gmra.mrb[164].mxu1 %v15226_v36 }
 0x72b   :  { %5935 = vmatmul.mubr.bf16.gmra.mrb[196].mxu0 %v15226_v36  ;;  %5265 = vmatprep.mubr.bf16.mxu1 %v17221_v10  ;;  %v17233_v36 = vld [vmem:[#allocation47_spill] sm:$0xff] }
 0x72c   :  { %5944 = vmatprep.mubr.bf16.mxu0 %v17221_v10 }
 0x732   :  { %5266 = vmatmul.mubr.bf16.gmra.mrb[168].mxu1 %v17222_v43 }
 0x733   :  { %5945 = vmatmul.mubr.bf16.gmra.mrb[200].mxu0 %v17222_v43  ;;  %5275 = vmatprep.mubr.bf16.mxu1 %v14960_v25 }
 0x734   :  { %5954 = vmatprep.mubr.bf16.mxu0 %v14960_v25  ;;  %v15363_v25 = vld [vmem:[#allocation11] sm:$0x3f] }
 0x73a   :  { %5276 = vmatmul.mubr.bf16.gmra.mrb[172].mxu1 %v14915_v23 }
 0x73b   :  { %5955 = vmatmul.mubr.bf16.gmra.mrb[204].mxu0 %v14915_v23  ;;  %5285 = vmatprep.mubr.bf16.mxu1 %v15061_v4  ;;  %v17229_v23 = vmov 0  }
 0x73c   :  { %5964 = vmatprep.mubr.bf16.mxu0 %v15061_v4  ;;  %v17230_v4 = vld [vmem:[#allocation44_spill] sm:$0xff] }
 0x742   :  { %5286 = vmatmul.mubr.bf16.gmra.mrb[176].mxu1 %v15030_v58 }
 0x743   :  { %5965 = vmatmul.mubr.bf16.gmra.mrb[208].mxu0 %v15030_v58  ;;  %5295 = vmatprep.mubr.bf16.mxu1 %v15147_v16  ;;  %v3630_v58 = vunpack.c.l.bf16 %v15363_v25 }
 0x744   :  { %5974 = vmatprep.mubr.bf16.mxu0 %v15147_v16  ;;  %v17231_v16 = vld [vmem:[#allocation46_spill] sm:$0xff] }
 0x745   :  { %v3645_v47 = vrot.slane %v3630_v58, %v17231_v16 }
 0x74a   :  { %5296 = vmatmul.mubr.bf16.gmra.mrb[180].mxu1 %v15122_v8 }
 0x74b   :  { %5975 = vmatmul.mubr.bf16.gmra.mrb[212].mxu0 %v15122_v8  ;;  %5305 = vmatprep.mubr.bf16.mxu1 %v15236_v0  ;;  %v3637_v8 = vrot.slane %v3630_v58, %v17230_v4 }
 0x74c   :  { %5984 = vmatprep.mubr.bf16.mxu0 %v15236_v0  ;;  %v3649_v0 = vrot.slane %v3630_v58, %v17233_v36 }
 0x74d   :  { %v15371_v30 = vrot.slane %v3637_v8, %v17230_v4 }
 0x74e   :  { %v15380_v43 = vrot.slane %v3649_v0, %v17230_v4 }
 0x752   :  { %5306 = vmatmul.mubr.bf16.gmra.mrb[184].mxu1 %v15208_v27 }
 0x753   :  { %5985 = vmatmul.mubr.bf16.gmra.mrb[216].mxu0 %v15208_v27  ;;  %5315 = vmatprep.mubr.bf16.mxu1 %v15260_v17  ;;  %v3641_v27 = vrot.slane %v3630_v58, %v17232_v54 }
 0x754   :  { %5994 = vmatprep.mubr.bf16.mxu0 %v15260_v17  ;;  %v15374_v17 = vrot.slane %v3645_v47, %v17230_v4 }
 0x755   :  { %v15377_v10 = vrot.slane %v3641_v27, %v17230_v4 }
 0x75a   :  { %5316 = vmatmul.mubr.bf16.gmra.mrb[188].mxu1 %v15248_v63 }
 0x75b   :  { %5995 = vmatmul.mubr.bf16.gmra.mrb[220].mxu0 %v15248_v63 }
 0x75c   :  { %6302 = vmatprep.mubr.bf16.mxu0 %v17229_v23 }
 0x774   :  { %v4795_v63 = vpop.f32.mrb[128].mxu1  ;;  %v5021_v18 = vpop.f32.mrb[160].mxu0 }
 0x775   :  { %v15383_v21 = vadd.f32 %v4795_v63, %v15371_v30  ;;  %v4797_v20 = vpop.f32.mrb[129].mxu1  ;;  %v5023_v19 = vpop.f32.mrb[161].mxu0  ;;  %v10503_v12 = vadd.f32 %v5021_v18, %v15374_v17 }
 0x776   :  { %v4799_v38 = vpop.f32.mrb[130].mxu1  ;;  %v5025_v31 = vpop.f32.mrb[162].mxu0  ;;  %v10472_v2 = vadd.f32 %v4797_v20, %v15377_v10  ;;  %v10504_v49 = vadd.f32 %v5023_v19, %v15380_v43 }
 0x777   :  { %v15387_v13 = vadd.f32 %v4799_v38, %v15371_v30  ;;  %v10505_v32 = vadd.f32 %v5025_v31, %v15374_v17  ;;  %v4801_v41 = vpop.f32.mrb[131].mxu1  ;;  %v5027_v45 = vpop.f32.mrb[163].mxu0 }
 0x778   :  { %v10474_v57 = vadd.f32 %v4801_v41, %v15377_v10  ;;  %v10506_v14 = vadd.f32 %v5027_v45, %v15380_v43 }
 0x779   :  { %v5326_v6 = vpack.c.bf16 %v15387_v13, %v15383_v21  ;;  %v5328_v28 = vpack.c.bf16 %v10505_v32, %v10503_v12 }
 0x77a   :  { %v5327_v44 = vpack.c.bf16 %v10474_v57, %v10472_v2  ;;  %v5329_v24 = vpack.c.bf16 %v10506_v14, %v10504_v49 }
 0x77c   :  { %v4805_v52 = vpop.f32.mrb[132].mxu1  ;;  %v5031_v34 = vpop.f32.mrb[164].mxu0  ;;  %6005 = vmatprep.subr.bf16.mxu1 %v5329_v24  ;;  %6037 = vmatprep.mubr.bf16.mxu1 %v5327_v44 }
 0x77d   :  { %v15397_v7 = vadd.f32 %v4805_v52, %v15371_v30  ;;  %v4807_v59 = vpop.f32.mrb[133].mxu1  ;;  %v5033_v33 = vpop.f32.mrb[165].mxu0  ;;  %6006 = vmatpush1.bf16.xpose.msra.mxu1 %v5328_v28  ;;  %v10507_v35 = vadd.f32 %v5031_v34, %v15374_v17 }
 0x77e   :  { %v15400_v22 = vadd.f32 %v4807_v59, %v15377_v10  ;;  %v4809_v29 = vpop.f32.mrb[134].mxu1  ;;  %v5035_v39 = vpop.f32.mrb[166].mxu0  ;;  %v10508_v56 = vadd.f32 %v5033_v33, %v15380_v43 }
 0x77f   :  { %v15404_v15 = vadd.f32 %v4809_v29, %v15371_v30  ;;  %v10509_v5 = vadd.f32 %v5035_v39, %v15374_v17  ;;  %v4811_v50 = vpop.f32.mrb[135].mxu1  ;;  %v5037_v60 = vpop.f32.mrb[167].mxu0 }
 0x780   :  { %v15409_v11 = vadd.f32 %v4811_v50, %v15377_v10  ;;  %v10510_v37 = vadd.f32 %v5037_v60, %v15380_v43 }
 0x781   :  { %v5332_v62 = vpack.c.bf16 %v15404_v15, %v15397_v7  ;;  %v5334_v53 = vpack.c.bf16 %v10509_v5, %v10507_v35 }
 0x782   :  { %v5333_v26 = vpack.c.bf16 %v15409_v11, %v15400_v22  ;;  %v5335_v48 = vpack.c.bf16 %v10510_v37, %v10508_v56 }
 0x784   :  { %v4815_v3 = vpop.f32.mrb[136].mxu1  ;;  %v5041_v61 = vpop.f32.mrb[168].mxu0  ;;  %6007 = vmatprep.subr.bf16.mxu1 %v5335_v48 }
 0x785   :  { %v15417_v46 = vadd.f32 %v4815_v3, %v15371_v30  ;;  %v4817_v40 = vpop.f32.mrb[137].mxu1  ;;  %v5043_v1 = vpop.f32.mrb[169].mxu0  ;;  %6008 = vmatpush1.bf16.xpose.msra.mxu1 %v5334_v53  ;;  %v10511_v9 = vadd.f32 %v5041_v61, %v15374_v17 }
 0x786   :  { %v15420_v51 = vadd.f32 %v4817_v40, %v15377_v10  ;;  %v4819_v55 = vpop.f32.mrb[138].mxu1  ;;  %v5045_v42 = vpop.f32.mrb[170].mxu0  ;;  %v10512_v36 = vadd.f32 %v5043_v1, %v15380_v43 }
 0x787   :  { %v15424_v58 = vadd.f32 %v4819_v55, %v15371_v30  ;;  %v10513_v8 = vadd.f32 %v5045_v42, %v15374_v17  ;;  %v4821_v47 = vpop.f32.mrb[139].mxu1  ;;  %v5047_v27 = vpop.f32.mrb[171].mxu0 }
 0x788   :  { %v15429_v0 = vadd.f32 %v4821_v47, %v15377_v10  ;;  %v10514_v63 = vadd.f32 %v5047_v27, %v15380_v43 }
 0x789   :  { %v5338_v18 = vpack.c.bf16 %v15424_v58, %v15417_v46  ;;  %v5340_v20 = vpack.c.bf16 %v10513_v8, %v10511_v9 }
 0x78a   :  { %v5339_v19 = vpack.c.bf16 %v15429_v0, %v15420_v51  ;;  %v5341_v38 = vpack.c.bf16 %v10514_v63, %v10512_v36 }
 0x78c   :  { %v4825_v31 = vpop.f32.mrb[140].mxu1  ;;  %v5051_v12 = vpop.f32.mrb[172].mxu0  ;;  %6009 = vmatprep.subr.bf16.mxu1 %v5341_v38 }
 0x78d   :  { %v15437_v32 = vadd.f32 %v4825_v31, %v15371_v30  ;;  %v4827_v41 = vpop.f32.mrb[141].mxu1  ;;  %v5053_v45 = vpop.f32.mrb[173].mxu0  ;;  %6010 = vmatpush1.bf16.xpose.msra.mxu1 %v5340_v20  ;;  %v10515_v14 = vadd.f32 %v5051_v12, %v15374_v17 }
 0x78e   :  { %v15440_v2 = vadd.f32 %v4827_v41, %v15377_v10  ;;  %v4829_v49 = vpop.f32.mrb[142].mxu1  ;;  %v5055_v57 = vpop.f32.mrb[174].mxu0  ;;  %v10516_v34 = vadd.f32 %v5053_v45, %v15380_v43 }
 0x78f   :  { %v15444_v28 = vadd.f32 %v4829_v49, %v15371_v30  ;;  %v10517_v44 = vadd.f32 %v5055_v57, %v15374_v17  ;;  %v4831_v24 = vpop.f32.mrb[143].mxu1  ;;  %v5057_v52 = vpop.f32.mrb[175].mxu0 }
 0x790   :  { %v15449_v59 = vadd.f32 %v4831_v24, %v15377_v10  ;;  %v10518_v33 = vadd.f32 %v5057_v52, %v15380_v43 }
 0x791   :  { %v5344_v29 = vpack.c.bf16 %v15444_v28, %v15437_v32  ;;  %v5346_v39 = vpack.c.bf16 %v10517_v44, %v10515_v14 }
 0x792   :  { %v5345_v35 = vpack.c.bf16 %v15449_v59, %v15440_v2  ;;  %v5347_v5 = vpack.c.bf16 %v10518_v33, %v10516_v34 }
 0x794   :  { %v4835_v50 = vpop.f32.mrb[144].mxu1  ;;  %v5061_v60 = vpop.f32.mrb[176].mxu0  ;;  %6011 = vmatprep.subr.bf16.mxu1 %v5347_v5 }
 0x795   :  { %v15457_v56 = vadd.f32 %v4835_v50, %v15371_v30  ;;  %v4837_v37 = vpop.f32.mrb[145].mxu1  ;;  %v5063_v53 = vpop.f32.mrb[177].mxu0  ;;  %6012 = vmatpush1.bf16.xpose.msra.mxu1 %v5346_v39  ;;  %v10519_v40 = vadd.f32 %v5061_v60, %v15374_v17 }
 0x796   :  { %v15460_v48 = vadd.f32 %v4837_v37, %v15377_v10  ;;  %v4839_v3 = vpop.f32.mrb[146].mxu1  ;;  %v5065_v61 = vpop.f32.mrb[178].mxu0  ;;  %v10520_v8 = vadd.f32 %v5063_v53, %v15380_v43 }
 0x797   :  { %v15464_v1 = vadd.f32 %v4839_v3, %v15371_v30  ;;  %v10521_v55 = vadd.f32 %v5065_v61, %v15374_v17  ;;  %v4841_v42 = vpop.f32.mrb[147].mxu1  ;;  %v5067_v9 = vpop.f32.mrb[179].mxu0 }
 0x798   :  { %v15469_v47 = vadd.f32 %v4841_v42, %v15377_v10  ;;  %v10522_v27 = vadd.f32 %v5067_v9, %v15380_v43 }
 0x799   :  { %v5350_v36 = vpack.c.bf16 %v15464_v1, %v15457_v56  ;;  %v5352_v63 = vpack.c.bf16 %v10521_v55, %v10519_v40 }
 0x79a   :  { %v5351_v20 = vpack.c.bf16 %v15469_v47, %v15460_v48  ;;  %v5353_v38 = vpack.c.bf16 %v10522_v27, %v10520_v8 }
 0x79c   :  { %v4845_v31 = vpop.f32.mrb[148].mxu1  ;;  %v5071_v12 = vpop.f32.mrb[180].mxu0  ;;  %6013 = vmatprep.subr.bf16.mxu1 %v5353_v38 }
 0x79d   :  { %v15477_v41 = vadd.f32 %v4845_v31, %v15371_v30  ;;  %v4847_v45 = vpop.f32.mrb[149].mxu1  ;;  %v5073_v49 = vpop.f32.mrb[181].mxu0  ;;  %6014 = vmatpush1.bf16.xpose.msra.mxu1 %v5352_v63  ;;  %v10523_v24 = vadd.f32 %v5071_v12, %v15374_v17 }
 0x79e   :  { %v15480_v57 = vadd.f32 %v4847_v45, %v15377_v10  ;;  %v4849_v14 = vpop.f32.mrb[150].mxu1  ;;  %v5075_v44 = vpop.f32.mrb[182].mxu0  ;;  %v10524_v5 = vadd.f32 %v5073_v49, %v15380_v43 }
 0x79f   :  { %v15484_v52 = vadd.f32 %v4849_v14, %v15371_v30  ;;  %v10525_v34 = vadd.f32 %v5075_v44, %v15374_v17  ;;  %v4851_v33 = vpop.f32.mrb[151].mxu1  ;;  %v5077_v39 = vpop.f32.mrb[183].mxu0 }
 0x7a0   :  { %v10494_v50 = vadd.f32 %v4851_v33, %v15377_v10  ;;  %v10526_v60 = vadd.f32 %v5077_v39, %v15380_v43 }
 0x7a1   :  { %v5356_v37 = vpack.c.bf16 %v15484_v52, %v15477_v41  ;;  %v5358_v53 = vpack.c.bf16 %v10525_v34, %v10523_v24 }
 0x7a2   :  { %v5357_v3 = vpack.c.bf16 %v10494_v50, %v15480_v57  ;;  %v5359_v61 = vpack.c.bf16 %v10526_v60, %v10524_v5 }
 0x7a4   :  { %v4855_v40 = vpop.f32.mrb[152].mxu1  ;;  %v5081_v55 = vpop.f32.mrb[184].mxu0  ;;  %6015 = vmatprep.subr.bf16.mxu1 %v5359_v61 }
 0x7a5   :  { %v10495_v42 = vadd.f32 %v4855_v40, %v15371_v30  ;;  %v4857_v9 = vpop.f32.mrb[153].mxu1  ;;  %v5083_v8 = vpop.f32.mrb[185].mxu0  ;;  %6016 = vmatpush1.bf16.xpose.msra.mxu1 %v5358_v53  ;;  %v10527_v31 = vadd.f32 %v5081_v55, %v15374_v17 }
 0x7a6   :  { %v10496_v27 = vadd.f32 %v4857_v9, %v15377_v10  ;;  %v4859_v63 = vpop.f32.mrb[154].mxu1  ;;  %v5085_v38 = vpop.f32.mrb[186].mxu0  ;;  %v10528_v57 = vadd.f32 %v5083_v8, %v15380_v43 }
 0x7a7   :  { %v10497_v12 = vadd.f32 %v4859_v63, %v15371_v30  ;;  %v10529_v41 = vadd.f32 %v5085_v38, %v15374_v17  ;;  %v4861_v45 = vpop.f32.mrb[155].mxu1  ;;  %v5087_v49 = vpop.f32.mrb[187].mxu0 }
 0x7a8   :  { %v10498_v14 = vadd.f32 %v4861_v45, %v15377_v10  ;;  %v10530_v44 = vadd.f32 %v5087_v49, %v15380_v43 }
 0x7a9   :  { %v5362_v24 = vpack.c.bf16 %v10497_v12, %v10495_v42  ;;  %v5364_v52 = vpack.c.bf16 %v10529_v41, %v10527_v31 }
 0x7aa   :  { %v5363_v34 = vpack.c.bf16 %v10498_v14, %v10496_v27  ;;  %v5365_v33 = vpack.c.bf16 %v10530_v44, %v10528_v57 }
 0x7ac   :  { %v4865_v39 = vpop.f32.mrb[156].mxu1  ;;  %v5091_v5 = vpop.f32.mrb[188].mxu0  ;;  %6017 = vmatprep.subr.bf16.mxu1 %v5365_v33 }
 0x7ad   :  { %v10499_v50 = vadd.f32 %v4865_v39, %v15371_v30  ;;  %v4867_v60 = vpop.f32.mrb[157].mxu1  ;;  %v5093_v53 = vpop.f32.mrb[189].mxu0  ;;  %6018 = vmatpush1.bf16.xpose.msra.mxu1 %v5364_v52  ;;  %v10531_v9 = vadd.f32 %v5091_v5, %v15374_v17 }
 0x7ae   :  { %v10500_v61 = vadd.f32 %v4867_v60, %v15377_v10  ;;  %v4869_v40 = vpop.f32.mrb[158].mxu1  ;;  %v5095_v55 = vpop.f32.mrb[190].mxu0  ;;  %v10532_v38 = vadd.f32 %v5093_v53, %v15380_v43 }
 0x7af   :  { %v10501_v8 = vadd.f32 %v4869_v40, %v15371_v30  ;;  %v10533_v42 = vadd.f32 %v5095_v55, %v15374_v17  ;;  %v4871_v27 = vpop.f32.mrb[159].mxu1  ;;  %v5097_v63 = vpop.f32.mrb[191].mxu0  ;;  %v3631_v30 = vunpack.c.h.bf16 %v15363_v25 }
 0x7b0   :  { %v10502_v31 = vadd.f32 %v4871_v27, %v15377_v10  ;;  %v10534_v12 = vadd.f32 %v5097_v63, %v15380_v43 }
 0x7b1   :  { %v5368_v41 = vpack.c.bf16 %v10501_v8, %v10499_v50  ;;  %v5370_v45 = vpack.c.bf16 %v10533_v42, %v10531_v9  ;;  %v3653_v17 = vrot.slane %v3631_v30, %v17230_v4  ;;  %v3657_v10 = vrot.slane %v3631_v30, %v17232_v54 }
 0x7b2   :  { %v5369_v49 = vpack.c.bf16 %v10502_v31, %v10500_v61  ;;  %v5371_v57 = vpack.c.bf16 %v10534_v12, %v10532_v38 }
 0x7b3   :  { %v15540_v43 = vrot.slane %v3653_v17, %v17230_v4  ;;  %v15543_v13 = vrot.slane %v3657_v10, %v17230_v4 }
 0x7b4   :  { %6019 = vmatprep.subr.bf16.mxu1 %v5371_v57 }
 0x7b5   :  { %6020 = vmatpush1.bf16.xpose.msra.mxu1 %v5370_v45 }
 0x7bc   :  { %6038 = vmatmul.mubr.bf16.vlgmr.msra.gmra.mrb[192].mxu1 %v5326_v6 }
 0x7bd   :  { %6045 = vmatprep.mubr.bf16.mxu1 %v5333_v26 }
 0x7c4   :  { %6046 = vmatmul.mubr.bf16.gmra.mrb[196].mxu1 %v5332_v62 }
 0x7c5   :  { %6053 = vmatprep.mubr.bf16.mxu1 %v5339_v19 }
 0x7cc   :  { %6054 = vmatmul.mubr.bf16.gmra.mrb[200].mxu1 %v5338_v18 }
 0x7cd   :  { %6061 = vmatprep.mubr.bf16.mxu1 %v5345_v35 }
 0x7d4   :  { %6062 = vmatmul.mubr.bf16.gmra.mrb[204].mxu1 %v5344_v29 }
 0x7d5   :  { %6069 = vmatprep.mubr.bf16.mxu1 %v5351_v20 }
 0x7dc   :  { %6070 = vmatmul.mubr.bf16.gmra.mrb[208].mxu1 %v5350_v36 }
 0x7dd   :  { %6077 = vmatprep.mubr.bf16.mxu1 %v5357_v3 }
 0x7e4   :  { %6078 = vmatmul.mubr.bf16.gmra.mrb[212].mxu1 %v5356_v37 }
 0x7e5   :  { %6085 = vmatprep.mubr.bf16.mxu1 %v5363_v34 }
 0x7ec   :  { %6086 = vmatmul.mubr.bf16.gmra.mrb[216].mxu1 %v5362_v24 }
 0x7ed   :  { %6093 = vmatprep.mubr.bf16.mxu1 %v5369_v49 }
 0x7f4   :  { %6094 = vmatmul.mubr.bf16.gmra.mrb[220].mxu1 %v5368_v41 }
 0x7f5   :  { %v5247_v21 = vpop.f32.mrb[160].mxu1 }
 0x7f6   :  { %v5249_v6 = vpop.f32.mrb[161].mxu1  ;;  %v10535_v22 = vadd.f32 %v5247_v21, %v15540_v43 }
 0x7f7   :  { %v5251_v7 = vpop.f32.mrb[162].mxu1  ;;  %v10536_v11 = vadd.f32 %v5249_v6, %v15543_v13 }
 0x7f8   :  { %v10537_v15 = vadd.f32 %v5251_v7, %v15540_v43  ;;  %v5253_v25 = vpop.f32.mrb[163].mxu1 }
 0x7f9   :  { %v10538_v62 = vadd.f32 %v5253_v25, %v15543_v13 }
 0x7fa   :  { %v5330_v26 = vpack.c.bf16 %v10537_v15, %v10535_v22 }
 0x7fb   :  { %v5331_v46 = vpack.c.bf16 %v10538_v62, %v10536_v11 }
 0x7fd   :  { %v5257_v51 = vpop.f32.mrb[164].mxu1  ;;  %6270 = vmatprep.subr.bf16.mxu0 %v5331_v46 }
 0x7fe   :  { %v5259_v58 = vpop.f32.mrb[165].mxu1  ;;  %6271 = vmatpush1.bf16.msra.mxu0 %v5330_v26  ;;  %v10539_v18 = vadd.f32 %v5257_v51, %v15540_v43 }
 0x7ff   :  { %v5261_v0 = vpop.f32.mrb[166].mxu1  ;;  %v10540_v2 = vadd.f32 %v5259_v58, %v15543_v13 }
 0x800   :  { %v10541_v19 = vadd.f32 %v5261_v0, %v15540_v43  ;;  %v5263_v32 = vpop.f32.mrb[167].mxu1 }
 0x801   :  { %v10542_v28 = vadd.f32 %v5263_v32, %v15543_v13 }
 0x802   :  { %v5336_v59 = vpack.c.bf16 %v10541_v19, %v10539_v18 }
 0x803   :  { %v5337_v29 = vpack.c.bf16 %v10542_v28, %v10540_v2 }
 0x805   :  { %v5267_v35 = vpop.f32.mrb[168].mxu1  ;;  %6272 = vmatprep.subr.bf16.mxu0 %v5337_v29 }
 0x806   :  { %v5269_v56 = vpop.f32.mrb[169].mxu1  ;;  %6273 = vmatpush1.bf16.msra.mxu0 %v5336_v59  ;;  %v10543_v1 = vadd.f32 %v5267_v35, %v15540_v43 }
 0x807   :  { %v5271_v48 = vpop.f32.mrb[170].mxu1  ;;  %v10544_v20 = vadd.f32 %v5269_v56, %v15543_v13 }
 0x808   :  { %v10545_v47 = vadd.f32 %v5271_v48, %v15540_v43  ;;  %v5273_v36 = vpop.f32.mrb[171].mxu1 }
 0x809   :  { %v10546_v37 = vadd.f32 %v5273_v36, %v15543_v13 }
 0x80a   :  { %v5342_v3 = vpack.c.bf16 %v10545_v47, %v10543_v1  ;;  %v17234_v1 = vld [vmem:[#allocation67_spill] sm:$0xff] }
 0x80b   :  { %v5343_v14 = vpack.c.bf16 %v10546_v37, %v10544_v20  ;;  %v17235_v37 = vld [vmem:[#allocation65_spill] sm:$0xff] }
 0x80d   :  { %v5277_v44 = vpop.f32.mrb[172].mxu1  ;;  %6274 = vmatprep.subr.bf16.mxu0 %v5343_v14 }
 0x80e   :  { %v5279_v24 = vpop.f32.mrb[173].mxu1  ;;  %6275 = vmatpush1.bf16.msra.mxu0 %v5342_v3  ;;  %v10547_v34 = vadd.f32 %v5277_v44, %v15540_v43 }
 0x80f   :  { %v5281_v52 = vpop.f32.mrb[174].mxu1  ;;  %v10548_v5 = vadd.f32 %v5279_v24, %v15543_v13 }
 0x810   :  { %v10549_v33 = vadd.f32 %v5281_v52, %v15540_v43  ;;  %v5283_v39 = vpop.f32.mrb[175].mxu1 }
 0x811   :  { %v10550_v50 = vadd.f32 %v5283_v39, %v15543_v13 }
 0x812   :  { %v5348_v60 = vpack.c.bf16 %v10549_v33, %v10547_v34  ;;  %v17237_v34 = vld [vmem:[#allocation63_spill] sm:$0xff] }
 0x813   :  { %v5349_v53 = vpack.c.bf16 %v10550_v50, %v10548_v5  ;;  %v17238_v50 = vld [vmem:[#allocation75_spill] sm:$0xff] }
 0x815   :  { %v5287_v61 = vpop.f32.mrb[176].mxu1  ;;  %6276 = vmatprep.subr.bf16.mxu0 %v5349_v53 }
 0x816   :  { %v5289_v40 = vpop.f32.mrb[177].mxu1  ;;  %6277 = vmatpush1.bf16.msra.mxu0 %v5348_v60  ;;  %v10551_v9 = vadd.f32 %v5287_v61, %v15540_v43 }
 0x817   :  { %v5291_v55 = vpop.f32.mrb[178].mxu1  ;;  %v10552_v27 = vadd.f32 %v5289_v40, %v15543_v13  ;;  %v17239_v40 = vld [vmem:[#allocation73_spill] sm:$0xff] }
 0x818   :  { %v10553_v8 = vadd.f32 %v5291_v55, %v15540_v43  ;;  %v5293_v42 = vpop.f32.mrb[179].mxu1 }
 0x819   :  { %v10554_v63 = vadd.f32 %v5293_v42, %v15543_v13  ;;  %v17240_v42 = vld [vmem:[#allocation74_spill] sm:$0xff] }
 0x81a   :  { %v5354_v38 = vpack.c.bf16 %v10553_v8, %v10551_v9 }
 0x81b   :  { %v5355_v31 = vpack.c.bf16 %v10554_v63, %v10552_v27 }
 0x81d   :  { %v5297_v12 = vpop.f32.mrb[180].mxu1  ;;  %6278 = vmatprep.subr.bf16.mxu0 %v5355_v31  ;;  %v17241_v31 = vld [vmem:[#allocation71_spill] sm:$0xff] }
 0x81e   :  { %v5299_v41 = vpop.f32.mrb[181].mxu1  ;;  %6279 = vmatpush1.bf16.msra.mxu0 %v5354_v38  ;;  %v10555_v49 = vadd.f32 %v5297_v12, %v15540_v43 }
 0x81f   :  { %v5301_v45 = vpop.f32.mrb[182].mxu1  ;;  %v10556_v17 = vadd.f32 %v5299_v41, %v15543_v13 }
 0x820   :  { %v10557_v57 = vadd.f32 %v5301_v45, %v15540_v43  ;;  %v5303_v30 = vpop.f32.mrb[183].mxu1 }
 0x821   :  { %v10558_v10 = vadd.f32 %v5303_v30, %v15543_v13 }
 0x822   :  { %v5360_v21 = vpack.c.bf16 %v10557_v57, %v10555_v49  ;;  %v17242_v49 = vld [vmem:[#allocation51_spill] sm:$0xff] }
 0x823   :  { %v5361_v6 = vpack.c.bf16 %v10558_v10, %v10556_v17  ;;  %v17243_v10 = vld [vmem:[#allocation49_spill] sm:$0xff] }
 0x825   :  { %v5307_v7 = vpop.f32.mrb[184].mxu1  ;;  %6280 = vmatprep.subr.bf16.mxu0 %v5361_v6 }
 0x826   :  { %v5309_v22 = vpop.f32.mrb[185].mxu1  ;;  %6281 = vmatpush1.bf16.msra.mxu0 %v5360_v21  ;;  %v10559_v25 = vadd.f32 %v5307_v7, %v15540_v43 }
 0x827   :  { %v5311_v15 = vpop.f32.mrb[186].mxu1  ;;  %v10560_v26 = vadd.f32 %v5309_v22, %v15543_v13  ;;  %v17244_v22 = vld [vmem:[#allocation50_spill] sm:$0xff] }
 0x828   :  { %v10561_v11 = vadd.f32 %v5311_v15, %v15540_v43  ;;  %v5313_v62 = vpop.f32.mrb[187].mxu1 }
 0x829   :  { %v10562_v46 = vadd.f32 %v5313_v62, %v15543_v13  ;;  %v17245_v62 = vld [vmem:[#allocation48_spill] sm:$0xff] }
 0x82a   :  { %v5366_v51 = vpack.c.bf16 %v10561_v11, %v10559_v25 }
 0x82b   :  { %v5367_v58 = vpack.c.bf16 %v10562_v46, %v10560_v26 }
 0x82d   :  { %v5317_v0 = vpop.f32.mrb[188].mxu1  ;;  %6282 = vmatprep.subr.bf16.mxu0 %v5367_v58  ;;  %v17246_v58 = vld [vmem:[#allocation55_spill] sm:$0xff] }
 0x82e   :  { %v5319_v18 = vpop.f32.mrb[189].mxu1  ;;  %6283 = vmatpush1.bf16.msra.mxu0 %v5366_v51  ;;  %v10563_v32 = vadd.f32 %v5317_v0, %v15540_v43 }
 0x82f   :  { %v5321_v19 = vpop.f32.mrb[190].mxu1  ;;  %v10564_v59 = vadd.f32 %v5319_v18, %v15543_v13 }
 0x830   :  { %v10565_v2 = vadd.f32 %v5321_v19, %v15540_v43  ;;  %v5323_v28 = vpop.f32.mrb[191].mxu1 }
 0x831   :  { %v10566_v29 = vadd.f32 %v5323_v28, %v15543_v13  ;;  %v17236_v13 = vld [vmem:[#allocation66_spill] sm:$0xff] }
 0x832   :  { %v5372_v35 = vpack.c.bf16 %v10565_v2, %v10563_v32  ;;  %v17247_v32 = vld [vmem:[#allocation53_spill] sm:$0xff] }
 0x833   :  { %v5373_v56 = vpack.c.bf16 %v10566_v29, %v10564_v59  ;;  %v17248_v29 = vld [vmem:[#allocation54_spill] sm:$0xff] }
 0x835   :  { %6284 = vmatprep.subr.bf16.mxu0 %v5373_v56 }
 0x836   :  { %6285 = vmatpush1.bf16.msra.mxu0 %v5372_v35 }
 0x88f   :  { %v6039_v48 = vpop.f32.mrb[192].mxu1 }
 0x890   :  { %v15578_v47 = vadd.f32 %v6039_v48, %v17234_v1  ;;  %v6041_v36 = vpop.f32.mrb[193].mxu1 }
 0x891   :  { %v6042_v20 = vpop.f32.mrb[194].mxu1  ;;  %v17249_v36 = vld [vmem:[#allocation52_spill] sm:$0xff] }
 0x892   :  { %v15581_v3 = vadd.f32 %v6042_v20, %v17235_v37  ;;  %v6044_v14 = vpop.f32.mrb[195].mxu1  ;;  %6102 = vmax.xlane.f32.xlu0 %v15578_v47 }
 0x894   :  { %6104 = vmax.xlane.f32.xlu1 %v15581_v3 }
 0x897   :  { %v6047_v43 = vpop.f32.mrb[196].mxu1 }
 0x898   :  { %v15586_v44 = vadd.f32 %v6047_v43, %v17236_v13  ;;  %v6049_v24 = vpop.f32.mrb[197].mxu1 }
 0x899   :  { %v6050_v52 = vpop.f32.mrb[198].mxu1 }
 0x89a   :  { %v15589_v33 = vadd.f32 %v6050_v52, %v17237_v34  ;;  %v6052_v39 = vpop.f32.mrb[199].mxu1  ;;  %6106 = vmax.xlane.f32.xlu0 %v15586_v44 }
 0x89c   :  { %6108 = vmax.xlane.f32.xlu1 %v15589_v33 }
 0x89f   :  { %v6055_v5 = vpop.f32.mrb[200].mxu1 }
 0x8a0   :  { %v15594_v60 = vadd.f32 %v6055_v5, %v17238_v50  ;;  %v6057_v53 = vpop.f32.mrb[201].mxu1 }
 0x8a1   :  { %v6058_v61 = vpop.f32.mrb[202].mxu1 }
 0x8a2   :  { %v15597_v55 = vadd.f32 %v6058_v61, %v17239_v40  ;;  %v6060_v9 = vpop.f32.mrb[203].mxu1  ;;  %6110 = vmax.xlane.f32.xlu0 %v15594_v60 }
 0x8a4   :  { %6112 = vmax.xlane.f32.xlu1 %v15597_v55 }
 0x8a7   :  { %v6063_v8 = vpop.f32.mrb[204].mxu1 }
 0x8a8   :  { %v15602_v27 = vadd.f32 %v6063_v8, %v17240_v42  ;;  %v6065_v63 = vpop.f32.mrb[205].mxu1 }
 0x8a9   :  { %v6066_v38 = vpop.f32.mrb[206].mxu1 }
 0x8aa   :  { %v15605_v12 = vadd.f32 %v6066_v38, %v17241_v31  ;;  %v6068_v41 = vpop.f32.mrb[207].mxu1  ;;  %6114 = vmax.xlane.f32.xlu0 %v15602_v27 }
 0x8ac   :  { %6116 = vmax.xlane.f32.xlu1 %v15605_v12 }
 0x8af   :  { %v6071_v45 = vpop.f32.mrb[208].mxu1 }
 0x8b0   :  { %v15610_v57 = vadd.f32 %v6071_v45, %v17242_v49  ;;  %v6073_v30 = vpop.f32.mrb[209].mxu1 }
 0x8b1   :  { %v6074_v17 = vpop.f32.mrb[210].mxu1 }
 0x8b2   :  { %v15613_v21 = vadd.f32 %v6074_v17, %v17243_v10  ;;  %v6076_v6 = vpop.f32.mrb[211].mxu1  ;;  %6118 = vmax.xlane.f32.xlu0 %v15610_v57 }
 0x8b4   :  { %6120 = vmax.xlane.f32.xlu1 %v15613_v21 }
 0x8b7   :  { %v6079_v7 = vpop.f32.mrb[212].mxu1 }
 0x8b8   :  { %v15618_v15 = vadd.f32 %v6079_v7, %v17244_v22  ;;  %v6081_v25 = vpop.f32.mrb[213].mxu1 }
 0x8b9   :  { %v6082_v11 = vpop.f32.mrb[214].mxu1 }
 0x8ba   :  { %v15621_v26 = vadd.f32 %v6082_v11, %v17245_v62  ;;  %v6084_v46 = vpop.f32.mrb[215].mxu1  ;;  %6122 = vmax.xlane.f32.xlu0 %v15618_v15 }
 0x8bc   :  { %6124 = vmax.xlane.f32.xlu1 %v15621_v26 }
 0x8bf   :  { %v6087_v51 = vpop.f32.mrb[216].mxu1 }
 0x8c0   :  { %v15626_v0 = vadd.f32 %v6087_v51, %v17246_v58  ;;  %v6089_v18 = vpop.f32.mrb[217].mxu1 }
 0x8c1   :  { %v6090_v19 = vpop.f32.mrb[218].mxu1 }
 0x8c2   :  { %v15629_v2 = vadd.f32 %v6090_v19, %v17247_v32  ;;  %v6092_v28 = vpop.f32.mrb[219].mxu1  ;;  %6126 = vmax.xlane.f32.xlu0 %v15626_v0 }
 0x8c4   :  { %6128 = vmax.xlane.f32.xlu1 %v15629_v2 }
 0x8c7   :  { %v6095_v59 = vpop.f32.mrb[220].mxu1 }
 0x8c8   :  { %v15634_v35 = vadd.f32 %v6095_v59, %v17248_v29  ;;  %v6097_v56 = vpop.f32.mrb[221].mxu1 }
 0x8c9   :  { %v6098_v48 = vpop.f32.mrb[222].mxu1 }
 0x8ca   :  { %v15637_v20 = vadd.f32 %v6098_v48, %v17249_v36  ;;  %v6100_v14 = vpop.f32.mrb[223].mxu1  ;;  %6130 = vmax.xlane.f32.xlu0 %v15634_v35 }
 0x8cc   :  { %6132 = vmax.xlane.f32.xlu1 %v15637_v20 }
 0x91f   :  { %v6103_v43 = vpop.xlane.xlu0 %6102 }
 0x920   :  { %v6134_v24 = vsub.f32 %v15578_v47, %v6103_v43 }
 0x921   :  { %v6105_v52 = vpop.xlane.xlu1 %6104 }
 0x922   :  { %v6150_v39 = vmul.f32 1.442695, %v6134_v24  ;;  %v6135_v5 = vsub.f32 %v15581_v3, %v6105_v52 }
 0x924   :  { %11824 = vpow2.f32 %v6150_v39  ;;  %v6152_v53 = vmul.f32 1.442695, %v6135_v5 }
 0x926   :  { %11826 = vpow2.f32 %v6152_v53 }
 0x927   :  { %v6107_v61 = vpop.xlane.xlu0 %6106 }
 0x928   :  { %v6136_v9 = vsub.f32 %v15586_v44, %v6107_v61 }
 0x929   :  { %v6109_v8 = vpop.xlane.xlu1 %6108 }
 0x92a   :  { %v6154_v63 = vmul.f32 1.442695, %v6136_v9  ;;  %v6137_v38 = vsub.f32 %v15589_v33, %v6109_v8 }
 0x92c   :  { %11828 = vpow2.f32 %v6154_v63  ;;  %v6156_v41 = vmul.f32 1.442695, %v6137_v38 }
 0x92e   :  { %v15645_v45 = vpop.eup %11824  ;;  %11830 = vpow2.f32 %v6156_v41 }
 0x92f   :  { %6182 = vadd.xlane.f32.xlu0 %v15645_v45  ;;  %v6111_v47 = vpop.xlane.xlu0 %6110 }
 0x930   :  { %v15648_v30 = vpop.eup %11826  ;;  %v6138_v3 = vsub.f32 %v15594_v60, %v6111_v47 }
 0x931   :  { %6184 = vadd.xlane.f32.xlu1 %v15648_v30  ;;  %v6113_v17 = vpop.xlane.xlu1 %6112 }
 0x932   :  { %v6158_v44 = vmul.f32 1.442695, %v6138_v3  ;;  %v6139_v6 = vsub.f32 %v15597_v55, %v6113_v17 }
 0x934   :  { %11832 = vpow2.f32 %v6158_v44  ;;  %v6160_v33 = vmul.f32 1.442695, %v6139_v6 }
 0x936   :  { %v15653_v7 = vpop.eup %11828  ;;  %11834 = vpow2.f32 %v6160_v33 }
 0x937   :  { %6186 = vadd.xlane.f32.xlu0 %v15653_v7  ;;  %v6115_v25 = vpop.xlane.xlu0 %6114 }
 0x938   :  { %v15656_v11 = vpop.eup %11830  ;;  %v6140_v46 = vsub.f32 %v15602_v27, %v6115_v25 }
 0x939   :  { %6188 = vadd.xlane.f32.xlu1 %v15656_v11  ;;  %v6117_v60 = vpop.xlane.xlu1 %6116 }
 0x93a   :  { %v6162_v51 = vmul.f32 1.442695, %v6140_v46  ;;  %v6141_v18 = vsub.f32 %v15605_v12, %v6117_v60 }
 0x93c   :  { %11836 = vpow2.f32 %v6162_v51  ;;  %v6164_v55 = vmul.f32 1.442695, %v6141_v18  ;;  %v11506_v51 = vld [vmem:[#allocation15 + $0x4] ss:$12 sps:$4 sm:$0xff]   ;;  %v11509_v18 = vld [vmem:[#allocation15 + $0x1c] ss:$12 sps:$4 sm:$0xff]  }
 0x93d   :  { %6941 = vmatprep.subr.bf16.mxu1 %v11506_v51  ;;  %v17251_v51 = vld [vmem:[#allocation57_spill] sm:$0xff] }
 0x93e   :  { %v15661_v19 = vpop.eup %11832  ;;  %11838 = vpow2.f32 %v6164_v55  ;;  %v11507_v55 = vld [vmem:[#allocation15 + $0x18] ss:$12 sps:$4 sm:$0xff]  }
 0x93f   :  { %6190 = vadd.xlane.f32.xlu0 %v15661_v19  ;;  %v6119_v28 = vpop.xlane.xlu0 %6118 }
 0x940   :  { %v15664_v59 = vpop.eup %11834  ;;  %v6142_v56 = vsub.f32 %v15610_v57, %v6119_v28  ;;  %v11512_v28 = vld [vmem:[#allocation15 + $0x34] ss:$12 sps:$4 sm:$0xff]  }
 0x941   :  { %6192 = vadd.xlane.f32.xlu1 %v15664_v59  ;;  %v6121_v27 = vpop.xlane.xlu1 %6120 }
 0x942   :  { %v6166_v48 = vmul.f32 1.442695, %v6142_v56  ;;  %v6143_v14 = vsub.f32 %v15613_v21, %v6121_v27  ;;  %v11531_v56 = vld [vmem:[#allocation18 + $0x40] sm:$0xff]   ;;  %v11510_v27 = vld [vmem:[#allocation15 + $0x30] ss:$12 sps:$4 sm:$0xff]  }
 0x943   :  { %9952 = vmatprep.subr.bf16.mxu0 %v11531_v56 }
 0x944   :  { %11840 = vpow2.f32 %v6166_v48  ;;  %v6168_v12 = vmul.f32 1.442695, %v6143_v14  ;;  %v11515_v48 = vld [vmem:[#allocation15 + $0x4c] ss:$12 sps:$4 sm:$0xff]   ;;  %v11513_v14 = vld [vmem:[#allocation15 + $0x48] ss:$12 sps:$4 sm:$0xff]  }
 0x946   :  { %v15669_v43 = vpop.eup %11836  ;;  %11842 = vpow2.f32 %v6168_v12  ;;  %v11518_v12 = vld [vmem:[#allocation15 + $0x64] ss:$12 sps:$4 sm:$0xff]  }
 0x947   :  { %6194 = vadd.xlane.f32.xlu0 %v15669_v43  ;;  %v6123_v24 = vpop.xlane.xlu0 %6122 }
 0x948   :  { %v15672_v52 = vpop.eup %11838  ;;  %v6144_v39 = vsub.f32 %v15618_v15, %v6123_v24  ;;  %v11516_v24 = vld [vmem:[#allocation15 + $0x60] ss:$12 sps:$4 sm:$0xff]  }
 0x949   :  { %6196 = vadd.xlane.f32.xlu1 %v15672_v52  ;;  %v6125_v57 = vpop.xlane.xlu1 %6124 }
 0x94a   :  { %v6170_v5 = vmul.f32 1.442695, %v6144_v39  ;;  %v6145_v53 = vsub.f32 %v15621_v26, %v6125_v57  ;;  %v11521_v39 = vld [vmem:[#allocation15 + $0x7c] ss:$12 sps:$4 sm:$0xff]   ;;  %v11519_v57 = vld [vmem:[#allocation15 + $0x78] ss:$12 sps:$4 sm:$0xff]  }
 0x94c   :  { %11844 = vpow2.f32 %v6170_v5  ;;  %v6172_v21 = vmul.f32 1.442695, %v6145_v53  ;;  %v11524_v5 = vld [vmem:[#allocation15 + $0x94] ss:$12 sps:$4 sm:$0xff]   ;;  %v11522_v53 = vld [vmem:[#allocation15 + $0x90] ss:$12 sps:$4 sm:$0xff]  }
 0x94e   :  { %v15677_v61 = vpop.eup %11840  ;;  %11846 = vpow2.f32 %v6172_v21  ;;  %v11527_v21 = vld [vmem:[#allocation15 + $0xac] ss:$12 sps:$4 sm:$0xff]  }
 0x94f   :  { %6198 = vadd.xlane.f32.xlu0 %v15677_v61  ;;  %v6127_v9 = vpop.xlane.xlu0 %6126 }
 0x950   :  { %v15680_v8 = vpop.eup %11842  ;;  %v6146_v63 = vsub.f32 %v15626_v0, %v6127_v9  ;;  %v11525_v9 = vld [vmem:[#allocation15 + $0xa8] ss:$12 sps:$4 sm:$0xff]  }
 0x951   :  { %6200 = vadd.xlane.f32.xlu1 %v15680_v8  ;;  %v6129_v15 = vpop.xlane.xlu1 %6128 }
 0x952   :  { %v6174_v38 = vmul.f32 1.442695, %v6146_v63  ;;  %v6147_v41 = vsub.f32 %v15629_v2, %v6129_v15  ;;  %v11530_v63 = vld [vmem:[#allocation15 + $0xc4] ss:$12 sps:$4 sm:$0xff]   ;;  %v11528_v15 = vld [vmem:[#allocation15 + $0xc0] ss:$12 sps:$4 sm:$0xff]  }
 0x954   :  { %11848 = vpow2.f32 %v6174_v38  ;;  %v6176_v26 = vmul.f32 1.442695, %v6147_v41  ;;  %v11535_v38 = vld [vmem:[#allocation15 + $0xdc] ss:$12 sps:$4 sm:$0xff]   ;;  %v11533_v41 = vld [vmem:[#allocation15 + $0xd8] ss:$12 sps:$4 sm:$0xff]  }
 0x956   :  { %v15685_v47 = vpop.eup %11844  ;;  %11850 = vpow2.f32 %v6176_v26 }
 0x957   :  { %6202 = vadd.xlane.f32.xlu0 %v15685_v47  ;;  %v6131_v3 = vpop.xlane.xlu0 %6130 }
 0x958   :  { %v15688_v17 = vpop.eup %11846  ;;  %v6148_v44 = vsub.f32 %v15634_v35, %v6131_v3 }
 0x959   :  { %6204 = vadd.xlane.f32.xlu1 %v15688_v17  ;;  %v6133_v0 = vpop.xlane.xlu1 %6132 }
 0x95a   :  { %v6178_v6 = vmul.f32 1.442695, %v6148_v44  ;;  %v6149_v33 = vsub.f32 %v15637_v20, %v6133_v0  ;;  %v11504_v20 = vld [vmem:[#allocation15] ss:$12 sps:$4 sm:$0xff]  }
 0x95b   :  { %6942 = vmatpush1.bf16.msra.mxu1 %v11504_v20 }
 0x95c   :  { %11852 = vpow2.f32 %v6178_v6  ;;  %v6180_v2 = vmul.f32 1.442695, %v6149_v33  ;;  %6943 = vmatprep.subr.bf16.mxu1 %v11509_v18  ;;  %v17250_v33 = vld [vmem:[#allocation59_spill] sm:$0xff] }
 0x95e   :  { %v15693_v25 = vpop.eup %11848  ;;  %11854 = vpow2.f32 %v6180_v2 }
 0x95f   :  { %6206 = vadd.xlane.f32.xlu0 %v15693_v25  ;;  %6944 = vmatpush1.bf16.msra.mxu1 %v11507_v55 }
 0x960   :  { %v15696_v46 = vpop.eup %11850  ;;  %6945 = vmatprep.subr.bf16.mxu1 %v11512_v28 }
 0x961   :  { %6208 = vadd.xlane.f32.xlu1 %v15696_v46 }
 0x963   :  { %6946 = vmatpush1.bf16.msra.mxu1 %v11510_v27  ;;  %v11532_v27 = vld [vmem:[#allocation18] sm:$0xff]  }
 0x964   :  { %6947 = vmatprep.subr.bf16.mxu1 %v11515_v48 }
 0x966   :  { %v15699_v60 = vpop.eup %11852 }
 0x967   :  { %6210 = vadd.xlane.f32.xlu0 %v15699_v60  ;;  %6948 = vmatpush1.bf16.msra.mxu1 %v11513_v14 }
 0x968   :  { %v15702_v35 = vpop.eup %11854  ;;  %6949 = vmatprep.subr.bf16.mxu1 %v11518_v12  ;;  %v11536_v12 = vld [vmem:[#allocation18 + $0x48] sm:$0xff]  }
 0x969   :  { %6212 = vadd.xlane.f32.xlu1 %v15702_v35 }
 0x96b   :  { %6950 = vmatpush1.bf16.msra.mxu1 %v11516_v24 }
 0x96c   :  { %6951 = vmatprep.subr.bf16.mxu1 %v11521_v39  ;;  %v17252_v39 = vld [vmem:[#allocation58_spill] sm:$0xff] }
 0x96f   :  { %6952 = vmatpush1.bf16.msra.mxu1 %v11519_v57 }
 0x970   :  { %6953 = vmatprep.subr.bf16.mxu1 %v11524_v5 }
 0x973   :  { %6954 = vmatpush1.bf16.msra.mxu1 %v11522_v53  ;;  %v17253_v53 = vld [vmem:[#allocation56_spill] sm:$0xff] }
 0x974   :  { %6955 = vmatprep.subr.bf16.mxu1 %v11527_v21 }
 0x977   :  { %6956 = vmatpush1.bf16.msra.mxu1 %v11525_v9 }
 0x978   :  { %6957 = vmatprep.subr.bf16.mxu1 %v11530_v63 }
 0x97b   :  { %6958 = vmatpush1.bf16.msra.mxu1 %v11528_v15 }
 0x97c   :  { %6959 = vmatprep.subr.bf16.mxu1 %v11535_v38 }
 0x97f   :  { %6960 = vmatpush1.bf16.msra.mxu1 %v11533_v41  ;;  %v17254_v41 = vld [vmem:[#allocation64_spill] sm:$0xff] }
 0x9bc   :  { %v6183_v26 = vpop.xlane.xlu0 %6182 }
 0x9bd   :  { %11856 = vrcp.f32 %v6183_v26 }
 0x9be   :  { %v6185_v3 = vpop.xlane.xlu1 %6184 }
 0x9bf   :  { %11858 = vrcp.f32 %v6185_v3 }
 0x9c4   :  { %v6187_v44 = vpop.xlane.xlu0 %6186 }
 0x9c5   :  { %11860 = vrcp.f32 %v6187_v44  ;;  %v17255_v44 = vld [vmem:[#allocation61_spill] sm:$0xff] }
 0x9c6   :  { %v6189_v0 = vpop.xlane.xlu1 %6188 }
 0x9c7   :  { %v11857_v6 = vpop.eup %11856  ;;  %11862 = vrcp.f32 %v6189_v0 }
 0x9c8   :  { %v6230_v2 = vmul.f32 %v11857_v6, %v17250_v33 }
 0x9c9   :  { %v11859_v20 = vpop.eup %11858 }
 0x9ca   :  { %v6231_v18 = vmul.f32 %v11859_v20, %v17251_v51  ;;  %v6246_v55 = vmul.f32 %v15645_v45, %v6230_v2 }
 0x9cc   :  { %v6247_v28 = vmul.f32 %v15648_v30, %v6231_v18  ;;  %v6191_v56 = vpop.xlane.xlu0 %6190 }
 0x9cd   :  { %11864 = vrcp.f32 %v6191_v56 }
 0x9ce   :  { %v6193_v48 = vpop.xlane.xlu1 %6192  ;;  %v6262_v14 = vpack.c.bf16 %v6247_v28, %v6246_v55  ;;  %v17256_v55 = vld [vmem:[#allocation62_spill] sm:$0xff] }
 0x9cf   :  { %v11861_v24 = vpop.eup %11860  ;;  %11866 = vrcp.f32 %v6193_v48 }
 0x9d0   :  { %6303 = vmatmul.mubr.bf16.vlgmr.msra.gmra.mrb[192].mxu0 %v6262_v14  ;;  %v6232_v57 = vmul.f32 %v11861_v24, %v17252_v39 }
 0x9d1   :  { %v11863_v5 = vpop.eup %11862  ;;  %6312 = vmatprep.mubr.bf16.mxu0 %v17229_v23  ;;  %9953 = vmatpush3.bf16.msra.mxu0 %v11532_v27  ;;  %v17257_v27 = vld [vmem:[#allocation60_spill] sm:$0xff] }
 0x9d2   :  { %v6233_v21 = vmul.f32 %v11863_v5, %v17253_v53  ;;  %9954 = vmatprep.subr.bf16.mxu0 %v11536_v12  ;;  %v6248_v30 = vmul.f32 %v15653_v7, %v6232_v57  ;;  %v17258_v5 = vld [vmem:[#allocation72_spill] sm:$0xff] }
 0x9d4   :  { %v6195_v45 = vpop.xlane.xlu0 %6194  ;;  %v6249_v9 = vmul.f32 %v15656_v11, %v6233_v21 }
 0x9d5   :  { %11868 = vrcp.f32 %v6195_v45 }
 0x9d6   :  { %v6197_v63 = vpop.xlane.xlu1 %6196  ;;  %v6263_v15 = vpack.c.bf16 %v6249_v9, %v6248_v30  ;;  %v17259_v30 = vld [vmem:[#allocation69_spill] sm:$0xff] }
 0x9d7   :  { %v11865_v38 = vpop.eup %11864  ;;  %11870 = vrcp.f32 %v6197_v63 }
 0x9d8   :  { %6313 = vmatmul.mubr.bf16.gmra.mrb[196].mxu0 %v6263_v15  ;;  %v6234_v26 = vmul.f32 %v11865_v38, %v17254_v41 }
 0x9d9   :  { %v11867_v3 = vpop.eup %11866  ;;  %6322 = vmatprep.mubr.bf16.mxu0 %v17229_v23 }
 0x9da   :  { %v6235_v0 = vmul.f32 %v11867_v3, %v17255_v44  ;;  %v6250_v2 = vmul.f32 %v15661_v19, %v6234_v26  ;;  %v17260_v3 = vld [vmem:[#allocation70_spill] sm:$0xff] }
 0x9dc   :  { %v6199_v6 = vpop.xlane.xlu0 %6198  ;;  %v6251_v7 = vmul.f32 %v15664_v59, %v6235_v0 }
 0x9dd   :  { %11872 = vrcp.f32 %v6199_v6 }
 0x9de   :  { %v6201_v11 = vpop.xlane.xlu1 %6200  ;;  %v6264_v20 = vpack.c.bf16 %v6251_v7, %v6250_v2  ;;  %v17261_v2 = vld [vmem:[#allocation68_spill] sm:$0xff] }
 0x9df   :  { %v11869_v18 = vpop.eup %11868  ;;  %11874 = vrcp.f32 %v6201_v11 }
 0x9e0   :  { %6323 = vmatmul.mubr.bf16.gmra.mrb[200].mxu0 %v6264_v20  ;;  %v6236_v28 = vmul.f32 %v11869_v18, %v17256_v55 }
 0x9e1   :  { %v11871_v56 = vpop.eup %11870  ;;  %6332 = vmatprep.mubr.bf16.mxu0 %v17229_v23 }
 0x9e2   :  { %v6237_v48 = vmul.f32 %v11871_v56, %v17257_v27  ;;  %v6252_v12 = vmul.f32 %v15669_v43, %v6236_v28  ;;  %v17262_v56 = vld [vmem:[#allocation79_spill] sm:$0xff] }
 0x9e4   :  { %v6203_v14 = vpop.xlane.xlu0 %6202  ;;  %v6253_v19 = vmul.f32 %v15672_v52, %v6237_v48 }
 0x9e5   :  { %11876 = vrcp.f32 %v6203_v14 }
 0x9e6   :  { %v6205_v59 = vpop.xlane.xlu1 %6204  ;;  %v6265_v24 = vpack.c.bf16 %v6253_v19, %v6252_v12  ;;  %v17263_v12 = vld [vmem:[#allocation77_spill] sm:$0xff] }
 0x9e7   :  { %v11873_v57 = vpop.eup %11872  ;;  %11878 = vrcp.f32 %v6205_v59 }
 0x9e8   :  { %6333 = vmatmul.mubr.bf16.gmra.mrb[204].mxu0 %v6265_v24  ;;  %v6238_v21 = vmul.f32 %v11873_v57, %v17258_v5 }
 0x9e9   :  { %v11875_v45 = vpop.eup %11874  ;;  %6342 = vmatprep.mubr.bf16.mxu0 %v17229_v23 }
 0x9ea   :  { %v6239_v9 = vmul.f32 %v11875_v45, %v17259_v30  ;;  %v6254_v15 = vmul.f32 %v15677_v61, %v6238_v21 }
 0x9ec   :  { %v6207_v63 = vpop.xlane.xlu0 %6206  ;;  %v6255_v43 = vmul.f32 %v15680_v8, %v6239_v9  ;;  %v17265_v9 = vld [vmem:[#allocation76_spill] sm:$0xff] }
 0x9ed   :  { %11880 = vrcp.f32 %v6207_v63 }
 0x9ee   :  { %v6209_v52 = vpop.xlane.xlu1 %6208  ;;  %v6266_v38 = vpack.c.bf16 %v6255_v43, %v6254_v15 }
 0x9ef   :  { %v11877_v26 = vpop.eup %11876  ;;  %11882 = vrcp.f32 %v6209_v52 }
 0x9f0   :  { %6343 = vmatmul.mubr.bf16.gmra.mrb[208].mxu0 %v6266_v38  ;;  %v6240_v0 = vmul.f32 %v11877_v26, %v17260_v3  ;;  %v11537_v38 = vld [vmem:[#allocation18 + $0x8] sm:$0xff]   ;;  %v11541_v26 = vld [vmem:[#allocation18 + $0x50] sm:$0xff]  }
 0x9f1   :  { %v11879_v6 = vpop.eup %11878  ;;  %6352 = vmatprep.mubr.bf16.mxu0 %v17229_v23  ;;  %9955 = vmatpush3.bf16.msra.mxu0 %v11537_v38 }
 0x9f2   :  { %v6241_v7 = vmul.f32 %v11879_v6, %v17261_v2  ;;  %v6256_v20 = vmul.f32 %v15685_v47, %v6240_v0  ;;  %v11542_v0 = vld [vmem:[#allocation18 + $0x10] sm:$0xff]   ;;  %9956 = vmatprep.subr.bf16.mxu0 %v11541_v26 }
 0x9f3   :  { %v11545_v6 = vld [vmem:[#allocation15 + $0x10c] ss:$12 sps:$4 sm:$0xff]  }
 0x9f4   :  { %v6211_v11 = vpop.xlane.xlu0 %6210  ;;  %v6257_v61 = vmul.f32 %v15688_v17, %v6241_v7  ;;  %v17264_v17 = vld [vmem:[#allocation78_spill] sm:$0xff] }
 0x9f5   :  { %11884 = vrcp.f32 %v6211_v11  ;;  %v11546_v7 = vld [vmem:[#allocation18 + $0x58] sm:$0xff]   ;;  %9957 = vmatpush3.bf16.msra.mxu0 %v11542_v0  ;;  %v11543_v11 = vld [vmem:[#allocation15 + $0x108] ss:$12 sps:$4 sm:$0xff]  }
 0x9f6   :  { %v6213_v8 = vpop.xlane.xlu1 %6212  ;;  %v6267_v18 = vpack.c.bf16 %v6257_v61, %v6256_v20  ;;  %v11547_v20 = vld [vmem:[#allocation18 + $0x18] sm:$0xff]   ;;  %9958 = vmatprep.subr.bf16.mxu0 %v11546_v7 }
 0x9f7   :  { %v11881_v28 = vpop.eup %11880  ;;  %11886 = vrcp.f32 %v6213_v8  ;;  %v11548_v61 = vld [vmem:[#allocation15 + $0x120] ss:$12 sps:$4 sm:$0xff]   ;;  %v11552_v8 = vld [vmem:[#allocation18 + $0x20] sm:$0xff]  }
 0x9f8   :  { %6353 = vmatmul.mubr.bf16.gmra.mrb[212].mxu0 %v6267_v18  ;;  %v6242_v48 = vmul.f32 %v11881_v28, %v17262_v56  ;;  %v11555_v18 = vld [vmem:[#allocation15 + $0x13c] ss:$12 sps:$4 sm:$0xff]   ;;  %v11556_v28 = vld [vmem:[#allocation18 + $0x68] sm:$0xff]  }
 0x9f9   :  { %v11883_v14 = vpop.eup %11882  ;;  %6362 = vmatprep.mubr.bf16.mxu0 %v17229_v23  ;;  %9959 = vmatpush3.bf16.msra.mxu0 %v11547_v20 }
 0x9fa   :  { %v6243_v19 = vmul.f32 %v11883_v14, %v17263_v12  ;;  %v6258_v59 = vmul.f32 %v15693_v25, %v6242_v48  ;;  %v11538_v25 = vld [vmem:[#allocation15 + $0xf0] ss:$12 sps:$4 sm:$0xff]   ;;  %v11553_v48 = vld [vmem:[#allocation15 + $0x138] ss:$12 sps:$4 sm:$0xff]  }
 0x9fb   :  { %v11557_v14 = vld [vmem:[#allocation18 + $0x28] sm:$0xff]  }
 0x9fc   :  { %v6259_v24 = vmul.f32 %v15696_v46, %v6243_v19  ;;  %v11540_v46 = vld [vmem:[#allocation15 + $0xf4] ss:$12 sps:$4 sm:$0xff]   ;;  %v11558_v19 = vld [vmem:[#allocation15 + $0x150] ss:$12 sps:$4 sm:$0xff]  }
 0x9fd   :  { %6961 = vmatprep.subr.bf16.mxu1 %v11540_v46 }
 0x9fe   :  { %v6268_v47 = vpack.c.bf16 %v6259_v24, %v6258_v59  ;;  %6962 = vmatpush1.bf16.msra.mxu1 %v11538_v25  ;;  %v11560_v59 = vld [vmem:[#allocation15 + $0x154] ss:$12 sps:$4 sm:$0xff]  }
 0x9ff   :  { %v11885_v57 = vpop.eup %11884  ;;  %6963 = vmatprep.subr.bf16.mxu1 %v11545_v6  ;;  %v11561_v24 = vld [vmem:[#allocation18 + $0x70] sm:$0xff]  }
 0xa00   :  { %6363 = vmatmul.mubr.bf16.gmra.mrb[216].mxu0 %v6268_v47  ;;  %v6244_v21 = vmul.f32 %v11885_v57, %v17264_v17  ;;  %v11562_v47 = vld [vmem:[#allocation18 + $0x30] sm:$0xff]  }
 0xa01   :  { %v11887_v45 = vpop.eup %11886  ;;  %6372 = vmatprep.mubr.bf16.mxu0 %v17229_v23  ;;  %v11565_v57 = vld [vmem:[#allocation15 + $0x16c] ss:$12 sps:$4 sm:$0xff]  }
 0xa02   :  { %v6245_v63 = vmul.f32 %v11887_v45, %v17265_v9  ;;  %v6260_v15 = vmul.f32 %v15699_v60, %v6244_v21  ;;  %v11550_v60 = vld [vmem:[#allocation15 + $0x124] ss:$12 sps:$4 sm:$0xff]   ;;  %6964 = vmatpush1.bf16.msra.mxu1 %v11543_v11  ;;  %v11566_v21 = vld [vmem:[#allocation18 + $0x78] sm:$0xff]   ;;  %v11563_v45 = vld [vmem:[#allocation15 + $0x168] ss:$12 sps:$4 sm:$0xff]  }
 0xa03   :  { %6965 = vmatprep.subr.bf16.mxu1 %v11550_v60 }
 0xa04   :  { %v6261_v43 = vmul.f32 %v15702_v35, %v6245_v63  ;;  %v11551_v35 = vld [vmem:[#allocation18 + $0x60] sm:$0xff]   ;;  %v11567_v63 = vld [vmem:[#allocation18 + $0x38] sm:$0xff]  }
 0xa05   :  { %9960 = vmatprep.subr.bf16.mxu0 %v11551_v35 }
 0xa06   :  { %v6269_v52 = vpack.c.bf16 %v6261_v43, %v6260_v15  ;;  %6966 = vmatpush1.bf16.msra.mxu1 %v11548_v61  ;;  %9961 = vmatpush3.bf16.msra.mxu0 %v11552_v8  ;;  %v11568_v15 = vld [vmem:[#allocation15 + $0xc8] ss:$12 sps:$4 sm:$0xff]   ;;  %v5438_v43 = vld [vmem:[#allocation14] sm:$0x3] }
 0xa07   :  { %6967 = vmatprep.subr.bf16.mxu1 %v11555_v18  ;;  %9962 = vmatprep.subr.bf16.mxu0 %v11556_v28 }
 0xa08   :  { %6373 = vmatmul.mubr.bf16.gmra.mrb[220].mxu0 %v6269_v52  ;;  %v5439_v52 = vunpack.c.l.bf16 %v5438_v43 }
 0xa0a   :  { %6968 = vmatpush1.bf16.msra.mxu1 %v11553_v48  ;;  %9963 = vmatpush3.bf16.msra.mxu0 %v11557_v14  ;;  %v5444_v38 = vrot.slane %v5439_v52, %v17230_v4  ;;  %v5448_v25 = vrot.slane %v5439_v52, %v17232_v54 }
 0xa0b   :  { %6969 = vmatprep.subr.bf16.mxu1 %v11560_v59  ;;  %9964 = vmatprep.subr.bf16.mxu0 %v11561_v24 }
 0xa0c   :  { %v15747_v46 = vrot.slane %v5444_v38, %v17230_v4  ;;  %v15750_v26 = vrot.slane %v5448_v25, %v17230_v4 }
 0xa0e   :  { %6970 = vmatpush1.bf16.msra.mxu1 %v11558_v19  ;;  %9965 = vmatpush3.bf16.msra.mxu0 %v11562_v47 }
 0xa0f   :  { %6971 = vmatprep.subr.bf16.mxu1 %v11565_v57  ;;  %9966 = vmatprep.subr.bf16.mxu0 %v11566_v21 }
 0xa12   :  { %6972 = vmatpush1.bf16.msra.mxu1 %v11563_v45  ;;  %9967 = vmatpush3.bf16.msra.mxu0 %v11567_v63 }
 0xa13   :  { %9888 = vmatprep.subr.bf16.mxu1 %v11568_v15 }
 0xaa3   :  { %v6304_v0 = vpop.f32.mrb[192].mxu0 }
 0xaa4   :  { %v10567_v6 = vadd.f32 %v6304_v0, %v15747_v46  ;;  %v6306_v7 = vpop.f32.mrb[193].mxu0 }
 0xaa5   :  { %v15754_v11 = vadd.f32 %v6306_v7, %v15750_v26  ;;  %v6308_v20 = vpop.f32.mrb[194].mxu0 }
 0xaa6   :  { %v6415_v60 = vmin.f32 %v10567_v6, 0.0  ;;  %v10569_v35 = vadd.f32 %v6308_v20, %v15747_v46  ;;  %v6310_v61 = vpop.f32.mrb[195].mxu0  ;;  %vm6383_vm0 = vcmp.gt.f32.partialorder %v10567_v6, 0.0 }
 0xaa7   :  { %v6416_v8 = vmin.f32 %v15754_v11, 0.0  ;;  %v15759_v18 = vadd.f32 %v6310_v61, %v15750_v26  ;;  %vm6384_vm1 = vcmp.gt.f32.partialorder %v15754_v11, 0.0 }
 0xaa8   :  { %v6447_v28 = vmul.f32 1.442695, %v6415_v60  ;;  %v6417_v48 = vmin.f32 %v10569_v35, 0.0  ;;  %vm6385_vm2 = vcmp.gt.f32.partialorder %v10569_v35, 0.0 }
 0xaa9   :  { %v6449_v14 = vmul.f32 1.442695, %v6416_v8  ;;  %v6418_v19 = vmin.f32 %v15759_v18, 0.0  ;;  %vm6386_vm3 = vcmp.gt.f32.partialorder %v15759_v18, 0.0 }
 0xaaa   :  { %11888 = vpow2.f32 %v6447_v28  ;;  %v6451_v59 = vmul.f32 1.442695, %v6417_v48 }
 0xaab   :  { %11890 = vpow2.f32 %v6449_v14  ;;  %v6453_v24 = vmul.f32 1.442695, %v6418_v19  ;;  %v6314_v47 = vpop.f32.mrb[196].mxu0 }
 0xaac   :  { %11892 = vpow2.f32 %v6451_v59  ;;  %v15763_v57 = vadd.f32 %v6314_v47, %v15747_v46  ;;  %v6316_v21 = vpop.f32.mrb[197].mxu0 }
 0xaad   :  { %11894 = vpow2.f32 %v6453_v24  ;;  %v15766_v45 = vadd.f32 %v6316_v21, %v15750_v26  ;;  %v6318_v63 = vpop.f32.mrb[198].mxu0 }
 0xaae   :  { %v6419_v15 = vmin.f32 %v15763_v57, 0.0  ;;  %v15770_v43 = vadd.f32 %v6318_v63, %v15747_v46  ;;  %v6320_v52 = vpop.f32.mrb[199].mxu0  ;;  %vm6387_vm4 = vcmp.gt.f32.partialorder %v15763_v57, 0.0 }
 0xaaf   :  { %v6420_v38 = vmin.f32 %v15766_v45, 0.0  ;;  %v15774_v25 = vadd.f32 %v6320_v52, %v15750_v26  ;;  %vm6388_vm5 = vcmp.gt.f32.partialorder %v15766_v45, 0.0 }
 0xab0   :  { %v6455_v0 = vmul.f32 1.442695, %v6419_v15  ;;  %v6421_v7 = vmin.f32 %v15770_v43, 0.0  ;;  %vm6389_vm6 = vcmp.gt.f32.partialorder %v15770_v43, 0.0 }
 0xab1   :  { %v6457_v20 = vmul.f32 1.442695, %v6420_v38  ;;  %v6422_v60 = vmin.f32 %v15774_v25, 0.0  ;;  %vm6390_vm7 = vcmp.gt.f32.partialorder %v15774_v25, 0.0 }
 0xab2   :  { %11896 = vpow2.f32 %v6455_v0  ;;  %v6459_v61 = vmul.f32 1.442695, %v6421_v7 }
 0xab3   :  { %11898 = vpow2.f32 %v6457_v20  ;;  %v6461_v8 = vmul.f32 1.442695, %v6422_v60  ;;  %v6324_v28 = vpop.f32.mrb[200].mxu0 }
 0xab4   :  { %v11889_v48 = vpop.eup %11888  ;;  %11900 = vpow2.f32 %v6459_v61  ;;  %v15779_v14 = vadd.f32 %v6324_v28, %v15747_v46  ;;  %v6326_v19 = vpop.f32.mrb[201].mxu0 }
 0xab5   :  { %v11891_v59 = vpop.eup %11890  ;;  %v9679_v24 = vadd.f32 -1.0, %v11889_v48  ;;  %11902 = vpow2.f32 %v6461_v8  ;;  %v15782_v47 = vadd.f32 %v6326_v19, %v15750_v26  ;;  %v6328_v21 = vpop.f32.mrb[202].mxu0 }
 0xab6   :  { %v11893_v63 = vpop.eup %11892  ;;  %v9680_v15 = vadd.f32 -1.0, %v11891_v59  ;;  %v6423_v52 = vmin.f32 %v15779_v14, 0.0  ;;  %v15787_v38 = vadd.f32 %v6328_v21, %v15747_v46  ;;  %v6330_v0 = vpop.f32.mrb[203].mxu0  ;;  %vm6391_vm9 = vcmp.gt.f32.partialorder %v15779_v14, 0.0 }
 0xab7   :  { %v11895_v7 = vpop.eup %11894  ;;  %v9681_v20 = vadd.f32 -1.0, %v11893_v63  ;;  %v6424_v60 = vmin.f32 %v15782_v47, 0.0  ;;  %v6543_v61 = vsel %vm6383_vm0, %v10567_v6, %v9679_v24  ;;  %v15794_v9 = vadd.f32 %v6330_v0, %v15750_v26 }
 0xab8   :  { %v9682_v8 = vadd.f32 -1.0, %v11895_v7  ;;  %v6463_v28 = vmul.f32 1.442695, %v6423_v52  ;;  %v6425_v48 = vmin.f32 %v15787_v38, 0.0  ;;  %v6544_v21 = vsel %vm6384_vm1, %v15754_v11, %v9680_v15  ;;  %v11570_v11 = vld [vmem:[#allocation15 + $0xe0] ss:$12 sps:$4 sm:$0xff]  }
 0xab9   :  { %v6545_v19 = vsel %vm6385_vm2, %v10569_v35, %v9681_v20  ;;  %v6465_v59 = vmul.f32 1.442695, %v6424_v60  ;;  %v6426_v6 = vmin.f32 %v15794_v9, 0.0  ;;  %v11569_v35 = vld [vmem:[#allocation15 + $0x8] ss:$12 sps:$4 sm:$0xff]   ;;  %vm6393_vm8 = vcmp.gt.f32.partialorder %v15787_v38, 0.0 }
 0xaba   :  { %v15799_v63 = vpack.c.bf16 %v6545_v19, %v6543_v61  ;;  %11904 = vpow2.f32 %v6463_v28  ;;  %v6467_v17 = vmul.f32 1.442695, %v6425_v48  ;;  %v6546_v12 = vsel %vm6386_vm3, %v15759_v18, %v9682_v8  ;;  %v11571_v19 = vld [vmem:[#allocation15 + $0x20] ss:$12 sps:$4 sm:$0xff]  }
 0xabb   :  { %11906 = vpow2.f32 %v6465_v59  ;;  %v6334_v24 = vpop.f32.mrb[204].mxu0  ;;  %v15803_v52 = vpack.c.bf16 %v6546_v12, %v6544_v21  ;;  %v6469_v60 = vmul.f32 1.442695, %v6426_v6  ;;  %vm6392_vm10 = vcmp.gt.f32.partialorder %v15782_v47, 0.0 }
 0xabc   :  { %v11897_v7 = vpop.eup %11896  ;;  %11908 = vpow2.f32 %v6467_v17  ;;  %v15806_v0 = vadd.f32 %v6334_v24, %v15747_v46  ;;  %v6336_v20 = vpop.f32.mrb[205].mxu0  ;;  %vm6394_vm11 = vcmp.gt.f32.partialorder %v15794_v9, 0.0 }
 0xabd   :  { %v11899_v15 = vpop.eup %11898  ;;  %v15810_v18 = vadd.f32 %v6336_v20, %v15750_v26  ;;  %v6338_v61 = vpop.f32.mrb[206].mxu0  ;;  %6973 = vmatprep.mubr.bf16.mxu1 %v15803_v52  ;;  %7341 = vmatprep.mubr.bf16.mxu0 %v15803_v52  ;;  %v9683_v21 = vadd.f32 -1.0, %v11897_v7  ;;  %11910 = vpow2.f32 %v6469_v60  ;;  %v11572_v20 = vld [vmem:[#allocation15 + $0xf8] ss:$12 sps:$4 sm:$0xff]  }
 0xabe   :  { %v11901_v12 = vpop.eup %11900  ;;  %v9684_v17 = vadd.f32 -1.0, %v11899_v15  ;;  %v6427_v8 = vmin.f32 %v15806_v0, 0.0  ;;  %v15817_v28 = vadd.f32 %v6338_v61, %v15747_v46  ;;  %v6340_v48 = vpop.f32.mrb[207].mxu0  ;;  %6974 = vmatmul.mubr.bf16.vlgmr.msra.gmra.mrb[224].mxu1 %v15799_v63  ;;  %7342 = vmatmul.mubr.bf16.vlgmr.msra.gmra.mrb[224].mxu0 %v15799_v63  ;;  %vm6395_vm13 = vcmp.gt.f32.partialorder %v15806_v0, 0.0 }
 0xabf   :  { %v11903_v59 = vpop.eup %11902  ;;  %v9685_v6 = vadd.f32 -1.0, %v11901_v12  ;;  %v6428_v24 = vmin.f32 %v15810_v18, 0.0  ;;  %9889 = vmatpush3.bf16.msra.mxu1 %v11569_v35  ;;  %v15826_v3 = vadd.f32 %v6340_v48, %v15750_v26  ;;  %v6547_v48 = vsel %vm6387_vm4, %v15763_v57, %v9683_v21 }
 0xac0   :  { %v9686_v15 = vadd.f32 -1.0, %v11903_v59  ;;  %v6471_v56 = vmul.f32 1.442695, %v6427_v8  ;;  %v6429_v61 = vmin.f32 %v15817_v28, 0.0  ;;  %9890 = vmatprep.subr.bf16.mxu1 %v11570_v11  ;;  %v6548_v7 = vsel %vm6388_vm5, %v15766_v45, %v9684_v17 }
 0xac1   :  { %v6473_v2 = vmul.f32 1.442695, %v6428_v24  ;;  %v6549_v12 = vsel %vm6389_vm6, %v15770_v43, %v9685_v6  ;;  %v6430_v8 = vmin.f32 %v15826_v3, 0.0  ;;  %v11573_v24 = vld [vmem:[#allocation15 + $0x38] ss:$12 sps:$4 sm:$0xff]   ;;  %vm6397_vm12 = vcmp.gt.f32.partialorder %v15817_v28, 0.0 }
 0xac2   :  { %11912 = vpow2.f32 %v6471_v56  ;;  %v6475_v35 = vmul.f32 1.442695, %v6429_v61  ;;  %v6550_v60 = vsel %vm6390_vm7, %v15774_v25, %v9686_v15  ;;  %v15842_v25 = vpack.c.bf16 %v6549_v12, %v6547_v48  ;;  %v11576_v48 = vld [vmem:[#allocation15 + $0x128] ss:$12 sps:$4 sm:$0xff]  }
 0xac3   :  { %11914 = vpow2.f32 %v6473_v2  ;;  %v6344_v11 = vpop.f32.mrb[208].mxu0  ;;  %v15834_v59 = vpack.c.bf16 %v6550_v60, %v6548_v7  ;;  %9891 = vmatpush3.bf16.msra.mxu1 %v11571_v19  ;;  %v11574_v2 = vld [vmem:[#allocation15 + $0x110] ss:$12 sps:$4 sm:$0xff]   ;;  %v6477_v17 = vmul.f32 1.442695, %v6430_v8  ;;  %vm6396_vm14 = vcmp.gt.f32.partialorder %v15810_v18, 0.0 }
 0xac4   :  { %v11905_v30 = vpop.eup %11904  ;;  %11916 = vpow2.f32 %v6475_v35  ;;  %v15840_v56 = vadd.f32 %v6344_v11, %v15747_v46  ;;  %v6346_v45 = vpop.f32.mrb[209].mxu0  ;;  %9892 = vmatprep.subr.bf16.mxu1 %v11572_v20  ;;  %v11575_v60 = vld [vmem:[#allocation15 + $0x50] ss:$12 sps:$4 sm:$0xff]   ;;  %vm6398_vm15 = vcmp.gt.f32.partialorder %v15826_v3, 0.0 }
 0xac5   :  { %v11907_v43 = vpop.eup %11906  ;;  %v15845_v6 = vadd.f32 %v6346_v45, %v15750_v26  ;;  %v6348_v15 = vpop.f32.mrb[210].mxu0  ;;  %6983 = vmatprep.mubr.bf16.mxu1 %v15834_v59  ;;  %7349 = vmatprep.mubr.bf16.mxu0 %v15834_v59  ;;  %v9687_v19 = vadd.f32 -1.0, %v11905_v30  ;;  %11918 = vpow2.f32 %v6477_v17 }
 0xac6   :  { %v11909_v57 = vpop.eup %11908  ;;  %v6431_v21 = vmin.f32 %v15840_v56, 0.0  ;;  %v15851_v61 = vadd.f32 %v6348_v15, %v15747_v46  ;;  %v6350_v7 = vpop.f32.mrb[211].mxu0  ;;  %6984 = vmatmul.mubr.bf16.gmra.mrb[228].mxu1 %v15842_v25  ;;  %7350 = vmatmul.mubr.bf16.gmra.mrb[228].mxu0 %v15842_v25  ;;  %v9688_v12 = vadd.f32 -1.0, %v11907_v43  ;;  %vm6399_vm1 = vcmp.gt.f32.partialorder %v15840_v56, 0.0 }
 0xac7   :  { %v9689_v20 = vadd.f32 -1.0, %v11909_v57  ;;  %v6432_v35 = vmin.f32 %v15845_v6, 0.0  ;;  %9893 = vmatpush3.bf16.msra.mxu1 %v11573_v24  ;;  %v15859_v11 = vadd.f32 %v6350_v7, %v15750_v26  ;;  %v11911_v45 = vpop.eup %11910  ;;  %v6551_v57 = vsel %vm6391_vm9, %v15779_v14, %v9687_v19 }
 0xac8   :  { %v6479_v30 = vmul.f32 1.442695, %v6431_v21  ;;  %v6433_v8 = vmin.f32 %v15851_v61, 0.0  ;;  %9894 = vmatprep.subr.bf16.mxu1 %v11574_v2  ;;  %v9690_v17 = vadd.f32 -1.0, %v11911_v45  ;;  %vm6401_vm0 = vcmp.gt.f32.partialorder %v15851_v61, 0.0 }
 0xac9   :  { %v6481_v15 = vmul.f32 1.442695, %v6432_v35  ;;  %v6553_v24 = vsel %vm6393_vm8, %v15787_v38, %v9689_v20  ;;  %v6434_v2 = vmin.f32 %v15859_v11, 0.0  ;;  %v6552_v20 = vsel %vm6392_vm10, %v15782_v47, %v9688_v12  ;;  %v11578_v12 = vld [vmem:[#allocation15 + $0x140] ss:$12 sps:$4 sm:$0xff]  }
 0xaca   :  { %11920 = vpow2.f32 %v6479_v30  ;;  %v6483_v43 = vmul.f32 1.442695, %v6433_v8  ;;  %v15869_v7 = vpack.c.bf16 %v6553_v24, %v6551_v57  ;;  %v6554_v14 = vsel %vm6394_vm11, %v15794_v9, %v9690_v17 }
 0xacb   :  { %11922 = vpow2.f32 %v6481_v15  ;;  %v6354_v21 = vpop.f32.mrb[212].mxu0  ;;  %9895 = vmatpush3.bf16.msra.mxu1 %v11575_v60  ;;  %v6485_v30 = vmul.f32 1.442695, %v6434_v2  ;;  %v15881_v60 = vpack.c.bf16 %v6554_v14, %v6552_v20  ;;  %v11577_v15 = vld [vmem:[#allocation15 + $0x68] ss:$12 sps:$4 sm:$0xff]   ;;  %vm6400_vm2 = vcmp.gt.f32.partialorder %v15845_v6, 0.0 }
 0xacc   :  { %v11913_v5 = vpop.eup %11912  ;;  %11924 = vpow2.f32 %v6483_v43  ;;  %v15872_v35 = vadd.f32 %v6354_v21, %v15747_v46  ;;  %v6356_v38 = vpop.f32.mrb[213].mxu0  ;;  %9896 = vmatprep.subr.bf16.mxu1 %v11576_v48  ;;  %vm6402_vm3 = vcmp.gt.f32.partialorder %v15859_v11, 0.0 }
 0xacd   :  { %v11915_v19 = vpop.eup %11914  ;;  %v15879_v8 = vadd.f32 %v6356_v38, %v15750_v26  ;;  %v6358_v45 = vpop.f32.mrb[214].mxu0  ;;  %v9691_v43 = vadd.f32 -1.0, %v11913_v5  ;;  %11926 = vpow2.f32 %v6485_v30  ;;  %6993 = vmatprep.mubr.bf16.mxu1 %v15881_v60  ;;  %7357 = vmatprep.mubr.bf16.mxu0 %v15881_v60  ;;  %v11579_v30 = vld [vmem:[#allocation15 + $0x80] ss:$12 sps:$4 sm:$0xff]  }
 0xace   :  { %v11917_v24 = vpop.eup %11916  ;;  %v6435_v57 = vmin.f32 %v15872_v35, 0.0  ;;  %v15885_v21 = vadd.f32 %v6358_v45, %v15747_v46  ;;  %v6360_v47 = vpop.f32.mrb[215].mxu0  ;;  %v9692_v17 = vadd.f32 -1.0, %v11915_v19  ;;  %6994 = vmatmul.mubr.bf16.gmra.mrb[232].mxu1 %v15869_v7  ;;  %7358 = vmatmul.mubr.bf16.gmra.mrb[232].mxu0 %v15869_v7  ;;  %vm6403_vm5 = vcmp.gt.f32.partialorder %v15872_v35, 0.0 }
 0xacf   :  { %v9693_v9 = vadd.f32 -1.0, %v11917_v24  ;;  %v6436_v48 = vmin.f32 %v15879_v8, 0.0  ;;  %v15893_v38 = vadd.f32 %v6360_v47, %v15750_v26  ;;  %v11919_v20 = vpop.eup %11918  ;;  %9897 = vmatpush3.bf16.msra.mxu1 %v11577_v15  ;;  %v11580_v47 = vld [vmem:[#allocation15 + $0x158] ss:$12 sps:$4 sm:$0xff]   ;;  %vm6404_vm6 = vcmp.gt.f32.partialorder %v15879_v8, 0.0 }
 0xad0   :  { %v6487_v2 = vmul.f32 1.442695, %v6435_v57  ;;  %v6437_v5 = vmin.f32 %v15885_v21, 0.0  ;;  %v9694_v45 = vadd.f32 -1.0, %v11919_v20  ;;  %v6555_v57 = vsel %vm6395_vm13, %v15806_v0, %v9691_v43  ;;  %9898 = vmatprep.subr.bf16.mxu1 %v11578_v12 }
 0xad1   :  { %v6489_v14 = vmul.f32 1.442695, %v6436_v48  ;;  %v6557_v19 = vsel %vm6397_vm12, %v15817_v28, %v9693_v9  ;;  %v6438_v27 = vmin.f32 %v15893_v38, 0.0  ;;  %v6556_v0 = vsel %vm6396_vm14, %v15810_v18, %v9692_v17 }
 0xad2   :  { %11928 = vpow2.f32 %v6487_v2  ;;  %v6491_v24 = vmul.f32 1.442695, %v6437_v5  ;;  %v15905_v48 = vpack.c.bf16 %v6557_v19, %v6555_v57  ;;  %v6558_v43 = vsel %vm6398_vm15, %v15826_v3, %v9694_v45  ;;  %v11582_v3 = vld [vmem:[#allocation15 + $0x170] ss:$12 sps:$4 sm:$0xff]  }
 0xad3   :  { %11930 = vpow2.f32 %v6489_v14  ;;  %v6364_v55 = vpop.f32.mrb[216].mxu0  ;;  %v6493_v9 = vmul.f32 1.442695, %v6438_v27  ;;  %v15917_v20 = vpack.c.bf16 %v6558_v43, %v6556_v0  ;;  %9899 = vmatpush3.bf16.msra.mxu1 %v11579_v30  ;;  %v11581_v14 = vld [vmem:[#allocation15 + $0x98] ss:$12 sps:$4 sm:$0xff]   ;;  %vm6405_vm4 = vcmp.gt.f32.partialorder %v15885_v21, 0.0 }
 0xad4   :  { %v11921_v44 = vpop.eup %11920  ;;  %11932 = vpow2.f32 %v6491_v24  ;;  %v15908_v28 = vadd.f32 %v6364_v55, %v15747_v46  ;;  %v6366_v15 = vpop.f32.mrb[217].mxu0  ;;  %9900 = vmatprep.subr.bf16.mxu1 %v11580_v47  ;;  %vm6406_vm7 = vcmp.gt.f32.partialorder %v15893_v38, 0.0 }
 0xad5   :  { %v11923_v12 = vpop.eup %11922  ;;  %v15915_v2 = vadd.f32 %v6366_v15, %v15750_v26  ;;  %v6368_v5 = vpop.f32.mrb[218].mxu0  ;;  %v9695_v55 = vadd.f32 -1.0, %v11921_v44  ;;  %11934 = vpow2.f32 %v6493_v9  ;;  %7003 = vmatprep.mubr.bf16.mxu1 %v15917_v20  ;;  %7365 = vmatprep.mubr.bf16.mxu0 %v15917_v20 }
 0xad6   :  { %v11925_v19 = vpop.eup %11924  ;;  %v6439_v24 = vmin.f32 %v15908_v28, 0.0  ;;  %v15921_v57 = vadd.f32 %v6368_v5, %v15747_v46  ;;  %v6370_v18 = vpop.f32.mrb[219].mxu0  ;;  %v9696_v30 = vadd.f32 -1.0, %v11923_v12  ;;  %7004 = vmatmul.mubr.bf16.gmra.mrb[236].mxu1 %v15905_v48  ;;  %7366 = vmatmul.mubr.bf16.gmra.mrb[236].mxu0 %v15905_v48  ;;  %v11583_v12 = vld [vmem:[#allocation15 + $0xb0] ss:$12 sps:$4 sm:$0xff]   ;;  %vm6407_vm8 = vcmp.gt.f32.partialorder %v15908_v28, 0.0 }
 0xad7   :  { %v9697_v27 = vadd.f32 -1.0, %v11925_v19  ;;  %v6440_v17 = vmin.f32 %v15915_v2, 0.0  ;;  %v15929_v15 = vadd.f32 %v6370_v18, %v15750_v26  ;;  %v11927_v47 = vpop.eup %11926  ;;  %9901 = vmatpush3.bf16.msra.mxu1 %v11581_v14  ;;  %v6559_v19 = vsel %vm6399_vm1, %v15840_v56, %v9695_v55 }
 0xad8   :  { %v6495_v44 = vmul.f32 1.442695, %v6439_v24  ;;  %v6441_v45 = vmin.f32 %v15921_v57, 0.0  ;;  %v9698_v9 = vadd.f32 -1.0, %v11927_v47  ;;  %9902 = vmatprep.subr.bf16.mxu1 %v11582_v3  ;;  %vm6409_vm9 = vcmp.gt.f32.partialorder %v15921_v57, 0.0 }
 0xad9   :  { %v6497_v0 = vmul.f32 1.442695, %v6440_v17  ;;  %v6561_v43 = vsel %vm6401_vm0, %v15851_v61, %v9697_v27  ;;  %v6442_v24 = vmin.f32 %v15929_v15, 0.0  ;;  %v6560_v27 = vsel %vm6400_vm2, %v15845_v6, %v9696_v30 }
 0xada   :  { %11936 = vpow2.f32 %v6495_v44  ;;  %v6499_v5 = vmul.f32 1.442695, %v6441_v45  ;;  %v15941_v41 = vpack.c.bf16 %v6561_v43, %v6559_v19  ;;  %v6562_v56 = vsel %vm6402_vm3, %v15859_v11, %v9698_v9 }
 0xadb   :  { %11938 = vpow2.f32 %v6497_v0  ;;  %v6374_v18 = vpop.f32.mrb[220].mxu0  ;;  %v6501_v3 = vmul.f32 1.442695, %v6442_v24  ;;  %v15953_v47 = vpack.c.bf16 %v6562_v56, %v6560_v27  ;;  %9903 = vmatpush3.bf16.msra.mxu1 %v11583_v12  ;;  %vm6408_vm10 = vcmp.gt.f32.partialorder %v15915_v2, 0.0 }
 0xadc   :  { %v11929_v17 = vpop.eup %11928  ;;  %11940 = vpow2.f32 %v6499_v5  ;;  %v15944_v61 = vadd.f32 %v6374_v18, %v15747_v46  ;;  %v6376_v14 = vpop.f32.mrb[221].mxu0  ;;  %vm6410_vm11 = vcmp.gt.f32.partialorder %v15929_v15, 0.0 }
 0xadd   :  { %v11931_v55 = vpop.eup %11930  ;;  %v15951_v44 = vadd.f32 %v6376_v14, %v15750_v26  ;;  %v6378_v45 = vpop.f32.mrb[222].mxu0  ;;  %v9699_v43 = vadd.f32 -1.0, %v11929_v17  ;;  %11942 = vpow2.f32 %v6501_v3  ;;  %7013 = vmatprep.mubr.bf16.mxu1 %v15953_v47  ;;  %7373 = vmatprep.mubr.bf16.mxu0 %v15953_v47 }
 0xade   :  { %v11933_v0 = vpop.eup %11932  ;;  %v6443_v5 = vmin.f32 %v15944_v61, 0.0  ;;  %v15957_v19 = vadd.f32 %v6378_v45, %v15747_v46  ;;  %v6380_v18 = vpop.f32.mrb[223].mxu0  ;;  %v9700_v30 = vadd.f32 -1.0, %v11931_v55  ;;  %7014 = vmatmul.mubr.bf16.gmra.mrb[240].mxu1 %v15941_v41  ;;  %7374 = vmatmul.mubr.bf16.gmra.mrb[240].mxu0 %v15941_v41  ;;  %vm6411_vm12 = vcmp.gt.f32.partialorder %v15944_v61, 0.0 }
 0xadf   :  { %v9701_v6 = vadd.f32 -1.0, %v11933_v0  ;;  %v6444_v11 = vmin.f32 %v15951_v44, 0.0  ;;  %v15965_v24 = vadd.f32 %v6380_v18, %v15750_v26  ;;  %v11935_v46 = vpop.eup %11934  ;;  %v6563_v26 = vsel %vm6403_vm5, %v15872_v35, %v9699_v43 }
 0xae0   :  { %v6503_v12 = vmul.f32 1.442695, %v6443_v5  ;;  %v6445_v9 = vmin.f32 %v15957_v19, 0.0  ;;  %v9702_v27 = vadd.f32 -1.0, %v11935_v46  ;;  %v6564_v0 = vsel %vm6404_vm6, %v15879_v8, %v9700_v30 }
 0xae1   :  { %v6505_v17 = vmul.f32 1.442695, %v6444_v11  ;;  %v6565_v14 = vsel %vm6405_vm4, %v15885_v21, %v9701_v6  ;;  %v6446_v55 = vmin.f32 %v15965_v24, 0.0  ;;  %vm6413_vm13 = vcmp.gt.f32.partialorder %v15957_v19, 0.0 }
 0xae2   :  { %11944 = vpow2.f32 %v6503_v12  ;;  %v6507_v56 = vmul.f32 1.442695, %v6445_v9  ;;  %v15977_v3 = vpack.c.bf16 %v6565_v14, %v6563_v26  ;;  %v6566_v5 = vsel %vm6406_vm7, %v15893_v38, %v9702_v27 }
 0xae3   :  { %11946 = vpow2.f32 %v6505_v17  ;;  %v6509_v6 = vmul.f32 1.442695, %v6446_v55  ;;  %v6586_v11 = vpack.c.bf16 %v6566_v5, %v6564_v0  ;;  %vm6412_vm14 = vcmp.gt.f32.partialorder %v15951_v44, 0.0 }
 0xae4   :  { %v11937_v45 = vpop.eup %11936  ;;  %11948 = vpow2.f32 %v6507_v56  ;;  %vm6414_vm15 = vcmp.gt.f32.partialorder %v15965_v24, 0.0 }
 0xae5   :  { %v11939_v18 = vpop.eup %11938  ;;  %v9703_v21 = vadd.f32 -1.0, %v11937_v45  ;;  %11950 = vpow2.f32 %v6509_v6  ;;  %7023 = vmatprep.mubr.bf16.mxu1 %v6586_v11  ;;  %7381 = vmatprep.mubr.bf16.mxu0 %v6586_v11 }
 0xae6   :  { %v11941_v12 = vpop.eup %11940  ;;  %v9704_v35 = vadd.f32 -1.0, %v11939_v18  ;;  %7024 = vmatmul.mubr.bf16.gmra.mrb[244].mxu1 %v15977_v3  ;;  %7382 = vmatmul.mubr.bf16.gmra.mrb[244].mxu0 %v15977_v3 }
 0xae7   :  { %v9705_v9 = vadd.f32 -1.0, %v11941_v12  ;;  %v11943_v8 = vpop.eup %11942  ;;  %v6567_v38 = vsel %vm6407_vm8, %v15908_v28, %v9703_v21 }
 0xae8   :  { %v9706_v30 = vadd.f32 -1.0, %v11943_v8  ;;  %v6568_v14 = vsel %vm6408_vm10, %v15915_v2, %v9704_v35 }
 0xae9   :  { %v6569_v43 = vsel %vm6409_vm9, %v15921_v57, %v9705_v9 }
 0xaea   :  { %v6587_v46 = vpack.c.bf16 %v6569_v43, %v6567_v38  ;;  %v6570_v27 = vsel %vm6410_vm11, %v15929_v15, %v9706_v30 }
 0xaeb   :  { %v6588_v55 = vpack.c.bf16 %v6570_v27, %v6568_v14 }
 0xaec   :  { %v11945_v17 = vpop.eup %11944 }
 0xaed   :  { %v11947_v56 = vpop.eup %11946  ;;  %v9707_v26 = vadd.f32 -1.0, %v11945_v17  ;;  %7033 = vmatprep.mubr.bf16.mxu1 %v6588_v55  ;;  %7389 = vmatprep.mubr.bf16.mxu0 %v6588_v55 }
 0xaee   :  { %v11949_v45 = vpop.eup %11948  ;;  %v9708_v28 = vadd.f32 -1.0, %v11947_v56  ;;  %7034 = vmatmul.mubr.bf16.gmra.mrb[248].mxu1 %v6587_v46  ;;  %7390 = vmatmul.mubr.bf16.gmra.mrb[248].mxu0 %v6587_v46 }
 0xaef   :  { %v9709_v0 = vadd.f32 -1.0, %v11949_v45  ;;  %v11951_v57 = vpop.eup %11950  ;;  %v6571_v5 = vsel %vm6411_vm12, %v15944_v61, %v9707_v26 }
 0xaf0   :  { %v9710_v15 = vadd.f32 -1.0, %v11951_v57  ;;  %v6572_v21 = vsel %vm6412_vm14, %v15951_v44, %v9708_v28 }
 0xaf1   :  { %v6573_v2 = vsel %vm6413_vm13, %v15957_v19, %v9709_v0 }
 0xaf2   :  { %v6589_v18 = vpack.c.bf16 %v6573_v2, %v6571_v5  ;;  %v6574_v6 = vsel %vm6414_vm15, %v15965_v24, %v9710_v15 }
 0xaf3   :  { %v6590_v12 = vpack.c.bf16 %v6574_v6, %v6572_v21 }
 0xaf5   :  { %7043 = vmatprep.mubr.bf16.mxu1 %v6590_v12  ;;  %7397 = vmatprep.mubr.bf16.mxu0 %v6590_v12 }
 0xaf6   :  { %7044 = vmatmul.mubr.bf16.gmra.mrb[252].mxu1 %v6589_v18  ;;  %7398 = vmatmul.mubr.bf16.gmra.mrb[252].mxu0 %v6589_v18 }
 0xaf7   :  { %7086 = vmatprep.mubr.bf16.mxu1 %v15803_v52  ;;  %8094 = vmatprep.mubr.bf16.mxu0 %v17229_v23 }
 0xafe   :  { %7087 = vmatmul.mubr.bf16.vlgmr.msra.gmra.mrb[0].mxu1 %v15799_v63  ;;  %v6655_v63 = vld [vmem:[#allocation17] sm:$0x7] }
 0xaff   :  { %7094 = vmatprep.mubr.bf16.mxu1 %v15834_v59  ;;  %v16011_v52 = vunpack.c.l.bf16 %v6655_v63 }
 0xb01   :  { %v6661_v59 = vrot.slane %v16011_v52, %v17230_v4 }
 0xb06   :  { %7095 = vmatmul.mubr.bf16.gmra.mrb[4].mxu1 %v15842_v25  ;;  %v6665_v25 = vrot.slane %v16011_v52, %v17232_v54 }
 0xb07   :  { %7102 = vmatprep.mubr.bf16.mxu1 %v15881_v60 }
 0xb0e   :  { %7103 = vmatmul.mubr.bf16.gmra.mrb[8].mxu1 %v15869_v7  ;;  %v16018_v7 = vrot.slane %v6661_v59, %v17230_v4 }
 0xb0f   :  { %7110 = vmatprep.mubr.bf16.mxu1 %v15917_v20 }
 0xb16   :  { %7111 = vmatmul.mubr.bf16.gmra.mrb[12].mxu1 %v15905_v48  ;;  %v16021_v48 = vrot.slane %v6665_v25, %v17230_v4 }
 0xb17   :  { %7118 = vmatprep.mubr.bf16.mxu1 %v15953_v47 }
 0xb1e   :  { %7119 = vmatmul.mubr.bf16.gmra.mrb[16].mxu1 %v15941_v41 }
 0xb1f   :  { %7126 = vmatprep.mubr.bf16.mxu1 %v6586_v11 }
 0xb26   :  { %7127 = vmatmul.mubr.bf16.gmra.mrb[20].mxu1 %v15977_v3 }
 0xb27   :  { %7134 = vmatprep.mubr.bf16.mxu1 %v6588_v55 }
 0xb2e   :  { %7135 = vmatmul.mubr.bf16.gmra.mrb[24].mxu1 %v6587_v46 }
 0xb2f   :  { %7142 = vmatprep.mubr.bf16.mxu1 %v6590_v12 }
 0xb36   :  { %7143 = vmatmul.mubr.bf16.gmra.mrb[28].mxu1 %v6589_v18 }
 0xb91   :  { %v6975_v41 = vpop.f32.mrb[224].mxu1  ;;  %v9968_v60 = vpop.f32.mrb[224].mxu0 }
 0xb92   :  { %v6977_v20 = vpop.f32.mrb[225].mxu1  ;;  %v9969_v61 = vpop.f32.mrb[225].mxu0  ;;  %v6976_v24 = vadd.f32 %v6975_v41, %v16018_v7 }
 0xb93   :  { %v16023_v44 = vadd.f32 %v9969_v61, %v9968_v60  ;;  %v6979_v47 = vpop.f32.mrb[226].mxu1  ;;  %v9971_v19 = vpop.f32.mrb[226].mxu0  ;;  %v6978_v35 = vadd.f32 %v6977_v20, %v16021_v48 }
 0xb94   :  { %v6980_v3 = vadd.f32 %v6979_v47, %v16018_v7  ;;  %v6981_v11 = vpop.f32.mrb[227].mxu1  ;;  %v9972_v9 = vpop.f32.mrb[227].mxu0 }
 0xb95   :  { %v6982_v8 = vadd.f32 %v6981_v11, %v16021_v48  ;;  %v16029_v38 = vadd.f32 %v9972_v9, %v9971_v19 }
 0xb96   :  { %v7151_v43 = vpack.c.bf16 %v6980_v3, %v6976_v24 }
 0xb97   :  { %v7152_v30 = vpack.c.bf16 %v6982_v8, %v6978_v35 }
 0xb98   :  { %10155 = vmatprep.mubr.bf16.mxu1 %v7151_v43 }
 0xb99   :  { %v6985_v46 = vpop.f32.mrb[228].mxu1  ;;  %v9974_v17 = vpop.f32.mrb[228].mxu0  ;;  %10139 = vmatprep.subr.bf16.mxu1 %v7152_v30 }
 0xb9a   :  { %v16032_v14 = vadd.f32 %v6985_v46, %v16018_v7  ;;  %v6987_v27 = vpop.f32.mrb[229].mxu1  ;;  %v9975_v56 = vpop.f32.mrb[229].mxu0  ;;  %10140 = vmatpush3.bf16.xpose.msra.mxu1 %v7152_v30 }
 0xb9b   :  { %v16034_v26 = vadd.f32 %v9975_v56, %v9974_v17  ;;  %v6989_v55 = vpop.f32.mrb[230].mxu1  ;;  %v9977_v45 = vpop.f32.mrb[230].mxu0  ;;  %v6988_v5 = vadd.f32 %v6987_v27, %v16021_v48 }
 0xb9c   :  { %v16037_v0 = vadd.f32 %v6989_v55, %v16018_v7  ;;  %v6991_v28 = vpop.f32.mrb[231].mxu1  ;;  %v9978_v57 = vpop.f32.mrb[231].mxu0 }
 0xb9d   :  { %v6992_v2 = vadd.f32 %v6991_v28, %v16021_v48  ;;  %v16041_v15 = vadd.f32 %v9978_v57, %v9977_v45 }
 0xb9f   :  { %v7155_v21 = vpack.c.bf16 %v6992_v2, %v6988_v5 }
 0xba1   :  { %10141 = vmatprep.subr.bf16.mxu1 %v7155_v21  ;;  %v6995_v6 = vpop.f32.mrb[232].mxu1  ;;  %v9980_v12 = vpop.f32.mrb[232].mxu0 }
 0xba2   :  { %10142 = vmatpush3.bf16.xpose.msra.mxu1 %v7155_v21  ;;  %v16046_v63 = vadd.f32 %v6995_v6, %v16018_v7  ;;  %v6997_v59 = vpop.f32.mrb[233].mxu1  ;;  %v9981_v25 = vpop.f32.mrb[233].mxu0 }
 0xba3   :  { %v16048_v41 = vadd.f32 %v9981_v25, %v9980_v12  ;;  %v6999_v60 = vpop.f32.mrb[234].mxu1  ;;  %v9983_v20 = vpop.f32.mrb[234].mxu0  ;;  %v6998_v24 = vadd.f32 %v6997_v59, %v16021_v48 }
 0xba4   :  { %v16051_v61 = vadd.f32 %v6999_v60, %v16018_v7  ;;  %v7001_v47 = vpop.f32.mrb[235].mxu1  ;;  %v9984_v19 = vpop.f32.mrb[235].mxu0 }
 0xba5   :  { %v7002_v3 = vadd.f32 %v7001_v47, %v16021_v48  ;;  %v16055_v11 = vadd.f32 %v9984_v19, %v9983_v20 }
 0xba7   :  { %v7158_v35 = vpack.c.bf16 %v7002_v3, %v6998_v24 }
 0xba9   :  { %v7005_v8 = vpop.f32.mrb[236].mxu1  ;;  %v9986_v43 = vpop.f32.mrb[236].mxu0  ;;  %10143 = vmatprep.subr.bf16.mxu1 %v7158_v35 }
 0xbaa   :  { %v16060_v30 = vadd.f32 %v7005_v8, %v16018_v7  ;;  %v7007_v46 = vpop.f32.mrb[237].mxu1  ;;  %v9987_v17 = vpop.f32.mrb[237].mxu0  ;;  %10144 = vmatpush3.bf16.xpose.msra.mxu1 %v7158_v35 }
 0xbab   :  { %v16062_v27 = vadd.f32 %v9987_v17, %v9986_v43  ;;  %v7009_v56 = vpop.f32.mrb[238].mxu1  ;;  %v9989_v55 = vpop.f32.mrb[238].mxu0  ;;  %v7008_v5 = vadd.f32 %v7007_v46, %v16021_v48 }
 0xbac   :  { %v16065_v45 = vadd.f32 %v7009_v56, %v16018_v7  ;;  %v7011_v28 = vpop.f32.mrb[239].mxu1  ;;  %v9990_v57 = vpop.f32.mrb[239].mxu0 }
 0xbad   :  { %v7012_v2 = vadd.f32 %v7011_v28, %v16021_v48  ;;  %v16069_v21 = vadd.f32 %v9990_v57, %v9989_v55 }
 0xbaf   :  { %v7161_v12 = vpack.c.bf16 %v7012_v2, %v7008_v5 }
 0xbb1   :  { %v7015_v59 = vpop.f32.mrb[240].mxu1  ;;  %v9992_v25 = vpop.f32.mrb[240].mxu0  ;;  %10145 = vmatprep.subr.bf16.mxu1 %v7161_v12 }
 0xbb2   :  { %v16074_v60 = vadd.f32 %v7015_v59, %v16018_v7  ;;  %v7017_v20 = vpop.f32.mrb[241].mxu1  ;;  %v9993_v47 = vpop.f32.mrb[241].mxu0  ;;  %10146 = vmatpush3.bf16.xpose.msra.mxu1 %v7161_v12 }
 0xbb3   :  { %v16076_v19 = vadd.f32 %v9993_v47, %v9992_v25  ;;  %v7019_v24 = vpop.f32.mrb[242].mxu1  ;;  %v9995_v3 = vpop.f32.mrb[242].mxu0  ;;  %v7018_v46 = vadd.f32 %v7017_v20, %v16021_v48 }
 0xbb4   :  { %v16079_v35 = vadd.f32 %v7019_v24, %v16018_v7  ;;  %v7021_v8 = vpop.f32.mrb[243].mxu1  ;;  %v9996_v43 = vpop.f32.mrb[243].mxu0 }
 0xbb5   :  { %v7022_v17 = vadd.f32 %v7021_v8, %v16021_v48  ;;  %v16083_v56 = vadd.f32 %v9996_v43, %v9995_v3 }
 0xbb7   :  { %17266 = vst [vmem:[#allocation88_spill] sm:$0xff] %v16083_v56  ;;  %v7164_v28 = vpack.c.bf16 %v7022_v17, %v7018_v46 }
 0xbb9   :  { %v7025_v57 = vpop.f32.mrb[244].mxu1  ;;  %v9998_v5 = vpop.f32.mrb[244].mxu0  ;;  %10147 = vmatprep.subr.bf16.mxu1 %v7164_v28 }
 0xbba   :  { %v16088_v2 = vadd.f32 %v7025_v57, %v16018_v7  ;;  %v7027_v12 = vpop.f32.mrb[245].mxu1  ;;  %v9999_v59 = vpop.f32.mrb[245].mxu0  ;;  %10148 = vmatpush3.bf16.xpose.msra.mxu1 %v7164_v28 }
 0xbbb   :  { %v16090_v25 = vadd.f32 %v9999_v59, %v9998_v5  ;;  %v7029_v20 = vpop.f32.mrb[246].mxu1  ;;  %v10001_v47 = vpop.f32.mrb[246].mxu0  ;;  %v7028_v43 = vadd.f32 %v7027_v12, %v16021_v48 }
 0xbbc   :  { %v16093_v24 = vadd.f32 %v7029_v20, %v16018_v7  ;;  %v7031_v3 = vpop.f32.mrb[247].mxu1  ;;  %v10002_v8 = vpop.f32.mrb[247].mxu0 }
 0xbbd   :  { %v7032_v46 = vadd.f32 %v7031_v3, %v16021_v48  ;;  %v16097_v17 = vadd.f32 %v10002_v8, %v10001_v47 }
 0xbbf   :  { %v7167_v55 = vpack.c.bf16 %v7032_v46, %v7028_v43 }
 0xbc1   :  { %v7035_v28 = vpop.f32.mrb[248].mxu1  ;;  %v10004_v5 = vpop.f32.mrb[248].mxu0  ;;  %10149 = vmatprep.subr.bf16.mxu1 %v7167_v55 }
 0xbc2   :  { %v16102_v59 = vadd.f32 %v7035_v28, %v16018_v7  ;;  %v7037_v20 = vpop.f32.mrb[249].mxu1  ;;  %v10005_v6 = vpop.f32.mrb[249].mxu0  ;;  %10150 = vmatpush3.bf16.xpose.msra.mxu1 %v7167_v55 }
 0xbc3   :  { %v16104_v9 = vadd.f32 %v10005_v6, %v10004_v5  ;;  %v7039_v12 = vpop.f32.mrb[250].mxu1  ;;  %v10007_v18 = vpop.f32.mrb[250].mxu0  ;;  %v7038_v43 = vadd.f32 %v7037_v20, %v16021_v48 }
 0xbc4   :  { %v16107_v47 = vadd.f32 %v7039_v12, %v16018_v7  ;;  %v7041_v3 = vpop.f32.mrb[251].mxu1  ;;  %v10008_v8 = vpop.f32.mrb[251].mxu0 }
 0xbc5   :  { %17267 = vst [vmem:[#allocation89_spill] sm:$0xff] %v16104_v9  ;;  %v7042_v46 = vadd.f32 %v7041_v3, %v16021_v48  ;;  %v16111_v57 = vadd.f32 %v10008_v8, %v10007_v18 }
 0xbc6   :  { %v7169_v28 = vpack.c.bf16 %v16107_v47, %v16102_v59 }
 0xbc7   :  { %17268 = vst [vmem:[#allocation90_spill] sm:$0xff] %v16111_v57  ;;  %v7170_v54 = vpack.c.bf16 %v7042_v46, %v7038_v43 }
 0xbc9   :  { %v7045_v55 = vpop.f32.mrb[252].mxu1  ;;  %v10010_v6 = vpop.f32.mrb[252].mxu0  ;;  %10151 = vmatprep.subr.bf16.mxu1 %v7170_v54 }
 0xbca   :  { %v16116_v5 = vadd.f32 %v7045_v55, %v16018_v7  ;;  %v7047_v12 = vpop.f32.mrb[253].mxu1  ;;  %v10011_v23 = vpop.f32.mrb[253].mxu0  ;;  %10152 = vmatpush3.bf16.xpose.msra.mxu1 %v7170_v54  ;;  %v6669_v54 = vrot.slane %v16011_v52, %v17231_v16 }
 0xbcb   :  { %v16118_v9 = vadd.f32 %v10011_v23, %v10010_v6  ;;  %v7049_v20 = vpop.f32.mrb[254].mxu1  ;;  %v10013_v56 = vpop.f32.mrb[254].mxu0  ;;  %v7048_v59 = vadd.f32 %v7047_v12, %v16021_v48 }
 0xbcc   :  { %v7050_v18 = vadd.f32 %v7049_v20, %v16018_v7  ;;  %v7051_v3 = vpop.f32.mrb[255].mxu1  ;;  %v10014_v8 = vpop.f32.mrb[255].mxu0  ;;  %v16129_v7 = vrot.slane %v6669_v54, %v17230_v4 }
 0xbcd   :  { %17269 = vst [vmem:[#allocation92_spill] sm:$0xff] %v16118_v9  ;;  %v7052_v47 = vadd.f32 %v7051_v3, %v16021_v48  ;;  %v16123_v43 = vadd.f32 %v10014_v8, %v10013_v56  ;;  %v17271_v8 = vpack.c.bf16 %v16051_v61, %v16046_v63  ;;  %v17273_v63 = vpack.c.bf16 %v16079_v35, %v16074_v60 }
 0xbce   :  { %v7172_v46 = vpack.c.bf16 %v7050_v18, %v16116_v5  ;;  %v17270_v18 = vpack.c.bf16 %v16037_v0, %v16032_v14  ;;  %v17272_v14 = vpack.c.bf16 %v16065_v45, %v16060_v30  ;;  %v17274_v30 = vpack.c.bf16 %v16093_v24, %v16088_v2 }
 0xbcf   :  { %v7173_v55 = vpack.c.bf16 %v7052_v47, %v7048_v59 }
 0xbd1   :  { %v9904_v23 = vpop.f32.mrb[0].mxu1  ;;  %10153 = vmatprep.subr.bf16.mxu1 %v7173_v55 }
 0xbd2   :  { %v9905_v6 = vpop.f32.mrb[1].mxu1  ;;  %10154 = vmatpush3.bf16.xpose.msra.mxu1 %v7173_v55 }
 0xbd3   :  { %v9906_v20 = vadd.f32 %v9905_v6, %v9904_v23  ;;  %v9907_v57 = vpop.f32.mrb[2].mxu1 }
 0xbd4   :  { %v9908_v12 = vpop.f32.mrb[3].mxu1 }
 0xbd5   :  { %v9909_v9 = vadd.f32 %v9908_v12, %v9907_v57  ;;  %v7089_v48 = vadd.f32 %v9906_v20, %v16129_v7 }
 0xbd7   :  { %v7092_v56 = vadd.f32 %v9909_v9, %v16129_v7 }
 0xbd9   :  { %v9910_v5 = vpop.f32.mrb[4].mxu1  ;;  %10156 = vmatmul.mubr.bf16.vlgmr.msra.gmra.mrb[32].mxu1 %v17270_v18  ;;  %v7153_v52 = vpack.c.bf16 %v7092_v56, %v7089_v48 }
 0xbda   :  { %v9911_v3 = vpop.f32.mrb[5].mxu1  ;;  %10159 = vmatprep.mubr.bf16.mxu1 %v17271_v8 }
 0xbdb   :  { %v9912_v59 = vadd.f32 %v9911_v3, %v9910_v5  ;;  %v9913_v47 = vpop.f32.mrb[6].mxu1  ;;  %10171 = vmatprep.subr.bf16.mxu1 %v7153_v52 }
 0xbdc   :  { %v9914_v55 = vpop.f32.mrb[7].mxu1  ;;  %10172 = vmatpush3.bf16.msra.mxu1 %v7153_v52 }
 0xbdd   :  { %v9915_v57 = vadd.f32 %v9914_v55, %v9913_v47  ;;  %v7097_v54 = vadd.f32 %v9912_v59, %v16129_v7 }
 0xbdf   :  { %v7100_v9 = vadd.f32 %v9915_v57, %v16129_v7 }
 0xbe1   :  { %v9916_v23 = vpop.f32.mrb[8].mxu1  ;;  %10160 = vmatmul.mubr.bf16.gmra.mrb[36].mxu1 %v17272_v14  ;;  %v7156_v0 = vpack.c.bf16 %v7100_v9, %v7097_v54 }
 0xbe2   :  { %v9917_v6 = vpop.f32.mrb[9].mxu1  ;;  %10163 = vmatprep.mubr.bf16.mxu1 %v17273_v63 }
 0xbe3   :  { %v9918_v61 = vadd.f32 %v9917_v6, %v9916_v23  ;;  %v9919_v20 = vpop.f32.mrb[10].mxu1  ;;  %10173 = vmatprep.subr.bf16.mxu1 %v7156_v0 }
 0xbe4   :  { %v9920_v12 = vpop.f32.mrb[11].mxu1  ;;  %10174 = vmatpush3.bf16.msra.mxu1 %v7156_v0 }
 0xbe5   :  { %v9921_v48 = vadd.f32 %v9920_v12, %v9919_v20  ;;  %v7105_v56 = vadd.f32 %v9918_v61, %v16129_v7 }
 0xbe7   :  { %v7108_v5 = vadd.f32 %v9921_v48, %v16129_v7 }
 0xbe9   :  { %v9922_v18 = vpop.f32.mrb[12].mxu1  ;;  %10164 = vmatmul.mubr.bf16.gmra.mrb[40].mxu1 %v17274_v30  ;;  %v7159_v45 = vpack.c.bf16 %v7108_v5, %v7105_v56 }
 0xbea   :  { %v9923_v52 = vpop.f32.mrb[13].mxu1  ;;  %10167 = vmatprep.mubr.bf16.mxu1 %v7169_v28 }
 0xbeb   :  { %v9924_v60 = vadd.f32 %v9923_v52, %v9922_v18  ;;  %v9925_v35 = vpop.f32.mrb[14].mxu1  ;;  %10175 = vmatprep.subr.bf16.mxu1 %v7159_v45 }
 0xbec   :  { %v9926_v3 = vpop.f32.mrb[15].mxu1  ;;  %10176 = vmatpush3.bf16.msra.mxu1 %v7159_v45 }
 0xbed   :  { %v9927_v8 = vadd.f32 %v9926_v3, %v9925_v35  ;;  %v7113_v59 = vadd.f32 %v9924_v60, %v16129_v7 }
 0xbef   :  { %v7116_v47 = vadd.f32 %v9927_v8, %v16129_v7 }
 0xbf1   :  { %v9928_v55 = vpop.f32.mrb[16].mxu1  ;;  %10168 = vmatmul.mubr.bf16.gmra.mrb[44].mxu1 %v7172_v46  ;;  %v7162_v57 = vpack.c.bf16 %v7116_v47, %v7113_v59 }
 0xbf2   :  { %v9929_v54 = vpop.f32.mrb[17].mxu1 }
 0xbf3   :  { %v9930_v9 = vadd.f32 %v9929_v54, %v9928_v55  ;;  %v9931_v2 = vpop.f32.mrb[18].mxu1  ;;  %10177 = vmatprep.subr.bf16.mxu1 %v7162_v57 }
 0xbf4   :  { %v9932_v24 = vpop.f32.mrb[19].mxu1  ;;  %10178 = vmatpush3.bf16.msra.mxu1 %v7162_v57 }
 0xbf5   :  { %v9933_v28 = vadd.f32 %v9932_v24, %v9931_v2  ;;  %v7121_v23 = vadd.f32 %v9930_v9, %v16129_v7 }
 0xbf7   :  { %v7124_v14 = vadd.f32 %v9933_v28, %v16129_v7 }
 0xbf9   :  { %v9934_v0 = vpop.f32.mrb[20].mxu1  ;;  %v7165_v6 = vpack.c.bf16 %v7124_v14, %v7121_v23 }
 0xbfa   :  { %v9935_v63 = vpop.f32.mrb[21].mxu1 }
 0xbfb   :  { %v9936_v61 = vadd.f32 %v9935_v63, %v9934_v0  ;;  %v9937_v20 = vpop.f32.mrb[22].mxu1  ;;  %10179 = vmatprep.subr.bf16.mxu1 %v7165_v6 }
 0xbfc   :  { %v9938_v12 = vpop.f32.mrb[23].mxu1  ;;  %10180 = vmatpush3.bf16.msra.mxu1 %v7165_v6 }
 0xbfd   :  { %v9939_v46 = vadd.f32 %v9938_v12, %v9937_v20  ;;  %v7129_v48 = vadd.f32 %v9936_v61, %v16129_v7 }
 0xbff   :  { %v7132_v56 = vadd.f32 %v9939_v46, %v16129_v7 }
 0xc01   :  { %v9940_v5 = vpop.f32.mrb[24].mxu1  ;;  %v7168_v18 = vpack.c.bf16 %v7132_v56, %v7129_v48 }
 0xc02   :  { %v9941_v30 = vpop.f32.mrb[25].mxu1 }
 0xc03   :  { %v9942_v45 = vadd.f32 %v9941_v30, %v9940_v5  ;;  %v9943_v52 = vpop.f32.mrb[26].mxu1  ;;  %10181 = vmatprep.subr.bf16.mxu1 %v7168_v18 }
 0xc04   :  { %v9944_v60 = vpop.f32.mrb[27].mxu1  ;;  %10182 = vmatpush3.bf16.msra.mxu1 %v7168_v18 }
 0xc05   :  { %v9945_v35 = vadd.f32 %v9944_v60, %v9943_v52  ;;  %v7137_v3 = vadd.f32 %v9942_v45, %v16129_v7 }
 0xc07   :  { %v7140_v8 = vadd.f32 %v9945_v35, %v16129_v7 }
 0xc09   :  { %v9946_v59 = vpop.f32.mrb[28].mxu1  ;;  %v7171_v47 = vpack.c.bf16 %v7140_v8, %v7137_v3 }
 0xc0a   :  { %v9947_v55 = vpop.f32.mrb[29].mxu1 }
 0xc0b   :  { %v9948_v57 = vadd.f32 %v9947_v55, %v9946_v59  ;;  %v9949_v54 = vpop.f32.mrb[30].mxu1  ;;  %10183 = vmatprep.subr.bf16.mxu1 %v7171_v47 }
 0xc0c   :  { %v9950_v9 = vpop.f32.mrb[31].mxu1  ;;  %10184 = vmatpush3.bf16.msra.mxu1 %v7171_v47 }
 0xc0d   :  { %v9951_v2 = vadd.f32 %v9950_v9, %v9949_v54  ;;  %v7145_v24 = vadd.f32 %v9948_v57, %v16129_v7 }
 0xc0f   :  { %v7148_v28 = vadd.f32 %v9951_v2, %v16129_v7 }
 0xc11   :  { %v7174_v23 = vpack.c.bf16 %v7148_v28, %v7145_v24 }
 0xc13   :  { %10185 = vmatprep.subr.bf16.mxu1 %v7174_v23 }
 0xc14   :  { %10186 = vmatpush3.bf16.msra.mxu1 %v7174_v23 }
 0xcac   :  { %v10157_v14 = vpop.f32.mrb[32].mxu1 }
 0xcad   :  { %v7440_v0 = vpop.f32.mrb[33].mxu1  ;;  %v7449_v12 = vadd.f32 %v10157_v14, %v17236_v13 }
 0xcae   :  { %v7441_v6 = vadd.f32 %v7440_v0, %v17234_v1  ;;  %v10158_v63 = vpop.f32.mrb[34].mxu1 }
 0xcaf   :  { %v7443_v61 = vpop.f32.mrb[35].mxu1  ;;  %v7452_v46 = vadd.f32 %v10158_v63, %v17237_v34 }
 0xcb0   :  { %v7444_v20 = vadd.f32 %v7443_v61, %v17235_v37  ;;  %7503 = vmax.xlane.f32.xlu0 %v7441_v6 }
 0xcb2   :  { %7505 = vmax.xlane.f32.xlu1 %v7444_v20 }
 0xcb4   :  { %v10161_v48 = vpop.f32.mrb[36].mxu1  ;;  %7507 = vmax.xlane.f32.xlu0 %v7449_v12 }
 0xcb5   :  { %v7456_v7 = vpop.f32.mrb[37].mxu1  ;;  %v7465_v45 = vadd.f32 %v10161_v48, %v17240_v42 }
 0xcb6   :  { %v7457_v56 = vadd.f32 %v7456_v7, %v17238_v50  ;;  %v10162_v5 = vpop.f32.mrb[38].mxu1  ;;  %7509 = vmax.xlane.f32.xlu1 %v7452_v46 }
 0xcb7   :  { %v7459_v18 = vpop.f32.mrb[39].mxu1  ;;  %v7468_v52 = vadd.f32 %v10162_v5, %v17241_v31 }
 0xcb8   :  { %v7460_v30 = vadd.f32 %v7459_v18, %v17239_v40  ;;  %7511 = vmax.xlane.f32.xlu0 %v7457_v56 }
 0xcba   :  { %7513 = vmax.xlane.f32.xlu1 %v7460_v30 }
 0xcbc   :  { %v10165_v60 = vpop.f32.mrb[40].mxu1  ;;  %7515 = vmax.xlane.f32.xlu0 %v7465_v45 }
 0xcbd   :  { %v7472_v35 = vpop.f32.mrb[41].mxu1  ;;  %v16178_v55 = vadd.f32 %v10165_v60, %v17244_v22 }
 0xcbe   :  { %v16171_v3 = vadd.f32 %v7472_v35, %v17242_v49  ;;  %v10166_v8 = vpop.f32.mrb[42].mxu1  ;;  %7517 = vmax.xlane.f32.xlu1 %v7468_v52 }
 0xcbf   :  { %v7475_v59 = vpop.f32.mrb[43].mxu1  ;;  %v16182_v57 = vadd.f32 %v10166_v8, %v17245_v62 }
 0xcc0   :  { %v16174_v47 = vadd.f32 %v7475_v59, %v17243_v10  ;;  %7519 = vmax.xlane.f32.xlu0 %v16171_v3 }
 0xcc2   :  { %7521 = vmax.xlane.f32.xlu1 %v16174_v47 }
 0xcc4   :  { %7523 = vmax.xlane.f32.xlu0 %v16178_v55  ;;  %v10169_v54 = vpop.f32.mrb[44].mxu1 }
 0xcc5   :  { %v7488_v9 = vpop.f32.mrb[45].mxu1  ;;  %v16194_v14 = vadd.f32 %v10169_v54, %v17248_v29 }
 0xcc6   :  { %v16186_v2 = vadd.f32 %v7488_v9, %v17246_v58  ;;  %7525 = vmax.xlane.f32.xlu1 %v16182_v57  ;;  %v10170_v24 = vpop.f32.mrb[46].mxu1 }
 0xcc7   :  { %v7491_v28 = vpop.f32.mrb[47].mxu1  ;;  %v16198_v0 = vadd.f32 %v10170_v24, %v17249_v36 }
 0xcc8   :  { %v16190_v23 = vadd.f32 %v7491_v28, %v17247_v32  ;;  %7527 = vmax.xlane.f32.xlu0 %v16186_v2 }
 0xcca   :  { %7529 = vmax.xlane.f32.xlu1 %v16190_v23 }
 0xccc   :  { %7531 = vmax.xlane.f32.xlu0 %v16194_v14 }
 0xcce   :  { %7533 = vmax.xlane.f32.xlu1 %v16198_v0 }
 0xd3d   :  { %v7504_v63 = vpop.xlane.xlu0 %7503 }
 0xd3e   :  { %v7535_v61 = vsub.f32 %v7441_v6, %v7504_v63 }
 0xd3f   :  { %v7506_v48 = vpop.xlane.xlu1 %7505 }
 0xd40   :  { %v7551_v7 = vmul.f32 1.442695, %v7535_v61  ;;  %v7536_v5 = vsub.f32 %v7444_v20, %v7506_v48 }
 0xd41   :  { %v7508_v18 = vpop.xlane.xlu0 %7507 }
 0xd42   :  { %11952 = vpow2.f32 %v7551_v7  ;;  %v7553_v60 = vmul.f32 1.442695, %v7536_v5  ;;  %v7537_v35 = vsub.f32 %v7449_v12, %v7508_v18 }
 0xd43   :  { %v7510_v8 = vpop.xlane.xlu1 %7509 }
 0xd44   :  { %11954 = vpow2.f32 %v7553_v60  ;;  %v7555_v59 = vmul.f32 1.442695, %v7537_v35  ;;  %v7538_v54 = vsub.f32 %v7452_v46, %v7510_v8 }
 0xd45   :  { %v7512_v9 = vpop.xlane.xlu0 %7511 }
 0xd46   :  { %11956 = vpow2.f32 %v7555_v59  ;;  %v7557_v24 = vmul.f32 1.442695, %v7538_v54  ;;  %v7539_v28 = vsub.f32 %v7457_v56, %v7512_v9 }
 0xd47   :  { %v7514_v36 = vpop.xlane.xlu1 %7513 }
 0xd48   :  { %11958 = vpow2.f32 %v7557_v24  ;;  %v7559_v29 = vmul.f32 1.442695, %v7539_v28  ;;  %v7540_v32 = vsub.f32 %v7460_v30, %v7514_v36 }
 0xd49   :  { %v7516_v6 = vpop.xlane.xlu0 %7515 }
 0xd4a   :  { %11960 = vpow2.f32 %v7559_v29  ;;  %v7561_v63 = vmul.f32 1.442695, %v7540_v32  ;;  %v7541_v20 = vsub.f32 %v7465_v45, %v7516_v6 }
 0xd4b   :  { %v7518_v61 = vpop.xlane.xlu1 %7517 }
 0xd4c   :  { %v16202_v48 = vpop.eup %11952  ;;  %11962 = vpow2.f32 %v7561_v63  ;;  %v7563_v12 = vmul.f32 1.442695, %v7541_v20  ;;  %v7542_v7 = vsub.f32 %v7468_v52, %v7518_v61 }
 0xd4d   :  { %v7520_v5 = vpop.xlane.xlu0 %7519  ;;  %7583 = vadd.xlane.f32.xlu0 %v16202_v48 }
 0xd4e   :  { %v16205_v46 = vpop.eup %11954  ;;  %11964 = vpow2.f32 %v7563_v12  ;;  %v7565_v56 = vmul.f32 1.442695, %v7542_v7  ;;  %v7543_v18 = vsub.f32 %v16171_v3, %v7520_v5 }
 0xd4f   :  { %v7522_v36 = vpop.xlane.xlu1 %7521  ;;  %7585 = vadd.xlane.f32.xlu1 %v16205_v46 }
 0xd50   :  { %v16209_v32 = vpop.eup %11956  ;;  %11966 = vpow2.f32 %v7565_v56  ;;  %v7567_v29 = vmul.f32 1.442695, %v7543_v18  ;;  %v7544_v30 = vsub.f32 %v16174_v47, %v7522_v36 }
 0xd51   :  { %v7524_v45 = vpop.xlane.xlu0 %7523  ;;  %7587 = vadd.xlane.f32.xlu0 %v16209_v32 }
 0xd52   :  { %v16213_v52 = vpop.eup %11958  ;;  %11968 = vpow2.f32 %v7567_v29  ;;  %v7569_v60 = vmul.f32 1.442695, %v7544_v30  ;;  %v7545_v35 = vsub.f32 %v16178_v55, %v7524_v45 }
 0xd53   :  { %v7526_v8 = vpop.xlane.xlu1 %7525  ;;  %7589 = vadd.xlane.f32.xlu1 %v16213_v52 }
 0xd54   :  { %v16217_v3 = vpop.eup %11960  ;;  %11970 = vpow2.f32 %v7569_v60  ;;  %v7571_v59 = vmul.f32 1.442695, %v7545_v35  ;;  %v7546_v54 = vsub.f32 %v16182_v57, %v7526_v8  ;;  %v11584_v35 = vld [vmem:[#allocation21] ss:$12 sps:$4 sm:$0xff]   ;;  %v11586_v8 = vld [vmem:[#allocation21 + $0x4] ss:$12 sps:$4 sm:$0xff]  }
 0xd55   :  { %7591 = vadd.xlane.f32.xlu0 %v16217_v3  ;;  %v7528_v47 = vpop.xlane.xlu0 %7527  ;;  %8062 = vmatprep.subr.bf16.mxu0 %v11586_v8 }
 0xd56   :  { %v16221_v9 = vpop.eup %11962  ;;  %11972 = vpow2.f32 %v7571_v59  ;;  %v7573_v24 = vmul.f32 1.442695, %v7546_v54  ;;  %v7547_v28 = vsub.f32 %v16186_v2, %v7528_v47  ;;  %v11589_v59 = vld [vmem:[#allocation21 + $0x1c] ss:$12 sps:$4 sm:$0xff]   ;;  %8063 = vmatpush1.bf16.msra.mxu0 %v11584_v35  ;;  %v11587_v54 = vld [vmem:[#allocation21 + $0x18] ss:$12 sps:$4 sm:$0xff]  }
 0xd57   :  { %7593 = vadd.xlane.f32.xlu1 %v16221_v9  ;;  %v7530_v55 = vpop.xlane.xlu1 %7529  ;;  %v16258_v47 = vld [vmem:[#allocation21 + $0x8] ss:$12 sps:$4 sm:$0xff]   ;;  %8064 = vmatprep.subr.bf16.mxu0 %v11589_v59 }
 0xd58   :  { %v16225_v6 = vpop.eup %11964  ;;  %11974 = vpow2.f32 %v7573_v24  ;;  %v7575_v63 = vmul.f32 1.442695, %v7547_v28  ;;  %v7548_v20 = vsub.f32 %v16190_v23, %v7530_v55  ;;  %v11592_v24 = vld [vmem:[#allocation21 + $0x34] ss:$12 sps:$4 sm:$0xff]   ;;  %10203 = vmatprep.subr.bf16.mxu1 %v16258_v47  ;;  %v11590_v28 = vld [vmem:[#allocation21 + $0x30] ss:$12 sps:$4 sm:$0xff]  }
 0xd59   :  { %7595 = vadd.xlane.f32.xlu0 %v16225_v6  ;;  %v7532_v57 = vpop.xlane.xlu0 %7531  ;;  %v11595_v55 = vld [vmem:[#allocation21 + $0x4c] ss:$12 sps:$4 sm:$0xff]  }
 0xd5a   :  { %v16229_v61 = vpop.eup %11966  ;;  %11976 = vpow2.f32 %v7575_v63  ;;  %v7577_v12 = vmul.f32 1.442695, %v7548_v20  ;;  %v7549_v7 = vsub.f32 %v16194_v14, %v7532_v57  ;;  %8065 = vmatpush1.bf16.msra.mxu0 %v11587_v54  ;;  %v11593_v63 = vld [vmem:[#allocation21 + $0x48] ss:$12 sps:$4 sm:$0xff]   ;;  %v11598_v20 = vld [vmem:[#allocation21 + $0x64] ss:$12 sps:$4 sm:$0xff]  }
 0xd5b   :  { %7597 = vadd.xlane.f32.xlu1 %v16229_v61  ;;  %v7534_v2 = vpop.xlane.xlu1 %7533  ;;  %8066 = vmatprep.subr.bf16.mxu0 %v11592_v24  ;;  %v11596_v57 = vld [vmem:[#allocation21 + $0x60] ss:$12 sps:$4 sm:$0xff]  }
 0xd5c   :  { %v16233_v5 = vpop.eup %11968  ;;  %11978 = vpow2.f32 %v7577_v12  ;;  %v7579_v56 = vmul.f32 1.442695, %v7549_v7  ;;  %v7550_v18 = vsub.f32 %v16198_v0, %v7534_v2 }
 0xd5d   :  { %7599 = vadd.xlane.f32.xlu0 %v16233_v5 }
 0xd5e   :  { %v16237_v23 = vpop.eup %11970  ;;  %11980 = vpow2.f32 %v7579_v56  ;;  %v7581_v36 = vmul.f32 1.442695, %v7550_v18  ;;  %8067 = vmatpush1.bf16.msra.mxu0 %v11590_v28 }
 0xd5f   :  { %7601 = vadd.xlane.f32.xlu1 %v16237_v23  ;;  %8068 = vmatprep.subr.bf16.mxu0 %v11595_v55 }
 0xd60   :  { %v16240_v29 = vpop.eup %11972  ;;  %11982 = vpow2.f32 %v7581_v36 }
 0xd61   :  { %7603 = vadd.xlane.f32.xlu0 %v16240_v29 }
 0xd62   :  { %v16243_v14 = vpop.eup %11974  ;;  %8069 = vmatpush1.bf16.msra.mxu0 %v11593_v63 }
 0xd63   :  { %7605 = vadd.xlane.f32.xlu1 %v16243_v14  ;;  %8070 = vmatprep.subr.bf16.mxu0 %v11598_v20 }
 0xd64   :  { %v16246_v30 = vpop.eup %11976 }
 0xd65   :  { %7607 = vadd.xlane.f32.xlu0 %v16246_v30 }
 0xd66   :  { %v16249_v0 = vpop.eup %11978  ;;  %8071 = vmatpush1.bf16.msra.mxu0 %v11596_v57 }
 0xd67   :  { %7609 = vadd.xlane.f32.xlu1 %v16249_v0 }
 0xd68   :  { %v16252_v45 = vpop.eup %11980 }
 0xd69   :  { %7611 = vadd.xlane.f32.xlu0 %v16252_v45 }
 0xd6a   :  { %v16255_v60 = vpop.eup %11982 }
 0xd6b   :  { %7613 = vadd.xlane.f32.xlu1 %v16255_v60 }
 0xdda   :  { %v7584_v12 = vpop.xlane.xlu0 %7583 }
 0xddb   :  { %11984 = vrcp.f32 %v7584_v12 }
 0xddc   :  { %v7586_v7 = vpop.xlane.xlu1 %7585 }
 0xddd   :  { %11986 = vrcp.f32 %v7586_v7 }
 0xdde   :  { %v7588_v2 = vpop.xlane.xlu0 %7587 }
 0xddf   :  { %11988 = vrcp.f32 %v7588_v2 }
 0xde0   :  { %v7590_v56 = vpop.xlane.xlu1 %7589 }
 0xde1   :  { %11990 = vrcp.f32 %v7590_v56 }
 0xde2   :  { %v7592_v18 = vpop.xlane.xlu0 %7591 }
 0xde3   :  { %11992 = vrcp.f32 %v7592_v18 }
 0xde4   :  { %v7594_v36 = vpop.xlane.xlu1 %7593 }
 0xde5   :  { %v11985_v35 = vpop.eup %11984  ;;  %11994 = vrcp.f32 %v7594_v36 }
 0xde6   :  { %v7596_v8 = vpop.xlane.xlu0 %7595  ;;  %v7631_v59 = vmul.f32 %v11985_v35, %v17250_v33 }
 0xde7   :  { %v11987_v54 = vpop.eup %11986  ;;  %11996 = vrcp.f32 %v7596_v8 }
 0xde8   :  { %v7598_v24 = vpop.xlane.xlu1 %7597  ;;  %v7632_v28 = vmul.f32 %v11987_v54, %v17251_v51  ;;  %v7647_v57 = vmul.f32 %v16202_v48, %v7631_v59  ;;  %v17276_v59 = vld [vmem:[#allocation61_spill] sm:$0xff] }
 0xde9   :  { %v11989_v55 = vpop.eup %11988  ;;  %11998 = vrcp.f32 %v7598_v24  ;;  %v17275_v24 = vld [vmem:[#allocation64_spill] sm:$0xff] }
 0xdea   :  { %v7633_v63 = vmul.f32 %v11989_v55, %v17252_v39  ;;  %v7600_v20 = vpop.xlane.xlu0 %7599  ;;  %v7648_v12 = vmul.f32 %v16205_v46, %v7632_v28 }
 0xdeb   :  { %v11991_v7 = vpop.eup %11990  ;;  %12000 = vrcp.f32 %v7600_v20  ;;  %v11600_v20 = vld [vmem:[#allocation21 + $0x20] ss:$12 sps:$4 sm:$0xff]  }
 0xdec   :  { %v7634_v2 = vmul.f32 %v11991_v7, %v17253_v53  ;;  %v7602_v56 = vpop.xlane.xlu1 %7601  ;;  %v7663_v18 = vpack.c.bf16 %v7648_v12, %v7647_v57  ;;  %v7649_v35 = vmul.f32 %v16209_v32, %v7633_v63  ;;  %v17277_v57 = vld [vmem:[#allocation62_spill] sm:$0xff] }
 0xded   :  { %v11993_v36 = vpop.eup %11992  ;;  %12002 = vrcp.f32 %v7602_v56 }
 0xdee   :  { %v7650_v8 = vmul.f32 %v16213_v52, %v7634_v2  ;;  %10187 = vmatprep.mubr.bf16.mxu1 %v7663_v18  ;;  %v7604_v54 = vpop.xlane.xlu0 %7603  ;;  %v7635_v55 = vmul.f32 %v11993_v36, %v17275_v24  ;;  %v17278_v2 = vld [vmem:[#allocation60_spill] sm:$0xff] }
 0xdef   :  { %v11995_v39 = vpop.eup %11994  ;;  %12004 = vrcp.f32 %v7604_v54 }
 0xdf0   :  { %v7664_v48 = vpack.c.bf16 %v7650_v8, %v7649_v35  ;;  %v7606_v46 = vpop.xlane.xlu1 %7605  ;;  %v7636_v28 = vmul.f32 %v11995_v39, %v17276_v59  ;;  %v7651_v32 = vmul.f32 %v16217_v3, %v7635_v55  ;;  %v17279_v3 = vld [vmem:[#allocation72_spill] sm:$0xff] }
 0xdf1   :  { %v11997_v7 = vpop.eup %11996  ;;  %12006 = vrcp.f32 %v7606_v46 }
 0xdf2   :  { %v7637_v12 = vmul.f32 %v11997_v7, %v17277_v57  ;;  %10188 = vmatmul.mubr.bf16.vlgmr.msra.gmra.mrb[48].mxu1 %v7664_v48  ;;  %v7608_v56 = vpop.xlane.xlu0 %7607  ;;  %v7652_v52 = vmul.f32 %v16221_v9, %v7636_v28  ;;  %v17280_v28 = vld [vmem:[#allocation69_spill] sm:$0xff] }
 0xdf3   :  { %v11999_v63 = vpop.eup %11998  ;;  %12008 = vrcp.f32 %v7608_v56  ;;  %10204 = vmatpush3.bf16.msra.mxu1 %v16258_v47 }
 0xdf4   :  { %v7638_v18 = vmul.f32 %v11999_v63, %v17278_v2  ;;  %v7610_v36 = vpop.xlane.xlu1 %7609  ;;  %v7665_v35 = vpack.c.bf16 %v7652_v52, %v7651_v32  ;;  %10205 = vmatprep.subr.bf16.mxu1 %v11600_v20  ;;  %v7653_v8 = vmul.f32 %v16225_v6, %v7637_v12  ;;  %v17281_v32 = vld [vmem:[#allocation70_spill] sm:$0xff]  ;;  %v17282_v63 = vld [vmem:[#allocation68_spill] sm:$0xff] }
 0xdf5   :  { %v12001_v39 = vpop.eup %12000  ;;  %12010 = vrcp.f32 %v7610_v36 }
 0xdf6   :  { %v7654_v54 = vmul.f32 %v16229_v61, %v7638_v18  ;;  %10191 = vmatprep.mubr.bf16.mxu1 %v7665_v35  ;;  %v7612_v48 = vpop.xlane.xlu0 %7611  ;;  %v7639_v55 = vmul.f32 %v12001_v39, %v17279_v3 }
 0xdf7   :  { %v12003_v9 = vpop.eup %12002  ;;  %12012 = vrcp.f32 %v7612_v48  ;;  %10206 = vmatpush3.bf16.msra.mxu1 %v11600_v20 }
 0xdf8   :  { %v7666_v46 = vpack.c.bf16 %v7654_v54, %v7653_v8  ;;  %v7614_v47 = vpop.xlane.xlu1 %7613  ;;  %v7640_v7 = vmul.f32 %v12003_v9, %v17280_v28  ;;  %v7655_v6 = vmul.f32 %v16233_v5, %v7639_v55  ;;  %v17283_v8 = vld [vmem:[#allocation79_spill] sm:$0xff]  ;;  %v17285_v5 = vld [vmem:[#allocation78_spill] sm:$0xff] }
 0xdf9   :  { %v12005_v56 = vpop.eup %12004  ;;  %12014 = vrcp.f32 %v7614_v47  ;;  %v17284_v47 = vld [vmem:[#allocation77_spill] sm:$0xff] }
 0xdfa   :  { %v7641_v52 = vmul.f32 %v12005_v56, %v17281_v32  ;;  %10192 = vmatmul.mubr.bf16.gmra.mrb[52].mxu1 %v7666_v46  ;;  %v7656_v61 = vmul.f32 %v16237_v23, %v7640_v7 }
 0xdfb   :  { %v12007_v12 = vpop.eup %12006 }
 0xdfc   :  { %v7642_v18 = vmul.f32 %v12007_v12, %v17282_v63  ;;  %v7667_v36 = vpack.c.bf16 %v7656_v61, %v7655_v6  ;;  %v7657_v20 = vmul.f32 %v16240_v29, %v7641_v52  ;;  %v17286_v61 = vld [vmem:[#allocation76_spill] sm:$0xff] }
 0xdfd   :  { %v12009_v35 = vpop.eup %12008 }
 0xdfe   :  { %v7658_v39 = vmul.f32 %v16243_v14, %v7642_v18  ;;  %10195 = vmatprep.mubr.bf16.mxu1 %v7667_v36  ;;  %v7643_v54 = vmul.f32 %v12009_v35, %v17283_v8  ;;  %v11601_v36 = vld [vmem:[#allocation21 + $0x78] ss:$12 sps:$4 sm:$0xff]   ;;  %v11603_v35 = vld [vmem:[#allocation21 + $0x7c] ss:$12 sps:$4 sm:$0xff]  }
 0xdff   :  { %v12011_v48 = vpop.eup %12010  ;;  %8072 = vmatprep.subr.bf16.mxu0 %v11603_v35 }
 0xe00   :  { %v7668_v9 = vpack.c.bf16 %v7658_v39, %v7657_v20  ;;  %v7644_v46 = vmul.f32 %v12011_v48, %v17284_v47  ;;  %v7659_v23 = vmul.f32 %v16246_v30, %v7643_v54  ;;  %v11604_v20 = vld [vmem:[#allocation21 + $0x38] ss:$12 sps:$4 sm:$0xff]   ;;  %v11605_v39 = vld [vmem:[#allocation21 + $0x50] ss:$12 sps:$4 sm:$0xff]   ;;  %8073 = vmatpush1.bf16.msra.mxu0 %v11601_v36  ;;  %v11609_v54 = vld [vmem:[#allocation21 + $0x68] ss:$12 sps:$4 sm:$0xff]  }
 0xe01   :  { %v12013_v56 = vpop.eup %12012  ;;  %10207 = vmatprep.subr.bf16.mxu1 %v11604_v20  ;;  %v11606_v30 = vld [vmem:[#allocation21 + $0x90] ss:$12 sps:$4 sm:$0xff]   ;;  %v11610_v48 = vld [vmem:[#allocation21 + $0x80] ss:$12 sps:$4 sm:$0xff]  }
 0xe02   :  { %v7645_v55 = vmul.f32 %v12013_v56, %v17285_v5  ;;  %10196 = vmatmul.mubr.bf16.gmra.mrb[56].mxu1 %v7668_v9  ;;  %v7660_v7 = vmul.f32 %v16249_v0, %v7644_v46  ;;  %v11608_v0 = vld [vmem:[#allocation21 + $0x94] ss:$12 sps:$4 sm:$0xff]   ;;  %v11614_v9 = vld [vmem:[#allocation21 + $0x98] ss:$12 sps:$4 sm:$0xff]   ;;  %v11615_v46 = vld [vmem:[#allocation21 + $0xb0] ss:$12 sps:$4 sm:$0xff]  }
 0xe03   :  { %v12015_v6 = vpop.eup %12014  ;;  %10208 = vmatpush3.bf16.msra.mxu1 %v11604_v20  ;;  %8074 = vmatprep.subr.bf16.mxu0 %v11608_v0  ;;  %v16294_v56 = vld [vmem:[#allocation24] sm:$0xff]  }
 0xe04   :  { %v7646_v29 = vmul.f32 %v12015_v6, %v17286_v61  ;;  %v7669_v52 = vpack.c.bf16 %v7660_v7, %v7659_v23  ;;  %v7661_v14 = vmul.f32 %v16252_v45, %v7645_v55  ;;  %10209 = vmatprep.subr.bf16.mxu1 %v11605_v39  ;;  %8075 = vmatpush1.bf16.msra.mxu0 %v11606_v30  ;;  %v11611_v45 = vld [vmem:[#allocation21 + $0xa8] ss:$12 sps:$4 sm:$0xff]   ;;  %v7207_v55 = vld [vmem:[#allocation20] sm:$0x1] }
 0xe05   :  { %v7208_v23 = vunpack.c.l.bf16 %v7207_v55 }
 0xe06   :  { %v7662_v12 = vmul.f32 %v16255_v60, %v7646_v29  ;;  %10199 = vmatprep.mubr.bf16.mxu1 %v7669_v52  ;;  %v11613_v60 = vld [vmem:[#allocation21 + $0xac] ss:$12 sps:$4 sm:$0xff]  }
 0xe07   :  { %10210 = vmatpush3.bf16.msra.mxu1 %v11605_v39  ;;  %8076 = vmatprep.subr.bf16.mxu0 %v11613_v60  ;;  %v16298_v7 = vrot.slane %v7208_v23, %v17230_v4 }
 0xe08   :  { %v7670_v18 = vpack.c.bf16 %v7662_v12, %v7661_v14  ;;  %10211 = vmatprep.subr.bf16.mxu1 %v11609_v54  ;;  %8077 = vmatpush1.bf16.msra.mxu0 %v11611_v45 }
 0xe09   :  { %v7352_v6 = vadd.f32 %v16034_v26, %v16298_v7  ;;  %v7344_v52 = vadd.f32 %v16023_v44, %v16298_v7  ;;  %v7347_v20 = vadd.f32 %v16029_v38, %v16298_v7  ;;  %v7368_v38 = vadd.f32 %v16062_v27, %v16298_v7 }
 0xe0a   :  { %10200 = vmatmul.mubr.bf16.gmra.mrb[60].mxu1 %v7670_v18  ;;  %v7355_v18 = vadd.f32 %v16041_v15, %v16298_v7  ;;  %v7360_v55 = vadd.f32 %v16048_v41, %v16298_v7  ;;  %v7363_v27 = vadd.f32 %v16055_v11, %v16298_v7  ;;  %v7384_v11 = vadd.f32 %v16090_v25, %v16298_v7 }
 0xe0b   :  { %10212 = vmatpush3.bf16.msra.mxu1 %v11609_v54 }
 0xe0c   :  { %10213 = vmatprep.subr.bf16.mxu1 %v11610_v48 }
 0xe0f   :  { %10214 = vmatpush3.bf16.msra.mxu1 %v11610_v48 }
 0xe10   :  { %10215 = vmatprep.subr.bf16.mxu1 %v11614_v9 }
 0xe13   :  { %10216 = vmatpush3.bf16.msra.mxu1 %v11614_v9 }
 0xe14   :  { %10217 = vmatprep.subr.bf16.mxu1 %v11615_v46 }
 0xe17   :  { %10218 = vmatpush3.bf16.msra.mxu1 %v11615_v46 }
 0xe18   :  { %10235 = vmatprep.subr.bf16.mxu1 %v16294_v56 }
 0xec5   :  { %v10189_v29 = vpop.f32.mrb[48].mxu1 }
 0xec6   :  { %v16304_v14 = vadd.f32 %v10189_v29, %v7352_v6  ;;  %v7705_v12 = vpop.f32.mrb[49].mxu1  ;;  %v7371_v29 = vadd.f32 %v16069_v21, %v16298_v7 }
 0xec7   :  { %v16308_v36 = vadd.f32 %v7705_v12, %v7344_v52  ;;  %v10190_v35 = vpop.f32.mrb[50].mxu1 }
 0xec8   :  { %v7786_v39 = vmin.f32 %v16304_v14, 0.0  ;;  %v16313_v30 = vadd.f32 %v10190_v35, %v7355_v18  ;;  %v7708_v26 = vpop.f32.mrb[51].mxu1  ;;  %vm7770_vm0 = vcmp.gt.f32.partialorder %v16304_v14, 0.0 }
 0xec9   :  { %v7784_v0 = vmin.f32 %v16308_v36, 0.0  ;;  %v16316_v44 = vadd.f32 %v7708_v26, %v7347_v20  ;;  %vm7768_vm1 = vcmp.gt.f32.partialorder %v16308_v36, 0.0 }
 0xeca   :  { %v7804_v54 = vmul.f32 1.442695, %v7786_v39  ;;  %v7787_v48 = vmin.f32 %v16313_v30, 0.0  ;;  %vm7771_vm2 = vcmp.gt.f32.partialorder %v16313_v30, 0.0 }
 0xecb   :  { %v7800_v45 = vmul.f32 1.442695, %v7784_v0  ;;  %v7785_v15 = vmin.f32 %v16316_v44, 0.0  ;;  %vm7769_vm3 = vcmp.gt.f32.partialorder %v16316_v44, 0.0 }
 0xecc   :  { %12016 = vpow2.f32 %v7804_v54  ;;  %v7806_v60 = vmul.f32 1.442695, %v7787_v48 }
 0xecd   :  { %12018 = vpow2.f32 %v7800_v45  ;;  %v7802_v9 = vmul.f32 1.442695, %v7785_v15  ;;  %v10193_v46 = vpop.f32.mrb[52].mxu1 }
 0xece   :  { %12020 = vpow2.f32 %v7806_v60  ;;  %v16324_v23 = vadd.f32 %v10193_v46, %v7368_v38  ;;  %v7721_v6 = vpop.f32.mrb[53].mxu1  ;;  %v7376_v60 = vadd.f32 %v16076_v19, %v16298_v7 }
 0xecf   :  { %12022 = vpow2.f32 %v7802_v9  ;;  %v16328_v52 = vadd.f32 %v7721_v6, %v7360_v55  ;;  %v10194_v12 = vpop.f32.mrb[54].mxu1  ;;  %v7387_v55 = vadd.f32 %v16097_v17, %v16298_v7  ;;  %v17287_v6 = vld [vmem:[#allocation88_spill] sm:$0xff] }
 0xed0   :  { %v7790_v18 = vmin.f32 %v16324_v23, 0.0  ;;  %v16333_v35 = vadd.f32 %v10194_v12, %v7371_v29  ;;  %v7724_v20 = vpop.f32.mrb[55].mxu1  ;;  %v7379_v29 = vadd.f32 %v17287_v6, %v16298_v7  ;;  %vm7774_vm4 = vcmp.gt.f32.partialorder %v16324_v23, 0.0 }
 0xed1   :  { %v7788_v41 = vmin.f32 %v16328_v52, 0.0  ;;  %v16336_v39 = vadd.f32 %v7724_v20, %v7363_v27  ;;  %v17288_v20 = vld [vmem:[#allocation92_spill] sm:$0xff]  ;;  %vm7772_vm5 = vcmp.gt.f32.partialorder %v16328_v52, 0.0 }
 0xed2   :  { %v7812_v26 = vmul.f32 1.442695, %v7790_v18  ;;  %v7791_v0 = vmin.f32 %v16333_v35, 0.0  ;;  %v7400_v19 = vadd.f32 %v17288_v20, %v16298_v7  ;;  %vm7775_vm6 = vcmp.gt.f32.partialorder %v16333_v35, 0.0 }
 0xed3   :  { %v7808_v21 = vmul.f32 1.442695, %v7788_v41  ;;  %v7789_v54 = vmin.f32 %v16336_v39, 0.0  ;;  %vm7773_vm7 = vcmp.gt.f32.partialorder %v16336_v39, 0.0 }
 0xed4   :  { %12024 = vpow2.f32 %v7812_v26  ;;  %v7814_v48 = vmul.f32 1.442695, %v7791_v0 }
 0xed5   :  { %12026 = vpow2.f32 %v7808_v21  ;;  %v7810_v45 = vmul.f32 1.442695, %v7789_v54  ;;  %v10197_v15 = vpop.f32.mrb[56].mxu1 }
 0xed6   :  { %v12017_v38 = vpop.eup %12016  ;;  %12028 = vpow2.f32 %v7814_v48  ;;  %v16344_v9 = vadd.f32 %v10197_v15, %v7384_v11  ;;  %v7737_v46 = vpop.f32.mrb[57].mxu1 }
 0xed7   :  { %v12019_v12 = vpop.eup %12018  ;;  %v9777_v27 = vadd.f32 -1.0, %v12017_v38  ;;  %12030 = vpow2.f32 %v7810_v45  ;;  %v16350_v25 = vadd.f32 %v7737_v46, %v7376_v60  ;;  %v10198_v18 = vpop.f32.mrb[58].mxu1 }
 0xed8   :  { %v12021_v41 = vpop.eup %12020  ;;  %v9775_v26 = vadd.f32 -1.0, %v12019_v12  ;;  %v7794_v0 = vmin.f32 %v16344_v9, 0.0  ;;  %v16356_v21 = vadd.f32 %v10198_v18, %v7387_v55  ;;  %v7740_v17 = vpop.f32.mrb[59].mxu1  ;;  %vm7778_vm8 = vcmp.gt.f32.partialorder %v16344_v9, 0.0 }
 0xed9   :  { %v12023_v54 = vpop.eup %12022  ;;  %v9778_v48 = vadd.f32 -1.0, %v12021_v41  ;;  %v7792_v11 = vmin.f32 %v16350_v25, 0.0  ;;  %v7850_v45 = vsel %vm7770_vm0, %v16304_v14, %v9777_v27  ;;  %v16365_v6 = vadd.f32 %v7740_v17, %v7379_v29 }
 0xeda   :  { %v9776_v15 = vadd.f32 -1.0, %v12023_v54  ;;  %v7820_v60 = vmul.f32 1.442695, %v7794_v0  ;;  %v7795_v55 = vmin.f32 %v16356_v21, 0.0  ;;  %v7848_v12 = vsel %vm7768_vm1, %v16308_v36, %v9775_v26  ;;  %v17289_v0 = vld [vmem:[#allocation89_spill] sm:$0xff]  ;;  %v17290_v36 = vld [vmem:[#allocation90_spill] sm:$0xff] }
 0xedb   :  { %v7851_v38 = vsel %vm7771_vm2, %v16313_v30, %v9778_v48  ;;  %v7816_v46 = vmul.f32 1.442695, %v7792_v11  ;;  %v7392_v54 = vadd.f32 %v17289_v0, %v16298_v7  ;;  %v7793_v48 = vmin.f32 %v16365_v6, 0.0  ;;  %v11617_v11 = vld [vmem:[#allocation24 + $0x8] sm:$0xff]  }
 0xedc   :  { %v16368_v18 = vpack.c.bf16 %v7851_v38, %v7850_v45  ;;  %v7849_v20 = vsel %vm7769_vm3, %v16316_v44, %v9776_v15  ;;  %12032 = vpow2.f32 %v7820_v60  ;;  %v7822_v14 = vmul.f32 1.442695, %v7795_v55 }
 0xedd   :  { %v16371_v41 = vpack.c.bf16 %v7849_v20, %v7848_v12  ;;  %v10201_v27 = vpop.f32.mrb[60].mxu1  ;;  %12034 = vpow2.f32 %v7816_v46  ;;  %v7395_v26 = vadd.f32 %v17290_v36, %v16298_v7  ;;  %v7403_v60 = vadd.f32 %v16123_v43, %v16298_v7 }
 0xede   :  { %v12025_v30 = vpop.eup %12024  ;;  %v16376_v29 = vadd.f32 %v10201_v27, %v7400_v19  ;;  %v7753_v17 = vpop.f32.mrb[61].mxu1  ;;  %12036 = vpow2.f32 %v7822_v14  ;;  %v7818_v46 = vmul.f32 1.442695, %v7793_v48  ;;  %v17291_v20 = vmov 0   ;;  %v11618_v48 = vld [vmem:[#allocation24 + $0x10] sm:$0xff]  }
 0xedf   :  { %v12027_v44 = vpop.eup %12026  ;;  %v9781_v45 = vadd.f32 -1.0, %v12025_v30  ;;  %v16380_v15 = vadd.f32 %v7753_v17, %v7392_v54  ;;  %v10202_v38 = vpop.f32.mrb[62].mxu1  ;;  %8095 = vmatmul.mubr.bf16.vlgmr.msra.gmra.mrb[0].mxu0 %v16371_v41  ;;  %10219 = vmatprep.mubr.bf16.mxu1 %v16371_v41  ;;  %vm7779_vm9 = vcmp.gt.f32.partialorder %v16356_v21, 0.0  ;;  %vm7776_vm10 = vcmp.gt.f32.partialorder %v16350_v25, 0.0 }
 0xee0   :  { %v12029_v19 = vpop.eup %12028  ;;  %v7798_v55 = vmin.f32 %v16376_v29, 0.0  ;;  %v7756_v12 = vpop.f32.mrb[63].mxu1  ;;  %10220 = vmatmul.mubr.bf16.vlgmr.msra.gmra.mrb[64].mxu1 %v16368_v18  ;;  %8104 = vmatprep.mubr.bf16.mxu0 %v17291_v20  ;;  %v9779_v43 = vadd.f32 -1.0, %v12027_v44  ;;  %12038 = vpow2.f32 %v7818_v46  ;;  %v16394_v30 = vadd.f32 %v10202_v38, %v7403_v60 }
 0xee1   :  { %v12031_v14 = vpop.eup %12030  ;;  %v9782_v7 = vadd.f32 -1.0, %v12029_v19  ;;  %v7796_v27 = vmin.f32 %v16380_v15, 0.0  ;;  %10236 = vmatpush3.bf16.msra.mxu1 %v16294_v56  ;;  %v7854_v17 = vsel %vm7774_vm4, %v16324_v23, %v9781_v45  ;;  %v16400_v61 = vadd.f32 %v7756_v12, %v7395_v26 }
 0xee2   :  { %v9780_v0 = vadd.f32 -1.0, %v12031_v14  ;;  %v7828_v54 = vmul.f32 1.442695, %v7798_v55  ;;  %10237 = vmatprep.subr.bf16.mxu1 %v11617_v11  ;;  %v7799_v56 = vmin.f32 %v16394_v30, 0.0  ;;  %v7852_v23 = vsel %vm7772_vm5, %v16328_v52, %v9779_v43  ;;  %v11619_v55 = vld [vmem:[#allocation24 + $0x18] sm:$0xff]   ;;  %v11620_v43 = vld [vmem:[#allocation24 + $0x20] sm:$0xff]  }
 0xee3   :  { %v7855_v36 = vsel %vm7775_vm6, %v16333_v35, %v9782_v7  ;;  %v7824_v44 = vmul.f32 1.442695, %v7796_v27  ;;  %v7797_v60 = vmin.f32 %v16400_v61, 0.0  ;;  %vm7777_vm11 = vcmp.gt.f32.partialorder %v16365_v6, 0.0 }
 0xee4   :  { %v16402_v19 = vpack.c.bf16 %v7855_v36, %v7854_v17  ;;  %12040 = vpow2.f32 %v7828_v54  ;;  %v7853_v35 = vsel %vm7773_vm7, %v16336_v39, %v9780_v0  ;;  %v7830_v26 = vmul.f32 1.442695, %v7799_v56 }
 0xee5   :  { %12042 = vpow2.f32 %v7824_v44  ;;  %10238 = vmatpush3.bf16.msra.mxu1 %v11617_v11  ;;  %v16411_v38 = vpack.c.bf16 %v7853_v35, %v7852_v23  ;;  %v7826_v46 = vmul.f32 1.442695, %v7797_v60  ;;  %v11621_v60 = vld [vmem:[#allocation24 + $0x28] sm:$0xff]   ;;  %vm7782_vm12 = vcmp.gt.f32.partialorder %v16376_v29, 0.0 }
 0xee6   :  { %v12033_v45 = vpop.eup %12032  ;;  %10239 = vmatprep.subr.bf16.mxu1 %v11618_v48  ;;  %12044 = vpow2.f32 %v7830_v26  ;;  %vm7783_vm13 = vcmp.gt.f32.partialorder %v16394_v30, 0.0  ;;  %vm7780_vm14 = vcmp.gt.f32.partialorder %v16380_v15, 0.0  ;;  %vm7781_vm15 = vcmp.gt.f32.partialorder %v16400_v61, 0.0 }
 0xee7   :  { %8105 = vmatmul.mubr.bf16.gmra.mrb[4].mxu0 %v16368_v18  ;;  %v12035_v12 = vpop.eup %12034  ;;  %v9785_v14 = vadd.f32 -1.0, %v12033_v45  ;;  %10223 = vmatprep.mubr.bf16.mxu1 %v16411_v38  ;;  %12046 = vpow2.f32 %v7826_v46  ;;  %v11622_v46 = vld [vmem:[#allocation24 + $0x30] sm:$0xff]   ;;  %vm12634_vm0 = vmmov 0  }
 0xee8   :  { %8114 = vmatprep.mubr.bf16.mxu0 %v17291_v20  ;;  %v12037_v11 = vpop.eup %12036  ;;  %10224 = vmatmul.mubr.bf16.gmra.mrb[68].mxu1 %v16402_v19  ;;  %v9783_v39 = vadd.f32 -1.0, %v12035_v12 }
 0xee9   :  { %v9786_v52 = vadd.f32 -1.0, %v12037_v11  ;;  %10240 = vmatpush3.bf16.msra.mxu1 %v11618_v48  ;;  %v7858_v27 = vsel %vm7778_vm8, %v16344_v9, %v9785_v14 }
 0xeea   :  { %10241 = vmatprep.subr.bf16.mxu1 %v11619_v55  ;;  %v12039_v7 = vpop.eup %12038  ;;  %v7856_v44 = vsel %vm7776_vm10, %v16350_v25, %v9783_v39  ;;  %v11623_v39 = vld [vmem:[#allocation24 + $0x38] sm:$0xff]  }
 0xeeb   :  { %v7859_v0 = vsel %vm7779_vm9, %v16356_v21, %v9786_v52  ;;  %v9784_v17 = vadd.f32 -1.0, %v12039_v7 }
 0xeec   :  { %v7869_v54 = vpack.c.bf16 %v7859_v0, %v7858_v27 }
 0xeed   :  { %10242 = vmatpush3.bf16.msra.mxu1 %v11619_v55  ;;  %v7857_v56 = vsel %vm7777_vm11, %v16365_v6, %v9784_v17 }
 0xeee   :  { %v12041_v36 = vpop.eup %12040  ;;  %10243 = vmatprep.subr.bf16.mxu1 %v11620_v43  ;;  %v7868_v9 = vpack.c.bf16 %v7857_v56, %v7856_v44 }
 0xeef   :  { %v12043_v48 = vpop.eup %12042  ;;  %8115 = vmatmul.mubr.bf16.gmra.mrb[8].mxu0 %v16411_v38  ;;  %v9789_v21 = vadd.f32 -1.0, %v12041_v36 }
 0xef0   :  { %8124 = vmatprep.mubr.bf16.mxu0 %v17291_v20  ;;  %v12045_v23 = vpop.eup %12044  ;;  %v9787_v35 = vadd.f32 -1.0, %v12043_v48  ;;  %10227 = vmatprep.mubr.bf16.mxu1 %v7868_v9 }
 0xef1   :  { %10244 = vmatpush3.bf16.msra.mxu1 %v11620_v43  ;;  %v12047_v45 = vpop.eup %12046  ;;  %v9790_v26 = vadd.f32 -1.0, %v12045_v23  ;;  %v7862_v6 = vsel %vm7782_vm12, %v16376_v29, %v9789_v21 }
 0xef2   :  { %10228 = vmatmul.mubr.bf16.gmra.mrb[72].mxu1 %v7869_v54  ;;  %10245 = vmatprep.subr.bf16.mxu1 %v11621_v60  ;;  %v9788_v25 = vadd.f32 -1.0, %v12047_v45  ;;  %v7860_v14 = vsel %vm7780_vm14, %v16380_v15, %v9787_v35 }
 0xef3   :  { %v7863_v55 = vsel %vm7783_vm13, %v16394_v30, %v9790_v26 }
 0xef4   :  { %v7871_v12 = vpack.c.bf16 %v7863_v55, %v7862_v6  ;;  %v7861_v11 = vsel %vm7781_vm15, %v16400_v61, %v9788_v25  ;;  %v7904_v61 = vld [vmem:[#allocation23] sm:$0x7] }
 0xef5   :  { %10246 = vmatpush3.bf16.msra.mxu1 %v11621_v60  ;;  %v7870_v52 = vpack.c.bf16 %v7861_v11, %v7860_v14 }
 0xef6   :  { %10247 = vmatprep.subr.bf16.mxu1 %v11622_v46 }
 0xef7   :  { %8125 = vmatmul.mubr.bf16.gmra.mrb[12].mxu0 %v16402_v19  ;;  %10231 = vmatprep.mubr.bf16.mxu1 %v7870_v52 }
 0xef8   :  { %8134 = vmatprep.mubr.bf16.mxu0 %v17291_v20 }
 0xef9   :  { %10248 = vmatpush3.bf16.msra.mxu1 %v11622_v46 }
 0xefa   :  { %10232 = vmatmul.mubr.bf16.gmra.mrb[76].mxu1 %v7871_v12  ;;  %10249 = vmatprep.subr.bf16.mxu1 %v11623_v39 }
 0xefb   :  { %10251 = vmatprep.mubr.bf16.mxu1 %v16371_v41  ;;  %v7905_v41 = vunpack.c.l.bf16 %v7904_v61 }
 0xefd   :  { %10250 = vmatpush3.bf16.msra.mxu1 %v11623_v39  ;;  %v7910_v29 = vrot.slane %v7905_v41, %v17230_v4  ;;  %v7918_v30 = vrot.slane %v7905_v41, %v17231_v16 }
 0xeff   :  { %8135 = vmatmul.mubr.bf16.gmra.mrb[16].mxu0 %v7868_v9 }
 0xf00   :  { %8144 = vmatprep.mubr.bf16.mxu0 %v17291_v20 }
 0xf02   :  { %10252 = vmatmul.mubr.bf16.vlgmr.msra.gmra.mrb[80].mxu1 %v16368_v18  ;;  %v17292_v18 = vld [vmem:[#allocation45_spill] sm:$0xff] }
 0xf03   :  { %10255 = vmatprep.mubr.bf16.mxu1 %v16411_v38  ;;  %v7914_v15 = vrot.slane %v7905_v41, %v17292_v18  ;;  %v16448_v38 = vrot.slane %v7910_v29, %v17230_v4 }
 0xf05   :  { %v16451_v43 = vrot.slane %v7914_v15, %v17230_v4 }
 0xf07   :  { %8145 = vmatmul.mubr.bf16.gmra.mrb[20].mxu0 %v7869_v54 }
 0xf08   :  { %8154 = vmatprep.mubr.bf16.mxu0 %v17291_v20 }
 0xf0a   :  { %10256 = vmatmul.mubr.bf16.gmra.mrb[84].mxu1 %v16402_v19 }
 0xf0b   :  { %10259 = vmatprep.mubr.bf16.mxu1 %v7868_v9 }
 0xf0f   :  { %8155 = vmatmul.mubr.bf16.gmra.mrb[24].mxu0 %v7870_v52 }
 0xf10   :  { %8164 = vmatprep.mubr.bf16.mxu0 %v17291_v20  ;;  %v16454_v20 = vrot.slane %v7918_v30, %v17230_v4 }
 0xf12   :  { %10260 = vmatmul.mubr.bf16.gmra.mrb[88].mxu1 %v7869_v54 }
 0xf13   :  { %10263 = vmatprep.mubr.bf16.mxu1 %v7870_v52 }
 0xf17   :  { %8165 = vmatmul.mubr.bf16.gmra.mrb[28].mxu0 %v7871_v12 }
 0xf1a   :  { %10264 = vmatmul.mubr.bf16.gmra.mrb[92].mxu1 %v7871_v12 }
 0xfb2   :  { %v8096_v19 = vpop.f32.mrb[0].mxu0 }
 0xfb3   :  { %v8098_v7 = vpop.f32.mrb[1].mxu0  ;;  %v10221_v27 = vpop.f32.mrb[64].mxu1  ;;  %v8097_v17 = vadd.f32 %v8096_v19, %v16448_v38 }
 0xfb4   :  { %v8100_v0 = vpop.f32.mrb[2].mxu0  ;;  %v8209_v54 = vpop.f32.mrb[65].mxu1  ;;  %v8099_v44 = vadd.f32 %v8098_v7, %v16451_v43  ;;  %v8218_v56 = vadd.f32 %v10221_v27, %v16454_v20 }
 0xfb5   :  { %v8101_v36 = vadd.f32 %v8100_v0, %v16448_v38  ;;  %v8102_v48 = vpop.f32.mrb[3].mxu0  ;;  %v10222_v16 = vpop.f32.mrb[66].mxu1  ;;  %v8210_v35 = vadd.f32 %v8209_v54, %v16454_v20 }
 0xfb6   :  { %v8103_v60 = vadd.f32 %v8102_v48, %v16451_v43  ;;  %v8221_v9 = vadd.f32 %v10222_v16, %v16454_v20  ;;  %v8212_v21 = vpop.f32.mrb[67].mxu1 }
 0xfb7   :  { %v8272_v23 = vpack.c.bf16 %v8101_v36, %v8097_v17  ;;  %v8213_v45 = vadd.f32 %v8212_v21, %v16454_v20 }
 0xfb8   :  { %v8273_v26 = vpack.c.bf16 %v8103_v60, %v8099_v44  ;;  %v8277_v46 = vpack.c.bf16 %v8221_v9, %v8218_v56 }
 0xfb9   :  { %v8274_v25 = vpack.c.bf16 %v8213_v45, %v8210_v35  ;;  %10283 = vmatprep.mubr.bf16.mxu0 %v8272_v23 }
 0xfba   :  { %v8106_v6 = vpop.f32.mrb[4].mxu0  ;;  %10267 = vmatprep.subr.bf16.mxu0 %v8273_v26 }
 0xfbb   :  { %v16465_v55 = vadd.f32 %v8106_v6, %v16448_v38  ;;  %v8108_v12 = vpop.f32.mrb[5].mxu0  ;;  %10268 = vmatpush3.bf16.xpose.msra.mxu0 %v8273_v26  ;;  %10299 = vmatprep.subr.bf16.mxu1 %v8274_v25  ;;  %v10225_v14 = vpop.f32.mrb[68].mxu1 }
 0xfbc   :  { %v8110_v11 = vpop.f32.mrb[6].mxu0  ;;  %10300 = vmatpush3.bf16.msra.mxu1 %v8274_v25  ;;  %v8225_v39 = vpop.f32.mrb[69].mxu1  ;;  %v8109_v41 = vadd.f32 %v8108_v12, %v16451_v43  ;;  %v8234_v15 = vadd.f32 %v10225_v14, %v16454_v20 }
 0xfbd   :  { %v16468_v52 = vadd.f32 %v8110_v11, %v16448_v38  ;;  %v8112_v61 = vpop.f32.mrb[7].mxu0  ;;  %10301 = vmatprep.subr.bf16.mxu1 %v8277_v46  ;;  %v10226_v18 = vpop.f32.mrb[70].mxu1  ;;  %v8226_v27 = vadd.f32 %v8225_v39, %v16454_v20 }
 0xfbe   :  { %v8113_v29 = vadd.f32 %v8112_v61, %v16451_v43  ;;  %v8237_v19 = vadd.f32 %v10226_v18, %v16454_v20  ;;  %v8228_v7 = vpop.f32.mrb[71].mxu1 }
 0xfbf   :  { %v8275_v30 = vpack.c.bf16 %v16468_v52, %v16465_v55  ;;  %v8229_v54 = vadd.f32 %v8228_v7, %v16454_v20 }
 0xfc0   :  { %v8276_v0 = vpack.c.bf16 %v8113_v29, %v8109_v41  ;;  %10302 = vmatpush3.bf16.msra.mxu1 %v8277_v46  ;;  %v8283_v17 = vpack.c.bf16 %v8237_v19, %v8234_v15 }
 0xfc1   :  { %v8280_v36 = vpack.c.bf16 %v8229_v54, %v8226_v27 }
 0xfc2   :  { %v8116_v48 = vpop.f32.mrb[8].mxu0  ;;  %10269 = vmatprep.subr.bf16.mxu0 %v8276_v0 }
 0xfc3   :  { %v16479_v16 = vadd.f32 %v8116_v48, %v16448_v38  ;;  %v8118_v44 = vpop.f32.mrb[9].mxu0  ;;  %10270 = vmatpush3.bf16.xpose.msra.mxu0 %v8276_v0  ;;  %10303 = vmatprep.subr.bf16.mxu1 %v8280_v36 }
 0xfc4   :  { %v8120_v56 = vpop.f32.mrb[10].mxu0  ;;  %10304 = vmatpush3.bf16.msra.mxu1 %v8280_v36  ;;  %v8119_v21 = vadd.f32 %v8118_v44, %v16451_v43 }
 0xfc5   :  { %v16482_v60 = vadd.f32 %v8120_v56, %v16448_v38  ;;  %v8122_v9 = vpop.f32.mrb[11].mxu0  ;;  %v10229_v23 = vpop.f32.mrb[72].mxu1  ;;  %10305 = vmatprep.subr.bf16.mxu1 %v8283_v17 }
 0xfc6   :  { %v8123_v35 = vadd.f32 %v8122_v9, %v16451_v43  ;;  %v8241_v26 = vpop.f32.mrb[73].mxu1  ;;  %v8250_v6 = vadd.f32 %v10229_v23, %v16454_v20 }
 0xfc7   :  { %v8278_v45 = vpack.c.bf16 %v16482_v60, %v16479_v16  ;;  %v10230_v25 = vpop.f32.mrb[74].mxu1  ;;  %v8242_v11 = vadd.f32 %v8241_v26, %v16454_v20 }
 0xfc8   :  { %v8279_v46 = vpack.c.bf16 %v8123_v35, %v8119_v21  ;;  %v8253_v12 = vadd.f32 %v10230_v25, %v16454_v20  ;;  %v8244_v14 = vpop.f32.mrb[75].mxu1  ;;  %10306 = vmatpush3.bf16.msra.mxu1 %v8283_v17 }
 0xfc9   :  { %v8245_v39 = vadd.f32 %v8244_v14, %v16454_v20 }
 0xfca   :  { %v8126_v61 = vpop.f32.mrb[12].mxu0  ;;  %10271 = vmatprep.subr.bf16.mxu0 %v8279_v46  ;;  %v8289_v41 = vpack.c.bf16 %v8253_v12, %v8250_v6 }
 0xfcb   :  { %v16493_v29 = vadd.f32 %v8126_v61, %v16448_v38  ;;  %v8128_v18 = vpop.f32.mrb[13].mxu0  ;;  %10272 = vmatpush3.bf16.xpose.msra.mxu0 %v8279_v46  ;;  %v8286_v15 = vpack.c.bf16 %v8245_v39, %v8242_v11 }
 0xfcc   :  { %v8130_v19 = vpop.f32.mrb[14].mxu0  ;;  %v8129_v0 = vadd.f32 %v8128_v18, %v16451_v43 }
 0xfcd   :  { %v16496_v7 = vadd.f32 %v8130_v19, %v16448_v38  ;;  %v8132_v27 = vpop.f32.mrb[15].mxu0  ;;  %v10233_v54 = vpop.f32.mrb[76].mxu1  ;;  %10307 = vmatprep.subr.bf16.mxu1 %v8286_v15 }
 0xfce   :  { %v8133_v17 = vadd.f32 %v8132_v27, %v16451_v43  ;;  %v8257_v48 = vpop.f32.mrb[77].mxu1  ;;  %10308 = vmatpush3.bf16.msra.mxu1 %v8286_v15  ;;  %v8266_v9 = vadd.f32 %v10233_v54, %v16454_v20 }
 0xfcf   :  { %v8281_v36 = vpack.c.bf16 %v16496_v7, %v16493_v29  ;;  %v10234_v56 = vpop.f32.mrb[78].mxu1  ;;  %10309 = vmatprep.subr.bf16.mxu1 %v8289_v41  ;;  %v8258_v35 = vadd.f32 %v8257_v48, %v16454_v20 }
 0xfd0   :  { %v8282_v44 = vpack.c.bf16 %v8133_v17, %v8129_v0  ;;  %v8269_v21 = vadd.f32 %v10234_v56, %v16454_v20  ;;  %v8260_v23 = vpop.f32.mrb[79].mxu1  ;;  %v17293_v17 = vmov 0.0  }
 0xfd1   :  { %v8261_v26 = vadd.f32 %v8260_v23, %v16454_v20 }
 0xfd2   :  { %v8136_v46 = vpop.f32.mrb[16].mxu0  ;;  %10273 = vmatprep.subr.bf16.mxu0 %v8282_v44  ;;  %v8295_v25 = vpack.c.bf16 %v8269_v21, %v8266_v9  ;;  %10310 = vmatpush3.bf16.msra.mxu1 %v8289_v41 }
 0xfd3   :  { %v8137_v6 = vadd.f32 %v8136_v46, %v16448_v38  ;;  %v8138_v12 = vpop.f32.mrb[17].mxu0  ;;  %10274 = vmatpush3.bf16.xpose.msra.mxu0 %v8282_v44  ;;  %v8292_v14 = vpack.c.bf16 %v8261_v26, %v8258_v35 }
 0xfd4   :  { %v8140_v11 = vpop.f32.mrb[18].mxu0  ;;  %v8139_v18 = vadd.f32 %v8138_v12, %v16451_v43 }
 0xfd5   :  { %v8141_v39 = vadd.f32 %v8140_v11, %v16448_v38  ;;  %v8142_v61 = vpop.f32.mrb[19].mxu0  ;;  %10311 = vmatprep.subr.bf16.mxu1 %v8292_v14 }
 0xfd6   :  { %v8143_v15 = vadd.f32 %v8142_v61, %v16451_v43  ;;  %10312 = vmatpush3.bf16.msra.mxu1 %v8292_v14 }
 0xfd7   :  { %v8284_v19 = vpack.c.bf16 %v8141_v39, %v8137_v6  ;;  %10313 = vmatprep.subr.bf16.mxu1 %v8295_v25 }
 0xfd8   :  { %v8285_v20 = vpack.c.bf16 %v8143_v15, %v8139_v18 }
 0xfda   :  { %v8146_v27 = vpop.f32.mrb[20].mxu0  ;;  %10275 = vmatprep.subr.bf16.mxu0 %v8285_v20  ;;  %10314 = vmatpush3.bf16.msra.mxu1 %v8295_v25 }
 0xfdb   :  { %v8147_v41 = vadd.f32 %v8146_v27, %v16448_v38  ;;  %v8148_v0 = vpop.f32.mrb[21].mxu0  ;;  %10276 = vmatpush3.bf16.xpose.msra.mxu0 %v8285_v20  ;;  %10351 = vmatprep.subr.bf16.mxu1 %v17293_v17 }
 0xfdc   :  { %v8150_v54 = vpop.f32.mrb[22].mxu0  ;;  %v8149_v56 = vadd.f32 %v8148_v0, %v16451_v43 }
 0xfdd   :  { %v8151_v48 = vadd.f32 %v8150_v54, %v16448_v38  ;;  %v8152_v44 = vpop.f32.mrb[23].mxu0 }
 0xfde   :  { %v8153_v9 = vadd.f32 %v8152_v44, %v16451_v43 }
 0xfdf   :  { %v8287_v21 = vpack.c.bf16 %v8151_v48, %v8147_v41 }
 0xfe0   :  { %v8288_v23 = vpack.c.bf16 %v8153_v9, %v8149_v56 }
 0xfe2   :  { %v8156_v35 = vpop.f32.mrb[24].mxu0  ;;  %10277 = vmatprep.subr.bf16.mxu0 %v8288_v23 }
 0xfe3   :  { %v8157_v26 = vadd.f32 %v8156_v35, %v16448_v38  ;;  %v8158_v46 = vpop.f32.mrb[25].mxu0  ;;  %10278 = vmatpush3.bf16.xpose.msra.mxu0 %v8288_v23 }
 0xfe4   :  { %v8160_v25 = vpop.f32.mrb[26].mxu0  ;;  %v8159_v14 = vadd.f32 %v8158_v46, %v16451_v43 }
 0xfe5   :  { %v8161_v6 = vadd.f32 %v8160_v25, %v16448_v38  ;;  %v8162_v12 = vpop.f32.mrb[27].mxu0 }
 0xfe6   :  { %v8163_v11 = vadd.f32 %v8162_v12, %v16451_v43 }
 0xfe7   :  { %v8290_v39 = vpack.c.bf16 %v8161_v6, %v8157_v26  ;;  %v17294_v6 = vld [vmem:[#allocation53_spill] sm:$0xff] }
 0xfe8   :  { %v8291_v61 = vpack.c.bf16 %v8163_v11, %v8159_v14 }
 0xfea   :  { %v8166_v18 = vpop.f32.mrb[28].mxu0  ;;  %10279 = vmatprep.subr.bf16.mxu0 %v8291_v61 }
 0xfeb   :  { %v8167_v15 = vadd.f32 %v8166_v18, %v16448_v38  ;;  %v8168_v20 = vpop.f32.mrb[29].mxu0  ;;  %10280 = vmatpush3.bf16.xpose.msra.mxu0 %v8291_v61 }
 0xfec   :  { %v8170_v27 = vpop.f32.mrb[30].mxu0  ;;  %v8169_v54 = vadd.f32 %v8168_v20, %v16451_v43 }
 0xfed   :  { %v8171_v41 = vadd.f32 %v8170_v27, %v16448_v38  ;;  %v8172_v0 = vpop.f32.mrb[31].mxu0 }
 0xfee   :  { %v8173_v48 = vadd.f32 %v8172_v0, %v16451_v43 }
 0xfef   :  { %v8293_v44 = vpack.c.bf16 %v8171_v41, %v8167_v15 }
 0xff0   :  { %v8294_v56 = vpack.c.bf16 %v8173_v48, %v8169_v54 }
 0xff2   :  { %10281 = vmatprep.subr.bf16.mxu0 %v8294_v56 }
 0xff3   :  { %10282 = vmatpush3.bf16.xpose.msra.mxu0 %v8294_v56 }
 0xff4   :  { %10331 = vmatprep.subr.bf16.mxu0 %v17293_v17 }
 0xffa   :  { %10284 = vmatmul.mubr.bf16.vlgmr.msra.gmra.mrb[32].mxu0 %v8275_v30 }
 0xffb   :  { %10287 = vmatprep.mubr.bf16.mxu0 %v8278_v45 }
0x1002   :  { %10288 = vmatmul.mubr.bf16.gmra.mrb[36].mxu0 %v8281_v36 }
0x1003   :  { %10291 = vmatprep.mubr.bf16.mxu0 %v8284_v19 }
0x100a   :  { %10292 = vmatmul.mubr.bf16.gmra.mrb[40].mxu0 %v8287_v21 }
0x100b   :  { %10295 = vmatprep.mubr.bf16.mxu0 %v8290_v39 }
0x1012   :  { %10296 = vmatmul.mubr.bf16.gmra.mrb[44].mxu0 %v8293_v44 }
0x1013   :  { %10347 = vmatprep.mubr.msk.bf16.mxu0 %vm12634_vm0, %v17293_v17 }
0x10cd   :  { %v10285_v38 = vpop.f32.mrb[32].mxu0 }
0x10ce   :  { %v8497_v43 = vpop.f32.mrb[33].mxu0  ;;  %v8506_v52 = vadd.f32 %v10285_v38, %v17236_v13 }
0x10cf   :  { %v8498_v9 = vadd.f32 %v8497_v43, %v17234_v1  ;;  %v10286_v23 = vpop.f32.mrb[34].mxu0 }
0x10d0   :  { %v8500_v35 = vpop.f32.mrb[35].mxu0  ;;  %v8509_v30 = vadd.f32 %v10286_v23, %v17237_v34 }
0x10d1   :  { %v8501_v55 = vadd.f32 %v8500_v35, %v17235_v37  ;;  %8560 = vmax.xlane.f32.xlu0 %v8498_v9 }
0x10d3   :  { %8562 = vmax.xlane.f32.xlu1 %v8501_v55 }
0x10d5   :  { %v10289_v16 = vpop.f32.mrb[36].mxu0  ;;  %8564 = vmax.xlane.f32.xlu0 %v8506_v52 }
0x10d6   :  { %v8513_v60 = vpop.f32.mrb[37].mxu0  ;;  %v8522_v36 = vadd.f32 %v10289_v16, %v17240_v42 }
0x10d7   :  { %v8514_v45 = vadd.f32 %v8513_v60, %v17238_v50  ;;  %v10290_v29 = vpop.f32.mrb[38].mxu0  ;;  %8566 = vmax.xlane.f32.xlu1 %v8509_v30 }
0x10d8   :  { %v8516_v7 = vpop.f32.mrb[39].mxu0  ;;  %v8525_v37 = vadd.f32 %v10290_v29, %v17241_v31 }
0x10d9   :  { %v8517_v1 = vadd.f32 %v8516_v7, %v17239_v40  ;;  %8568 = vmax.xlane.f32.xlu0 %v8514_v45 }
0x10db   :  { %8570 = vmax.xlane.f32.xlu1 %v8517_v1 }
0x10dd   :  { %v10293_v13 = vpop.f32.mrb[40].mxu0  ;;  %8572 = vmax.xlane.f32.xlu0 %v8522_v36 }
0x10de   :  { %v8529_v19 = vpop.f32.mrb[41].mxu0  ;;  %v16549_v40 = vadd.f32 %v10293_v13, %v17244_v22  ;;  %v17295_v22 = vld [vmem:[#allocation54_spill] sm:$0xff] }
0x10df   :  { %v16542_v34 = vadd.f32 %v8529_v19, %v17242_v49  ;;  %v10294_v21 = vpop.f32.mrb[42].mxu0  ;;  %8574 = vmax.xlane.f32.xlu1 %v8525_v37 }
0x10e0   :  { %v8532_v50 = vpop.f32.mrb[43].mxu0  ;;  %v16553_v42 = vadd.f32 %v10294_v21, %v17245_v62  ;;  %v17296_v62 = vld [vmem:[#allocation52_spill] sm:$0xff] }
0x10e1   :  { %v16545_v26 = vadd.f32 %v8532_v50, %v17243_v10  ;;  %8576 = vmax.xlane.f32.xlu0 %v16542_v34 }
0x10e3   :  { %8578 = vmax.xlane.f32.xlu1 %v16545_v26 }
0x10e5   :  { %8580 = vmax.xlane.f32.xlu0 %v16549_v40  ;;  %v10297_v31 = vpop.f32.mrb[44].mxu0 }
0x10e6   :  { %v8545_v49 = vpop.f32.mrb[45].mxu0  ;;  %v16565_v14 = vadd.f32 %v10297_v31, %v17295_v22 }
0x10e7   :  { %v16557_v46 = vadd.f32 %v8545_v49, %v17246_v58  ;;  %8582 = vmax.xlane.f32.xlu1 %v16553_v42  ;;  %v10298_v10 = vpop.f32.mrb[46].mxu0 }
0x10e8   :  { %v8548_v25 = vpop.f32.mrb[47].mxu0  ;;  %v16569_v11 = vadd.f32 %v10298_v10, %v17296_v62 }
0x10e9   :  { %v16561_v12 = vadd.f32 %v8548_v25, %v17294_v6  ;;  %8584 = vmax.xlane.f32.xlu0 %v16557_v46 }
0x10eb   :  { %8586 = vmax.xlane.f32.xlu1 %v16561_v12 }
0x10ed   :  { %8588 = vmax.xlane.f32.xlu0 %v16565_v14 }
0x10ef   :  { %8590 = vmax.xlane.f32.xlu1 %v16569_v11 }
0x115e   :  { %v8561_v58 = vpop.xlane.xlu0 %8560 }
0x115f   :  { %v8592_v39 = vsub.f32 %v8498_v9, %v8561_v58 }
0x1160   :  { %v8563_v61 = vpop.xlane.xlu1 %8562 }
0x1161   :  { %v8608_v18 = vmul.f32 1.442695, %v8592_v39  ;;  %v8593_v15 = vsub.f32 %v8501_v55, %v8563_v61 }
0x1162   :  { %v8565_v20 = vpop.xlane.xlu0 %8564 }
0x1163   :  { %12048 = vpow2.f32 %v8608_v18  ;;  %v8610_v27 = vmul.f32 1.442695, %v8593_v15  ;;  %v8594_v41 = vsub.f32 %v8506_v52, %v8565_v20 }
0x1164   :  { %v8567_v0 = vpop.xlane.xlu1 %8566 }
0x1165   :  { %12050 = vpow2.f32 %v8610_v27  ;;  %v8612_v54 = vmul.f32 1.442695, %v8594_v41  ;;  %v8595_v48 = vsub.f32 %v8509_v30, %v8567_v0 }
0x1166   :  { %v8569_v44 = vpop.xlane.xlu0 %8568 }
0x1167   :  { %12052 = vpow2.f32 %v8612_v54  ;;  %v8614_v56 = vmul.f32 1.442695, %v8595_v48  ;;  %v8596_v38 = vsub.f32 %v8514_v45, %v8569_v44 }
0x1168   :  { %v8571_v43 = vpop.xlane.xlu1 %8570 }
0x1169   :  { %12054 = vpow2.f32 %v8614_v56  ;;  %v8616_v23 = vmul.f32 1.442695, %v8596_v38  ;;  %v8597_v35 = vsub.f32 %v8517_v1, %v8571_v43 }
0x116a   :  { %v8573_v9 = vpop.xlane.xlu0 %8572 }
0x116b   :  { %12056 = vpow2.f32 %v8616_v23  ;;  %v8618_v16 = vmul.f32 1.442695, %v8597_v35  ;;  %v8598_v55 = vsub.f32 %v8522_v36, %v8573_v9 }
0x116c   :  { %v8575_v60 = vpop.xlane.xlu1 %8574 }
0x116d   :  { %v16573_v29 = vpop.eup %12048  ;;  %12058 = vpow2.f32 %v8618_v16  ;;  %v8620_v52 = vmul.f32 1.442695, %v8598_v55  ;;  %v8599_v7 = vsub.f32 %v8525_v37, %v8575_v60 }
0x116e   :  { %v8577_v13 = vpop.xlane.xlu0 %8576  ;;  %8640 = vadd.xlane.f32.xlu0 %v16573_v29 }
0x116f   :  { %v16576_v30 = vpop.eup %12050  ;;  %12060 = vpow2.f32 %v8620_v52  ;;  %v8622_v45 = vmul.f32 1.442695, %v8599_v7  ;;  %v8600_v19 = vsub.f32 %v16542_v34, %v8577_v13 }
0x1170   :  { %v8579_v1 = vpop.xlane.xlu1 %8578  ;;  %8642 = vadd.xlane.f32.xlu1 %v16576_v30 }
0x1171   :  { %v16580_v21 = vpop.eup %12052  ;;  %12062 = vpow2.f32 %v8622_v45  ;;  %v8624_v36 = vmul.f32 1.442695, %v8600_v19  ;;  %v8601_v50 = vsub.f32 %v16545_v26, %v8579_v1 }
0x1172   :  { %v8581_v31 = vpop.xlane.xlu0 %8580  ;;  %8644 = vadd.xlane.f32.xlu0 %v16580_v21 }
0x1173   :  { %v16584_v37 = vpop.eup %12054  ;;  %12064 = vpow2.f32 %v8624_v36  ;;  %v8626_v49 = vmul.f32 1.442695, %v8601_v50  ;;  %v8602_v10 = vsub.f32 %v16549_v40, %v8581_v31  ;;  %v17297_v31 = vld [vmem:[#allocation58_spill] sm:$0xff] }
0x1174   :  { %v8583_v25 = vpop.xlane.xlu1 %8582  ;;  %8646 = vadd.xlane.f32.xlu1 %v16584_v37 }
0x1175   :  { %v16588_v34 = vpop.eup %12056  ;;  %12066 = vpow2.f32 %v8626_v49  ;;  %v8628_v6 = vmul.f32 1.442695, %v8602_v10  ;;  %v8603_v22 = vsub.f32 %v16553_v42, %v8583_v25 }
0x1176   :  { %8648 = vadd.xlane.f32.xlu0 %v16588_v34  ;;  %v8585_v26 = vpop.xlane.xlu0 %8584 }
0x1177   :  { %v16592_v62 = vpop.eup %12058  ;;  %12068 = vpow2.f32 %v8628_v6  ;;  %v8630_v58 = vmul.f32 1.442695, %v8603_v22  ;;  %v8604_v39 = vsub.f32 %v16557_v46, %v8585_v26 }
0x1178   :  { %8650 = vadd.xlane.f32.xlu1 %v16592_v62  ;;  %v8587_v40 = vpop.xlane.xlu1 %8586 }
0x1179   :  { %v16596_v61 = vpop.eup %12060  ;;  %12070 = vpow2.f32 %v8630_v58  ;;  %v8632_v18 = vmul.f32 1.442695, %v8604_v39  ;;  %v8605_v15 = vsub.f32 %v16561_v12, %v8587_v40 }
0x117a   :  { %8652 = vadd.xlane.f32.xlu0 %v16596_v61  ;;  %v8589_v42 = vpop.xlane.xlu0 %8588 }
0x117b   :  { %v16600_v20 = vpop.eup %12062  ;;  %12072 = vpow2.f32 %v8632_v18  ;;  %v8634_v27 = vmul.f32 1.442695, %v8605_v15  ;;  %v8606_v41 = vsub.f32 %v16565_v14, %v8589_v42 }
0x117c   :  { %8654 = vadd.xlane.f32.xlu1 %v16600_v20  ;;  %v8591_v46 = vpop.xlane.xlu1 %8590 }
0x117d   :  { %v16604_v0 = vpop.eup %12064  ;;  %12074 = vpow2.f32 %v8634_v27  ;;  %v8636_v54 = vmul.f32 1.442695, %v8606_v41  ;;  %v8607_v48 = vsub.f32 %v16569_v11, %v8591_v46 }
0x117e   :  { %8656 = vadd.xlane.f32.xlu0 %v16604_v0 }
0x117f   :  { %v16608_v12 = vpop.eup %12066  ;;  %12076 = vpow2.f32 %v8636_v54  ;;  %v8638_v44 = vmul.f32 1.442695, %v8607_v48 }
0x1180   :  { %8658 = vadd.xlane.f32.xlu1 %v16608_v12 }
0x1181   :  { %v16611_v56 = vpop.eup %12068  ;;  %12078 = vpow2.f32 %v8638_v44 }
0x1182   :  { %8660 = vadd.xlane.f32.xlu0 %v16611_v56 }
0x1183   :  { %v16614_v14 = vpop.eup %12070 }
0x1184   :  { %8662 = vadd.xlane.f32.xlu1 %v16614_v14 }
0x1185   :  { %v16617_v38 = vpop.eup %12072 }
0x1186   :  { %8664 = vadd.xlane.f32.xlu0 %v16617_v38 }
0x1187   :  { %v16620_v11 = vpop.eup %12074 }
0x1188   :  { %8666 = vadd.xlane.f32.xlu1 %v16620_v11 }
0x1189   :  { %v16623_v43 = vpop.eup %12076 }
0x118a   :  { %8668 = vadd.xlane.f32.xlu0 %v16623_v43 }
0x118b   :  { %v16626_v23 = vpop.eup %12078 }
0x118c   :  { %8670 = vadd.xlane.f32.xlu1 %v16626_v23 }
0x11fb   :  { %v8641_v35 = vpop.xlane.xlu0 %8640 }
0x11fc   :  { %12080 = vrcp.f32 %v8641_v35 }
0x11fd   :  { %v8643_v9 = vpop.xlane.xlu1 %8642 }
0x11fe   :  { %12082 = vrcp.f32 %v8643_v9 }
0x11ff   :  { %v8645_v16 = vpop.xlane.xlu0 %8644 }
0x1200   :  { %12084 = vrcp.f32 %v8645_v16 }
0x1201   :  { %v8647_v55 = vpop.xlane.xlu1 %8646 }
0x1202   :  { %12086 = vrcp.f32 %v8647_v55 }
0x1203   :  { %v8649_v60 = vpop.xlane.xlu0 %8648 }
0x1204   :  { %12088 = vrcp.f32 %v8649_v60 }
0x1205   :  { %v8651_v52 = vpop.xlane.xlu1 %8650 }
0x1206   :  { %v12081_v7 = vpop.eup %12080  ;;  %12090 = vrcp.f32 %v8651_v52 }
0x1207   :  { %v8653_v13 = vpop.xlane.xlu0 %8652  ;;  %v8688_v45 = vmul.f32 %v12081_v7, %v17250_v33 }
0x1208   :  { %v12083_v19 = vpop.eup %12082  ;;  %12092 = vrcp.f32 %v8653_v13 }
0x1209   :  { %v8655_v1 = vpop.xlane.xlu1 %8654  ;;  %v8689_v36 = vmul.f32 %v12083_v19, %v17251_v51  ;;  %v8704_v25 = vmul.f32 %v16573_v29, %v8688_v45 }
0x120a   :  { %v12085_v50 = vpop.eup %12084  ;;  %12094 = vrcp.f32 %v8655_v1 }
0x120b   :  { %v8690_v49 = vmul.f32 %v12085_v50, %v17297_v31  ;;  %v8657_v10 = vpop.xlane.xlu0 %8656  ;;  %v8705_v6 = vmul.f32 %v16576_v30, %v8689_v36 }
0x120c   :  { %v12087_v22 = vpop.eup %12086  ;;  %12096 = vrcp.f32 %v8657_v10  ;;  %v17298_v10 = vld [vmem:[#allocation76_spill] sm:$0xff] }
0x120d   :  { %v8691_v26 = vmul.f32 %v12087_v22, %v17253_v53  ;;  %v8659_v58 = vpop.xlane.xlu1 %8658  ;;  %v8720_v33 = vpack.c.bf16 %v8705_v6, %v8704_v25  ;;  %v8706_v40 = vmul.f32 %v16580_v21, %v8690_v49 }
0x120e   :  { %v12089_v39 = vpop.eup %12088  ;;  %12098 = vrcp.f32 %v8659_v58 }
0x120f   :  { %v8707_v51 = vmul.f32 %v16584_v37, %v8691_v26  ;;  %10315 = vmatprep.mubr.bf16.mxu1 %v8720_v33  ;;  %v8661_v18 = vpop.xlane.xlu0 %8660  ;;  %v8692_v15 = vmul.f32 %v12089_v39, %v17275_v24 }
0x1210   :  { %v12091_v42 = vpop.eup %12090  ;;  %12100 = vrcp.f32 %v8661_v18 }
0x1211   :  { %v8721_v29 = vpack.c.bf16 %v8707_v51, %v8706_v40  ;;  %v8663_v30 = vpop.xlane.xlu1 %8662  ;;  %v8693_v27 = vmul.f32 %v12091_v42, %v17276_v59  ;;  %v8708_v21 = vmul.f32 %v16588_v34, %v8692_v15 }
0x1212   :  { %v12093_v41 = vpop.eup %12092  ;;  %12102 = vrcp.f32 %v8663_v30 }
0x1213   :  { %v8694_v53 = vmul.f32 %v12093_v41, %v17277_v57  ;;  %10316 = vmatmul.mubr.bf16.vlgmr.msra.gmra.mrb[80].mxu1 %v8721_v29  ;;  %v8665_v46 = vpop.xlane.xlu0 %8664  ;;  %v8709_v37 = vmul.f32 %v16592_v62, %v8693_v27 }
0x1214   :  { %v12095_v54 = vpop.eup %12094  ;;  %12104 = vrcp.f32 %v8665_v46 }
0x1215   :  { %v8695_v24 = vmul.f32 %v12095_v54, %v17278_v2  ;;  %v8667_v48 = vpop.xlane.xlu1 %8666  ;;  %v8722_v44 = vpack.c.bf16 %v8709_v37, %v8708_v21  ;;  %v8710_v59 = vmul.f32 %v16596_v61, %v8694_v53 }
0x1216   :  { %v12097_v35 = vpop.eup %12096  ;;  %12106 = vrcp.f32 %v8667_v48 }
0x1217   :  { %v8711_v9 = vmul.f32 %v16600_v20, %v8695_v24  ;;  %10319 = vmatprep.mubr.bf16.mxu1 %v8722_v44  ;;  %v8669_v57 = vpop.xlane.xlu0 %8668  ;;  %v8696_v16 = vmul.f32 %v12097_v35, %v17279_v3 }
0x1218   :  { %v12099_v55 = vpop.eup %12098  ;;  %12108 = vrcp.f32 %v8669_v57 }
0x1219   :  { %v8723_v34 = vpack.c.bf16 %v8711_v9, %v8710_v59  ;;  %v8671_v62 = vpop.xlane.xlu1 %8670  ;;  %v8697_v60 = vmul.f32 %v12099_v55, %v17280_v28  ;;  %v8712_v7 = vmul.f32 %v16604_v0, %v8696_v16 }
0x121a   :  { %v12101_v52 = vpop.eup %12100  ;;  %12110 = vrcp.f32 %v8671_v62 }
0x121b   :  { %v8698_v2 = vmul.f32 %v12101_v52, %v17281_v32  ;;  %10320 = vmatmul.mubr.bf16.gmra.mrb[84].mxu1 %v8723_v34  ;;  %v8713_v61 = vmul.f32 %v16608_v12, %v8697_v60 }
0x121c   :  { %v12103_v20 = vpop.eup %12102 }
0x121d   :  { %v8699_v13 = vmul.f32 %v12103_v20, %v17282_v63  ;;  %v8724_v45 = vpack.c.bf16 %v8713_v61, %v8712_v7  ;;  %v8714_v19 = vmul.f32 %v16611_v56, %v8698_v2 }
0x121e   :  { %v12105_v3 = vpop.eup %12104 }
0x121f   :  { %v8715_v1 = vmul.f32 %v16614_v14, %v8699_v13  ;;  %10323 = vmatprep.mubr.bf16.mxu1 %v8724_v45  ;;  %v8700_v28 = vmul.f32 %v12105_v3, %v17283_v8 }
0x1220   :  { %v12107_v36 = vpop.eup %12106 }
0x1221   :  { %v8725_v50 = vpack.c.bf16 %v8715_v1, %v8714_v19  ;;  %v8701_v32 = vmul.f32 %v12107_v36, %v17284_v47  ;;  %v8716_v12 = vmul.f32 %v16617_v38, %v8700_v28  ;;  %v8931_v47 = vld [vmem:[#allocation2] sm:$0x1] }
0x1222   :  { %v12109_v31 = vpop.eup %12108  ;;  %8934 = vperm.xlu0 %10919, %v8931_v47  }
0x1223   :  { %v8702_v0 = vmul.f32 %v12109_v31, %v17285_v5  ;;  %10324 = vmatmul.mubr.bf16.gmra.mrb[88].mxu1 %v8725_v50  ;;  %v8717_v63 = vmul.f32 %v16620_v11, %v8701_v32  ;;  %v8312_v5 = vld [vmem:[#allocation26] sm:$0x1] }
0x1224   :  { %v12111_v49 = vpop.eup %12110  ;;  %v8313_v38 = vunpack.c.l.bf16 %v8312_v5 }
0x1225   :  { %v8703_v56 = vmul.f32 %v12111_v49, %v17298_v10  ;;  %v8726_v25 = vpack.c.bf16 %v8717_v63, %v8716_v12  ;;  %v8718_v14 = vmul.f32 %v16623_v43, %v8702_v0 }
0x1226   :  { %v16666_v11 = vrot.slane %v8313_v38, %v17230_v4 }
0x1227   :  { %v8719_v8 = vmul.f32 %v16626_v23, %v8703_v56  ;;  %10327 = vmatprep.mubr.bf16.mxu1 %v8726_v25 }
0x1229   :  { %v8727_v6 = vpack.c.bf16 %v8719_v8, %v8718_v14 }
0x122b   :  { %10328 = vmatmul.mubr.bf16.gmra.mrb[92].mxu1 %v8727_v6 }
0x122c   :  { %10367 = vmatprep.mubr.msk.bf16.mxu1 %vm12634_vm0, %v17293_v17 }
0x12e6   :  { %v10317_v43 = vpop.f32.mrb[80].mxu1 }
0x12e7   :  { %v10599_v23 = vadd.f32 %v10317_v43, %v16666_v11  ;;  %v8762_v22 = vpop.f32.mrb[81].mxu1 }
0x12e8   :  { %v16670_v26 = vadd.f32 %v8762_v22, %v16666_v11  ;;  %v10318_v58 = vpop.f32.mrb[82].mxu1 }
0x12e9   :  { %v8843_v33 = vmin.f32 %v10599_v23, 0.0  ;;  %v10601_v39 = vadd.f32 %v10318_v58, %v16666_v11  ;;  %v8765_v40 = vpop.f32.mrb[83].mxu1  ;;  %vm8827_vm1 = vcmp.gt.f32.partialorder %v10599_v23, 0.0 }
0x12ea   :  { %v8841_v51 = vmin.f32 %v16670_v26, 0.0  ;;  %v10602_v18 = vadd.f32 %v8765_v40, %v16666_v11  ;;  %vm8825_vm2 = vcmp.gt.f32.partialorder %v16670_v26, 0.0 }
0x12eb   :  { %v8861_v15 = vmul.f32 1.442695, %v8843_v33  ;;  %v8844_v42 = vmin.f32 %v10601_v39, 0.0  ;;  %vm8828_vm3 = vcmp.gt.f32.partialorder %v10601_v39, 0.0 }
0x12ec   :  { %v8857_v29 = vmul.f32 1.442695, %v8841_v51  ;;  %v8842_v30 = vmin.f32 %v10602_v18, 0.0  ;;  %vm8826_vm4 = vcmp.gt.f32.partialorder %v10602_v18, 0.0 }
0x12ed   :  { %12112 = vpow2.f32 %v8861_v15  ;;  %v8863_v27 = vmul.f32 1.442695, %v8844_v42 }
0x12ee   :  { %12114 = vpow2.f32 %v8857_v29  ;;  %v8859_v41 = vmul.f32 1.442695, %v8842_v30  ;;  %v10321_v53 = vpop.f32.mrb[84].mxu1 }
0x12ef   :  { %12116 = vpow2.f32 %v8863_v27  ;;  %v16676_v46 = vadd.f32 %v10321_v53, %v16666_v11  ;;  %v8778_v21 = vpop.f32.mrb[85].mxu1 }
0x12f0   :  { %12118 = vpow2.f32 %v8859_v41  ;;  %v16679_v37 = vadd.f32 %v8778_v21, %v16666_v11  ;;  %v10322_v54 = vpop.f32.mrb[86].mxu1 }
0x12f1   :  { %v8847_v24 = vmin.f32 %v16676_v46, 0.0  ;;  %v16683_v48 = vadd.f32 %v10322_v54, %v16666_v11  ;;  %v8781_v44 = vpop.f32.mrb[87].mxu1  ;;  %vm8831_vm5 = vcmp.gt.f32.partialorder %v16676_v46, 0.0 }
0x12f2   :  { %v8845_v35 = vmin.f32 %v16679_v37, 0.0  ;;  %v16687_v59 = vadd.f32 %v8781_v44, %v16666_v11  ;;  %vm8829_vm6 = vcmp.gt.f32.partialorder %v16679_v37, 0.0 }
0x12f3   :  { %v8869_v9 = vmul.f32 1.442695, %v8847_v24  ;;  %v8848_v57 = vmin.f32 %v16683_v48, 0.0  ;;  %vm8832_vm7 = vcmp.gt.f32.partialorder %v16683_v48, 0.0 }
0x12f4   :  { %v8865_v16 = vmul.f32 1.442695, %v8845_v35  ;;  %v8846_v55 = vmin.f32 %v16687_v59, 0.0  ;;  %vm8830_vm8 = vcmp.gt.f32.partialorder %v16687_v59, 0.0 }
0x12f5   :  { %12120 = vpow2.f32 %v8869_v9  ;;  %v8871_v34 = vmul.f32 1.442695, %v8848_v57 }
0x12f6   :  { %12122 = vpow2.f32 %v8865_v16  ;;  %v8867_v62 = vmul.f32 1.442695, %v8846_v55  ;;  %v10325_v60 = vpop.f32.mrb[88].mxu1 }
0x12f7   :  { %v12113_v52 = vpop.eup %12112  ;;  %12124 = vpow2.f32 %v8871_v34  ;;  %v16692_v2 = vadd.f32 %v10325_v60, %v16666_v11  ;;  %v8794_v7 = vpop.f32.mrb[89].mxu1 }
0x12f8   :  { %v12115_v61 = vpop.eup %12114  ;;  %v9825_v20 = vadd.f32 -1.0, %v12113_v52  ;;  %12126 = vpow2.f32 %v8867_v62  ;;  %v16695_v13 = vadd.f32 %v8794_v7, %v16666_v11  ;;  %v10326_v45 = vpop.f32.mrb[90].mxu1 }
0x12f9   :  { %v12117_v3 = vpop.eup %12116  ;;  %v9823_v19 = vadd.f32 -1.0, %v12115_v61  ;;  %v8851_v1 = vmin.f32 %v16692_v2, 0.0  ;;  %v16699_v28 = vadd.f32 %v10326_v45, %v16666_v11  ;;  %v8797_v36 = vpop.f32.mrb[91].mxu1  ;;  %vm8835_vm9 = vcmp.gt.f32.partialorder %v16692_v2, 0.0 }
0x12fa   :  { %v12119_v50 = vpop.eup %12118  ;;  %v9826_v32 = vadd.f32 -1.0, %v12117_v3  ;;  %v8849_v31 = vmin.f32 %v16695_v13, 0.0  ;;  %v8907_v0 = vsel %vm8827_vm1, %v10599_v23, %v9825_v20  ;;  %v16705_v25 = vadd.f32 %v8797_v36, %v16666_v11 }
0x12fb   :  { %v9824_v12 = vadd.f32 -1.0, %v12119_v50  ;;  %v8877_v63 = vmul.f32 1.442695, %v8851_v1  ;;  %v8852_v56 = vmin.f32 %v16699_v28, 0.0  ;;  %v8905_v14 = vsel %vm8825_vm2, %v16670_v26, %v9823_v19 }
0x12fc   :  { %v8908_v49 = vsel %vm8828_vm3, %v10601_v39, %v9826_v32  ;;  %v8873_v10 = vmul.f32 1.442695, %v8849_v31  ;;  %v8850_v23 = vmin.f32 %v16705_v25, 0.0  ;;  %vm8836_vm10 = vcmp.gt.f32.partialorder %v16699_v28, 0.0 }
0x12fd   :  { %v8922_v8 = vpack.c.bf16 %v8908_v49, %v8907_v0  ;;  %v8906_v6 = vsel %vm8826_vm4, %v10602_v18, %v9824_v12  ;;  %12128 = vpow2.f32 %v8877_v63  ;;  %v8879_v5 = vmul.f32 1.442695, %v8852_v56 }
0x12fe   :  { %v8921_v47 = vpack.c.bf16 %v8906_v6, %v8905_v14  ;;  %v10329_v38 = vpop.f32.mrb[92].mxu1  ;;  %12130 = vpow2.f32 %v8873_v10  ;;  %v8875_v15 = vmul.f32 1.442695, %v8850_v23  ;;  %vm8833_vm11 = vcmp.gt.f32.partialorder %v16695_v13, 0.0 }
0x12ff   :  { %v12121_v43 = vpop.eup %12120  ;;  %v16710_v22 = vadd.f32 %v10329_v38, %v16666_v11  ;;  %v8810_v58 = vpop.f32.mrb[93].mxu1  ;;  %12132 = vpow2.f32 %v8879_v5  ;;  %vm8834_vm12 = vcmp.gt.f32.partialorder %v16705_v25, 0.0  ;;  %v8929_v38 = vld [vmem:[%s17299_s13] sm:$0x3]  ;;  %vm8988_vm2 = vcmask 1041408  }
0x1300   :  { %v12123_v33 = vpop.eup %12122  ;;  %v9829_v39 = vadd.f32 -1.0, %v12121_v43  ;;  %v16714_v26 = vadd.f32 %v8810_v58, %v16666_v11  ;;  %v10330_v40 = vpop.f32.mrb[94].mxu1  ;;  %10332 = vmatpush3.bf16.xpose.msra.mxu0 %v8921_v47  ;;  %10352 = vmatpush3.bf16.msra.mxu1 %v8921_v47  ;;  %12134 = vpow2.f32 %v8875_v15  ;;  %v8930_v47 = vld [vmem:[#allocation27] sm:$0x1]  ;;  %v9839_v23 = vadd.f32 -1.0, %v8929_v38 }
0x1301   :  { %v12125_v51 = vpop.eup %12124  ;;  %v9827_v18 = vadd.f32 -1.0, %v12123_v33  ;;  %v8855_v42 = vmin.f32 %v16710_v22, 0.0  ;;  %v8813_v29 = vpop.f32.mrb[95].mxu1  ;;  %10353 = vmatprep.subr.bf16.mxu1 %v17293_v17  ;;  %10333 = vmatprep.subr.bf16.mxu0 %v17293_v17  ;;  %v10613_v35 = vadd.f32 %v10330_v40, %v16666_v11  ;;  %vm8839_vm13 = vcmp.gt.f32.partialorder %v16710_v22, 0.0 }
0x1302   :  { %v12127_v30 = vpop.eup %12126  ;;  %v9830_v27 = vadd.f32 -1.0, %v12125_v51  ;;  %v8853_v41 = vmin.f32 %v16714_v26, 0.0  ;;  %v8911_v53 = vsel %vm8831_vm5, %v16676_v46, %v9829_v39  ;;  %v10614_v9 = vadd.f32 %v8813_v29, %v16666_v11  ;;  %v8935_v5 = vpop.permute.xlu0 %8934 }
0x1303   :  { %v9828_v21 = vadd.f32 -1.0, %v12127_v30  ;;  %v8885_v54 = vmul.f32 1.442695, %v8855_v42  ;;  %v8909_v57 = vsel %vm8829_vm6, %v16679_v37, %v9827_v18  ;;  %v8856_v34 = vmin.f32 %v10613_v35, 0.0 }
0x1304   :  { %v8912_v24 = vsel %vm8832_vm7, %v16683_v48, %v9830_v27  ;;  %v8881_v44 = vmul.f32 1.442695, %v8853_v41  ;;  %10354 = vmatpush3.bf16.msra.mxu1 %v8922_v8  ;;  %v8854_v48 = vmin.f32 %v10614_v9, 0.0  ;;  %vm8840_vm14 = vcmp.gt.f32.partialorder %v10613_v35, 0.0 }
0x1305   :  { %v8924_v16 = vpack.c.bf16 %v8912_v24, %v8911_v53  ;;  %v8910_v55 = vsel %vm8830_vm8, %v16687_v59, %v9828_v21  ;;  %10355 = vmatprep.subr.bf16.mxu1 %v17293_v17  ;;  %12136 = vpow2.f32 %v8885_v54  ;;  %v8887_v60 = vmul.f32 1.442695, %v8856_v34  ;;  %v11624_v34 = vld [vmem:[#allocation29] sm:$0xff]  }
0x1306   :  { %v8923_v46 = vpack.c.bf16 %v8910_v55, %v8909_v57  ;;  %12138 = vpow2.f32 %v8881_v44  ;;  %v8883_v7 = vmul.f32 1.442695, %v8854_v48  ;;  %vm8837_vm15 = vcmp.gt.f32.partialorder %v16714_v26, 0.0  ;;  %v11626_v48 = vld [vmem:[#allocation29 + $0x10] sm:$0xff]  }
0x1307   :  { %v12129_v62 = vpop.eup %12128  ;;  %12140 = vpow2.f32 %v8887_v60  ;;  %vm8838_vm1 = vcmp.gt.f32.partialorder %v10614_v9, 0.0  ;;  %v8940_v43 = vrot.slane %v8935_v5, %v17230_v4  ;;  %v8982_v39 = vmul.f32 1e+30, %v9839_v23  ;;  %v11628_v60 = vld [vmem:[#allocation29 + $0x20] sm:$0xff]  }
0x1308   :  { %10334 = vmatpush3.bf16.xpose.msra.mxu0 %v8922_v8  ;;  %10356 = vmatpush3.bf16.msra.mxu1 %v8923_v46  ;;  %v12131_v11 = vpop.eup %12130  ;;  %v9833_v52 = vadd.f32 -1.0, %v12129_v62  ;;  %12142 = vpow2.f32 %v8883_v7  ;;  %v11625_v62 = vld [vmem:[#allocation29 + $0x8] sm:$0xff]   ;;  %v11631_v7 = vld [vmem:[#allocation29 + $0x38] sm:$0xff]  }
0x1309   :  { %10357 = vmatprep.subr.bf16.mxu1 %v17293_v17  ;;  %10335 = vmatprep.subr.bf16.mxu0 %v17293_v17  ;;  %v12133_v37 = vpop.eup %12132  ;;  %v9831_v61 = vadd.f32 -1.0, %v12131_v11  ;;  %v11629_v11 = vld [vmem:[#allocation29 + $0x28] sm:$0xff]  }
0x130a   :  { %v9834_v59 = vadd.f32 -1.0, %v12133_v37  ;;  %v12135_v20 = vpop.eup %12134  ;;  %v8915_v45 = vsel %vm8835_vm9, %v16692_v2, %v9833_v52  ;;  %v11630_v52 = vld [vmem:[#allocation29 + $0x30] sm:$0xff]  }
0x130b   :  { %v9832_v1 = vadd.f32 -1.0, %v12135_v20  ;;  %v8913_v50 = vsel %vm8833_vm11, %v16695_v13, %v9831_v61 }
0x130c   :  { %10358 = vmatpush3.bf16.msra.mxu1 %v8924_v16  ;;  %v8916_v3 = vsel %vm8836_vm10, %v16699_v28, %v9834_v59 }
0x130d   :  { %10359 = vmatprep.subr.bf16.mxu1 %v17293_v17  ;;  %v8926_v19 = vpack.c.bf16 %v8916_v3, %v8915_v45  ;;  %v8914_v32 = vsel %vm8834_vm12, %v16705_v25, %v9832_v1 }
0x130e   :  { %v8925_v0 = vpack.c.bf16 %v8914_v32, %v8913_v50 }
0x130f   :  { %v12137_v36 = vpop.eup %12136 }
0x1310   :  { %10336 = vmatpush3.bf16.xpose.msra.mxu0 %v8923_v46  ;;  %v12139_v31 = vpop.eup %12138  ;;  %v9837_v2 = vadd.f32 -1.0, %v12137_v36  ;;  %10360 = vmatpush3.bf16.msra.mxu1 %v8925_v0  ;;  %v9840_v36 = vld [vmem:[#allocation30] ss:$0 sm:$0xff] }
0x1311   :  { %10337 = vmatprep.subr.bf16.mxu0 %v17293_v17  ;;  %v12141_v28 = vpop.eup %12140  ;;  %v9835_v12 = vadd.f32 -1.0, %v12139_v31  ;;  %10361 = vmatprep.subr.bf16.mxu1 %v17293_v17 }
0x1312   :  { %v12143_v63 = vpop.eup %12142  ;;  %v9838_v49 = vadd.f32 -1.0, %v12141_v28  ;;  %v8919_v13 = vsel %vm8839_vm13, %v16710_v22, %v9837_v2 }
0x1313   :  { %v9836_v10 = vadd.f32 -1.0, %v12143_v63  ;;  %v8917_v25 = vsel %vm8837_vm15, %v16714_v26, %v9835_v12 }
0x1314   :  { %v8920_v56 = vsel %vm8840_vm14, %v10613_v35, %v9838_v49  ;;  %10362 = vmatpush3.bf16.msra.mxu1 %v8926_v19 }
0x1315   :  { %v8928_v14 = vpack.c.bf16 %v8920_v56, %v8919_v13  ;;  %v8918_v8 = vsel %vm8838_vm1, %v10614_v9, %v9836_v10  ;;  %10363 = vmatprep.subr.bf16.mxu1 %v17293_v17 }
0x1316   :  { %v8927_v6 = vpack.c.bf16 %v8918_v8, %v8917_v25 }
0x1318   :  { %10338 = vmatpush3.bf16.xpose.msra.mxu0 %v8924_v16  ;;  %10364 = vmatpush3.bf16.msra.mxu1 %v8927_v6 }
0x1319   :  { %10339 = vmatprep.subr.bf16.mxu0 %v17293_v17  ;;  %10365 = vmatprep.subr.bf16.mxu1 %v17293_v17 }
0x131c   :  { %10366 = vmatpush3.bf16.msra.mxu1 %v8928_v14 }
0x131d   :  { %10371 = vmatprep.subr.bf16.mxu1 %v17293_v17 }
0x1320   :  { %10340 = vmatpush3.bf16.xpose.msra.mxu0 %v8925_v0 }
0x1321   :  { %10341 = vmatprep.subr.bf16.mxu0 %v17293_v17 }
0x1328   :  { %10342 = vmatpush3.bf16.xpose.msra.mxu0 %v8926_v19 }
0x1329   :  { %10343 = vmatprep.subr.bf16.mxu0 %v17293_v17 }
0x1330   :  { %10344 = vmatpush3.bf16.xpose.msra.mxu0 %v8927_v6 }
0x1331   :  { %10345 = vmatprep.subr.bf16.mxu0 %v17293_v17 }
0x1338   :  { %10346 = vmatpush3.bf16.xpose.msra.mxu0 %v8928_v14 }
0x133f   :  { %10348 = vmatmul.mubr.bf16.vlgmr.msra.gmra.mrb[48].mxu0 %v8930_v47 }
0x1412   :  { %v8975_v22 = vpop.f32.mrb[48].mxu0 }
0x1413   :  { %v8976_v58 = vadd.f32 %v8975_v22, %v8940_v43  ;;  %v10349_v33 = vpop.f32.mrb[49].mxu0 }
0x1414   :  { %v8978_v26 = vpop.f32.mrb[50].mxu0 }
0x1415   :  { %v8986_v40 = vrot.slane %v8976_v58, %v17230_v4  ;;  %v10350_v51 = vpop.f32.mrb[51].mxu0 }
0x1417   :  { %v8987_v18 = vadd.f32 %v8986_v40, %v8982_v39 }
0x1419   :  { %v8989_v15 = vsel %vm8988_vm2, %v8987_v18, -inf }
0x141a   :  { %8990 = vmax.xlane.f32.xlu1 %v8989_v15 }
0x14a7   :  { %v8991_v42 = vpop.xlane.xlu1 %8990 }
0x14a8   :  { %v8992_v29 = vmul.f32 %v8991_v42, %v8929_v38 }
0x14aa   :  { %v8993_v30 = vsel %vm8988_vm2, %v8992_v29, 0.0 }
0x14ab   :  { %v8994_v27 = vrot.slane %v8993_v30, 4 }
0x14ad   :  { %v8995_v41 = vadd.f32 %v8994_v27, %v8993_v30 }
0x14af   :  { %v8996_v53 = vrot.slane %v8995_v41, 2 }
0x14b1   :  { %v8997_v21 = vadd.f32 %v8996_v53, %v8995_v41 }
0x14b3   :  { %v8998_v54 = vrot.slane %v8997_v21, 1 }
0x14b5   :  { %v8999_v24 = vadd.f32 %v8998_v54, %v8997_v21 }
0x14b7   :  { %v9000_v44 = vsub.f32 %v8976_v58, %v8999_v24 }
0x14b9   :  { %v9001_v35 = vmul.f32 1.442695, %v9000_v44 }
0x14bb   :  { %12144 = vpow2.f32 %v9001_v35 }
0x14c5   :  { %v12145_v9 = vpop.eup %12144 }
0x14c6   :  { %v9006_v57 = vrot.slane %v12145_v9, %v17230_v4  ;;  %v11627_v4 = vld [vmem:[#allocation29 + $0x18] sm:$0xff]  }
0x14c8   :  { %v9007_v16 = vmul.f32 %v9006_v57, %v8929_v38 }
0x14ca   :  { %v9049_v55 = vsel %vm8988_vm2, %v9007_v16, 0.0  ;;  %v9008_v46 = vpack.c.bf16 %v9007_v16, %v9007_v16 }
0x14cb   :  { %9050 = vadd.xlane.f32.xlu1 %v9049_v55 }
0x14cc   :  { %10368 = vmatmul.mubr.bf16.vlgmr.msra.gmra.mrb[96].mxu1 %v9008_v46 }
0x14cd   :  { %10387 = vmatprep.mubr.msk.bf16.mxu1 %vm12634_vm0, %v17293_v17  ;;  %10372 = vmatpush3.bf16.msra.mxu1 %v11624_v34 }
0x14ce   :  { %10373 = vmatprep.subr.bf16.mxu1 %v17293_v17 }
0x14d1   :  { %10374 = vmatpush3.bf16.msra.mxu1 %v11625_v62 }
0x14d2   :  { %10375 = vmatprep.subr.bf16.mxu1 %v17293_v17 }
0x14d5   :  { %10376 = vmatpush3.bf16.msra.mxu1 %v11626_v48 }
0x14d6   :  { %10377 = vmatprep.subr.bf16.mxu1 %v17293_v17 }
0x14d9   :  { %10378 = vmatpush3.bf16.msra.mxu1 %v11627_v4 }
0x14da   :  { %10379 = vmatprep.subr.bf16.mxu1 %v17293_v17 }
0x14dd   :  { %10380 = vmatpush3.bf16.msra.mxu1 %v11628_v60 }
0x14de   :  { %10381 = vmatprep.subr.bf16.mxu1 %v17293_v17 }
0x14e1   :  { %10382 = vmatpush3.bf16.msra.mxu1 %v11629_v11 }
0x14e2   :  { %10383 = vmatprep.subr.bf16.mxu1 %v17293_v17 }
0x14e5   :  { %10384 = vmatpush3.bf16.msra.mxu1 %v11630_v52 }
0x14e6   :  { %10385 = vmatprep.subr.bf16.mxu1 %v17293_v17 }
0x14e9   :  { %10386 = vmatpush3.bf16.msra.mxu1 %v11631_v7 }
0x1558   :  { %v9051_v37 = vpop.xlane.xlu1 %9050 }
0x1559   :  { %12146 = vrcp.f32 %v9051_v37 }
0x1563   :  { %v12147_v59 = vpop.eup %12146 }
0x159f   :  { %v9043_v61 = vpop.f32.mrb[96].mxu1 }
0x15a0   :  { %v9053_v20 = vmul.f32 %v12147_v59, %v9043_v61  ;;  %v10369_v45 = vpop.f32.mrb[97].mxu1 }
0x15a1   :  { %v9046_v3 = vpop.f32.mrb[98].mxu1 }
0x15a2   :  { %v9054_v19 = vpack.c.bf16 %v9053_v20, %v9053_v20  ;;  %v10370_v1 = vpop.f32.mrb[99].mxu1 }
0x15a4   :  { %10388 = vmatmul.mubr.bf16.vlgmr.msra.gmra.mrb[100].mxu1 %v9054_v19 }
0x1677   :  { %v9160_v50 = vpop.f32.mrb[100].mxu1 }
0x1678   :  { %v9161_v32 = vadd.f32 %v9840_v36, %v9160_v50  ;;  %v10389_v31 = vpop.f32.mrb[101].mxu1 }
0x1679   :  { %v9163_v17 = vpop.f32.mrb[102].mxu1 }
0x167a   :  { %9166 = vst [vmem:[#allocation32] sm:$0x3] %v9161_v32  ;;  %v10390_v0 = vpop.f32.mrb[103].mxu1 }
0x167b   :  { %12571 = shalt.err (!%p12568_p8)
}
0x167c   :  { %s12572_s7 = scalar_lea.hbm %s16811_s23, 32 }
0x167d   :  { %p12573_p9 = scmp.ne.s32.totalorder %s16811_s23, %s12572_s7  ;;  %p12576_p10 = scmp.lt.u32.totalorder %s12572_s7, %s16811_s23 }
0x167f   :  { %p12578_p11 = pnand %p12576_p10, %p12573_p9 }
0x1681   :  { %12581 = shalt.err (!%p12578_p11)
}
0x1682   :  { %9176 = dma.vmem_to_hbm [thread:$0]  %s9174_s6, 32, %s16811_s23, [#allocation5]  }
0x1683   :  { %12602 = dma.done.wait [#allocation5], 32  }
0x1684   :  { %12603 = vsyncadd [#allocation5], 4294967264 }
0x1685   :  { %9180 = vsyncpa [#allocation4], 1 }
0x1686   :  { %9181 = vsyncpa [#allocation7], 1 }
0x1687   :  { %9182 = vsyncpa [#allocation10], 1 }
0x1688   :  { %9183 = vsyncpa [#allocation13], 1 }
0x1689   :  { %9184 = vsyncpa [#allocation16], 1 }
0x168a   :  { %9185 = vsyncpa [#allocation19], 1 }
0x168b   :  { %9186 = vsyncpa [#allocation22], 1 }
0x168c   :  { %9187 = vsyncpa [#allocation25], 1 }
0x168d   :  { %9188 = vsyncpa [#allocation28], 1 }
0x168e   :  { %9189 = vsyncpa [#allocation31], 1 }
0x168f   :  { %9190 = vsyncpa [#allocation5], 1 }

</bundles_post_ra>
